<compile_context>
chip_gen: v7x
topology: tpu7x:2x2x1
jax: 0.10.0
libtpu: 0.0.40
codegen_flags: <defaults>
</compile_context>

<pallas_src>
import math
import functools

import jax
import jax.numpy as jnp
from jax.experimental import pallas as pl
from jax.experimental.pallas import tpu as pltpu

# Stand-in for config/config.yaml (d_model must equal the backbone's 128 ch).
CFG = {
    "window_size": 16,
    "num_classes": 6,
    "transformer": {"d_model": 128, "n_heads": 4, "n_layers": 2},
}

BN_EPS = 1e-5
LN_EPS = 1e-5
LANE = 128          # every activation / weight is padded to 128 lanes


# ---------------------------------------------------------------------------
# The fused kernel
# ---------------------------------------------------------------------------

def _har_kernel(x_ref, mfirst_ref, mlast_ref,
                b1w1, b1s1, b1w2, b1s2, b1skw, b1skb, b1cw1, b1cb1, b1cw2, b1cb2,
                b2w1, b2s1, b2w2, b2s2, b2skw, b2skb, b2cw1, b2cb1, b2cw2, b2cb2,
                pool_ref, mask_ref,
                a_ref, kq_ref, bm_ref, ab_ref,
                g1_ref, be1_ref, fw1_ref, fb1_ref, fw2_ref, fb2_ref, g2_ref, be2_ref,
                hw1_ref, hb1_ref, hw2_ref, hb2_ref,
                o_ref, *, batch, time, seq, nlayers, nhead):
    B, T, S = batch, time, seq
    BT, BS = B * T, B * S
    f32, bf16 = jnp.float32, jnp.bfloat16
    d = a_ref.shape[1]                                       # = LANE = 128

    # ---------------- helpers -------------------------------------------
    def conv_taps(v):
        """(BT, LANE) f32 -> [x(t-1) | x(t) | x(t+1)] as (BT, 3*LANE) bf16.
        Shifts via XLU roll; batch-segment edges zeroed by mfirst/mlast."""
        vd = pltpu.roll(v, 1, 0) * mfirst_ref[...]
        vu = pltpu.roll(v, BT - 1, 0) * mlast_ref[...]
        return jnp.concatenate([vd, v, vu], axis=1).astype(bf16)

    def res_block(v, w1, s1, w2, s2, skw, skb, cw1, cb1, cw2, cb2):
        """Fused ResidualBlockCAM on a (BT, LANE) f32 activation."""
        vb = v.astype(bf16)
        identity = jnp.dot(vb, skw[...], preferred_element_type=f32) + skb[...]
        # conv1 + folded BN1 + SiLU (single MXU push, K = 3*LANE)
        out = jnp.dot(conv_taps(v), w1[...], preferred_element_type=f32) + s1[...]
        out = out * jax.nn.sigmoid(out)
        # conv2 + folded BN2
        out = jnp.dot(conv_taps(out), w2[...], preferred_element_type=f32) + s2[...]
        # channel attention: AvgPool(1) -> 1x1 -> ReLU -> 1x1 -> sigmoid
        outb = out.reshape(B, T, LANE)
        pooled = jnp.mean(outb, axis=1)                       # (B, LANE)
        h = jnp.dot(pooled.astype(bf16), cw1[...], preferred_element_type=f32) + cb1[...]
        h = jnp.maximum(h, 0.0)
        ca = jax.nn.sigmoid(
            jnp.dot(h.astype(bf16), cw2[...], preferred_element_type=f32) + cb2[...])
        y = outb * ca[:, None, :] + identity.reshape(B, T, LANE)
        y = y * jax.nn.sigmoid(y)                             # final SiLU
        return y.reshape(BT, LANE)

    def layernorm(v, g, b):
        mu = jnp.mean(v, axis=-1, keepdims=True)
        var = jnp.mean(jnp.square(v - mu), axis=-1, keepdims=True)
        return (v - mu) * jax.lax.rsqrt(var + LN_EPS) * g + b

    # ---------------- backbone -------------------------------------------
    x = x_ref[...].astype(f32).reshape(BT, LANE)
    x = res_block(x, b1w1, b1s1, b1w2, b1s2, b1skw, b1skb, b1cw1, b1cb1, b1cw2, b1cb2)
    x = res_block(x, b2w1, b2s1, b2w2, b2s2, b2skw, b2skb, b2cw1, b2cb1, b2cw2, b2cb2)

    # AdaptiveAvgPool1d(T -> S): tiny per-batch (S, T) averaging matmul.
    xe = jnp.einsum('bst,btc->bsc', pool_ref[...], x.reshape(B, T, d),
                    preferred_element_type=f32).reshape(BS, d)

    # ---------------- transformer encoder (post-norm, dropout=identity) ---
    attn_mask = mask_ref[...]                                  # block-diag 0/-1e30
    for l in range(nlayers):                                   # static unroll (2)
        xe_b = xe.astype(bf16)                                 # (BS, d)
        xet_b = xe.T.astype(bf16)                              # (d, BS)
        # all heads' score projections in one wide (d, H*d) matmul
        th_all = jnp.dot(xe_b, a_ref[l], preferred_element_type=f32) + kq_ref[l]
        ctxs = []
        for h in range(nhead):                                 # static unroll (4)
            th_h = th_all[:, h * d:(h + 1) * d].astype(bf16)
            sc = jnp.dot(th_h, xet_b, preferred_element_type=f32) + attn_mask
            sc = sc - jnp.max(sc, axis=-1, keepdims=True)
            e = jnp.exp(sc)
            p = e / jnp.sum(e, axis=-1, keepdims=True)         # exact: rows sum to 1
            ctxs.append(jnp.dot(p.astype(bf16), xe_b, preferred_element_type=f32))
        ctx_all = jnp.concatenate(ctxs, axis=1).astype(bf16)   # (BS, H*d)
        attn = jnp.dot(ctx_all, bm_ref[l], preferred_element_type=f32) + ab_ref[l]
        y = layernorm(xe + attn, g1_ref[l], be1_ref[l])
        h1 = jnp.dot(y.astype(bf16), fw1_ref[l], preferred_element_type=f32) + fb1_ref[l]
        h1 = jnp.maximum(h1, 0.0)                              # ReLU
        ff = jnp.dot(h1.astype(bf16), fw2_ref[l], preferred_element_type=f32) + fb2_ref[l]
        xe = layernorm(y + ff, g2_ref[l], be2_ref[l])

    # ---------------- mean over sequence + classification head ------------
    m = jnp.mean(xe.reshape(B, S, d), axis=1)                  # (B, d)
    hh = jnp.dot(m.astype(bf16), hw1_ref[...], preferred_element_type=f32) + hb1_ref[...]
    hh = hh * jax.nn.sigmoid(hh)                               # SiLU
    logits = jnp.dot(hh.astype(bf16), hw2_ref[...], preferred_element_type=f32) + hb2_ref[...]
    o_ref[...] = logits.astype(o_ref.dtype)


# ---------------------------------------------------------------------------
# Trace-time parameter preparation
# ---------------------------------------------------------------------------

def _pad_to(a, shape):
    return jnp.pad(a, [(0, s - n) for n, s in zip(a.shape, shape)])


def _prep_block(p, in_ch, out_ch):
    """Fold BN, stack conv taps, pad everything to 128 lanes, cast to bf16."""
    bf16 = jnp.bfloat16

    def fold(w, b, g, beta, mean, var):
        s = g * jax.lax.rsqrt(var + BN_EPS)
        shift = beta + s * (b - mean)                         # (out_ch,)
        wf = w * s[None, None, :]                             # (3, cin, cout)
        wp = _pad_to(wf, (3, LANE, LANE)).reshape(3 * LANE, LANE)
        return wp.astype(bf16), _pad_to(shift.reshape(1, -1), (1, LANE))

    w1, s1 = fold(p["w1"], p["b1"], p["bn1_g"], p["bn1_b"], p["bn1_m"], p["bn1_v"])
    w2, s2 = fold(p["w2"], p["b2"], p["bn2_g"], p["bn2_b"], p["bn2_m"], p["bn2_v"])

    if "skip_w" in p:
        skw = _pad_to(p["skip_w"].reshape(in_ch, out_ch), (LANE, LANE)).astype(bf16)
        skb = _pad_to(p["skip_b"].reshape(1, -1), (1, LANE))
    else:
        # TODO(synk): in_ch == out_ch case could skip this matmul entirely.
        skw = jnp.eye(LANE, dtype=jnp.float32).astype(bf16)
        skb = jnp.zeros((1, LANE), jnp.float32)

    cw1 = _pad_to(p["ca_w1"], (LANE, LANE)).astype(bf16)
    cb1 = _pad_to(p["ca_b1"].reshape(1, -1), (1, LANE))
    cw2 = _pad_to(p["ca_w2"], (LANE, LANE)).astype(bf16)
    cb2 = _pad_to(p["ca_b2"].reshape(1, -1), (1, LANE))
    return [w1, s1, w2, s2, skw, skb, cw1, cb1, cw2, cb2]


def _adaptive_pool_matrix(T, S):
    """(S, T) averaging matrix implementing nn.AdaptiveAvgPool1d(S)."""
    t = jnp.arange(T, dtype=jnp.int32)[None, :]
    w = jnp.arange(S, dtype=jnp.int32)[:, None]
    start = (w * T) // S
    end = ((w + 1) * T + S - 1) // S
    m = ((t >= start) & (t < end)).astype(jnp.float32)
    return m / (end - start).astype(jnp.float32)


def _fold_attention(p, nhead, d):
    """Fold per-head MHA weights into wide, head-concatenated matrices."""
    hd = d // nhead
    scale = 1.0 / math.sqrt(hd)
    wq = p["wqkv"][:, :d].reshape(d, nhead, hd)
    wk = p["wqkv"][:, d:2 * d].reshape(d, nhead, hd)
    wv = p["wqkv"][:, 2 * d:].reshape(d, nhead, hd)
    bq = p["bqkv"][0, :d].reshape(nhead, hd)
    bv = p["bqkv"][0, 2 * d:].reshape(nhead, hd)
    wo = p["wo"].reshape(nhead, hd, d)
    a = jnp.einsum('ihk,jhk->hij', wq, wk) * scale            # Wq_h Wk_h^T / sqrt(hd)
    kq = jnp.einsum('ihk,hk->hi', wk, bq) * scale             # Wk_h bq_h / sqrt(hd)
    bm = jnp.einsum('ihk,hkj->hij', wv, wo)                   # Wv_h Wo_h
    ab = (jnp.einsum('hkj,hk->j', wo, bv) + p["bo"][0]).reshape(1, d)
    a_all = jnp.transpose(a, (1, 0, 2)).reshape(d, nhead * d)  # cols blocked by head
    kq_all = kq.reshape(1, nhead * d)
    bm_all = bm.reshape(nhead * d, d)                          # rows blocked by head
    return a_all, kq_all, bm_all, ab


# ---------------------------------------------------------------------------
# Model wrapper: one fused pallas_call
# ---------------------------------------------------------------------------

def har_transformer(x, params):
    """x: (B, T, 9) -> (B, num_classes)."""
    B, T, Cin = x.shape
    S = CFG["window_size"]
    nhead = CFG["transformer"]["n_heads"]
    d = CFG["transformer"]["d_model"]
    nc = CFG["num_classes"]
    layers = params["layers"]
    head = params["head"]
    L = len(layers)
    bf16 = jnp.bfloat16

    blk1 = _prep_block(params["block1"], 9, 64)
    blk2 = _prep_block(params["block2"], 64, 128)

    # lane-dense input (zero-padded channels); padded lanes stay exactly zero.
    xp = jnp.pad(x.astype(jnp.float32), ((0, 0), (0, 0), (0, LANE - Cin)))

    # batch-segment edge masks for the conv time shifts (linear in B).
    t_ids = jnp.arange(B * T, dtype=jnp.int32) % T
    mfirst = (t_ids != 0).astype(jnp.float32).reshape(B * T, 1)
    mlast = (t_ids != T - 1).astype(jnp.float32).reshape(B * T, 1)

    # per-batch adaptive-pool matrix (tiny, linear in B).
    pool_b = jnp.broadcast_to(_adaptive_pool_matrix(T, S)[None], (B, S, T))

    # block-diagonal additive attention mask over the batch-folded tokens.
    sids = jnp.arange(B * S, dtype=jnp.int32) // S
    attn_mask = jnp.where(sids[:, None] == sids[None, :], 0.0, -1e30).astype(jnp.float32)

    folded = [_fold_attention(lp, nhead, d) for lp in layers]
    a_all = jnp.stack([f[0] for f in folded]).astype(bf16)     # (L, d, H*d)
    kq_all = jnp.stack([f[1] for f in folded])                 # (L, 1, H*d)
    bm_all = jnp.stack([f[2] for f in folded]).astype(bf16)    # (L, H*d, d)
    ab_all = jnp.stack([f[3] for f in folded])                 # (L, 1, d)
    g1 = jnp.stack([lp["ln1_g"] for lp in layers])
    be1 = jnp.stack([lp["ln1_b"] for lp in layers])
    fw1 = jnp.stack([lp["w1"] for lp in layers]).astype(bf16)  # (L, d, 256)
    fb1 = jnp.stack([lp["b1"] for lp in layers])
    fw2 = jnp.stack([lp["w2"] for lp in layers]).astype(bf16)  # (L, 256, d)
    fb2 = jnp.stack([lp["b2"] for lp in layers])
    g2 = jnp.stack([lp["ln2_g"] for lp in layers])
    be2 = jnp.stack([lp["ln2_b"] for lp in layers])

    # cls head, padded lane-dense end to end (exact: pads are zeros).
    hw1 = _pad_to(head["w1"], (d, LANE)).astype(bf16)
    hb1 = _pad_to(head["b1"], (1, LANE))
    hw2 = _pad_to(head["w2"], (LANE, LANE)).astype(bf16)
    hb2 = _pad_to(head["b2"], (1, LANE))

    kern = functools.partial(_har_kernel, batch=B, time=T, seq=S,
                             nlayers=L, nhead=nhead)
    # TODO(synk): at larger batch add grid=(B // Bt,) with
    # dimension_semantics=("parallel",) + per-block BlockSpecs so v7x's second
    # TensorCore is used; at B=2 a single grid-less call is latency-optimal.
    logits = pl.pallas_call(
        kern,
        out_shape=jax.ShapeDtypeStruct((B, LANE), jnp.float32),
        compiler_params=pltpu.CompilerParams(
            vmem_limit_bytes=16 * 1024 * 1024),
    )(xp, mfirst, mlast, *blk1, *blk2, pool_b, attn_mask,
      a_all, kq_all, bm_all, ab_all,
      g1, be1, fw1, fb1, fw2, fb2, g2, be2,
      hw1, hb1, hw2, hb2)
    return logits[:, :nc]


# ---------------------------------------------------------------------------
# Deterministic parameter init (matches the PyTorch module's shapes; weights
# are stored "x @ W" style, i.e. transposed relative to torch Linear/Conv).
# ---------------------------------------------------------------------------

def _nrm(kit, shape, s=0.1):
    return s * jax.random.normal(next(kit), shape, jnp.float32)


def init_residual_block(kit, in_ch, out_ch, k=3):
    p = {
        "w1": _nrm(kit, (k, in_ch, out_ch), 0.2),
        "b1": _nrm(kit, (out_ch,)),
        "bn1_g": 1.0 + _nrm(kit, (out_ch,)),
        "bn1_b": _nrm(kit, (out_ch,)),
        "bn1_m": _nrm(kit, (out_ch,)),
        "bn1_v": 1.0 + jnp.abs(_nrm(kit, (out_ch,))),
        "w2": _nrm(kit, (k, out_ch, out_ch), 0.1),
        "b2": _nrm(kit, (out_ch,)),
        "bn2_g": 1.0 + _nrm(kit, (out_ch,)),
        "bn2_b": _nrm(kit, (out_ch,)),
        "bn2_m": _nrm(kit, (out_ch,)),
        "bn2_v": 1.0 + jnp.abs(_nrm(kit, (out_ch,))),
        "ca_w1": _nrm(kit, (out_ch, out_ch // 8), 0.2),
        "ca_b1": _nrm(kit, (out_ch // 8,)),
        "ca_w2": _nrm(kit, (out_ch // 8, out_ch), 0.2),
        "ca_b2": _nrm(kit, (out_ch,)),
    }
    if in_ch != out_ch:
        # PyTorch skip here is a bare Conv1d (no BN), matched as such.
        p["skip_w"] = _nrm(kit, (1, in_ch, out_ch), 0.2)
        p["skip_b"] = _nrm(kit, (out_ch,))
    return p


def init_encoder_layer(kit, d, dff):
    return {
        "wqkv": _nrm(kit, (d, 3 * d), 0.05),   # = in_proj_weight.T, [q|k|v] columns
        "bqkv": _nrm(kit, (1, 3 * d)),
        "wo": _nrm(kit, (d, d), 0.05),         # = out_proj.weight.T
        "bo": _nrm(kit, (1, d)),
        "ln1_g": 1.0 + _nrm(kit, (1, d)),
        "ln1_b": _nrm(kit, (1, d)),
        "w1": _nrm(kit, (d, dff), 0.05),
        "b1": _nrm(kit, (1, dff)),
        "w2": _nrm(kit, (dff, d), 0.05),
        "b2": _nrm(kit, (1, d)),
        "ln2_g": 1.0 + _nrm(kit, (1, d)),
        "ln2_b": _nrm(kit, (1, d)),
    }


def init_params(kit):
    d = CFG["transformer"]["d_model"]
    nl = CFG["transformer"]["n_layers"]
    nc = CFG["num_classes"]
    return {
        "block1": init_residual_block(kit, 9, 64),
        "block2": init_residual_block(kit, 64, 128),
        "layers": [init_encoder_layer(kit, d, 256) for _ in range(nl)],
        "head": {
            "w1": _nrm(kit, (d, 64), 0.1),
            "b1": _nrm(kit, (1, 64)),
            "w2": _nrm(kit, (64, nc), 0.1),
            "b2": _nrm(kit, (1, nc)),
        },
    }


# ---------------------------------------------------------------------------

if __name__ == "__main__":
    key = jax.random.PRNGKey(0)
    kit = iter(jax.random.split(key, 256))

    B, T, Cin = 2, 32, 9                      # (batch, time, 9 IMU channels)
    x = jax.random.normal(next(kit), (B, T, Cin), jnp.float32)
    params = init_params(kit)

    fwd = jax.jit(lambda inp: har_transformer(inp, params))
    out = jax.block_until_ready(fwd(x))

    assert out.shape == (B, CFG["num_classes"]), out.shape
    assert bool(jnp.all(jnp.isfinite(out)))
    print("KERNEL_OK")
</pallas_src>

<mosaic_0001>
module attributes {stable_mosaic.version = 11 : i64} {
  func.func @_har_kernel(%arg0: memref<2x32x128xf32, #tpu.memory_space<vmem>>, %arg1: memref<64x1xf32, #tpu.memory_space<vmem>>, %arg2: memref<64x1xf32, #tpu.memory_space<vmem>>, %arg3: memref<384x128xbf16, #tpu.memory_space<vmem>>, %arg4: memref<1x128xf32, #tpu.memory_space<vmem>>, %arg5: memref<384x128xbf16, #tpu.memory_space<vmem>>, %arg6: memref<1x128xf32, #tpu.memory_space<vmem>>, %arg7: memref<128x128xbf16, #tpu.memory_space<vmem>>, %arg8: memref<1x128xf32, #tpu.memory_space<vmem>>, %arg9: memref<128x128xbf16, #tpu.memory_space<vmem>>, %arg10: memref<1x128xf32, #tpu.memory_space<vmem>>, %arg11: memref<128x128xbf16, #tpu.memory_space<vmem>>, %arg12: memref<1x128xf32, #tpu.memory_space<vmem>>, %arg13: memref<384x128xbf16, #tpu.memory_space<vmem>>, %arg14: memref<1x128xf32, #tpu.memory_space<vmem>>, %arg15: memref<384x128xbf16, #tpu.memory_space<vmem>>, %arg16: memref<1x128xf32, #tpu.memory_space<vmem>>, %arg17: memref<128x128xbf16, #tpu.memory_space<vmem>>, %arg18: memref<1x128xf32, #tpu.memory_space<vmem>>, %arg19: memref<128x128xbf16, #tpu.memory_space<vmem>>, %arg20: memref<1x128xf32, #tpu.memory_space<vmem>>, %arg21: memref<128x128xbf16, #tpu.memory_space<vmem>>, %arg22: memref<1x128xf32, #tpu.memory_space<vmem>>, %arg23: memref<2x16x32xf32, #tpu.memory_space<vmem>>, %arg24: memref<32x32xf32, #tpu.memory_space<vmem>>, %arg25: memref<2x128x512xbf16, #tpu.memory_space<vmem>>, %arg26: memref<2x1x512xf32, #tpu.memory_space<vmem>>, %arg27: memref<2x512x128xbf16, #tpu.memory_space<vmem>>, %arg28: memref<2x1x128xf32, #tpu.memory_space<vmem>>, %arg29: memref<2x1x128xf32, #tpu.memory_space<vmem>>, %arg30: memref<2x1x128xf32, #tpu.memory_space<vmem>>, %arg31: memref<2x128x256xbf16, #tpu.memory_space<vmem>>, %arg32: memref<2x1x256xf32, #tpu.memory_space<vmem>>, %arg33: memref<2x256x128xbf16, #tpu.memory_space<vmem>>, %arg34: memref<2x1x128xf32, #tpu.memory_space<vmem>>, %arg35: memref<2x1x128xf32, #tpu.memory_space<vmem>>, %arg36: memref<2x1x128xf32, #tpu.memory_space<vmem>>, %arg37: memref<128x128xbf16, #tpu.memory_space<vmem>>, %arg38: memref<1x128xf32, #tpu.memory_space<vmem>>, %arg39: memref<128x128xbf16, #tpu.memory_space<vmem>>, %arg40: memref<1x128xf32, #tpu.memory_space<vmem>>, %arg41: memref<2x128xf32, #tpu.memory_space<vmem>>) attributes {dimension_semantics = [], scalar_prefetch = 0 : i64, scratch_operands = 0 : i64, tpu.core_type = #tpu.core_type<tc>} {
    %c0 = arith.constant 0 : index
    %c0_0 = arith.constant 0 : index
    %c0_1 = arith.constant 0 : index
    %0 = vector.load %arg0[%c0, %c0_0, %c0_1] : memref<2x32x128xf32, #tpu.memory_space<vmem>>, vector<2x32x128xf32>
    %1 = vector.shape_cast %0 : vector<2x32x128xf32> to vector<64x128xf32>
    %2 = arith.truncf %1 : vector<64x128xf32> to vector<64x128xbf16>
    %c0_2 = arith.constant 0 : index
    %c0_3 = arith.constant 0 : index
    %3 = vector.load %arg7[%c0_2, %c0_3] : memref<128x128xbf16, #tpu.memory_space<vmem>>, vector<128x128xbf16>
    %cst = arith.constant dense<0.000000e+00> : vector<64x128xf32>
    %4 = tpu.matmul %2, %3, %cst {dimension_numbers = #tpu.dot_dimension_numbers<[1], [0], [0], [1], [0, 0, 1, 1], [], []>} : vector<64x128xbf16>, vector<128x128xbf16>, vector<64x128xf32> -> vector<64x128xf32>
    %c0_4 = arith.constant 0 : index
    %c0_5 = arith.constant 0 : index
    %5 = vector.load %arg8[%c0_4, %c0_5] : memref<1x128xf32, #tpu.memory_space<vmem>>, vector<1x128xf32>
    %6 = vector.broadcast %5 : vector<1x128xf32> to vector<64x128xf32>
    %7 = arith.addf %4, %6 : vector<64x128xf32>
    %c1_i32 = arith.constant 1 : i32
    %8 = tpu.dynamic_rotate %1 by %c1_i32 dim 0 : vector<64x128xf32>, i32 -> vector<64x128xf32>
    %c0_6 = arith.constant 0 : index
    %c0_7 = arith.constant 0 : index
    %9 = vector.load %arg1[%c0_6, %c0_7] : memref<64x1xf32, #tpu.memory_space<vmem>>, vector<64x1xf32>
    %10 = vector.broadcast %9 : vector<64x1xf32> to vector<64x128xf32>
    %11 = arith.mulf %8, %10 : vector<64x128xf32>
    %c63_i32 = arith.constant 63 : i32
    %12 = tpu.dynamic_rotate %1 by %c63_i32 dim 0 : vector<64x128xf32>, i32 -> vector<64x128xf32>
    %c0_8 = arith.constant 0 : index
    %c0_9 = arith.constant 0 : index
    %13 = vector.load %arg2[%c0_8, %c0_9] : memref<64x1xf32, #tpu.memory_space<vmem>>, vector<64x1xf32>
    %14 = vector.broadcast %13 : vector<64x1xf32> to vector<64x128xf32>
    %15 = arith.mulf %12, %14 : vector<64x128xf32>
    %16 = tpu.concatenate %11, %1, %15 in 1 : vector<64x128xf32>, vector<64x128xf32>, vector<64x128xf32> -> vector<64x384xf32>
    %17 = arith.truncf %16 : vector<64x384xf32> to vector<64x384xbf16>
    %c0_10 = arith.constant 0 : index
    %c0_11 = arith.constant 0 : index
    %18 = vector.load %arg3[%c0_10, %c0_11] : memref<384x128xbf16, #tpu.memory_space<vmem>>, vector<384x128xbf16>
    %cst_12 = arith.constant dense<0.000000e+00> : vector<64x128xf32>
    %19 = tpu.matmul %17, %18, %cst_12 {dimension_numbers = #tpu.dot_dimension_numbers<[1], [0], [0], [1], [0, 0, 1, 1], [], []>} : vector<64x384xbf16>, vector<384x128xbf16>, vector<64x128xf32> -> vector<64x128xf32>
    %c0_13 = arith.constant 0 : index
    %c0_14 = arith.constant 0 : index
    %20 = vector.load %arg4[%c0_13, %c0_14] : memref<1x128xf32, #tpu.memory_space<vmem>>, vector<1x128xf32>
    %21 = vector.broadcast %20 : vector<1x128xf32> to vector<64x128xf32>
    %22 = arith.addf %19, %21 : vector<64x128xf32>
    %23 = arith.negf %22 : vector<64x128xf32>
    %24 = math.exp %23 : vector<64x128xf32>
    %cst_15 = arith.constant 1.000000e+00 : f32
    %25 = vector.broadcast %cst_15 : f32 to vector<64x128xf32>
    %26 = arith.addf %25, %24 : vector<64x128xf32>
    %27 = arith.divf %25, %26 : vector<64x128xf32>
    %28 = arith.mulf %22, %27 : vector<64x128xf32>
    %c1_i32_16 = arith.constant 1 : i32
    %29 = tpu.dynamic_rotate %28 by %c1_i32_16 dim 0 : vector<64x128xf32>, i32 -> vector<64x128xf32>
    %c0_17 = arith.constant 0 : index
    %c0_18 = arith.constant 0 : index
    %30 = vector.load %arg1[%c0_17, %c0_18] : memref<64x1xf32, #tpu.memory_space<vmem>>, vector<64x1xf32>
    %31 = vector.broadcast %30 : vector<64x1xf32> to vector<64x128xf32>
    %32 = arith.mulf %29, %31 : vector<64x128xf32>
    %c63_i32_19 = arith.constant 63 : i32
    %33 = tpu.dynamic_rotate %28 by %c63_i32_19 dim 0 : vector<64x128xf32>, i32 -> vector<64x128xf32>
    %c0_20 = arith.constant 0 : index
    %c0_21 = arith.constant 0 : index
    %34 = vector.load %arg2[%c0_20, %c0_21] : memref<64x1xf32, #tpu.memory_space<vmem>>, vector<64x1xf32>
    %35 = vector.broadcast %34 : vector<64x1xf32> to vector<64x128xf32>
    %36 = arith.mulf %33, %35 : vector<64x128xf32>
    %37 = tpu.concatenate %32, %28, %36 in 1 : vector<64x128xf32>, vector<64x128xf32>, vector<64x128xf32> -> vector<64x384xf32>
    %38 = arith.truncf %37 : vector<64x384xf32> to vector<64x384xbf16>
    %c0_22 = arith.constant 0 : index
    %c0_23 = arith.constant 0 : index
    %39 = vector.load %arg5[%c0_22, %c0_23] : memref<384x128xbf16, #tpu.memory_space<vmem>>, vector<384x128xbf16>
    %cst_24 = arith.constant dense<0.000000e+00> : vector<64x128xf32>
    %40 = tpu.matmul %38, %39, %cst_24 {dimension_numbers = #tpu.dot_dimension_numbers<[1], [0], [0], [1], [0, 0, 1, 1], [], []>} : vector<64x384xbf16>, vector<384x128xbf16>, vector<64x128xf32> -> vector<64x128xf32>
    %c0_25 = arith.constant 0 : index
    %c0_26 = arith.constant 0 : index
    %41 = vector.load %arg6[%c0_25, %c0_26] : memref<1x128xf32, #tpu.memory_space<vmem>>, vector<1x128xf32>
    %42 = vector.broadcast %41 : vector<1x128xf32> to vector<64x128xf32>
    %43 = arith.addf %40, %42 : vector<64x128xf32>
    %44 = vector.shape_cast %43 : vector<64x128xf32> to vector<2x32x128xf32>
    %cst_27 = arith.constant dense<0.000000e+00> : vector<2x128xf32>
    %45 = vector.multi_reduction <add>, %44, %cst_27 [1] : vector<2x32x128xf32> to vector<2x128xf32>
    %cst_28 = arith.constant 3.200000e+01 : f32
    %46 = vector.broadcast %cst_28 : f32 to vector<2x128xf32>
    %47 = arith.divf %45, %46 : vector<2x128xf32>
    %48 = arith.truncf %47 : vector<2x128xf32> to vector<2x128xbf16>
    %c0_29 = arith.constant 0 : index
    %c0_30 = arith.constant 0 : index
    %49 = vector.load %arg9[%c0_29, %c0_30] : memref<128x128xbf16, #tpu.memory_space<vmem>>, vector<128x128xbf16>
    %cst_31 = arith.constant dense<0.000000e+00> : vector<2x128xf32>
    %50 = tpu.matmul %48, %49, %cst_31 {dimension_numbers = #tpu.dot_dimension_numbers<[1], [0], [0], [1], [0, 0, 1, 1], [], []>} : vector<2x128xbf16>, vector<128x128xbf16>, vector<2x128xf32> -> vector<2x128xf32>
    %c0_32 = arith.constant 0 : index
    %c0_33 = arith.constant 0 : index
    %51 = vector.load %arg10[%c0_32, %c0_33] : memref<1x128xf32, #tpu.memory_space<vmem>>, vector<1x128xf32>
    %52 = vector.broadcast %51 : vector<1x128xf32> to vector<2x128xf32>
    %53 = arith.addf %50, %52 : vector<2x128xf32>
    %cst_34 = arith.constant 0.000000e+00 : f32
    %54 = vector.broadcast %cst_34 : f32 to vector<2x128xf32>
    %55 = arith.maximumf %53, %54 : vector<2x128xf32>
    %56 = arith.truncf %55 : vector<2x128xf32> to vector<2x128xbf16>
    %c0_35 = arith.constant 0 : index
    %c0_36 = arith.constant 0 : index
    %57 = vector.load %arg11[%c0_35, %c0_36] : memref<128x128xbf16, #tpu.memory_space<vmem>>, vector<128x128xbf16>
    %cst_37 = arith.constant dense<0.000000e+00> : vector<2x128xf32>
    %58 = tpu.matmul %56, %57, %cst_37 {dimension_numbers = #tpu.dot_dimension_numbers<[1], [0], [0], [1], [0, 0, 1, 1], [], []>} : vector<2x128xbf16>, vector<128x128xbf16>, vector<2x128xf32> -> vector<2x128xf32>
    %c0_38 = arith.constant 0 : index
    %c0_39 = arith.constant 0 : index
    %59 = vector.load %arg12[%c0_38, %c0_39] : memref<1x128xf32, #tpu.memory_space<vmem>>, vector<1x128xf32>
    %60 = vector.broadcast %59 : vector<1x128xf32> to vector<2x128xf32>
    %61 = arith.addf %58, %60 : vector<2x128xf32>
    %62 = arith.negf %61 : vector<2x128xf32>
    %63 = math.exp %62 : vector<2x128xf32>
    %cst_40 = arith.constant 1.000000e+00 : f32
    %64 = vector.broadcast %cst_40 : f32 to vector<2x128xf32>
    %65 = arith.addf %64, %63 : vector<2x128xf32>
    %66 = arith.divf %64, %65 : vector<2x128xf32>
    %67 = vector.shape_cast %66 : vector<2x128xf32> to vector<2x1x128xf32>
    %68 = vector.broadcast %67 : vector<2x1x128xf32> to vector<2x32x128xf32>
    %69 = arith.mulf %44, %68 : vector<2x32x128xf32>
    %70 = vector.shape_cast %7 : vector<64x128xf32> to vector<2x32x128xf32>
    %71 = arith.addf %69, %70 : vector<2x32x128xf32>
    %72 = arith.negf %71 : vector<2x32x128xf32>
    %73 = math.exp %72 : vector<2x32x128xf32>
    %cst_41 = arith.constant 1.000000e+00 : f32
    %74 = vector.broadcast %cst_41 : f32 to vector<2x32x128xf32>
    %75 = arith.addf %74, %73 : vector<2x32x128xf32>
    %76 = arith.divf %74, %75 : vector<2x32x128xf32>
    %77 = arith.mulf %71, %76 : vector<2x32x128xf32>
    %78 = vector.shape_cast %77 : vector<2x32x128xf32> to vector<64x128xf32>
    %79 = arith.truncf %78 : vector<64x128xf32> to vector<64x128xbf16>
    %c0_42 = arith.constant 0 : index
    %c0_43 = arith.constant 0 : index
    %80 = vector.load %arg17[%c0_42, %c0_43] : memref<128x128xbf16, #tpu.memory_space<vmem>>, vector<128x128xbf16>
    %cst_44 = arith.constant dense<0.000000e+00> : vector<64x128xf32>
    %81 = tpu.matmul %79, %80, %cst_44 {dimension_numbers = #tpu.dot_dimension_numbers<[1], [0], [0], [1], [0, 0, 1, 1], [], []>} : vector<64x128xbf16>, vector<128x128xbf16>, vector<64x128xf32> -> vector<64x128xf32>
    %c0_45 = arith.constant 0 : index
    %c0_46 = arith.constant 0 : index
    %82 = vector.load %arg18[%c0_45, %c0_46] : memref<1x128xf32, #tpu.memory_space<vmem>>, vector<1x128xf32>
    %83 = vector.broadcast %82 : vector<1x128xf32> to vector<64x128xf32>
    %84 = arith.addf %81, %83 : vector<64x128xf32>
    %c1_i32_47 = arith.constant 1 : i32
    %85 = tpu.dynamic_rotate %78 by %c1_i32_47 dim 0 : vector<64x128xf32>, i32 -> vector<64x128xf32>
    %c0_48 = arith.constant 0 : index
    %c0_49 = arith.constant 0 : index
    %86 = vector.load %arg1[%c0_48, %c0_49] : memref<64x1xf32, #tpu.memory_space<vmem>>, vector<64x1xf32>
    %87 = vector.broadcast %86 : vector<64x1xf32> to vector<64x128xf32>
    %88 = arith.mulf %85, %87 : vector<64x128xf32>
    %c63_i32_50 = arith.constant 63 : i32
    %89 = tpu.dynamic_rotate %78 by %c63_i32_50 dim 0 : vector<64x128xf32>, i32 -> vector<64x128xf32>
    %c0_51 = arith.constant 0 : index
    %c0_52 = arith.constant 0 : index
    %90 = vector.load %arg2[%c0_51, %c0_52] : memref<64x1xf32, #tpu.memory_space<vmem>>, vector<64x1xf32>
    %91 = vector.broadcast %90 : vector<64x1xf32> to vector<64x128xf32>
    %92 = arith.mulf %89, %91 : vector<64x128xf32>
    %93 = tpu.concatenate %88, %78, %92 in 1 : vector<64x128xf32>, vector<64x128xf32>, vector<64x128xf32> -> vector<64x384xf32>
    %94 = arith.truncf %93 : vector<64x384xf32> to vector<64x384xbf16>
    %c0_53 = arith.constant 0 : index
    %c0_54 = arith.constant 0 : index
    %95 = vector.load %arg13[%c0_53, %c0_54] : memref<384x128xbf16, #tpu.memory_space<vmem>>, vector<384x128xbf16>
    %cst_55 = arith.constant dense<0.000000e+00> : vector<64x128xf32>
    %96 = tpu.matmul %94, %95, %cst_55 {dimension_numbers = #tpu.dot_dimension_numbers<[1], [0], [0], [1], [0, 0, 1, 1], [], []>} : vector<64x384xbf16>, vector<384x128xbf16>, vector<64x128xf32> -> vector<64x128xf32>
    %c0_56 = arith.constant 0 : index
    %c0_57 = arith.constant 0 : index
    %97 = vector.load %arg14[%c0_56, %c0_57] : memref<1x128xf32, #tpu.memory_space<vmem>>, vector<1x128xf32>
    %98 = vector.broadcast %97 : vector<1x128xf32> to vector<64x128xf32>
    %99 = arith.addf %96, %98 : vector<64x128xf32>
    %100 = arith.negf %99 : vector<64x128xf32>
    %101 = math.exp %100 : vector<64x128xf32>
    %cst_58 = arith.constant 1.000000e+00 : f32
    %102 = vector.broadcast %cst_58 : f32 to vector<64x128xf32>
    %103 = arith.addf %102, %101 : vector<64x128xf32>
    %104 = arith.divf %102, %103 : vector<64x128xf32>
    %105 = arith.mulf %99, %104 : vector<64x128xf32>
    %c1_i32_59 = arith.constant 1 : i32
    %106 = tpu.dynamic_rotate %105 by %c1_i32_59 dim 0 : vector<64x128xf32>, i32 -> vector<64x128xf32>
    %c0_60 = arith.constant 0 : index
    %c0_61 = arith.constant 0 : index
    %107 = vector.load %arg1[%c0_60, %c0_61] : memref<64x1xf32, #tpu.memory_space<vmem>>, vector<64x1xf32>
    %108 = vector.broadcast %107 : vector<64x1xf32> to vector<64x128xf32>
    %109 = arith.mulf %106, %108 : vector<64x128xf32>
    %c63_i32_62 = arith.constant 63 : i32
    %110 = tpu.dynamic_rotate %105 by %c63_i32_62 dim 0 : vector<64x128xf32>, i32 -> vector<64x128xf32>
    %c0_63 = arith.constant 0 : index
    %c0_64 = arith.constant 0 : index
    %111 = vector.load %arg2[%c0_63, %c0_64] : memref<64x1xf32, #tpu.memory_space<vmem>>, vector<64x1xf32>
    %112 = vector.broadcast %111 : vector<64x1xf32> to vector<64x128xf32>
    %113 = arith.mulf %110, %112 : vector<64x128xf32>
    %114 = tpu.concatenate %109, %105, %113 in 1 : vector<64x128xf32>, vector<64x128xf32>, vector<64x128xf32> -> vector<64x384xf32>
    %115 = arith.truncf %114 : vector<64x384xf32> to vector<64x384xbf16>
    %c0_65 = arith.constant 0 : index
    %c0_66 = arith.constant 0 : index
    %116 = vector.load %arg15[%c0_65, %c0_66] : memref<384x128xbf16, #tpu.memory_space<vmem>>, vector<384x128xbf16>
    %cst_67 = arith.constant dense<0.000000e+00> : vector<64x128xf32>
    %117 = tpu.matmul %115, %116, %cst_67 {dimension_numbers = #tpu.dot_dimension_numbers<[1], [0], [0], [1], [0, 0, 1, 1], [], []>} : vector<64x384xbf16>, vector<384x128xbf16>, vector<64x128xf32> -> vector<64x128xf32>
    %c0_68 = arith.constant 0 : index
    %c0_69 = arith.constant 0 : index
    %118 = vector.load %arg16[%c0_68, %c0_69] : memref<1x128xf32, #tpu.memory_space<vmem>>, vector<1x128xf32>
    %119 = vector.broadcast %118 : vector<1x128xf32> to vector<64x128xf32>
    %120 = arith.addf %117, %119 : vector<64x128xf32>
    %121 = vector.shape_cast %120 : vector<64x128xf32> to vector<2x32x128xf32>
    %cst_70 = arith.constant dense<0.000000e+00> : vector<2x128xf32>
    %122 = vector.multi_reduction <add>, %121, %cst_70 [1] : vector<2x32x128xf32> to vector<2x128xf32>
    %cst_71 = arith.constant 3.200000e+01 : f32
    %123 = vector.broadcast %cst_71 : f32 to vector<2x128xf32>
    %124 = arith.divf %122, %123 : vector<2x128xf32>
    %125 = arith.truncf %124 : vector<2x128xf32> to vector<2x128xbf16>
    %c0_72 = arith.constant 0 : index
    %c0_73 = arith.constant 0 : index
    %126 = vector.load %arg19[%c0_72, %c0_73] : memref<128x128xbf16, #tpu.memory_space<vmem>>, vector<128x128xbf16>
    %cst_74 = arith.constant dense<0.000000e+00> : vector<2x128xf32>
    %127 = tpu.matmul %125, %126, %cst_74 {dimension_numbers = #tpu.dot_dimension_numbers<[1], [0], [0], [1], [0, 0, 1, 1], [], []>} : vector<2x128xbf16>, vector<128x128xbf16>, vector<2x128xf32> -> vector<2x128xf32>
    %c0_75 = arith.constant 0 : index
    %c0_76 = arith.constant 0 : index
    %128 = vector.load %arg20[%c0_75, %c0_76] : memref<1x128xf32, #tpu.memory_space<vmem>>, vector<1x128xf32>
    %129 = vector.broadcast %128 : vector<1x128xf32> to vector<2x128xf32>
    %130 = arith.addf %127, %129 : vector<2x128xf32>
    %cst_77 = arith.constant 0.000000e+00 : f32
    %131 = vector.broadcast %cst_77 : f32 to vector<2x128xf32>
    %132 = arith.maximumf %130, %131 : vector<2x128xf32>
    %133 = arith.truncf %132 : vector<2x128xf32> to vector<2x128xbf16>
    %c0_78 = arith.constant 0 : index
    %c0_79 = arith.constant 0 : index
    %134 = vector.load %arg21[%c0_78, %c0_79] : memref<128x128xbf16, #tpu.memory_space<vmem>>, vector<128x128xbf16>
    %cst_80 = arith.constant dense<0.000000e+00> : vector<2x128xf32>
    %135 = tpu.matmul %133, %134, %cst_80 {dimension_numbers = #tpu.dot_dimension_numbers<[1], [0], [0], [1], [0, 0, 1, 1], [], []>} : vector<2x128xbf16>, vector<128x128xbf16>, vector<2x128xf32> -> vector<2x128xf32>
    %c0_81 = arith.constant 0 : index
    %c0_82 = arith.constant 0 : index
    %136 = vector.load %arg22[%c0_81, %c0_82] : memref<1x128xf32, #tpu.memory_space<vmem>>, vector<1x128xf32>
    %137 = vector.broadcast %136 : vector<1x128xf32> to vector<2x128xf32>
    %138 = arith.addf %135, %137 : vector<2x128xf32>
    %139 = arith.negf %138 : vector<2x128xf32>
    %140 = math.exp %139 : vector<2x128xf32>
    %cst_83 = arith.constant 1.000000e+00 : f32
    %141 = vector.broadcast %cst_83 : f32 to vector<2x128xf32>
    %142 = arith.addf %141, %140 : vector<2x128xf32>
    %143 = arith.divf %141, %142 : vector<2x128xf32>
    %144 = vector.shape_cast %143 : vector<2x128xf32> to vector<2x1x128xf32>
    %145 = vector.broadcast %144 : vector<2x1x128xf32> to vector<2x32x128xf32>
    %146 = arith.mulf %121, %145 : vector<2x32x128xf32>
    %147 = vector.shape_cast %84 : vector<64x128xf32> to vector<2x32x128xf32>
    %148 = arith.addf %146, %147 : vector<2x32x128xf32>
    %149 = arith.negf %148 : vector<2x32x128xf32>
    %150 = math.exp %149 : vector<2x32x128xf32>
    %cst_84 = arith.constant 1.000000e+00 : f32
    %151 = vector.broadcast %cst_84 : f32 to vector<2x32x128xf32>
    %152 = arith.addf %151, %150 : vector<2x32x128xf32>
    %153 = arith.divf %151, %152 : vector<2x32x128xf32>
    %154 = arith.mulf %148, %153 : vector<2x32x128xf32>
    %155 = vector.shape_cast %154 : vector<2x32x128xf32> to vector<64x128xf32>
    %c0_85 = arith.constant 0 : index
    %c0_86 = arith.constant 0 : index
    %c0_87 = arith.constant 0 : index
    %156 = vector.load %arg23[%c0_85, %c0_86, %c0_87] : memref<2x16x32xf32, #tpu.memory_space<vmem>>, vector<2x16x32xf32>
    %157 = vector.shape_cast %155 : vector<64x128xf32> to vector<2x32x128xf32>
    "tpu.trace_start"() <{level = 10 : i32, message = "bst,btc->bsc"}> : () -> ()
    %cst_88 = arith.constant dense<0.000000e+00> : vector<2x16x128xf32>
    %158 = tpu.matmul %156, %157, %cst_88 {dimension_numbers = #tpu.dot_dimension_numbers<[2], [1], [1], [2], [0, 0, 0, 1, 1, 2], [0], [0]>} : vector<2x16x32xf32>, vector<2x32x128xf32>, vector<2x16x128xf32> -> vector<2x16x128xf32>
    "tpu.trace_stop"() : () -> ()
    %159 = vector.shape_cast %158 : vector<2x16x128xf32> to vector<32x128xf32>
    %c0_89 = arith.constant 0 : index
    %c0_90 = arith.constant 0 : index
    %160 = vector.load %arg24[%c0_89, %c0_90] : memref<32x32xf32, #tpu.memory_space<vmem>>, vector<32x32xf32>
    %161 = arith.truncf %159 : vector<32x128xf32> to vector<32x128xbf16>
    %162 = tpu.transpose %159, [1, 0] : vector<32x128xf32> -> vector<128x32xf32>
    %163 = arith.truncf %162 : vector<128x32xf32> to vector<128x32xbf16>
    %c0_91 = arith.constant 0 : index
    %c0_92 = arith.constant 0 : index
    %c0_93 = arith.constant 0 : index
    %164 = vector.load %arg25[%c0_91, %c0_92, %c0_93] : memref<2x128x512xbf16, #tpu.memory_space<vmem>>, vector<1x128x512xbf16>
    %165 = vector.shape_cast %164 : vector<1x128x512xbf16> to vector<128x512xbf16>
    %cst_94 = arith.constant dense<0.000000e+00> : vector<32x512xf32>
    %166 = tpu.matmul %161, %165, %cst_94 {dimension_numbers = #tpu.dot_dimension_numbers<[1], [0], [0], [1], [0, 0, 1, 1], [], []>} : vector<32x128xbf16>, vector<128x512xbf16>, vector<32x512xf32> -> vector<32x512xf32>
    %c0_95 = arith.constant 0 : index
    %c0_96 = arith.constant 0 : index
    %c0_97 = arith.constant 0 : index
    %167 = vector.load %arg26[%c0_95, %c0_96, %c0_97] : memref<2x1x512xf32, #tpu.memory_space<vmem>>, vector<1x1x512xf32>
    %168 = vector.shape_cast %167 : vector<1x1x512xf32> to vector<1x512xf32>
    %169 = vector.broadcast %168 : vector<1x512xf32> to vector<32x512xf32>
    %170 = arith.addf %166, %169 : vector<32x512xf32>
    %171 = vector.extract_strided_slice %170 {offsets = [0, 0], sizes = [32, 128], strides = [1, 1]} : vector<32x512xf32> to vector<32x128xf32>
    %172 = arith.truncf %171 : vector<32x128xf32> to vector<32x128xbf16>
    %cst_98 = arith.constant dense<0.000000e+00> : vector<32x32xf32>
    %173 = tpu.matmul %172, %163, %cst_98 {dimension_numbers = #tpu.dot_dimension_numbers<[1], [0], [0], [1], [0, 0, 1, 1], [], []>} : vector<32x128xbf16>, vector<128x32xbf16>, vector<32x32xf32> -> vector<32x32xf32>
    %174 = arith.addf %173, %160 : vector<32x32xf32>
    %cst_99 = arith.constant dense<0xFF800000> : vector<32xf32>
    %175 = vector.multi_reduction <maximumf>, %174, %cst_99 [1] : vector<32x32xf32> to vector<32xf32>
    %176 = vector.shape_cast %175 : vector<32xf32> to vector<32x1xf32>
    %177 = vector.broadcast %176 : vector<32x1xf32> to vector<32x32xf32>
    %178 = arith.subf %174, %177 : vector<32x32xf32>
    %179 = math.exp %178 : vector<32x32xf32>
    %cst_100 = arith.constant dense<0.000000e+00> : vector<32xf32>
    %180 = vector.multi_reduction <add>, %179, %cst_100 [1] : vector<32x32xf32> to vector<32xf32>
    %181 = vector.shape_cast %180 : vector<32xf32> to vector<32x1xf32>
    %182 = vector.broadcast %181 : vector<32x1xf32> to vector<32x32xf32>
    %183 = arith.divf %179, %182 : vector<32x32xf32>
    %184 = arith.truncf %183 : vector<32x32xf32> to vector<32x32xbf16>
    %cst_101 = arith.constant dense<0.000000e+00> : vector<32x128xf32>
    %185 = tpu.matmul %184, %161, %cst_101 {dimension_numbers = #tpu.dot_dimension_numbers<[1], [0], [0], [1], [0, 0, 1, 1], [], []>} : vector<32x32xbf16>, vector<32x128xbf16>, vector<32x128xf32> -> vector<32x128xf32>
    %186 = vector.extract_strided_slice %170 {offsets = [0, 128], sizes = [32, 128], strides = [1, 1]} : vector<32x512xf32> to vector<32x128xf32>
    %187 = arith.truncf %186 : vector<32x128xf32> to vector<32x128xbf16>
    %cst_102 = arith.constant dense<0.000000e+00> : vector<32x32xf32>
    %188 = tpu.matmul %187, %163, %cst_102 {dimension_numbers = #tpu.dot_dimension_numbers<[1], [0], [0], [1], [0, 0, 1, 1], [], []>} : vector<32x128xbf16>, vector<128x32xbf16>, vector<32x32xf32> -> vector<32x32xf32>
    %189 = arith.addf %188, %160 : vector<32x32xf32>
    %cst_103 = arith.constant dense<0xFF800000> : vector<32xf32>
    %190 = vector.multi_reduction <maximumf>, %189, %cst_103 [1] : vector<32x32xf32> to vector<32xf32>
    %191 = vector.shape_cast %190 : vector<32xf32> to vector<32x1xf32>
    %192 = vector.broadcast %191 : vector<32x1xf32> to vector<32x32xf32>
    %193 = arith.subf %189, %192 : vector<32x32xf32>
    %194 = math.exp %193 : vector<32x32xf32>
    %cst_104 = arith.constant dense<0.000000e+00> : vector<32xf32>
    %195 = vector.multi_reduction <add>, %194, %cst_104 [1] : vector<32x32xf32> to vector<32xf32>
    %196 = vector.shape_cast %195 : vector<32xf32> to vector<32x1xf32>
    %197 = vector.broadcast %196 : vector<32x1xf32> to vector<32x32xf32>
    %198 = arith.divf %194, %197 : vector<32x32xf32>
    %199 = arith.truncf %198 : vector<32x32xf32> to vector<32x32xbf16>
    %cst_105 = arith.constant dense<0.000000e+00> : vector<32x128xf32>
    %200 = tpu.matmul %199, %161, %cst_105 {dimension_numbers = #tpu.dot_dimension_numbers<[1], [0], [0], [1], [0, 0, 1, 1], [], []>} : vector<32x32xbf16>, vector<32x128xbf16>, vector<32x128xf32> -> vector<32x128xf32>
    %201 = vector.extract_strided_slice %170 {offsets = [0, 256], sizes = [32, 128], strides = [1, 1]} : vector<32x512xf32> to vector<32x128xf32>
    %202 = arith.truncf %201 : vector<32x128xf32> to vector<32x128xbf16>
    %cst_106 = arith.constant dense<0.000000e+00> : vector<32x32xf32>
    %203 = tpu.matmul %202, %163, %cst_106 {dimension_numbers = #tpu.dot_dimension_numbers<[1], [0], [0], [1], [0, 0, 1, 1], [], []>} : vector<32x128xbf16>, vector<128x32xbf16>, vector<32x32xf32> -> vector<32x32xf32>
    %204 = arith.addf %203, %160 : vector<32x32xf32>
    %cst_107 = arith.constant dense<0xFF800000> : vector<32xf32>
    %205 = vector.multi_reduction <maximumf>, %204, %cst_107 [1] : vector<32x32xf32> to vector<32xf32>
    %206 = vector.shape_cast %205 : vector<32xf32> to vector<32x1xf32>
    %207 = vector.broadcast %206 : vector<32x1xf32> to vector<32x32xf32>
    %208 = arith.subf %204, %207 : vector<32x32xf32>
    %209 = math.exp %208 : vector<32x32xf32>
    %cst_108 = arith.constant dense<0.000000e+00> : vector<32xf32>
    %210 = vector.multi_reduction <add>, %209, %cst_108 [1] : vector<32x32xf32> to vector<32xf32>
    %211 = vector.shape_cast %210 : vector<32xf32> to vector<32x1xf32>
    %212 = vector.broadcast %211 : vector<32x1xf32> to vector<32x32xf32>
    %213 = arith.divf %209, %212 : vector<32x32xf32>
    %214 = arith.truncf %213 : vector<32x32xf32> to vector<32x32xbf16>
    %cst_109 = arith.constant dense<0.000000e+00> : vector<32x128xf32>
    %215 = tpu.matmul %214, %161, %cst_109 {dimension_numbers = #tpu.dot_dimension_numbers<[1], [0], [0], [1], [0, 0, 1, 1], [], []>} : vector<32x32xbf16>, vector<32x128xbf16>, vector<32x128xf32> -> vector<32x128xf32>
    %216 = vector.extract_strided_slice %170 {offsets = [0, 384], sizes = [32, 128], strides = [1, 1]} : vector<32x512xf32> to vector<32x128xf32>
    %217 = arith.truncf %216 : vector<32x128xf32> to vector<32x128xbf16>
    %cst_110 = arith.constant dense<0.000000e+00> : vector<32x32xf32>
    %218 = tpu.matmul %217, %163, %cst_110 {dimension_numbers = #tpu.dot_dimension_numbers<[1], [0], [0], [1], [0, 0, 1, 1], [], []>} : vector<32x128xbf16>, vector<128x32xbf16>, vector<32x32xf32> -> vector<32x32xf32>
    %219 = arith.addf %218, %160 : vector<32x32xf32>
    %cst_111 = arith.constant dense<0xFF800000> : vector<32xf32>
    %220 = vector.multi_reduction <maximumf>, %219, %cst_111 [1] : vector<32x32xf32> to vector<32xf32>
    %221 = vector.shape_cast %220 : vector<32xf32> to vector<32x1xf32>
    %222 = vector.broadcast %221 : vector<32x1xf32> to vector<32x32xf32>
    %223 = arith.subf %219, %222 : vector<32x32xf32>
    %224 = math.exp %223 : vector<32x32xf32>
    %cst_112 = arith.constant dense<0.000000e+00> : vector<32xf32>
    %225 = vector.multi_reduction <add>, %224, %cst_112 [1] : vector<32x32xf32> to vector<32xf32>
    %226 = vector.shape_cast %225 : vector<32xf32> to vector<32x1xf32>
    %227 = vector.broadcast %226 : vector<32x1xf32> to vector<32x32xf32>
    %228 = arith.divf %224, %227 : vector<32x32xf32>
    %229 = arith.truncf %228 : vector<32x32xf32> to vector<32x32xbf16>
    %cst_113 = arith.constant dense<0.000000e+00> : vector<32x128xf32>
    %230 = tpu.matmul %229, %161, %cst_113 {dimension_numbers = #tpu.dot_dimension_numbers<[1], [0], [0], [1], [0, 0, 1, 1], [], []>} : vector<32x32xbf16>, vector<32x128xbf16>, vector<32x128xf32> -> vector<32x128xf32>
    %231 = tpu.concatenate %185, %200, %215, %230 in 1 : vector<32x128xf32>, vector<32x128xf32>, vector<32x128xf32>, vector<32x128xf32> -> vector<32x512xf32>
    %232 = arith.truncf %231 : vector<32x512xf32> to vector<32x512xbf16>
    %c0_114 = arith.constant 0 : index
    %c0_115 = arith.constant 0 : index
    %c0_116 = arith.constant 0 : index
    %233 = vector.load %arg27[%c0_114, %c0_115, %c0_116] : memref<2x512x128xbf16, #tpu.memory_space<vmem>>, vector<1x512x128xbf16>
    %234 = vector.shape_cast %233 : vector<1x512x128xbf16> to vector<512x128xbf16>
    %cst_117 = arith.constant dense<0.000000e+00> : vector<32x128xf32>
    %235 = tpu.matmul %232, %234, %cst_117 {dimension_numbers = #tpu.dot_dimension_numbers<[1], [0], [0], [1], [0, 0, 1, 1], [], []>} : vector<32x512xbf16>, vector<512x128xbf16>, vector<32x128xf32> -> vector<32x128xf32>
    %c0_118 = arith.constant 0 : index
    %c0_119 = arith.constant 0 : index
    %c0_120 = arith.constant 0 : index
    %236 = vector.load %arg28[%c0_118, %c0_119, %c0_120] : memref<2x1x128xf32, #tpu.memory_space<vmem>>, vector<1x1x128xf32>
    %237 = vector.shape_cast %236 : vector<1x1x128xf32> to vector<1x128xf32>
    %238 = vector.broadcast %237 : vector<1x128xf32> to vector<32x128xf32>
    %239 = arith.addf %235, %238 : vector<32x128xf32>
    %240 = arith.addf %159, %239 : vector<32x128xf32>
    %c0_121 = arith.constant 0 : index
    %c0_122 = arith.constant 0 : index
    %c0_123 = arith.constant 0 : index
    %241 = vector.load %arg29[%c0_121, %c0_122, %c0_123] : memref<2x1x128xf32, #tpu.memory_space<vmem>>, vector<1x1x128xf32>
    %242 = vector.shape_cast %241 : vector<1x1x128xf32> to vector<1x128xf32>
    %c0_124 = arith.constant 0 : index
    %c0_125 = arith.constant 0 : index
    %c0_126 = arith.constant 0 : index
    %243 = vector.load %arg30[%c0_124, %c0_125, %c0_126] : memref<2x1x128xf32, #tpu.memory_space<vmem>>, vector<1x1x128xf32>
    %244 = vector.shape_cast %243 : vector<1x1x128xf32> to vector<1x128xf32>
    %cst_127 = arith.constant dense<0.000000e+00> : vector<32xf32>
    %245 = vector.multi_reduction <add>, %240, %cst_127 [1] : vector<32x128xf32> to vector<32xf32>
    %246 = vector.shape_cast %245 : vector<32xf32> to vector<32x1xf32>
    %cst_128 = arith.constant 1.280000e+02 : f32
    %247 = vector.broadcast %cst_128 : f32 to vector<32x1xf32>
    %248 = arith.divf %246, %247 : vector<32x1xf32>
    %249 = vector.broadcast %248 : vector<32x1xf32> to vector<32x128xf32>
    %250 = arith.subf %240, %249 : vector<32x128xf32>
    %251 = arith.mulf %250, %250 : vector<32x128xf32>
    %cst_129 = arith.constant dense<0.000000e+00> : vector<32xf32>
    %252 = vector.multi_reduction <add>, %251, %cst_129 [1] : vector<32x128xf32> to vector<32xf32>
    %253 = vector.shape_cast %252 : vector<32xf32> to vector<32x1xf32>
    %cst_130 = arith.constant 1.280000e+02 : f32
    %254 = vector.broadcast %cst_130 : f32 to vector<32x1xf32>
    %255 = arith.divf %253, %254 : vector<32x1xf32>
    %256 = vector.broadcast %248 : vector<32x1xf32> to vector<32x128xf32>
    %257 = arith.subf %240, %256 : vector<32x128xf32>
    %cst_131 = arith.constant 9.99999974E-6 : f32
    %258 = vector.broadcast %cst_131 : f32 to vector<32x1xf32>
    %259 = arith.addf %255, %258 : vector<32x1xf32>
    %260 = math.rsqrt %259 : vector<32x1xf32>
    %261 = vector.broadcast %260 : vector<32x1xf32> to vector<32x128xf32>
    %262 = arith.mulf %257, %261 : vector<32x128xf32>
    %263 = vector.broadcast %242 : vector<1x128xf32> to vector<32x128xf32>
    %264 = arith.mulf %262, %263 : vector<32x128xf32>
    %265 = vector.broadcast %244 : vector<1x128xf32> to vector<32x128xf32>
    %266 = arith.addf %264, %265 : vector<32x128xf32>
    %267 = arith.truncf %266 : vector<32x128xf32> to vector<32x128xbf16>
    %c0_132 = arith.constant 0 : index
    %c0_133 = arith.constant 0 : index
    %c0_134 = arith.constant 0 : index
    %268 = vector.load %arg31[%c0_132, %c0_133, %c0_134] : memref<2x128x256xbf16, #tpu.memory_space<vmem>>, vector<1x128x256xbf16>
    %269 = vector.shape_cast %268 : vector<1x128x256xbf16> to vector<128x256xbf16>
    %cst_135 = arith.constant dense<0.000000e+00> : vector<32x256xf32>
    %270 = tpu.matmul %267, %269, %cst_135 {dimension_numbers = #tpu.dot_dimension_numbers<[1], [0], [0], [1], [0, 0, 1, 1], [], []>} : vector<32x128xbf16>, vector<128x256xbf16>, vector<32x256xf32> -> vector<32x256xf32>
    %c0_136 = arith.constant 0 : index
    %c0_137 = arith.constant 0 : index
    %c0_138 = arith.constant 0 : index
    %271 = vector.load %arg32[%c0_136, %c0_137, %c0_138] : memref<2x1x256xf32, #tpu.memory_space<vmem>>, vector<1x1x256xf32>
    %272 = vector.shape_cast %271 : vector<1x1x256xf32> to vector<1x256xf32>
    %273 = vector.broadcast %272 : vector<1x256xf32> to vector<32x256xf32>
    %274 = arith.addf %270, %273 : vector<32x256xf32>
    %cst_139 = arith.constant 0.000000e+00 : f32
    %275 = vector.broadcast %cst_139 : f32 to vector<32x256xf32>
    %276 = arith.maximumf %274, %275 : vector<32x256xf32>
    %277 = arith.truncf %276 : vector<32x256xf32> to vector<32x256xbf16>
    %c0_140 = arith.constant 0 : index
    %c0_141 = arith.constant 0 : index
    %c0_142 = arith.constant 0 : index
    %278 = vector.load %arg33[%c0_140, %c0_141, %c0_142] : memref<2x256x128xbf16, #tpu.memory_space<vmem>>, vector<1x256x128xbf16>
    %279 = vector.shape_cast %278 : vector<1x256x128xbf16> to vector<256x128xbf16>
    %cst_143 = arith.constant dense<0.000000e+00> : vector<32x128xf32>
    %280 = tpu.matmul %277, %279, %cst_143 {dimension_numbers = #tpu.dot_dimension_numbers<[1], [0], [0], [1], [0, 0, 1, 1], [], []>} : vector<32x256xbf16>, vector<256x128xbf16>, vector<32x128xf32> -> vector<32x128xf32>
    %c0_144 = arith.constant 0 : index
    %c0_145 = arith.constant 0 : index
    %c0_146 = arith.constant 0 : index
    %281 = vector.load %arg34[%c0_144, %c0_145, %c0_146] : memref<2x1x128xf32, #tpu.memory_space<vmem>>, vector<1x1x128xf32>
    %282 = vector.shape_cast %281 : vector<1x1x128xf32> to vector<1x128xf32>
    %283 = vector.broadcast %282 : vector<1x128xf32> to vector<32x128xf32>
    %284 = arith.addf %280, %283 : vector<32x128xf32>
    %285 = arith.addf %266, %284 : vector<32x128xf32>
    %c0_147 = arith.constant 0 : index
    %c0_148 = arith.constant 0 : index
    %c0_149 = arith.constant 0 : index
    %286 = vector.load %arg35[%c0_147, %c0_148, %c0_149] : memref<2x1x128xf32, #tpu.memory_space<vmem>>, vector<1x1x128xf32>
    %287 = vector.shape_cast %286 : vector<1x1x128xf32> to vector<1x128xf32>
    %c0_150 = arith.constant 0 : index
    %c0_151 = arith.constant 0 : index
    %c0_152 = arith.constant 0 : index
    %288 = vector.load %arg36[%c0_150, %c0_151, %c0_152] : memref<2x1x128xf32, #tpu.memory_space<vmem>>, vector<1x1x128xf32>
    %289 = vector.shape_cast %288 : vector<1x1x128xf32> to vector<1x128xf32>
    %cst_153 = arith.constant dense<0.000000e+00> : vector<32xf32>
    %290 = vector.multi_reduction <add>, %285, %cst_153 [1] : vector<32x128xf32> to vector<32xf32>
    %291 = vector.shape_cast %290 : vector<32xf32> to vector<32x1xf32>
    %cst_154 = arith.constant 1.280000e+02 : f32
    %292 = vector.broadcast %cst_154 : f32 to vector<32x1xf32>
    %293 = arith.divf %291, %292 : vector<32x1xf32>
    %294 = vector.broadcast %293 : vector<32x1xf32> to vector<32x128xf32>
    %295 = arith.subf %285, %294 : vector<32x128xf32>
    %296 = arith.mulf %295, %295 : vector<32x128xf32>
    %cst_155 = arith.constant dense<0.000000e+00> : vector<32xf32>
    %297 = vector.multi_reduction <add>, %296, %cst_155 [1] : vector<32x128xf32> to vector<32xf32>
    %298 = vector.shape_cast %297 : vector<32xf32> to vector<32x1xf32>
    %cst_156 = arith.constant 1.280000e+02 : f32
    %299 = vector.broadcast %cst_156 : f32 to vector<32x1xf32>
    %300 = arith.divf %298, %299 : vector<32x1xf32>
    %301 = vector.broadcast %293 : vector<32x1xf32> to vector<32x128xf32>
    %302 = arith.subf %285, %301 : vector<32x128xf32>
    %cst_157 = arith.constant 9.99999974E-6 : f32
    %303 = vector.broadcast %cst_157 : f32 to vector<32x1xf32>
    %304 = arith.addf %300, %303 : vector<32x1xf32>
    %305 = math.rsqrt %304 : vector<32x1xf32>
    %306 = vector.broadcast %305 : vector<32x1xf32> to vector<32x128xf32>
    %307 = arith.mulf %302, %306 : vector<32x128xf32>
    %308 = vector.broadcast %287 : vector<1x128xf32> to vector<32x128xf32>
    %309 = arith.mulf %307, %308 : vector<32x128xf32>
    %310 = vector.broadcast %289 : vector<1x128xf32> to vector<32x128xf32>
    %311 = arith.addf %309, %310 : vector<32x128xf32>
    %312 = arith.truncf %311 : vector<32x128xf32> to vector<32x128xbf16>
    %313 = tpu.transpose %311, [1, 0] : vector<32x128xf32> -> vector<128x32xf32>
    %314 = arith.truncf %313 : vector<128x32xf32> to vector<128x32xbf16>
    %c1 = arith.constant 1 : index
    %c0_158 = arith.constant 0 : index
    %c0_159 = arith.constant 0 : index
    %315 = vector.load %arg25[%c1, %c0_158, %c0_159] : memref<2x128x512xbf16, #tpu.memory_space<vmem>>, vector<1x128x512xbf16>
    %316 = vector.shape_cast %315 : vector<1x128x512xbf16> to vector<128x512xbf16>
    %cst_160 = arith.constant dense<0.000000e+00> : vector<32x512xf32>
    %317 = tpu.matmul %312, %316, %cst_160 {dimension_numbers = #tpu.dot_dimension_numbers<[1], [0], [0], [1], [0, 0, 1, 1], [], []>} : vector<32x128xbf16>, vector<128x512xbf16>, vector<32x512xf32> -> vector<32x512xf32>
    %c1_161 = arith.constant 1 : index
    %c0_162 = arith.constant 0 : index
    %c0_163 = arith.constant 0 : index
    %318 = vector.load %arg26[%c1_161, %c0_162, %c0_163] : memref<2x1x512xf32, #tpu.memory_space<vmem>>, vector<1x1x512xf32>
    %319 = vector.shape_cast %318 : vector<1x1x512xf32> to vector<1x512xf32>
    %320 = vector.broadcast %319 : vector<1x512xf32> to vector<32x512xf32>
    %321 = arith.addf %317, %320 : vector<32x512xf32>
    %322 = vector.extract_strided_slice %321 {offsets = [0, 0], sizes = [32, 128], strides = [1, 1]} : vector<32x512xf32> to vector<32x128xf32>
    %323 = arith.truncf %322 : vector<32x128xf32> to vector<32x128xbf16>
    %cst_164 = arith.constant dense<0.000000e+00> : vector<32x32xf32>
    %324 = tpu.matmul %323, %314, %cst_164 {dimension_numbers = #tpu.dot_dimension_numbers<[1], [0], [0], [1], [0, 0, 1, 1], [], []>} : vector<32x128xbf16>, vector<128x32xbf16>, vector<32x32xf32> -> vector<32x32xf32>
    %325 = arith.addf %324, %160 : vector<32x32xf32>
    %cst_165 = arith.constant dense<0xFF800000> : vector<32xf32>
    %326 = vector.multi_reduction <maximumf>, %325, %cst_165 [1] : vector<32x32xf32> to vector<32xf32>
    %327 = vector.shape_cast %326 : vector<32xf32> to vector<32x1xf32>
    %328 = vector.broadcast %327 : vector<32x1xf32> to vector<32x32xf32>
    %329 = arith.subf %325, %328 : vector<32x32xf32>
    %330 = math.exp %329 : vector<32x32xf32>
    %cst_166 = arith.constant dense<0.000000e+00> : vector<32xf32>
    %331 = vector.multi_reduction <add>, %330, %cst_166 [1] : vector<32x32xf32> to vector<32xf32>
    %332 = vector.shape_cast %331 : vector<32xf32> to vector<32x1xf32>
    %333 = vector.broadcast %332 : vector<32x1xf32> to vector<32x32xf32>
    %334 = arith.divf %330, %333 : vector<32x32xf32>
    %335 = arith.truncf %334 : vector<32x32xf32> to vector<32x32xbf16>
    %cst_167 = arith.constant dense<0.000000e+00> : vector<32x128xf32>
    %336 = tpu.matmul %335, %312, %cst_167 {dimension_numbers = #tpu.dot_dimension_numbers<[1], [0], [0], [1], [0, 0, 1, 1], [], []>} : vector<32x32xbf16>, vector<32x128xbf16>, vector<32x128xf32> -> vector<32x128xf32>
    %337 = vector.extract_strided_slice %321 {offsets = [0, 128], sizes = [32, 128], strides = [1, 1]} : vector<32x512xf32> to vector<32x128xf32>
    %338 = arith.truncf %337 : vector<32x128xf32> to vector<32x128xbf16>
    %cst_168 = arith.constant dense<0.000000e+00> : vector<32x32xf32>
    %339 = tpu.matmul %338, %314, %cst_168 {dimension_numbers = #tpu.dot_dimension_numbers<[1], [0], [0], [1], [0, 0, 1, 1], [], []>} : vector<32x128xbf16>, vector<128x32xbf16>, vector<32x32xf32> -> vector<32x32xf32>
    %340 = arith.addf %339, %160 : vector<32x32xf32>
    %cst_169 = arith.constant dense<0xFF800000> : vector<32xf32>
    %341 = vector.multi_reduction <maximumf>, %340, %cst_169 [1] : vector<32x32xf32> to vector<32xf32>
    %342 = vector.shape_cast %341 : vector<32xf32> to vector<32x1xf32>
    %343 = vector.broadcast %342 : vector<32x1xf32> to vector<32x32xf32>
    %344 = arith.subf %340, %343 : vector<32x32xf32>
    %345 = math.exp %344 : vector<32x32xf32>
    %cst_170 = arith.constant dense<0.000000e+00> : vector<32xf32>
    %346 = vector.multi_reduction <add>, %345, %cst_170 [1] : vector<32x32xf32> to vector<32xf32>
    %347 = vector.shape_cast %346 : vector<32xf32> to vector<32x1xf32>
    %348 = vector.broadcast %347 : vector<32x1xf32> to vector<32x32xf32>
    %349 = arith.divf %345, %348 : vector<32x32xf32>
    %350 = arith.truncf %349 : vector<32x32xf32> to vector<32x32xbf16>
    %cst_171 = arith.constant dense<0.000000e+00> : vector<32x128xf32>
    %351 = tpu.matmul %350, %312, %cst_171 {dimension_numbers = #tpu.dot_dimension_numbers<[1], [0], [0], [1], [0, 0, 1, 1], [], []>} : vector<32x32xbf16>, vector<32x128xbf16>, vector<32x128xf32> -> vector<32x128xf32>
    %352 = vector.extract_strided_slice %321 {offsets = [0, 256], sizes = [32, 128], strides = [1, 1]} : vector<32x512xf32> to vector<32x128xf32>
    %353 = arith.truncf %352 : vector<32x128xf32> to vector<32x128xbf16>
    %cst_172 = arith.constant dense<0.000000e+00> : vector<32x32xf32>
    %354 = tpu.matmul %353, %314, %cst_172 {dimension_numbers = #tpu.dot_dimension_numbers<[1], [0], [0], [1], [0, 0, 1, 1], [], []>} : vector<32x128xbf16>, vector<128x32xbf16>, vector<32x32xf32> -> vector<32x32xf32>
    %355 = arith.addf %354, %160 : vector<32x32xf32>
    %cst_173 = arith.constant dense<0xFF800000> : vector<32xf32>
    %356 = vector.multi_reduction <maximumf>, %355, %cst_173 [1] : vector<32x32xf32> to vector<32xf32>
    %357 = vector.shape_cast %356 : vector<32xf32> to vector<32x1xf32>
    %358 = vector.broadcast %357 : vector<32x1xf32> to vector<32x32xf32>
    %359 = arith.subf %355, %358 : vector<32x32xf32>
    %360 = math.exp %359 : vector<32x32xf32>
    %cst_174 = arith.constant dense<0.000000e+00> : vector<32xf32>
    %361 = vector.multi_reduction <add>, %360, %cst_174 [1] : vector<32x32xf32> to vector<32xf32>
    %362 = vector.shape_cast %361 : vector<32xf32> to vector<32x1xf32>
    %363 = vector.broadcast %362 : vector<32x1xf32> to vector<32x32xf32>
    %364 = arith.divf %360, %363 : vector<32x32xf32>
    %365 = arith.truncf %364 : vector<32x32xf32> to vector<32x32xbf16>
    %cst_175 = arith.constant dense<0.000000e+00> : vector<32x128xf32>
    %366 = tpu.matmul %365, %312, %cst_175 {dimension_numbers = #tpu.dot_dimension_numbers<[1], [0], [0], [1], [0, 0, 1, 1], [], []>} : vector<32x32xbf16>, vector<32x128xbf16>, vector<32x128xf32> -> vector<32x128xf32>
    %367 = vector.extract_strided_slice %321 {offsets = [0, 384], sizes = [32, 128], strides = [1, 1]} : vector<32x512xf32> to vector<32x128xf32>
    %368 = arith.truncf %367 : vector<32x128xf32> to vector<32x128xbf16>
    %cst_176 = arith.constant dense<0.000000e+00> : vector<32x32xf32>
    %369 = tpu.matmul %368, %314, %cst_176 {dimension_numbers = #tpu.dot_dimension_numbers<[1], [0], [0], [1], [0, 0, 1, 1], [], []>} : vector<32x128xbf16>, vector<128x32xbf16>, vector<32x32xf32> -> vector<32x32xf32>
    %370 = arith.addf %369, %160 : vector<32x32xf32>
    %cst_177 = arith.constant dense<0xFF800000> : vector<32xf32>
    %371 = vector.multi_reduction <maximumf>, %370, %cst_177 [1] : vector<32x32xf32> to vector<32xf32>
    %372 = vector.shape_cast %371 : vector<32xf32> to vector<32x1xf32>
    %373 = vector.broadcast %372 : vector<32x1xf32> to vector<32x32xf32>
    %374 = arith.subf %370, %373 : vector<32x32xf32>
    %375 = math.exp %374 : vector<32x32xf32>
    %cst_178 = arith.constant dense<0.000000e+00> : vector<32xf32>
    %376 = vector.multi_reduction <add>, %375, %cst_178 [1] : vector<32x32xf32> to vector<32xf32>
    %377 = vector.shape_cast %376 : vector<32xf32> to vector<32x1xf32>
    %378 = vector.broadcast %377 : vector<32x1xf32> to vector<32x32xf32>
    %379 = arith.divf %375, %378 : vector<32x32xf32>
    %380 = arith.truncf %379 : vector<32x32xf32> to vector<32x32xbf16>
    %cst_179 = arith.constant dense<0.000000e+00> : vector<32x128xf32>
    %381 = tpu.matmul %380, %312, %cst_179 {dimension_numbers = #tpu.dot_dimension_numbers<[1], [0], [0], [1], [0, 0, 1, 1], [], []>} : vector<32x32xbf16>, vector<32x128xbf16>, vector<32x128xf32> -> vector<32x128xf32>
    %382 = tpu.concatenate %336, %351, %366, %381 in 1 : vector<32x128xf32>, vector<32x128xf32>, vector<32x128xf32>, vector<32x128xf32> -> vector<32x512xf32>
    %383 = arith.truncf %382 : vector<32x512xf32> to vector<32x512xbf16>
    %c1_180 = arith.constant 1 : index
    %c0_181 = arith.constant 0 : index
    %c0_182 = arith.constant 0 : index
    %384 = vector.load %arg27[%c1_180, %c0_181, %c0_182] : memref<2x512x128xbf16, #tpu.memory_space<vmem>>, vector<1x512x128xbf16>
    %385 = vector.shape_cast %384 : vector<1x512x128xbf16> to vector<512x128xbf16>
    %cst_183 = arith.constant dense<0.000000e+00> : vector<32x128xf32>
    %386 = tpu.matmul %383, %385, %cst_183 {dimension_numbers = #tpu.dot_dimension_numbers<[1], [0], [0], [1], [0, 0, 1, 1], [], []>} : vector<32x512xbf16>, vector<512x128xbf16>, vector<32x128xf32> -> vector<32x128xf32>
    %c1_184 = arith.constant 1 : index
    %c0_185 = arith.constant 0 : index
    %c0_186 = arith.constant 0 : index
    %387 = vector.load %arg28[%c1_184, %c0_185, %c0_186] : memref<2x1x128xf32, #tpu.memory_space<vmem>>, vector<1x1x128xf32>
    %388 = vector.shape_cast %387 : vector<1x1x128xf32> to vector<1x128xf32>
    %389 = vector.broadcast %388 : vector<1x128xf32> to vector<32x128xf32>
    %390 = arith.addf %386, %389 : vector<32x128xf32>
    %391 = arith.addf %311, %390 : vector<32x128xf32>
    %c1_187 = arith.constant 1 : index
    %c0_188 = arith.constant 0 : index
    %c0_189 = arith.constant 0 : index
    %392 = vector.load %arg29[%c1_187, %c0_188, %c0_189] : memref<2x1x128xf32, #tpu.memory_space<vmem>>, vector<1x1x128xf32>
    %393 = vector.shape_cast %392 : vector<1x1x128xf32> to vector<1x128xf32>
    %c1_190 = arith.constant 1 : index
    %c0_191 = arith.constant 0 : index
    %c0_192 = arith.constant 0 : index
    %394 = vector.load %arg30[%c1_190, %c0_191, %c0_192] : memref<2x1x128xf32, #tpu.memory_space<vmem>>, vector<1x1x128xf32>
    %395 = vector.shape_cast %394 : vector<1x1x128xf32> to vector<1x128xf32>
    %cst_193 = arith.constant dense<0.000000e+00> : vector<32xf32>
    %396 = vector.multi_reduction <add>, %391, %cst_193 [1] : vector<32x128xf32> to vector<32xf32>
    %397 = vector.shape_cast %396 : vector<32xf32> to vector<32x1xf32>
    %cst_194 = arith.constant 1.280000e+02 : f32
    %398 = vector.broadcast %cst_194 : f32 to vector<32x1xf32>
    %399 = arith.divf %397, %398 : vector<32x1xf32>
    %400 = vector.broadcast %399 : vector<32x1xf32> to vector<32x128xf32>
    %401 = arith.subf %391, %400 : vector<32x128xf32>
    %402 = arith.mulf %401, %401 : vector<32x128xf32>
    %cst_195 = arith.constant dense<0.000000e+00> : vector<32xf32>
    %403 = vector.multi_reduction <add>, %402, %cst_195 [1] : vector<32x128xf32> to vector<32xf32>
    %404 = vector.shape_cast %403 : vector<32xf32> to vector<32x1xf32>
    %cst_196 = arith.constant 1.280000e+02 : f32
    %405 = vector.broadcast %cst_196 : f32 to vector<32x1xf32>
    %406 = arith.divf %404, %405 : vector<32x1xf32>
    %407 = vector.broadcast %399 : vector<32x1xf32> to vector<32x128xf32>
    %408 = arith.subf %391, %407 : vector<32x128xf32>
    %cst_197 = arith.constant 9.99999974E-6 : f32
    %409 = vector.broadcast %cst_197 : f32 to vector<32x1xf32>
    %410 = arith.addf %406, %409 : vector<32x1xf32>
    %411 = math.rsqrt %410 : vector<32x1xf32>
    %412 = vector.broadcast %411 : vector<32x1xf32> to vector<32x128xf32>
    %413 = arith.mulf %408, %412 : vector<32x128xf32>
    %414 = vector.broadcast %393 : vector<1x128xf32> to vector<32x128xf32>
    %415 = arith.mulf %413, %414 : vector<32x128xf32>
    %416 = vector.broadcast %395 : vector<1x128xf32> to vector<32x128xf32>
    %417 = arith.addf %415, %416 : vector<32x128xf32>
    %418 = arith.truncf %417 : vector<32x128xf32> to vector<32x128xbf16>
    %c1_198 = arith.constant 1 : index
    %c0_199 = arith.constant 0 : index
    %c0_200 = arith.constant 0 : index
    %419 = vector.load %arg31[%c1_198, %c0_199, %c0_200] : memref<2x128x256xbf16, #tpu.memory_space<vmem>>, vector<1x128x256xbf16>
    %420 = vector.shape_cast %419 : vector<1x128x256xbf16> to vector<128x256xbf16>
    %cst_201 = arith.constant dense<0.000000e+00> : vector<32x256xf32>
    %421 = tpu.matmul %418, %420, %cst_201 {dimension_numbers = #tpu.dot_dimension_numbers<[1], [0], [0], [1], [0, 0, 1, 1], [], []>} : vector<32x128xbf16>, vector<128x256xbf16>, vector<32x256xf32> -> vector<32x256xf32>
    %c1_202 = arith.constant 1 : index
    %c0_203 = arith.constant 0 : index
    %c0_204 = arith.constant 0 : index
    %422 = vector.load %arg32[%c1_202, %c0_203, %c0_204] : memref<2x1x256xf32, #tpu.memory_space<vmem>>, vector<1x1x256xf32>
    %423 = vector.shape_cast %422 : vector<1x1x256xf32> to vector<1x256xf32>
    %424 = vector.broadcast %423 : vector<1x256xf32> to vector<32x256xf32>
    %425 = arith.addf %421, %424 : vector<32x256xf32>
    %cst_205 = arith.constant 0.000000e+00 : f32
    %426 = vector.broadcast %cst_205 : f32 to vector<32x256xf32>
    %427 = arith.maximumf %425, %426 : vector<32x256xf32>
    %428 = arith.truncf %427 : vector<32x256xf32> to vector<32x256xbf16>
    %c1_206 = arith.constant 1 : index
    %c0_207 = arith.constant 0 : index
    %c0_208 = arith.constant 0 : index
    %429 = vector.load %arg33[%c1_206, %c0_207, %c0_208] : memref<2x256x128xbf16, #tpu.memory_space<vmem>>, vector<1x256x128xbf16>
    %430 = vector.shape_cast %429 : vector<1x256x128xbf16> to vector<256x128xbf16>
    %cst_209 = arith.constant dense<0.000000e+00> : vector<32x128xf32>
    %431 = tpu.matmul %428, %430, %cst_209 {dimension_numbers = #tpu.dot_dimension_numbers<[1], [0], [0], [1], [0, 0, 1, 1], [], []>} : vector<32x256xbf16>, vector<256x128xbf16>, vector<32x128xf32> -> vector<32x128xf32>
    %c1_210 = arith.constant 1 : index
    %c0_211 = arith.constant 0 : index
    %c0_212 = arith.constant 0 : index
    %432 = vector.load %arg34[%c1_210, %c0_211, %c0_212] : memref<2x1x128xf32, #tpu.memory_space<vmem>>, vector<1x1x128xf32>
    %433 = vector.shape_cast %432 : vector<1x1x128xf32> to vector<1x128xf32>
    %434 = vector.broadcast %433 : vector<1x128xf32> to vector<32x128xf32>
    %435 = arith.addf %431, %434 : vector<32x128xf32>
    %436 = arith.addf %417, %435 : vector<32x128xf32>
    %c1_213 = arith.constant 1 : index
    %c0_214 = arith.constant 0 : index
    %c0_215 = arith.constant 0 : index
    %437 = vector.load %arg35[%c1_213, %c0_214, %c0_215] : memref<2x1x128xf32, #tpu.memory_space<vmem>>, vector<1x1x128xf32>
    %438 = vector.shape_cast %437 : vector<1x1x128xf32> to vector<1x128xf32>
    %c1_216 = arith.constant 1 : index
    %c0_217 = arith.constant 0 : index
    %c0_218 = arith.constant 0 : index
    %439 = vector.load %arg36[%c1_216, %c0_217, %c0_218] : memref<2x1x128xf32, #tpu.memory_space<vmem>>, vector<1x1x128xf32>
    %440 = vector.shape_cast %439 : vector<1x1x128xf32> to vector<1x128xf32>
    %cst_219 = arith.constant dense<0.000000e+00> : vector<32xf32>
    %441 = vector.multi_reduction <add>, %436, %cst_219 [1] : vector<32x128xf32> to vector<32xf32>
    %442 = vector.shape_cast %441 : vector<32xf32> to vector<32x1xf32>
    %cst_220 = arith.constant 1.280000e+02 : f32
    %443 = vector.broadcast %cst_220 : f32 to vector<32x1xf32>
    %444 = arith.divf %442, %443 : vector<32x1xf32>
    %445 = vector.broadcast %444 : vector<32x1xf32> to vector<32x128xf32>
    %446 = arith.subf %436, %445 : vector<32x128xf32>
    %447 = arith.mulf %446, %446 : vector<32x128xf32>
    %cst_221 = arith.constant dense<0.000000e+00> : vector<32xf32>
    %448 = vector.multi_reduction <add>, %447, %cst_221 [1] : vector<32x128xf32> to vector<32xf32>
    %449 = vector.shape_cast %448 : vector<32xf32> to vector<32x1xf32>
    %cst_222 = arith.constant 1.280000e+02 : f32
    %450 = vector.broadcast %cst_222 : f32 to vector<32x1xf32>
    %451 = arith.divf %449, %450 : vector<32x1xf32>
    %452 = vector.broadcast %444 : vector<32x1xf32> to vector<32x128xf32>
    %453 = arith.subf %436, %452 : vector<32x128xf32>
    %cst_223 = arith.constant 9.99999974E-6 : f32
    %454 = vector.broadcast %cst_223 : f32 to vector<32x1xf32>
    %455 = arith.addf %451, %454 : vector<32x1xf32>
    %456 = math.rsqrt %455 : vector<32x1xf32>
    %457 = vector.broadcast %456 : vector<32x1xf32> to vector<32x128xf32>
    %458 = arith.mulf %453, %457 : vector<32x128xf32>
    %459 = vector.broadcast %438 : vector<1x128xf32> to vector<32x128xf32>
    %460 = arith.mulf %458, %459 : vector<32x128xf32>
    %461 = vector.broadcast %440 : vector<1x128xf32> to vector<32x128xf32>
    %462 = arith.addf %460, %461 : vector<32x128xf32>
    %463 = vector.shape_cast %462 : vector<32x128xf32> to vector<2x16x128xf32>
    %cst_224 = arith.constant dense<0.000000e+00> : vector<2x128xf32>
    %464 = vector.multi_reduction <add>, %463, %cst_224 [1] : vector<2x16x128xf32> to vector<2x128xf32>
    %cst_225 = arith.constant 1.600000e+01 : f32
    %465 = vector.broadcast %cst_225 : f32 to vector<2x128xf32>
    %466 = arith.divf %464, %465 : vector<2x128xf32>
    %467 = arith.truncf %466 : vector<2x128xf32> to vector<2x128xbf16>
    %c0_226 = arith.constant 0 : index
    %c0_227 = arith.constant 0 : index
    %468 = vector.load %arg37[%c0_226, %c0_227] : memref<128x128xbf16, #tpu.memory_space<vmem>>, vector<128x128xbf16>
    %cst_228 = arith.constant dense<0.000000e+00> : vector<2x128xf32>
    %469 = tpu.matmul %467, %468, %cst_228 {dimension_numbers = #tpu.dot_dimension_numbers<[1], [0], [0], [1], [0, 0, 1, 1], [], []>} : vector<2x128xbf16>, vector<128x128xbf16>, vector<2x128xf32> -> vector<2x128xf32>
    %c0_229 = arith.constant 0 : index
    %c0_230 = arith.constant 0 : index
    %470 = vector.load %arg38[%c0_229, %c0_230] : memref<1x128xf32, #tpu.memory_space<vmem>>, vector<1x128xf32>
    %471 = vector.broadcast %470 : vector<1x128xf32> to vector<2x128xf32>
    %472 = arith.addf %469, %471 : vector<2x128xf32>
    %473 = arith.negf %472 : vector<2x128xf32>
    %474 = math.exp %473 : vector<2x128xf32>
    %cst_231 = arith.constant 1.000000e+00 : f32
    %475 = vector.broadcast %cst_231 : f32 to vector<2x128xf32>
    %476 = arith.addf %475, %474 : vector<2x128xf32>
    %477 = arith.divf %475, %476 : vector<2x128xf32>
    %478 = arith.mulf %472, %477 : vector<2x128xf32>
    %479 = arith.truncf %478 : vector<2x128xf32> to vector<2x128xbf16>
    %c0_232 = arith.constant 0 : index
    %c0_233 = arith.constant 0 : index
    %480 = vector.load %arg39[%c0_232, %c0_233] : memref<128x128xbf16, #tpu.memory_space<vmem>>, vector<128x128xbf16>
    %cst_234 = arith.constant dense<0.000000e+00> : vector<2x128xf32>
    %481 = tpu.matmul %479, %480, %cst_234 {dimension_numbers = #tpu.dot_dimension_numbers<[1], [0], [0], [1], [0, 0, 1, 1], [], []>} : vector<2x128xbf16>, vector<128x128xbf16>, vector<2x128xf32> -> vector<2x128xf32>
    %c0_235 = arith.constant 0 : index
    %c0_236 = arith.constant 0 : index
    %482 = vector.load %arg40[%c0_235, %c0_236] : memref<1x128xf32, #tpu.memory_space<vmem>>, vector<1x128xf32>
    %483 = vector.broadcast %482 : vector<1x128xf32> to vector<2x128xf32>
    %484 = arith.addf %481, %483 : vector<2x128xf32>
    %c0_237 = arith.constant 0 : index
    %c0_238 = arith.constant 0 : index
    %485 = vector.load %arg41[%c0_237, %c0_238] : memref<2x128xf32, #tpu.memory_space<vmem>>, vector<2x128xf32>
    tpu.vector_store %arg41[%c0_237, %c0_238], %484 {strides = array<i32>} : memref<2x128xf32, #tpu.memory_space<vmem>>, vector<2x128xf32>,
    return
  }
}

</mosaic_0001>

<bundles_post_ra>
// kernel: _lambda_.1
= control target key start
LH: loop header
LB: loop body
LE: loop exit
PB: predicated region body
PF: predicated region fallthrough
CT: control target
= control target key end

     0   :  { %s10515_s6 = smov 1   ;;  %s10516_s10 = smov 2   ;;  %s12620_s0 = inlined_call_operand.smem [shape: u32[42], index: -1, kind: input, shape index: {}] }
   0x1   :  { %s10600_s5 = sld [smem:[%s12620_s0]]   ;;  %s10517_s14 = smov 3  }
   0x2   :  { %s10605_s9 = sld [smem:[%s12620_s0 + %s10515_s6]]   ;;  %s10518_s18 = smov 4  }
   0x3   :  { %s10610_s13 = sld [smem:[%s12620_s0 + %s10516_s10]]   ;;  %s10519_s22 = smov 5  }
   0x4   :  { %s10615_s17 = sld [smem:[%s12620_s0 + %s10517_s14]]   ;;  %s10520_s26 = smov 6  }
   0x5   :  { %s10620_s21 = sld [smem:[%s12620_s0 + %s10518_s18]]   ;;  %s10521_s30 = smov 7  }
   0x6   :  { %s10625_s25 = sld [smem:[%s12620_s0 + %s10519_s22]]   ;;  %s10522_s4 = smov 8  }
   0x7   :  { %12645 = sst [smem:[#allocation56_spill]] %s10600_s5  ;;  %s10523_s10 = smov 9  }
   0x8   :  { %12646 = sst [smem:[#allocation57_spill]] %s10605_s9  ;;  %s10524_s15 = smov 10  }
   0x9   :  { %12647 = sst [smem:[#allocation58_spill]] %s10610_s13  ;;  %s10525_s20 = smov 11  }
   0xa   :  { %s10630_s29 = sld [smem:[%s12620_s0 + %s10520_s26]]   ;;  %s10526_s26 = smov 12  }
   0xb   :  { %s10635_s3 = sld [smem:[%s12620_s0 + %s10521_s30]]   ;;  %s10527_s1 = smov 13  }
   0xc   :  { %12648 = sst [smem:[#allocation59_spill]] %s10625_s25  ;;  %s10528_s7 = smov 14  }
   0xd   :  { %s10640_s8 = sld [smem:[%s12620_s0 + %s10522_s4]]   ;;  %s10530_s22 = smov 16  }
   0xe   :  { %s10645_s14 = sld [smem:[%s12620_s0 + %s10523_s10]]   ;;  %s10531_s28 = smov 17  }
   0xf   :  { %s10650_s19 = sld [smem:[%s12620_s0 + %s10524_s15]]   ;;  %s10529_s15 = smov 15  }
  0x10   :  { %s10655_s24 = sld [smem:[%s12620_s0 + %s10525_s20]]  }
  0x11   :  { %s10660_s30 = sld [smem:[%s12620_s0 + %s10526_s26]]  }
  0x12   :  { %s10665_s6 = sld [smem:[%s12620_s0 + %s10527_s1]]  }
  0x13   :  { %12649 = sst [smem:[#allocation60_spill]] %s10640_s8 }
  0x14   :  { %s10670_s12 = sld [smem:[%s12620_s0 + %s10528_s7]]   ;;  %s10532_s7 = smov 18  }
  0x15   :  { %12650 = sst [smem:[#allocation61_spill]] %s10650_s19 }
  0x16   :  { %s10675_s20 = sld [smem:[%s12620_s0 + %s10529_s15]]   ;;  %s10533_s15 = smov 19  }
  0x17   :  { %12651 = sst [smem:[#allocation62_spill]] %s10660_s30 }
  0x18   :  { %12652 = sst [smem:[#allocation63_spill]] %s10665_s6 }
  0x19   :  { %s10680_s27 = sld [smem:[%s12620_s0 + %s10530_s22]]   ;;  %s10534_s22 = smov 20  }
  0x1a   :  { %s10685_s4 = sld [smem:[%s12620_s0 + %s10531_s28]]   ;;  %s10535_s28 = smov 21  }
  0x1b   :  { %s10690_s6 = sld [smem:[%s12620_s0 + %s10532_s7]]   ;;  %s10536_s7 = smov 22  }
  0x1c   :  { %12653 = sst [smem:[#allocation64_spill]] %s10675_s20 }
  0x1d   :  { %s10695_s20 = sld [smem:[%s12620_s0 + %s10533_s15]]   ;;  %s10537_s15 = smov 23  }
  0x1e   :  { %s10700_s25 = sld [smem:[%s12620_s0 + %s10534_s22]]   ;;  %s10538_s22 = smov 24  }
  0x1f   :  { %12654 = sst [smem:[#allocation65_spill]] %s10680_s27 }
  0x20   :  { %s10705_s5 = sld [smem:[%s12620_s0 + %s10535_s28]]   ;;  %s10539_s28 = smov 25  }
  0x21   :  { %12655 = sst [smem:[#allocation66_spill]] %s10690_s6 }
  0x22   :  { %s10710_s13 = sld [smem:[%s12620_s0 + %s10536_s7]]   ;;  %s10540_s7 = smov 26  }
  0x23   :  { %s10715_s9 = sld [smem:[%s12620_s0 + %s10537_s15]]   ;;  %s10541_s15 = smov 27  }
  0x24   :  { %12656 = sst [smem:[#allocation67_spill]] %s10700_s25 }
  0x25   :  { %s10720_s25 = sld [smem:[%s12620_s0 + %s10538_s22]]   ;;  %s10542_s22 = smov 28  }
  0x26   :  { %s10725_s6 = sld [smem:[%s12620_s0 + %s10539_s28]]   ;;  %s10543_s28 = smov 29  }
  0x28   :  { %12657 = sst [smem:[#allocation68_spill]] %s10710_s13 }
  0x29   :  { %12658 = sst [smem:[#allocation69_spill]] %s10715_s9 }
  0x2a   :  { %s10730_s13 = sld [smem:[%s12620_s0 + %s10540_s7]]   ;;  %s10544_s7 = smov 30  }
  0x2b   :  { %12659 = sst [smem:[#allocation70_spill]] %s10720_s25 }
  0x2c   :  { %12660 = sst [smem:[#allocation71_spill]] %s10725_s6 }
  0x2d   :  { %s10735_s9 = sld [smem:[%s12620_s0 + %s10541_s15]]   ;;  %s10545_s15 = smov 31  }
  0x2e   :  { %s10740_s25 = sld [smem:[%s12620_s0 + %s10542_s22]]   ;;  %s10546_s22 = smov 32  }
  0x2f   :  { %s10745_s6 = sld [smem:[%s12620_s0 + %s10543_s28]]   ;;  %s10547_s28 = smov 33  }
  0x30   :  { %12661 = sst [smem:[#allocation72_spill]] %s10730_s13 }
  0x31   :  { %s10750_s13 = sld [smem:[%s12620_s0 + %s10544_s7]]   ;;  %s10548_s7 = smov 34  }
  0x32   :  { %s10765_s27 = sld [smem:[%s12620_s0 + %s10547_s28]]   ;;  %s10551_s28 = smov 37  }
  0x33   :  { %12662 = sst [smem:[#allocation73_spill]] %s10735_s9 }
  0x34   :  { %12663 = sst [smem:[#allocation74_spill]] %s10740_s25 }
  0x35   :  { %s10755_s9 = sld [smem:[%s12620_s0 + %s10545_s15]]   ;;  %s10549_s15 = smov 35  }
  0x36   :  { %s10760_s25 = sld [smem:[%s12620_s0 + %s10546_s22]]   ;;  %s10550_s22 = smov 36  }
  0x37   :  { %12664 = sst [smem:[#allocation75_spill]] %s10750_s13 }
  0x38   :  { %12666 = sst [smem:[#allocation77_spill]] %s10765_s27 }
  0x39   :  { %s10770_s13 = sld [smem:[%s12620_s0 + %s10548_s7]]   ;;  %s10552_s7 = smov 38  }
  0x3a   :  { %s10780_s30 = sld [smem:[%s12620_s0 + %s10550_s22]]   ;;  %s10554_s22 = smov 40  }
  0x3b   :  { %12665 = sst [smem:[#allocation76_spill]] %s10755_s9 }
  0x3c   :  { %s10775_s9 = sld [smem:[%s12620_s0 + %s10549_s15]]   ;;  %s10553_s15 = smov 39  }
  0x3d   :  { %s10785_s27 = sld [smem:[%s12620_s0 + %s10551_s28]]   ;;  %s10555_s28 = smov 41  }
  0x3e   :  { %s10795_s19 = sld [smem:[%s12620_s0 + %s10553_s15]]  }
  0x3f   :  { %12667 = sst [smem:[#allocation78_spill]] %s10770_s13 }
  0x40   :  { %12668 = sst [smem:[#allocation79_spill]] %s10780_s30 }
  0x41   :  { %s10790_s13 = sld [smem:[%s12620_s0 + %s10552_s7]]  }
  0x42   :  { %s10800_s30 = sld [smem:[%s12620_s0 + %s10554_s22]]  }
  0x43   :  { %s10805_s8 = sld [smem:[%s12620_s0 + %s10555_s28]]  }
  0x44   :  { %88 = vsyncpa [#allocation3], 0 }
  0x45   :  { %89 = vsyncpa [#allocation6], 0 }
  0x46   :  { %90 = vsyncpa [#allocation9], 0 }
  0x47   :  { %91 = vsyncpa [#allocation12], 0 }
  0x48   :  { %92 = vsyncpa [#allocation15], 0 }
  0x49   :  { %93 = vsyncpa [#allocation18], 0 }
  0x4a   :  { %94 = vsyncpa [#allocation21], 0 }
  0x4b   :  { %95 = vsyncpa [#allocation24], 0 }
  0x4c   :  { %96 = vsyncpa [#allocation27], 0 }
  0x4d   :  { %97 = vsyncpa [#allocation30], 0 }
  0x4e   :  { %98 = vsyncpa [#allocation33], 0 }
  0x4f   :  { %99 = vsyncpa [#allocation36], 0 }
  0x50   :  { %100 = vsyncpa [#allocation39], 0 }
  0x51   :  { %101 = vsyncpa [#allocation4], 0  ;;  %s10556_s7 = smov [#allocation5]   ;;  %s9915_s10 = scalar_lea.hbm %s10620_s21, 16 }
  0x52   :  { %s126_s0 = sshll.u32 %s10556_s7, 4  ;;  %p9916_p0 = scmp.ne.s32.totalorder %s10620_s21, %s9915_s10  ;;  %s127_s0 = int_to_ptr.vmem [resolvable:$true] %s126_s0 }
  0x53   :  { %p9919_p1 = scmp.lt.u32.totalorder %s9915_s10, %s10620_s21 }
  0x55   :  { %p9921_p2 = pnand %p9919_p1, %p9916_p0 }
  0x57   :  { %9924 = shalt.err (!%p9921_p2)
}
  0x58   :  { %s9925_s11 = scalar_lea.vmem %s127_s0, 16  ;;  %s9929_s15 = scalar_lea.vmem %s127_s0, 32 }
  0x59   :  { %p9926_p3 = scmp.ne.s32.totalorder %s127_s0, %s9925_s11  ;;  %p9930_p4 = scmp.lt.s32.totalorder %s127_s0, %s127_s0 }
  0x5a   :  { %p9931_p5 = scmp.lt.s32.totalorder %s9929_s15, %s9925_s11 }
  0x5c   :  { %p9932_p6 = por %p9931_p5, %p9930_p4 }
  0x5e   :  { %p9933_p7 = pnand %p9932_p6, %p9926_p3 }
  0x60   :  { %9936 = shalt.err (!%p9933_p7)
}
  0x61   :  { %129 = dma.hbm_to_vmem [thread:$0]  %s10620_s21, 16, %s127_s0, [#allocation6]  }
  0x62   :  { %s10557_s16 = smov [#allocation8]   ;;  %s10558_s22 = smov [#allocation11]  }
  0x63   :  { %s147_s18 = sshll.u32 %s10557_s16, 4  ;;  %s169_s23 = sshll.u32 %s10558_s22, 4  ;;  %s148_s18 = int_to_ptr.vmem [resolvable:$true] %s147_s18  ;;  %s170_s23 = int_to_ptr.vmem [resolvable:$true] %s169_s23 }
  0x64   :  { %s9937_s26 = scalar_lea.hbm %s10635_s3, 1024 }
  0x65   :  { %p9938_p8 = scmp.ne.s32.totalorder %s10635_s3, %s9937_s26  ;;  %p9941_p9 = scmp.lt.u32.totalorder %s9937_s26, %s10635_s3 }
  0x67   :  { %p9943_p10 = pnand %p9941_p9, %p9938_p8 }
  0x69   :  { %9946 = shalt.err (!%p9943_p10)
}
  0x6a   :  { %s9947_s28 = scalar_lea.vmem %s148_s18, 1024  ;;  %p9952_p12 = scmp.lt.s32.totalorder %s148_s18, %s148_s18 }
  0x6b   :  { %p9948_p11 = scmp.ne.s32.totalorder %s148_s18, %s9947_s28  ;;  %p9953_p13 = scmp.lt.s32.totalorder %s9947_s28, %s9947_s28 }
  0x6d   :  { %p9954_p0 = por %p9953_p13, %p9952_p12 }
  0x6f   :  { %p9955_p1 = pnand %p9954_p0, %p9948_p11 }
  0x71   :  { %9958 = shalt.err (!%p9955_p1)
}
  0x72   :  { %s10559_s1 = smov 64   ;;  %s10560_s21 = smov 4  }
  0x73   :  { %153 = dma.hbm_to_vmem [thread:$0]  %s10635_s3, 1024, %s148_s18, [#allocation9], %s10559_s1, %s10559_s1, %s10560_s21  }
  0x74   :  { %s9959_s2 = scalar_lea.hbm %s10645_s14, 1024 }
  0x75   :  { %p9960_p2 = scmp.ne.s32.totalorder %s10645_s14, %s9959_s2  ;;  %p9963_p3 = scmp.lt.u32.totalorder %s9959_s2, %s10645_s14 }
  0x77   :  { %p9965_p4 = pnand %p9963_p3, %p9960_p2 }
  0x79   :  { %9968 = shalt.err (!%p9965_p4)
}
  0x7a   :  { %s9969_s7 = scalar_lea.vmem %s170_s23, 1024  ;;  %p9974_p6 = scmp.lt.s32.totalorder %s170_s23, %s170_s23 }
  0x7b   :  { %p9970_p5 = scmp.ne.s32.totalorder %s170_s23, %s9969_s7  ;;  %p9975_p7 = scmp.lt.s32.totalorder %s9969_s7, %s9969_s7 }
  0x7d   :  { %p9976_p8 = por %p9975_p7, %p9974_p6 }
  0x7f   :  { %p9977_p9 = pnand %p9976_p8, %p9970_p5 }
  0x81   :  { %9980 = shalt.err (!%p9977_p9)
}
  0x82   :  { %175 = dma.hbm_to_vmem [thread:$0]  %s10645_s14, 1024, %s170_s23, [#allocation12], %s10559_s1, %s10559_s1, %s10560_s21  }
  0x83   :  { %s10561_s3 = smov [#allocation14]   ;;  %s10562_s10 = smov [#allocation17]  }
  0x84   :  { %s191_s0 = sshll.u32 %s10561_s3, 4  ;;  %s216_s11 = sshll.u32 %s10562_s10, 4  ;;  %s192_s0 = int_to_ptr.vmem [resolvable:$true] %s191_s0  ;;  %s217_s11 = int_to_ptr.vmem [resolvable:$true] %s216_s11 }
  0x85   :  { %s9981_s15 = scalar_lea.hbm %s10655_s24, 1024 }
  0x86   :  { %p9982_p10 = scmp.ne.s32.totalorder %s10655_s24, %s9981_s15  ;;  %p9985_p11 = scmp.lt.u32.totalorder %s9981_s15, %s10655_s24 }
  0x88   :  { %p9987_p12 = pnand %p9985_p11, %p9982_p10 }
  0x8a   :  { %9990 = shalt.err (!%p9987_p12)
}
  0x8b   :  { %s9991_s16 = scalar_lea.vmem %s192_s0, 1024  ;;  %p9996_p0 = scmp.lt.s32.totalorder %s192_s0, %s192_s0 }
  0x8c   :  { %p9992_p13 = scmp.ne.s32.totalorder %s192_s0, %s9991_s16  ;;  %p9997_p1 = scmp.lt.s32.totalorder %s9991_s16, %s9991_s16 }
  0x8e   :  { %p9998_p2 = por %p9997_p1, %p9996_p0 }
  0x90   :  { %p9999_p3 = pnand %p9998_p2, %p9992_p13 }
  0x92   :  { %10002 = shalt.err (!%p9999_p3)
}
  0x93   :  { %197 = dma.hbm_to_vmem [thread:$0]  %s10655_s24, 1024, %s192_s0, [#allocation15], %s10559_s1, %s10559_s1, %s10560_s21  }
  0x94   :  { %s10003_s14 = scalar_lea.hbm %s10670_s12, 16 }
  0x95   :  { %p10004_p4 = scmp.ne.s32.totalorder %s10670_s12, %s10003_s14  ;;  %p10007_p5 = scmp.lt.u32.totalorder %s10003_s14, %s10670_s12 }
  0x97   :  { %p10009_p6 = pnand %p10007_p5, %p10004_p4 }
  0x99   :  { %10012 = shalt.err (!%p10009_p6)
}
  0x9a   :  { %s10013_s18 = scalar_lea.vmem %s217_s11, 16  ;;  %s10017_s22 = scalar_lea.vmem %s217_s11, 32 }
  0x9b   :  { %p10014_p7 = scmp.ne.s32.totalorder %s217_s11, %s10013_s18  ;;  %p10018_p8 = scmp.lt.s32.totalorder %s217_s11, %s217_s11 }
  0x9c   :  { %p10019_p9 = scmp.lt.s32.totalorder %s10017_s22, %s10013_s18 }
  0x9e   :  { %p10020_p10 = por %p10019_p9, %p10018_p8 }
  0xa0   :  { %p10021_p11 = pnand %p10020_p10, %p10014_p7 }
  0xa2   :  { %10024 = shalt.err (!%p10021_p11)
}
  0xa3   :  { %219 = dma.hbm_to_vmem [thread:$0]  %s10670_s12, 16, %s217_s11, [#allocation18]  }
  0xa4   :  { %s10563_s24 = smov [#allocation20]   ;;  %s10564_s26 = smov [#allocation23]  }
  0xa5   :  { %s237_s23 = sshll.u32 %s10563_s24, 4  ;;  %s259_s28 = sshll.u32 %s10564_s26, 4  ;;  %s238_s23 = int_to_ptr.vmem [resolvable:$true] %s237_s23  ;;  %s260_s28 = int_to_ptr.vmem [resolvable:$true] %s259_s28 }
  0xa6   :  { %s10025_s2 = scalar_lea.hbm %s10685_s4, 1024 }
  0xa7   :  { %p10026_p12 = scmp.ne.s32.totalorder %s10685_s4, %s10025_s2  ;;  %p10029_p13 = scmp.lt.u32.totalorder %s10025_s2, %s10685_s4 }
  0xa9   :  { %p10031_p0 = pnand %p10029_p13, %p10026_p12 }
  0xab   :  { %10034 = shalt.err (!%p10031_p0)
}
  0xac   :  { %s10035_s7 = scalar_lea.vmem %s238_s23, 1024  ;;  %p10040_p2 = scmp.lt.s32.totalorder %s238_s23, %s238_s23 }
  0xad   :  { %p10036_p1 = scmp.ne.s32.totalorder %s238_s23, %s10035_s7  ;;  %p10041_p3 = scmp.lt.s32.totalorder %s10035_s7, %s10035_s7 }
  0xaf   :  { %p10042_p4 = por %p10041_p3, %p10040_p2 }
  0xb1   :  { %p10043_p5 = pnand %p10042_p4, %p10036_p1 }
  0xb3   :  { %10046 = shalt.err (!%p10043_p5)
}
  0xb4   :  { %243 = dma.hbm_to_vmem [thread:$0]  %s10685_s4, 1024, %s238_s23, [#allocation21], %s10559_s1, %s10559_s1, %s10560_s21  }
  0xb5   :  { %s10047_s12 = scalar_lea.hbm %s10695_s20, 1024 }
  0xb6   :  { %p10048_p6 = scmp.ne.s32.totalorder %s10695_s20, %s10047_s12  ;;  %p10051_p7 = scmp.lt.u32.totalorder %s10047_s12, %s10695_s20 }
  0xb8   :  { %p10053_p8 = pnand %p10051_p7, %p10048_p6 }
  0xba   :  { %10056 = shalt.err (!%p10053_p8)
}
  0xbb   :  { %s10057_s3 = scalar_lea.vmem %s260_s28, 1024  ;;  %p10062_p10 = scmp.lt.s32.totalorder %s260_s28, %s260_s28 }
  0xbc   :  { %p10058_p9 = scmp.ne.s32.totalorder %s260_s28, %s10057_s3  ;;  %p10063_p11 = scmp.lt.s32.totalorder %s10057_s3, %s10057_s3 }
  0xbe   :  { %p10064_p12 = por %p10063_p11, %p10062_p10 }
  0xc0   :  { %p10065_p13 = pnand %p10064_p12, %p10058_p9 }
  0xc2   :  { %10068 = shalt.err (!%p10065_p13)
}
  0xc3   :  { %265 = dma.hbm_to_vmem [thread:$0]  %s10695_s20, 1024, %s260_s28, [#allocation24], %s10559_s1, %s10559_s1, %s10560_s21  }
  0xc4   :  { %s10565_s4 = smov [#allocation26]   ;;  %s10566_s10 = smov [#allocation29]  }
  0xc5   :  { %s281_s0 = sshll.u32 %s10565_s4, 4  ;;  %s315_s11 = sshll.u32 %s10566_s10, 4  ;;  %s282_s0 = int_to_ptr.vmem [resolvable:$true] %s281_s0  ;;  %s316_s11 = int_to_ptr.vmem [resolvable:$true] %s315_s11 }
  0xc6   :  { %s10069_s15 = scalar_lea.hbm %s10705_s5, 1024 }
  0xc7   :  { %p10070_p0 = scmp.ne.s32.totalorder %s10705_s5, %s10069_s15  ;;  %p10073_p1 = scmp.lt.u32.totalorder %s10069_s15, %s10705_s5 }
  0xc9   :  { %p10075_p2 = pnand %p10073_p1, %p10070_p0 }
  0xcb   :  { %10078 = shalt.err (!%p10075_p2)
}
  0xcc   :  { %s10079_s16 = scalar_lea.vmem %s282_s0, 1024  ;;  %p10084_p4 = scmp.lt.s32.totalorder %s282_s0, %s282_s0 }
  0xcd   :  { %p10080_p3 = scmp.ne.s32.totalorder %s282_s0, %s10079_s16  ;;  %p10085_p5 = scmp.lt.s32.totalorder %s10079_s16, %s10079_s16 }
  0xcf   :  { %p10086_p6 = por %p10085_p5, %p10084_p4 }
  0xd1   :  { %p10087_p7 = pnand %p10086_p6, %p10080_p3 }
  0xd3   :  { %10090 = shalt.err (!%p10087_p7)
}
  0xd4   :  { %287 = dma.hbm_to_vmem [thread:$0]  %s10705_s5, 1024, %s282_s0, [#allocation27], %s10559_s1, %s10559_s1, %s10560_s21  }
  0xd5   :  { %s10091_s20 = scalar_lea.hbm %s10745_s6, 32 }
  0xd6   :  { %p10092_p8 = scmp.ne.s32.totalorder %s10745_s6, %s10091_s20  ;;  %p10095_p9 = scmp.lt.u32.totalorder %s10091_s20, %s10745_s6 }
  0xd8   :  { %p10097_p10 = pnand %p10095_p9, %p10092_p8 }
  0xda   :  { %10100 = shalt.err (!%p10097_p10)
}
  0xdb   :  { %s10101_s14 = scalar_lea.vmem %s316_s11, 32  ;;  %p10106_p12 = scmp.lt.s32.totalorder %s316_s11, %s316_s11 }
  0xdc   :  { %p10102_p11 = scmp.ne.s32.totalorder %s316_s11, %s10101_s14  ;;  %p10107_p13 = scmp.lt.s32.totalorder %s10101_s14, %s10101_s14 }
  0xde   :  { %p10108_p0 = por %p10107_p13, %p10106_p12 }
  0xe0   :  { %p10109_p1 = pnand %p10108_p0, %p10102_p11 }
  0xe2   :  { %10112 = shalt.err (!%p10109_p1)
}
  0xe3   :  { %s10567_s18 = smov 16   ;;  %s10568_s22 = smov 1  }
  0xe4   :  { %321 = dma.hbm_to_vmem [thread:$0]  %s10745_s6, 32, %s316_s11, [#allocation30], %s10567_s18, %s10567_s18, %s10568_s22  }
  0xe5   :  { %s10569_s5 = smov [#allocation32]   ;;  %s10113_s23 = scalar_lea.hbm %s10760_s25, 64 }
  0xe6   :  { %s341_s24 = sshll.u32 %s10569_s5, 4  ;;  %p10114_p2 = scmp.ne.s32.totalorder %s10760_s25, %s10113_s23  ;;  %s342_s24 = int_to_ptr.vmem [resolvable:$true] %s341_s24 }
  0xe7   :  { %p10117_p3 = scmp.lt.u32.totalorder %s10113_s23, %s10760_s25 }
  0xe9   :  { %p10119_p4 = pnand %p10117_p3, %p10114_p2 }
  0xeb   :  { %10122 = shalt.err (!%p10119_p4)
}
  0xec   :  { %s10123_s26 = scalar_lea.vmem %s342_s24, 64  ;;  %p10128_p6 = scmp.lt.s32.totalorder %s342_s24, %s342_s24 }
  0xed   :  { %p10124_p5 = scmp.ne.s32.totalorder %s342_s24, %s10123_s26  ;;  %p10129_p7 = scmp.lt.s32.totalorder %s10123_s26, %s10123_s26 }
  0xef   :  { %p10130_p8 = por %p10129_p7, %p10128_p6 }
  0xf1   :  { %p10131_p9 = pnand %p10130_p8, %p10124_p5 }
  0xf3   :  { %10134 = shalt.err (!%p10131_p9)
}
  0xf4   :  { %s10570_s28 = smov 32   ;;  %s10571_s6 = smov 2  }
  0xf5   :  { %347 = dma.hbm_to_vmem [thread:$0]  %s10760_s25, 64, %s342_s24, [#allocation33], %s10570_s28, %s10570_s28, %s10571_s6  }
  0xf6   :  { %s10572_s2 = smov [#allocation35]   ;;  %s10573_s12 = smov [#allocation38]  }
  0xf7   :  { %s367_s7 = sshll.u32 %s10572_s2, 4  ;;  %s391_s3 = sshll.u32 %s10573_s12, 4  ;;  %s368_s7 = int_to_ptr.vmem [resolvable:$true] %s367_s7  ;;  %s10868_s3 = int_to_ptr.vmem [resolvable:$true] %s391_s3 }
  0xf8   :  { %s10135_s4 = scalar_lea.hbm %s10775_s9, 32 }
  0xf9   :  { %p10136_p10 = scmp.ne.s32.totalorder %s10775_s9, %s10135_s4  ;;  %p10139_p11 = scmp.lt.u32.totalorder %s10135_s4, %s10775_s9 }
  0xfb   :  { %p10141_p12 = pnand %p10139_p11, %p10136_p10 }
  0xfd   :  { %10144 = shalt.err (!%p10141_p12)
}
  0xfe   :  { %s10145_s0 = scalar_lea.vmem %s368_s7, 32  ;;  %p10150_p0 = scmp.lt.s32.totalorder %s368_s7, %s368_s7 }
  0xff   :  { %p10146_p13 = scmp.ne.s32.totalorder %s368_s7, %s10145_s0  ;;  %p10151_p1 = scmp.lt.s32.totalorder %s10145_s0, %s10145_s0 }
 0x101   :  { %p10152_p2 = por %p10151_p1, %p10150_p0 }
 0x103   :  { %p10153_p3 = pnand %p10152_p2, %p10146_p13 }
 0x105   :  { %10156 = shalt.err (!%p10153_p3)
}
 0x106   :  { %373 = dma.hbm_to_vmem [thread:$0]  %s10775_s9, 32, %s368_s7, [#allocation36], %s10567_s18, %s10567_s18, %s10568_s22  }
 0x107   :  { %s10157_s25 = scalar_lea.hbm %s10785_s27, 1024 }
 0x108   :  { %p10158_p4 = scmp.ne.s32.totalorder %s10785_s27, %s10157_s25  ;;  %p10161_p5 = scmp.lt.u32.totalorder %s10157_s25, %s10785_s27 }
 0x10a   :  { %p10163_p6 = pnand %p10161_p5, %p10158_p4 }
 0x10c   :  { %10166 = shalt.err (!%p10163_p6)
}
 0x10d   :  { %s10167_s10 = scalar_lea.vmem %s10868_s3, 1024  ;;  %p10172_p8 = scmp.lt.s32.totalorder %s10868_s3, %s10868_s3 }
 0x10e   :  { %p10168_p7 = scmp.ne.s32.totalorder %s10868_s3, %s10167_s10  ;;  %p10173_p9 = scmp.lt.s32.totalorder %s10167_s10, %s10167_s10 }
 0x110   :  { %p10174_p10 = por %p10173_p9, %p10172_p8 }
 0x112   :  { %p10175_p11 = pnand %p10174_p10, %p10168_p7 }
 0x114   :  { %10178 = shalt.err (!%p10175_p11)
}
 0x115   :  { %397 = dma.hbm_to_vmem [thread:$0]  %s10785_s27, 1024, %s10868_s3, [#allocation39], %s10559_s1, %s10559_s1, %s10560_s21  }
 0x116   :  { %s10574_s9 = smov [#allocation2]   ;;  %s10575_s15 = smov [#allocation7]  }
 0x117   :  { %s113_s11 = sshll.u32 %s10574_s9, 4  ;;  %s138_s16 = sshll.u32 %s10575_s15, 4  ;;  %s114_s11 = int_to_ptr.vmem [resolvable:$true] %s113_s11  ;;  %s139_s16 = int_to_ptr.vmem [resolvable:$true] %s138_s16 }
 0x118   :  { %s10179_s20 = scalar_lea.hbm %s10615_s17, 3072 }
 0x119   :  { %p10180_p12 = scmp.ne.s32.totalorder %s10615_s17, %s10179_s20  ;;  %p10183_p13 = scmp.lt.u32.totalorder %s10179_s20, %s10615_s17 }
 0x11b   :  { %p10185_p0 = pnand %p10183_p13, %p10180_p12 }
 0x11d   :  { %10188 = shalt.err (!%p10185_p0)
}
 0x11e   :  { %s10189_s14 = scalar_lea.vmem %s114_s11, 3072  ;;  %p10194_p2 = scmp.lt.s32.totalorder %s114_s11, %s114_s11 }
 0x11f   :  { %p10190_p1 = scmp.ne.s32.totalorder %s114_s11, %s10189_s14  ;;  %p10195_p3 = scmp.lt.s32.totalorder %s10189_s14, %s10189_s14 }
 0x121   :  { %p10196_p4 = por %p10195_p3, %p10194_p2 }
 0x123   :  { %p10197_p5 = pnand %p10196_p4, %p10190_p1 }
 0x125   :  { %10200 = shalt.err (!%p10197_p5)
}
 0x126   :  { %119 = dma.hbm_to_vmem [thread:$0]  %s10615_s17, 3072, %s114_s11, [#allocation3], %s10559_s1, %s10559_s1, %s10560_s21  }
 0x127   :  { %s10201_s27 = scalar_lea.hbm %s10630_s29, 16 }
 0x128   :  { %p10202_p6 = scmp.ne.s32.totalorder %s10630_s29, %s10201_s27  ;;  %p10205_p7 = scmp.lt.u32.totalorder %s10201_s27, %s10630_s29 }
 0x12a   :  { %p10207_p8 = pnand %p10205_p7, %p10202_p6 }
 0x12c   :  { %10210 = shalt.err (!%p10207_p8)
}
 0x12d   :  { %s10211_s5 = scalar_lea.vmem %s139_s16, 16  ;;  %s10215_s24 = scalar_lea.vmem %s139_s16, 32 }
 0x12e   :  { %p10212_p9 = scmp.ne.s32.totalorder %s139_s16, %s10211_s5  ;;  %p10216_p10 = scmp.lt.s32.totalorder %s139_s16, %s139_s16 }
 0x12f   :  { %p10217_p11 = scmp.lt.s32.totalorder %s10215_s24, %s10211_s5 }
 0x131   :  { %p10218_p12 = por %p10217_p11, %p10216_p10 }
 0x133   :  { %p10219_p13 = pnand %p10218_p12, %p10212_p9 }
 0x135   :  { %10222 = shalt.err (!%p10219_p13)
}
 0x136   :  { %s12669_s23 = sld [smem:[#allocation60_spill]]  ;;  %s10576_s26 = smov [#allocation10]  }
 0x137   :  { %141 = dma.hbm_to_vmem [thread:$0]  %s10630_s29, 16, %s139_s16, [#allocation6]  }
 0x138   :  { %s160_s17 = sshll.u32 %s10576_s26, 4  ;;  %s10577_s1 = smov [#allocation13]   ;;  %s161_s17 = int_to_ptr.vmem [resolvable:$true] %s160_s17 }
 0x139   :  { %s182_s21 = sshll.u32 %s10577_s1, 4  ;;  %s183_s21 = int_to_ptr.vmem [resolvable:$true] %s182_s21 }
 0x13c   :  { %s10223_s28 = scalar_lea.hbm %s12669_s23, 16 }
 0x13d   :  { %p10224_p0 = scmp.ne.s32.totalorder %s12669_s23, %s10223_s28  ;;  %p10227_p1 = scmp.lt.u32.totalorder %s10223_s28, %s12669_s23 }
 0x13f   :  { %p10229_p2 = pnand %p10227_p1, %p10224_p0 }
 0x141   :  { %10232 = shalt.err (!%p10229_p2)
}
 0x142   :  { %s10233_s6 = scalar_lea.vmem %s161_s17, 16  ;;  %s10237_s2 = scalar_lea.vmem %s161_s17, 32 }
 0x143   :  { %p10234_p3 = scmp.ne.s32.totalorder %s161_s17, %s10233_s6  ;;  %p10238_p4 = scmp.lt.s32.totalorder %s161_s17, %s161_s17 }
 0x144   :  { %p10239_p5 = scmp.lt.s32.totalorder %s10237_s2, %s10233_s6 }
 0x146   :  { %p10240_p6 = por %p10239_p5, %p10238_p4 }
 0x148   :  { %p10241_p7 = pnand %p10240_p6, %p10234_p3 }
 0x14a   :  { %10244 = shalt.err (!%p10241_p7)
}
 0x14b   :  { %s12670_s29 = sld [smem:[#allocation61_spill]] }
 0x14c   :  { %163 = dma.hbm_to_vmem [thread:$0]  %s12669_s23, 16, %s161_s17, [#allocation9]  }
 0x151   :  { %s10245_s7 = scalar_lea.hbm %s12670_s29, 16 }
 0x152   :  { %p10246_p8 = scmp.ne.s32.totalorder %s12670_s29, %s10245_s7  ;;  %p10249_p9 = scmp.lt.u32.totalorder %s10245_s7, %s12670_s29 }
 0x154   :  { %p10251_p10 = pnand %p10249_p9, %p10246_p8 }
 0x156   :  { %10254 = shalt.err (!%p10251_p10)
}
 0x157   :  { %s10255_s12 = scalar_lea.vmem %s183_s21, 16  ;;  %s10259_s3 = scalar_lea.vmem %s183_s21, 32 }
 0x158   :  { %p10256_p11 = scmp.ne.s32.totalorder %s183_s21, %s10255_s12  ;;  %p10260_p12 = scmp.lt.s32.totalorder %s183_s21, %s183_s21 }
 0x159   :  { %p10261_p13 = scmp.lt.s32.totalorder %s10259_s3, %s10255_s12 }
 0x15b   :  { %p10262_p0 = por %p10261_p13, %p10260_p12 }
 0x15d   :  { %p10263_p1 = pnand %p10262_p0, %p10256_p11 }
 0x15f   :  { %10266 = shalt.err (!%p10263_p1)
}
 0x160   :  { %s12671_s4 = sld [smem:[#allocation62_spill]]  ;;  %s10578_s0 = smov [#allocation16]  }
 0x161   :  { %185 = dma.hbm_to_vmem [thread:$0]  %s12670_s29, 16, %s183_s21, [#allocation12]  }
 0x162   :  { %s204_s25 = sshll.u32 %s10578_s0, 4  ;;  %s10579_s10 = smov [#allocation19]   ;;  %s205_s25 = int_to_ptr.vmem [resolvable:$true] %s204_s25 }
 0x163   :  { %s228_s9 = sshll.u32 %s10579_s10, 4  ;;  %s229_s9 = int_to_ptr.vmem [resolvable:$true] %s228_s9 }
 0x166   :  { %s10267_s11 = scalar_lea.hbm %s12671_s4, 16 }
 0x167   :  { %p10268_p2 = scmp.ne.s32.totalorder %s12671_s4, %s10267_s11  ;;  %p10271_p3 = scmp.lt.u32.totalorder %s10267_s11, %s12671_s4 }
 0x169   :  { %p10273_p4 = pnand %p10271_p3, %p10268_p2 }
 0x16b   :  { %10276 = shalt.err (!%p10273_p4)
}
 0x16c   :  { %s10277_s15 = scalar_lea.vmem %s205_s25, 16  ;;  %s10281_s16 = scalar_lea.vmem %s205_s25, 32 }
 0x16d   :  { %p10278_p5 = scmp.ne.s32.totalorder %s205_s25, %s10277_s15  ;;  %p10282_p6 = scmp.lt.s32.totalorder %s205_s25, %s205_s25 }
 0x16e   :  { %p10283_p7 = scmp.lt.s32.totalorder %s10281_s16, %s10277_s15 }
 0x170   :  { %p10284_p8 = por %p10283_p7, %p10282_p6 }
 0x172   :  { %p10285_p9 = pnand %p10284_p8, %p10278_p5 }
 0x174   :  { %10288 = shalt.err (!%p10285_p9)
}
 0x175   :  { %s12672_s20 = sld [smem:[#allocation65_spill]] }
 0x176   :  { %207 = dma.hbm_to_vmem [thread:$0]  %s12671_s4, 16, %s205_s25, [#allocation15]  }
 0x17b   :  { %s10289_s14 = scalar_lea.hbm %s12672_s20, 16 }
 0x17c   :  { %p10290_p10 = scmp.ne.s32.totalorder %s12672_s20, %s10289_s14  ;;  %p10293_p11 = scmp.lt.u32.totalorder %s10289_s14, %s12672_s20 }
 0x17e   :  { %p10295_p12 = pnand %p10293_p11, %p10290_p10 }
 0x180   :  { %10298 = shalt.err (!%p10295_p12)
}
 0x181   :  { %s10299_s27 = scalar_lea.vmem %s229_s9, 16  ;;  %s10303_s5 = scalar_lea.vmem %s229_s9, 32 }
 0x182   :  { %p10300_p13 = scmp.ne.s32.totalorder %s229_s9, %s10299_s27  ;;  %p10304_p0 = scmp.lt.s32.totalorder %s229_s9, %s229_s9 }
 0x183   :  { %p10305_p1 = scmp.lt.s32.totalorder %s10303_s5, %s10299_s27 }
 0x185   :  { %p10306_p2 = por %p10305_p1, %p10304_p0 }
 0x187   :  { %p10307_p3 = pnand %p10306_p2, %p10300_p13 }
 0x189   :  { %10310 = shalt.err (!%p10307_p3)
}
 0x18a   :  { %s12673_s24 = sld [smem:[#allocation66_spill]]  ;;  %s10580_s23 = smov [#allocation22]  }
 0x18b   :  { %231 = dma.hbm_to_vmem [thread:$0]  %s12672_s20, 16, %s229_s9, [#allocation18]  }
 0x18c   :  { %s250_s26 = sshll.u32 %s10580_s23, 4  ;;  %s10581_s17 = smov [#allocation25]   ;;  %s251_s26 = int_to_ptr.vmem [resolvable:$true] %s250_s26 }
 0x18d   :  { %s272_s1 = sshll.u32 %s10581_s17, 4  ;;  %s273_s1 = int_to_ptr.vmem [resolvable:$true] %s272_s1 }
 0x190   :  { %s10311_s21 = scalar_lea.hbm %s12673_s24, 16 }
 0x191   :  { %p10312_p4 = scmp.ne.s32.totalorder %s12673_s24, %s10311_s21  ;;  %p10315_p5 = scmp.lt.u32.totalorder %s10311_s21, %s12673_s24 }
 0x193   :  { %p10317_p6 = pnand %p10315_p5, %p10312_p4 }
 0x195   :  { %10320 = shalt.err (!%p10317_p6)
}
 0x196   :  { %s10321_s28 = scalar_lea.vmem %s251_s26, 16  ;;  %s10325_s6 = scalar_lea.vmem %s251_s26, 32 }
 0x197   :  { %p10322_p7 = scmp.ne.s32.totalorder %s251_s26, %s10321_s28  ;;  %p10326_p8 = scmp.lt.s32.totalorder %s251_s26, %s251_s26 }
 0x198   :  { %p10327_p9 = scmp.lt.s32.totalorder %s10325_s6, %s10321_s28 }
 0x19a   :  { %p10328_p10 = por %p10327_p9, %p10326_p8 }
 0x19c   :  { %p10329_p11 = pnand %p10328_p10, %p10322_p7 }
 0x19e   :  { %10332 = shalt.err (!%p10329_p11)
}
 0x19f   :  { %s12674_s2 = sld [smem:[#allocation67_spill]] }
 0x1a0   :  { %253 = dma.hbm_to_vmem [thread:$0]  %s12673_s24, 16, %s251_s26, [#allocation21]  }
 0x1a5   :  { %s10333_s29 = scalar_lea.hbm %s12674_s2, 16 }
 0x1a6   :  { %p10334_p12 = scmp.ne.s32.totalorder %s12674_s2, %s10333_s29  ;;  %p10337_p13 = scmp.lt.u32.totalorder %s10333_s29, %s12674_s2 }
 0x1a8   :  { %p10339_p0 = pnand %p10337_p13, %p10334_p12 }
 0x1aa   :  { %10342 = shalt.err (!%p10339_p0)
}
 0x1ab   :  { %s10343_s7 = scalar_lea.vmem %s273_s1, 16  ;;  %s10347_s12 = scalar_lea.vmem %s273_s1, 32 }
 0x1ac   :  { %p10344_p1 = scmp.ne.s32.totalorder %s273_s1, %s10343_s7  ;;  %p10348_p2 = scmp.lt.s32.totalorder %s273_s1, %s273_s1 }
 0x1ad   :  { %p10349_p3 = scmp.lt.s32.totalorder %s10347_s12, %s10343_s7 }
 0x1af   :  { %p10350_p4 = por %p10349_p3, %p10348_p2 }
 0x1b1   :  { %p10351_p5 = pnand %p10350_p4, %p10344_p1 }
 0x1b3   :  { %10354 = shalt.err (!%p10351_p5)
}
 0x1b4   :  { %s12675_s3 = sld [smem:[#allocation68_spill]]  ;;  %s10582_s4 = smov [#allocation28]  }
 0x1b5   :  { %275 = dma.hbm_to_vmem [thread:$0]  %s12674_s2, 16, %s273_s1, [#allocation24]  }
 0x1b6   :  { %s294_s0 = sshll.u32 %s10582_s4, 4  ;;  %s10583_s25 = smov [#allocation31]   ;;  %s295_s0 = int_to_ptr.vmem [resolvable:$true] %s294_s0 }
 0x1b7   :  { %s327_s10 = sshll.u32 %s10583_s25, 4  ;;  %s10924_s10 = int_to_ptr.vmem [resolvable:$true] %s327_s10 }
 0x1ba   :  { %s10355_s9 = scalar_lea.hbm %s12675_s3, 16 }
 0x1bb   :  { %p10356_p6 = scmp.ne.s32.totalorder %s12675_s3, %s10355_s9  ;;  %p10359_p7 = scmp.lt.u32.totalorder %s10355_s9, %s12675_s3 }
 0x1bd   :  { %p10361_p8 = pnand %p10359_p7, %p10356_p6 }
 0x1bf   :  { %10364 = shalt.err (!%p10361_p8)
}
 0x1c0   :  { %s10365_s11 = scalar_lea.vmem %s295_s0, 16  ;;  %s10369_s15 = scalar_lea.vmem %s295_s0, 32 }
 0x1c1   :  { %p10366_p9 = scmp.ne.s32.totalorder %s295_s0, %s10365_s11  ;;  %p10370_p10 = scmp.lt.s32.totalorder %s295_s0, %s295_s0 }
 0x1c2   :  { %p10371_p11 = scmp.lt.s32.totalorder %s10369_s15, %s10365_s11 }
 0x1c4   :  { %p10372_p12 = por %p10371_p11, %p10370_p10 }
 0x1c6   :  { %p10373_p13 = pnand %p10372_p12, %p10366_p9 }
 0x1c8   :  { %10376 = shalt.err (!%p10373_p13)
}
 0x1c9   :  { %s12676_s16 = sld [smem:[#allocation75_spill]] }
 0x1ca   :  { %297 = dma.hbm_to_vmem [thread:$0]  %s12675_s3, 16, %s295_s0, [#allocation27]  }
 0x1cf   :  { %s10377_s20 = scalar_lea.hbm %s12676_s16, 32 }
 0x1d0   :  { %p10378_p0 = scmp.ne.s32.totalorder %s12676_s16, %s10377_s20  ;;  %p10381_p1 = scmp.lt.u32.totalorder %s10377_s20, %s12676_s16 }
 0x1d2   :  { %p10383_p2 = pnand %p10381_p1, %p10378_p0 }
 0x1d4   :  { %10386 = shalt.err (!%p10383_p2)
}
 0x1d5   :  { %s10387_s14 = scalar_lea.vmem %s10924_s10, 32  ;;  %p10392_p4 = scmp.lt.s32.totalorder %s10924_s10, %s10924_s10 }
 0x1d6   :  { %p10388_p3 = scmp.ne.s32.totalorder %s10924_s10, %s10387_s14  ;;  %p10393_p5 = scmp.lt.s32.totalorder %s10387_s14, %s10387_s14 }
 0x1d8   :  { %p10394_p6 = por %p10393_p5, %p10392_p4 }
 0x1da   :  { %p10395_p7 = pnand %p10394_p6, %p10388_p3 }
 0x1dc   :  { %10398 = shalt.err (!%p10395_p7)
}
 0x1dd   :  { %s12677_s27 = sld [smem:[#allocation78_spill]]  ;;  %s10584_s5 = smov [#allocation34]  }
 0x1de   :  { %333 = dma.hbm_to_vmem [thread:$0]  %s12676_s16, 32, %s10924_s10, [#allocation30], %s10567_s18, %s10567_s18, %s10568_s22  }
 0x1df   :  { %s355_s24 = sshll.u32 %s10584_s5, 4  ;;  %s10585_s23 = smov [#allocation37]   ;;  %s356_s24 = int_to_ptr.vmem [resolvable:$true] %s355_s24 }
 0x1e0   :  { %s379_s26 = sshll.u32 %s10585_s23, 4  ;;  %s10942_s26 = int_to_ptr.vmem [resolvable:$true] %s379_s26 }
 0x1e3   :  { %s10399_s17 = scalar_lea.hbm %s12677_s27, 32 }
 0x1e4   :  { %p10400_p8 = scmp.ne.s32.totalorder %s12677_s27, %s10399_s17  ;;  %p10403_p9 = scmp.lt.u32.totalorder %s10399_s17, %s12677_s27 }
 0x1e6   :  { %p10405_p10 = pnand %p10403_p9, %p10400_p8 }
 0x1e8   :  { %10408 = shalt.err (!%p10405_p10)
}
 0x1e9   :  { %s10409_s1 = scalar_lea.vmem %s356_s24, 32  ;;  %p10414_p12 = scmp.lt.s32.totalorder %s356_s24, %s356_s24 }
 0x1ea   :  { %p10410_p11 = scmp.ne.s32.totalorder %s356_s24, %s10409_s1  ;;  %p10415_p13 = scmp.lt.s32.totalorder %s10409_s1, %s10409_s1 }
 0x1ec   :  { %p10416_p0 = por %p10415_p13, %p10414_p12 }
 0x1ee   :  { %p10417_p1 = pnand %p10416_p0, %p10410_p11 }
 0x1f0   :  { %10420 = shalt.err (!%p10417_p1)
}
 0x1f1   :  { %s12678_s21 = sld [smem:[#allocation79_spill]] }
 0x1f2   :  { %361 = dma.hbm_to_vmem [thread:$0]  %s12677_s27, 32, %s356_s24, [#allocation33], %s10567_s18, %s10567_s18, %s10568_s22  }
 0x1f7   :  { %s10421_s28 = scalar_lea.hbm %s12678_s21, 32 }
 0x1f8   :  { %p10422_p2 = scmp.ne.s32.totalorder %s12678_s21, %s10421_s28  ;;  %p10425_p3 = scmp.lt.u32.totalorder %s10421_s28, %s12678_s21 }
 0x1fa   :  { %p10427_p4 = pnand %p10425_p3, %p10422_p2 }
 0x1fc   :  { %10430 = shalt.err (!%p10427_p4)
}
 0x1fd   :  { %s10431_s6 = scalar_lea.vmem %s10942_s26, 32  ;;  %p10436_p6 = scmp.lt.s32.totalorder %s10942_s26, %s10942_s26 }
 0x1fe   :  { %p10432_p5 = scmp.ne.s32.totalorder %s10942_s26, %s10431_s6  ;;  %p10437_p7 = scmp.lt.s32.totalorder %s10431_s6, %s10431_s6 }
 0x200   :  { %p10438_p8 = por %p10437_p7, %p10436_p6 }
 0x202   :  { %p10439_p9 = pnand %p10438_p8, %p10432_p5 }
 0x204   :  { %10442 = shalt.err (!%p10439_p9)
}
 0x205   :  { %385 = dma.hbm_to_vmem [thread:$0]  %s12678_s21, 32, %s10942_s26, [#allocation36], %s10567_s18, %s10567_s18, %s10568_s22  }
 0x206   :  { %s10586_s2 = smov [#allocation40]   ;;  %s10443_s7 = scalar_lea.hbm %s10790_s13, 16 }
 0x207   :  { %s404_s29 = sshll.u32 %s10586_s2, 4  ;;  %p10444_p10 = scmp.ne.s32.totalorder %s10790_s13, %s10443_s7  ;;  %s405_s29 = int_to_ptr.vmem [resolvable:$true] %s404_s29 }
 0x208   :  { %p10447_p11 = scmp.lt.u32.totalorder %s10443_s7, %s10790_s13 }
 0x20a   :  { %p10449_p12 = pnand %p10447_p11, %p10444_p10 }
 0x20c   :  { %10452 = shalt.err (!%p10449_p12)
}
 0x20d   :  { %s10453_s12 = scalar_lea.vmem %s405_s29, 16  ;;  %s10457_s3 = scalar_lea.vmem %s405_s29, 32 }
 0x20e   :  { %p10454_p13 = scmp.ne.s32.totalorder %s405_s29, %s10453_s12  ;;  %p10458_p0 = scmp.lt.s32.totalorder %s405_s29, %s405_s29 }
 0x20f   :  { %p10459_p1 = scmp.lt.s32.totalorder %s10457_s3, %s10453_s12 }
 0x211   :  { %p10460_p2 = por %p10459_p1, %p10458_p0 }
 0x213   :  { %p10461_p3 = pnand %p10460_p2, %p10454_p13 }
 0x215   :  { %10464 = shalt.err (!%p10461_p3)
}
 0x216   :  { %407 = dma.hbm_to_vmem [thread:$0]  %s10790_s13, 16, %s405_s29, [#allocation39]  }
 0x217   :  { %10487 = dma.done.wait [#allocation3], 3072  }
 0x218   :  { %10488 = vsyncadd [#allocation3], 4294964224 }
 0x219   :  { %10489 = dma.done.wait [#allocation6], 32  }
 0x21a   :  { %10490 = vsyncadd [#allocation6], 4294967264 }
 0x21b   :  { %10491 = dma.done.wait [#allocation9], 1040  }
 0x21c   :  { %10492 = vsyncadd [#allocation9], 4294966256 }
 0x21d   :  { %10493 = dma.done.wait [#allocation12], 1040  }
 0x21e   :  { %10494 = vsyncadd [#allocation12], 4294966256 }
 0x21f   :  { %10495 = dma.done.wait [#allocation15], 1040  }
 0x220   :  { %10496 = vsyncadd [#allocation15], 4294966256 }
 0x221   :  { %10497 = dma.done.wait [#allocation18], 32  }
 0x222   :  { %10498 = vsyncadd [#allocation18], 4294967264 }
 0x223   :  { %10499 = dma.done.wait [#allocation21], 1040  }
 0x224   :  { %10500 = vsyncadd [#allocation21], 4294966256 }
 0x225   :  { %10501 = dma.done.wait [#allocation24], 1040  }
 0x226   :  { %10502 = vsyncadd [#allocation24], 4294966256 }
 0x227   :  { %10503 = dma.done.wait [#allocation27], 1040  }
 0x228   :  { %10504 = vsyncadd [#allocation27], 4294966256 }
 0x229   :  { %10505 = dma.done.wait [#allocation30], 64  }
 0x22a   :  { %10506 = vsyncadd [#allocation30], 4294967232 }
 0x22b   :  { %10507 = dma.done.wait [#allocation33], 96  }
 0x22c   :  { %10508 = vsyncadd [#allocation33], 4294967200 }
 0x22d   :  { %10509 = dma.done.wait [#allocation36], 64  }
 0x22e   :  { %10510 = vsyncadd [#allocation36], 4294967232 }
 0x22f   :  { %10511 = dma.done.wait [#allocation39], 1040  }
 0x230   :  { %10512 = vsyncadd [#allocation39], 4294966256  ;;  %s12679_s13 = sld [smem:[#allocation57_spill]]  ;;  %v10587_v0 = vmov 0   ;;  %s12680_s18 = sld [smem:[#allocation58_spill]]  ;;  %v9211_v7 = vld [vmem:[#allocation8] sm:$0xff]   ;;  %v644_v12 = vlaneseq }
 0x231   :  { %9210 = vset.pattern.permute.xlu1 %v10587_v0  ;;  %9209 = vset.pattern.permute.xlu0 %v10587_v0  ;;  %v9212_v8 = vld [vmem:[#allocation8 + $0x8] sm:$0xff]   ;;  %v9213_v11 = vld [vmem:[#allocation8 + $0x10] sm:$0xff]   ;;  %v9217_v15 = vld [vmem:[#allocation2 + $0x40] sm:$0xff]   ;;  %s12681_s22 = sld [smem:[#allocation56_spill]]  ;;  %s12682_s4 = sld [smem:[#allocation59_spill]]  ;;  %vm10589_vm2 = vmmov 0  }
 0x232   :  { %8606 = vmatprep.subr.bf16.mxu0 %v9211_v7  ;;  %v9218_v16 = vld [vmem:[#allocation2] sm:$0xff]   ;;  %8040 = vmatprep.subr.bf16.mxu1 %v9217_v15  ;;  %v9220_v18 = vld [vmem:[#allocation2 + $0x48] sm:$0xff]   ;;  %v10979_v19 = vshrl.u32 %v644_v12, 7  ;;  %v9223_v24 = vld [vmem:[#allocation2 + $0x50] sm:$0xff]   ;;  %vm1616_vm3 = vcmask 1041409   ;;  %s12683_s0 = sld [smem:[#allocation63_spill]] }
 0x233   :  { %8607 = vmatpush3.bf16.msra.mxu0 %v9211_v7  ;;  %v9214_v17 = vld [vmem:[#allocation8 + $0x18] sm:$0xff]   ;;  %8041 = vmatpush3.bf16.msra.mxu1 %v9218_v16  ;;  %v9221_v22 = vld [vmem:[#allocation2 + $0x8] sm:$0xff]   ;;  %v9224_v25 = vld [vmem:[#allocation2 + $0x10] sm:$0xff]   ;;  %s12684_s25 = sld [smem:[#allocation64_spill]]  ;;  %s12685_s10 = sld [smem:[#allocation69_spill]]  ;;  %vm3270_vm4 = vcmask 261120  }
 0x234   :  { %8608 = vmatprep.subr.bf16.mxu0 %v9212_v8  ;;  %v9215_v23 = vld [vmem:[#allocation8 + $0x20] sm:$0xff]   ;;  %8042 = vmatprep.subr.bf16.mxu1 %v9220_v18  ;;  %vm646_vm0 = vcmp.lt.s32.totalorder %v10979_v19, 1  ;;  %vm719_vm1 = vcmp.lt.s32.totalorder %v10979_v19, 7  ;;  %v9225_v34 = vld [vmem:[#allocation2 + $0x58] sm:$0xff]   ;;  %v9216_v35 = vld [vmem:[#allocation8 + $0x28] sm:$0xff]   ;;  %s12686_s9 = sld [smem:[#allocation71_spill]] }
 0x235   :  { %v9227_v43 = vld [vmem:[#allocation2 + $0x18] sm:$0xff]   ;;  %v9228_v47 = vld [vmem:[#allocation2 + $0x60] sm:$0xff]   ;;  %v9231_v55 = vld [vmem:[#allocation2 + $0x68] sm:$0xff]   ;;  %s12687_s11 = sld [smem:[#allocation72_spill]]  ;;  %s12688_s15 = sld [smem:[#allocation70_spill]] }
 0x236   :  { %v657_v1 = vld [vmem:[%s12679_s13 + $0x10] sm:$0xff]  ;;  %v655_v2 = vld [vmem:[%s12679_s13] sm:$0xff]  ;;  %v658_v3 = vld [vmem:[%s12679_s13 + $0x18] sm:$0xff]  ;;  %s12689_s16 = sld [smem:[#allocation73_spill]]  ;;  %s12690_s20 = sld [smem:[#allocation74_spill]] }
 0x237   :  { %675 = vperm.xlu1 %9210, %v657_v1   ;;  %665 = vperm.xlu0 %9209, %v655_v2   ;;  %v656_v4 = vld [vmem:[%s12679_s13 + $0x8] sm:$0xff]  ;;  %v659_v6 = vld [vmem:[%s12679_s13 + $0x20] sm:$0xff]  ;;  %v731_v13 = vld [vmem:[%s12680_s18 + $0x18] sm:$0xff]  ;;  %s12691_s14 = sld [smem:[#allocation76_spill]]  ;;  %s12692_s27 = sld [smem:[#allocation77_spill]] }
 0x238   :  { %v660_v5 = vld [vmem:[%s12679_s13 + $0x28] sm:$0xff]  ;;  %v728_v10 = vld [vmem:[%s12680_s18] sm:$0xff]  ;;  %v730_v14 = vld [vmem:[%s12680_s18 + $0x10] sm:$0xff]  ;;  %8609 = vmatpush3.bf16.msra.mxu0 %v9212_v8  ;;  %8043 = vmatpush3.bf16.msra.mxu1 %v9221_v22  ;;  %s10591_s5 = smov [#allocation41]  }
 0x239   :  { %v729_v9 = vld [vmem:[%s12680_s18 + $0x8] sm:$0xff]  ;;  %8610 = vmatprep.subr.bf16.mxu0 %v9213_v11  ;;  %v662_v20 = vld [vmem:[%s12679_s13 + $0x38] sm:$0xff]  ;;  %v661_v21 = vld [vmem:[%s12679_s13 + $0x30] sm:$0xff]  ;;  %8044 = vmatprep.subr.bf16.mxu1 %v9223_v24 }
 0x23a   :  { %v10984_v26 = vld [vmem:[%s12681_s22] sm:$0xff]  ;;  %v489_v27 = vld [vmem:[%s12681_s22 + $0x8] sm:$0xff]  ;;  %v490_v37 = vld [vmem:[%s12681_s22 + $0x10] sm:$0xff] }
 0x23b   :  { %680 = vperm.xlu1 %9210, %v658_v3   ;;  %670 = vperm.xlu0 %9209, %v656_v4   ;;  %v733_v28 = vld [vmem:[%s12680_s18 + $0x28] sm:$0xff]  ;;  %v732_v29 = vld [vmem:[%s12680_s18 + $0x20] sm:$0xff]  ;;  %v496_v30 = vpack.c.bf16 %v489_v27, %v10984_v26  ;;  %v636_v31 = vrot.slane %v10984_v26, 7  ;;  %v637_v32 = vrot.slane %v489_v27, 7  ;;  %v711_v33 = vrot.slane %v10984_v26, 1  ;;  %v10996_v38 = vld [vmem:[%s12681_s22 + $0x18] sm:$0xff] }
 0x23c   :  { %8611 = vmatpush3.bf16.msra.mxu0 %v9213_v11  ;;  %v712_v36 = vrot.slane %v489_v27, 1  ;;  %8045 = vmatpush3.bf16.msra.mxu1 %v9224_v25  ;;  %v638_v40 = vrot.slane %v490_v37, 7  ;;  %v639_v41 = vrot.slane %v10996_v38, 7  ;;  %v713_v42 = vrot.slane %v490_v37, 1  ;;  %v735_v44 = vld [vmem:[%s12680_s18 + $0x38] sm:$0xff]  ;;  %v734_v45 = vld [vmem:[%s12680_s18 + $0x30] sm:$0xff] }
 0x23d   :  { %8612 = vmatprep.subr.bf16.mxu0 %v9214_v17  ;;  %8622 = vmatprep.mubr.bf16.mxu0 %v496_v30  ;;  %v11002_v39 = vsel %vm646_vm0, %v636_v31, %v637_v32  ;;  %v714_v46 = vrot.slane %v10996_v38, 1  ;;  %v9219_v52 = vld [vmem:[#allocation8 + $0x30] sm:$0xff]   ;;  %v9230_v54 = vld [vmem:[#allocation2 + $0x20] sm:$0xff]   ;;  %v9233_v57 = vld [vmem:[#allocation2 + $0x28] sm:$0xff]   ;;  %v11035_v1 = vpack.c.bf16 %v10996_v38, %v490_v37 }
 0x23e   :  { %8046 = vmatprep.subr.bf16.mxu1 %v9225_v34  ;;  %1023 = vmatprep.mubr.bf16.mxu1 %v496_v30  ;;  %v11012_v48 = vsel %vm719_vm1, %v711_v33, %v712_v36  ;;  %v11016_v49 = vsel %vm646_vm0, %v637_v32, %v638_v40  ;;  %v11020_v50 = vsel %vm646_vm0, %v638_v40, %v639_v41  ;;  %v9222_v56 = vld [vmem:[#allocation8 + $0x38] sm:$0xff]   ;;  %v9234_v58 = vld [vmem:[#allocation2 + $0x70] sm:$0xff]   ;;  %v493_v63 = vld [vmem:[%s12681_s22 + $0x28] sm:$0xff] }
 0x23f   :  { %690 = vperm.xlu1 %9210, %v660_v5   ;;  %685 = vperm.xlu0 %9209, %v659_v6   ;;  %v11024_v51 = vsel %vm719_vm1, %v712_v36, %v713_v42  ;;  %v11030_v53 = vsel %vm719_vm1, %v713_v42, %v714_v46  ;;  %v9226_v59 = vld [vmem:[#allocation2 + $0x80] sm:$0xff]   ;;  %v9236_v60 = vld [vmem:[#allocation2 + $0x30] sm:$0xff]   ;;  %v9237_v61 = vld [vmem:[#allocation2 + $0x78] sm:$0xff]   ;;  %v641_v3 = vrot.slane %v493_v63, 7  ;;  %v716_v15 = vrot.slane %v493_v63, 1 }
 0x240   :  { %8613 = vmatpush3.bf16.msra.mxu0 %v9214_v17  ;;  %8047 = vmatpush3.bf16.msra.mxu1 %v9227_v43  ;;  %v492_v62 = vld [vmem:[%s12681_s22 + $0x20] sm:$0xff]  ;;  %v495_v4 = vld [vmem:[%s12681_s22 + $0x38] sm:$0xff]  ;;  %v494_v7 = vld [vmem:[%s12681_s22 + $0x30] sm:$0xff] }
 0x241   :  { %8614 = vmatprep.subr.bf16.mxu0 %v9215_v23  ;;  %8048 = vmatprep.subr.bf16.mxu1 %v9228_v47  ;;  %v640_v2 = vrot.slane %v492_v62, 7  ;;  %v643_v5 = vrot.slane %v495_v4, 7  ;;  %v11038_v6 = vpack.c.bf16 %v493_v63, %v492_v62  ;;  %v9229_v8 = vld [vmem:[#allocation2 + $0x88] sm:$0xff]   ;;  %v642_v11 = vrot.slane %v494_v7, 7  ;;  %v9232_v17 = vld [vmem:[#allocation2 + $0x90] sm:$0xff]   ;;  %v9238_v30 = vld [vmem:[#allocation2 + $0xa0] sm:$0xff]  }
 0x242   :  { %v717_v12 = vrot.slane %v494_v7, 1  ;;  %v9241_v26 = vld [vmem:[#allocation2 + $0xb0] sm:$0xff]   ;;  %v9242_v32 = vld [vmem:[#allocation2 + $0xb8] sm:$0xff]  }
 0x243   :  { %743 = vperm.xlu1 %9210, %v729_v9   ;;  %738 = vperm.xlu0 %9209, %v728_v10   ;;  %v9239_v9 = vld [vmem:[#allocation2 + $0x38] sm:$0xff]   ;;  %v649_v10 = vsel %vm646_vm0, %v640_v2, %v641_v3  ;;  %v650_v16 = vsel %vm646_vm0, %v639_v41, %v640_v2  ;;  %v11052_v18 = vsel %vm646_vm0, %v642_v11, %v643_v5 }
 0x244   :  { %8615 = vmatpush3.bf16.msra.mxu0 %v9215_v23  ;;  %8049 = vmatpush3.bf16.msra.mxu1 %v9230_v54  ;;  %v11065_v23 = vsel %vm719_vm1, %v716_v15, %v717_v12 }
 0x245   :  { %8616 = vmatprep.subr.bf16.mxu0 %v9216_v35  ;;  %8050 = vmatprep.subr.bf16.mxu1 %v9231_v55 }
 0x247   :  { %753 = vperm.xlu1 %9210, %v731_v13   ;;  %748 = vperm.xlu0 %9209, %v730_v14   ;;  %v654_v13 = vsel %vm646_vm0, %v643_v5, %v636_v31  ;;  %v715_v14 = vrot.slane %v492_v62, 1  ;;  %v9240_v31 = vld [vmem:[#allocation2 + $0xa8] sm:$0xff]  }
 0x248   :  { %8617 = vmatpush3.bf16.msra.mxu0 %v9216_v35  ;;  %8051 = vmatpush3.bf16.msra.mxu1 %v9233_v57 }
 0x249   :  { %8618 = vmatprep.subr.bf16.mxu0 %v9219_v52  ;;  %8052 = vmatprep.subr.bf16.mxu1 %v9234_v58  ;;  %v723_v22 = vsel %vm719_vm1, %v714_v46, %v715_v14  ;;  %v11069_v24 = vsel %vm719_vm1, %v715_v14, %v716_v15  ;;  %v9244_v15 = vld [vmem:[%s12682_s4 + $0x88] sm:$0xff]  }
 0x24b   :  { %700 = vperm.xlu1 %9210, %v662_v20   ;;  %695 = vperm.xlu0 %9209, %v661_v21   ;;  %v718_v20 = vrot.slane %v495_v4, 1  ;;  %v11056_v21 = vsel %vm646_vm0, %v641_v3, %v642_v11 }
 0x24c   :  { %8619 = vmatpush3.bf16.msra.mxu0 %v9219_v52  ;;  %8053 = vmatpush3.bf16.msra.mxu1 %v9236_v60 }
 0x24d   :  { %8620 = vmatprep.subr.bf16.mxu0 %v9222_v56  ;;  %8054 = vmatprep.subr.bf16.mxu1 %v9237_v61  ;;  %v11075_v25 = vsel %vm719_vm1, %v718_v20, %v711_v33  ;;  %v11079_v27 = vsel %vm719_vm1, %v717_v12, %v718_v20  ;;  %v9246_v20 = vld [vmem:[%s12682_s4] sm:$0xff]  }
 0x24f   :  { %763 = vperm.xlu1 %9210, %v733_v28   ;;  %758 = vperm.xlu0 %9209, %v732_v29   ;;  %v9235_v28 = vld [vmem:[#allocation2 + $0x98] sm:$0xff]   ;;  %v499_v29 = vpack.c.bf16 %v495_v4, %v494_v7 }
 0x250   :  { %8621 = vmatpush3.bf16.msra.mxu0 %v9222_v56  ;;  %8055 = vmatpush3.bf16.msra.mxu1 %v9239_v9 }
 0x251   :  { %8630 = vmatprep.subr.bf16.mxu0 %v9226_v59 }
 0x253   :  { %773 = vperm.xlu1 %9210, %v735_v44   ;;  %768 = vperm.xlu0 %9209, %v734_v45  }
 0x254   :  { %8623 = vmatmul.mubr.bf16.vlgmr.msra.gmra.mrb[0].mxu0 %v11035_v1 }
 0x255   :  { %8631 = vmatpush3.bf16.msra.mxu0 %v9226_v59  ;;  %8626 = vmatprep.mubr.bf16.mxu0 %v11038_v6 }
 0x256   :  { %8632 = vmatprep.subr.bf16.mxu0 %v9229_v8 }
 0x259   :  { %8633 = vmatpush3.bf16.msra.mxu0 %v9229_v8 }
 0x25a   :  { %8634 = vmatprep.subr.bf16.mxu0 %v9232_v17 }
 0x25c   :  { %8627 = vmatmul.mubr.bf16.gmra.mrb[4].mxu0 %v499_v29 }
 0x25d   :  { %8635 = vmatpush3.bf16.msra.mxu0 %v9232_v17  ;;  %v9245_v17 = vld [vmem:[%s12682_s4 + $0x40] sm:$0xff]  }
 0x25e   :  { %8636 = vmatprep.subr.bf16.mxu0 %v9235_v28  ;;  %8092 = vmatprep.subr.bf16.mxu1 %v9245_v17 }
 0x261   :  { %8637 = vmatpush3.bf16.msra.mxu0 %v9235_v28  ;;  %v9251_v28 = vld [vmem:[%s12682_s4 + $0x50] sm:$0xff]  }
 0x262   :  { %8638 = vmatprep.subr.bf16.mxu0 %v9238_v30 }
 0x265   :  { %8639 = vmatpush3.bf16.msra.mxu0 %v9238_v30  ;;  %v9253_v30 = vld [vmem:[%s12682_s4 + $0xa0] sm:$0xff]  }
 0x266   :  { %8640 = vmatprep.subr.bf16.mxu0 %v9240_v31 }
 0x269   :  { %8641 = vmatpush3.bf16.msra.mxu0 %v9240_v31  ;;  %v9254_v31 = vld [vmem:[%s12682_s4 + $0x58] sm:$0xff]  }
 0x26a   :  { %8642 = vmatprep.subr.bf16.mxu0 %v9241_v26 }
 0x26d   :  { %8643 = vmatpush3.bf16.msra.mxu0 %v9241_v26  ;;  %v9255_v26 = vld [vmem:[%s12682_s4 + $0x18] sm:$0xff]  }
 0x26e   :  { %8644 = vmatprep.subr.bf16.mxu0 %v9242_v32 }
 0x271   :  { %8645 = vmatpush3.bf16.msra.mxu0 %v9242_v32  ;;  %v9256_v32 = vld [vmem:[%s12682_s4 + $0xa8] sm:$0xff]  }
 0x2b6   :  { %v11081_v33 = vpop.permute.xlu1 %675  ;;  %v11083_v34 = vpop.permute.xlu0 %665 }
 0x2b7   :  { %v705_v35 = vmul.f32 %v11081_v33, %v11016_v49  ;;  %v703_v40 = vmul.f32 %v11083_v34, %v654_v13  ;;  %v9243_v13 = vld [vmem:[%s12682_s4 + $0x80] sm:$0xff]  }
 0x2b8   :  { %8654 = vmatprep.subr.bf16.mxu0 %v9243_v13 }
 0x2ba   :  { %v11087_v36 = vpop.permute.xlu1 %680  ;;  %v11089_v37 = vpop.permute.xlu0 %670 }
 0x2bb   :  { %v706_v38 = vmul.f32 %v11087_v36, %v11020_v50  ;;  %v704_v41 = vmul.f32 %v11089_v37, %v11002_v39 }
 0x2bd   :  { %v784_v42 = vpack.c.bf16 %v704_v41, %v703_v40  ;;  %v786_v43 = vpack.c.bf16 %v706_v38, %v705_v35  ;;  %v9257_v35 = vld [vmem:[%s12682_s4 + $0x60] sm:$0xff]   ;;  %v9259_v40 = vld [vmem:[%s12682_s4 + $0xb0] sm:$0xff]   ;;  %v9260_v41 = vld [vmem:[%s12682_s4 + $0x68] sm:$0xff]  }
 0x2be   :  { %v11096_v44 = vpop.permute.xlu1 %690  ;;  %v11098_v45 = vpop.permute.xlu0 %685  ;;  %v9258_v38 = vld [vmem:[%s12682_s4 + $0x20] sm:$0xff]  }
 0x2bf   :  { %v708_v46 = vmul.f32 %v11096_v44, %v649_v10  ;;  %1024 = vmatmul.mubr.bf16.vlgmr.msra.gmra.mrb[0].mxu1 %v784_v42  ;;  %v707_v47 = vmul.f32 %v11098_v45, %v650_v16  ;;  %v9261_v42 = vld [vmem:[%s12682_s4 + $0x28] sm:$0xff]  }
 0x2c0   :  { %1031 = vmatprep.mubr.bf16.mxu1 %v11035_v1  ;;  %8093 = vmatpush3.bf16.msra.mxu1 %v9246_v20 }
 0x2c1   :  { %v788_v49 = vpack.c.bf16 %v708_v46, %v707_v47  ;;  %v9263_v46 = vld [vmem:[%s12682_s4 + $0x70] sm:$0xff]  }
 0x2c2   :  { %v11103_v50 = vpop.permute.xlu1 %743  ;;  %v11105_v52 = vpop.permute.xlu0 %738  ;;  %v9264_v47 = vld [vmem:[%s12682_s4 + $0x30] sm:$0xff]  }
 0x2c3   :  { %v777_v39 = vmul.f32 %v11103_v50, %v11024_v51  ;;  %v776_v54 = vmul.f32 %v11105_v52, %v11012_v48 }
 0x2c5   :  { %v785_v55 = vpack.c.bf16 %v777_v39, %v776_v54  ;;  %v9266_v39 = vld [vmem:[%s12682_s4 + $0x38] sm:$0xff]  }
 0x2c6   :  { %v11111_v56 = vpop.permute.xlu1 %753  ;;  %v11113_v57 = vpop.permute.xlu0 %748 }
 0x2c7   :  { %v779_v58 = vmul.f32 %v11111_v56, %v723_v22  ;;  %v778_v59 = vmul.f32 %v11113_v57, %v11030_v53  ;;  %1032 = vmatmul.mubr.bf16.gmra.mrb[4].mxu1 %v786_v43  ;;  %8646 = vmatprep.mubr.bf16.mxu0 %v785_v55  ;;  %v9247_v22 = vld [vmem:[%s12682_s4 + $0x90] sm:$0xff]   ;;  %v9262_v43 = vld [vmem:[%s12682_s4 + $0xb8] sm:$0xff]  }
 0x2c8   :  { %1039 = vmatprep.mubr.bf16.mxu1 %v11038_v6 }
 0x2c9   :  { %v787_v60 = vpack.c.bf16 %v779_v58, %v778_v59 }
 0x2ca   :  { %v11119_v61 = vpop.permute.xlu1 %700  ;;  %v11121_v51 = vpop.permute.xlu0 %695 }
 0x2cb   :  { %v710_v48 = vmul.f32 %v11119_v61, %v11052_v18  ;;  %8647 = vmatmul.mubr.bf16.vlgmr.msra.gmra.mrb[8].mxu0 %v787_v60  ;;  %v709_v62 = vmul.f32 %v11121_v51, %v11056_v21 }
 0x2cc   :  { %8655 = vmatpush3.bf16.msra.mxu0 %v9243_v13 }
 0x2cd   :  { %v790_v63 = vpack.c.bf16 %v710_v48, %v709_v62  ;;  %8656 = vmatprep.subr.bf16.mxu0 %v9244_v15 }
 0x2ce   :  { %v11127_v1 = vpop.permute.xlu1 %763  ;;  %v11129_v53 = vpop.permute.xlu0 %758 }
 0x2cf   :  { %v781_v2 = vmul.f32 %v11127_v1, %v11065_v23  ;;  %1040 = vmatmul.mubr.bf16.gmra.mrb[8].mxu1 %v788_v49  ;;  %v780_v3 = vmul.f32 %v11129_v53, %v11069_v24  ;;  %v9248_v24 = vld [vmem:[%s12682_s4 + $0x48] sm:$0xff]   ;;  %v9265_v49 = vld [vmem:[%s12682_s4 + $0x78] sm:$0xff]  }
 0x2d0   :  { %1047 = vmatprep.mubr.bf16.mxu1 %v499_v29  ;;  %8657 = vmatpush3.bf16.msra.mxu0 %v9244_v15  ;;  %v9252_v29 = vld [vmem:[%s12682_s4 + $0x10] sm:$0xff]  }
 0x2d1   :  { %v789_v4 = vpack.c.bf16 %v781_v2, %v780_v3  ;;  %8658 = vmatprep.subr.bf16.mxu0 %v9247_v22  ;;  %8094 = vmatprep.subr.bf16.mxu1 %v9248_v24  ;;  %v7460_v2 = vld [vmem:[#allocation5] ss:$0 sm:$0xff] }
 0x2d2   :  { %v11135_v5 = vpop.permute.xlu1 %773  ;;  %v11137_v6 = vpop.permute.xlu0 %768 }
 0x2d3   :  { %v783_v7 = vmul.f32 %v11135_v5, %v11075_v25  ;;  %8650 = vmatprep.mubr.bf16.mxu0 %v789_v4  ;;  %v782_v8 = vmul.f32 %v11137_v6, %v11079_v27  ;;  %v9249_v25 = vld [vmem:[%s12682_s4 + $0x8] sm:$0xff]   ;;  %v9250_v27 = vld [vmem:[%s12682_s4 + $0x98] sm:$0xff]  }
 0x2d4   :  { %8659 = vmatpush3.bf16.msra.mxu0 %v9247_v22  ;;  %8095 = vmatpush3.bf16.msra.mxu1 %v9249_v25 }
 0x2d5   :  { %v791_v9 = vpack.c.bf16 %v783_v7, %v782_v8  ;;  %8660 = vmatprep.subr.bf16.mxu0 %v9250_v27  ;;  %8096 = vmatprep.subr.bf16.mxu1 %v9251_v28 }
 0x2d7   :  { %1048 = vmatmul.mubr.bf16.gmra.mrb[12].mxu1 %v790_v63  ;;  %8651 = vmatmul.mubr.bf16.gmra.mrb[12].mxu0 %v791_v9 }
 0x2d8   :  { %8661 = vmatpush3.bf16.msra.mxu0 %v9250_v27  ;;  %8097 = vmatpush3.bf16.msra.mxu1 %v9252_v29 }
 0x2d9   :  { %8662 = vmatprep.subr.bf16.mxu0 %v9253_v30  ;;  %8098 = vmatprep.subr.bf16.mxu1 %v9254_v31 }
 0x2dc   :  { %8663 = vmatpush3.bf16.msra.mxu0 %v9253_v30  ;;  %8099 = vmatpush3.bf16.msra.mxu1 %v9255_v26 }
 0x2dd   :  { %8664 = vmatprep.subr.bf16.mxu0 %v9256_v32  ;;  %8100 = vmatprep.subr.bf16.mxu1 %v9257_v35 }
 0x2e0   :  { %8665 = vmatpush3.bf16.msra.mxu0 %v9256_v32  ;;  %8101 = vmatpush3.bf16.msra.mxu1 %v9258_v38 }
 0x2e1   :  { %8666 = vmatprep.subr.bf16.mxu0 %v9259_v40  ;;  %8102 = vmatprep.subr.bf16.mxu1 %v9260_v41 }
 0x2e4   :  { %8667 = vmatpush3.bf16.msra.mxu0 %v9259_v40  ;;  %8103 = vmatpush3.bf16.msra.mxu1 %v9261_v42 }
 0x2e5   :  { %8668 = vmatprep.subr.bf16.mxu0 %v9262_v43  ;;  %8104 = vmatprep.subr.bf16.mxu1 %v9263_v46 }
 0x2e8   :  { %8669 = vmatpush3.bf16.msra.mxu0 %v9262_v43  ;;  %8105 = vmatpush3.bf16.msra.mxu1 %v9264_v47 }
 0x2e9   :  { %8106 = vmatprep.subr.bf16.mxu1 %v9265_v49 }
 0x2ec   :  { %8107 = vmatpush3.bf16.msra.mxu1 %v9266_v39 }
 0x327   :  { %v11143_v10 = vpop.f32.mrb[0].mxu0 }
 0x328   :  { %v11145_v11 = vpop.f32.mrb[1].mxu0 }
 0x329   :  { %v11147_v12 = vpop.f32.mrb[2].mxu0 }
 0x32a   :  { %v11150_v14 = vpop.f32.mrb[3].mxu0 }
 0x32f   :  { %v11153_v16 = vpop.f32.mrb[4].mxu0 }
 0x330   :  { %v11156_v18 = vpop.f32.mrb[5].mxu0 }
 0x331   :  { %v11159_v21 = vpop.f32.mrb[6].mxu0 }
 0x332   :  { %v11162_v23 = vpop.f32.mrb[7].mxu0 }
 0x392   :  { %v8056_v54 = vpop.f32.mrb[0].mxu1 }
 0x393   :  { %v8057_v55 = vpop.f32.mrb[1].mxu1 }
 0x394   :  { %v8058_v58 = vadd.f32 %v8057_v55, %v8056_v54  ;;  %v8059_v59 = vpop.f32.mrb[2].mxu1 }
 0x395   :  { %v8060_v60 = vpop.f32.mrb[3].mxu1 }
 0x396   :  { %v8061_v48 = vadd.f32 %v8060_v60, %v8059_v59  ;;  %v1026_v15 = vadd.f32 %v8058_v58, %v7460_v2 }
 0x398   :  { %v1029_v27 = vadd.f32 %v8061_v48, %v7460_v2 }
 0x39a   :  { %v8062_v62 = vpop.f32.mrb[4].mxu1 }
 0x39b   :  { %v8063_v63 = vpop.f32.mrb[5].mxu1 }
 0x39c   :  { %v8064_v3 = vadd.f32 %v8063_v63, %v8062_v62  ;;  %v8065_v4 = vpop.f32.mrb[6].mxu1 }
 0x39d   :  { %v8066_v7 = vpop.f32.mrb[7].mxu1 }
 0x39e   :  { %v8067_v8 = vadd.f32 %v8066_v7, %v8065_v4  ;;  %v1034_v9 = vadd.f32 %v8064_v3, %v7460_v2  ;;  %v8648_v13 = vpop.f32.mrb[8].mxu0 }
 0x39f   :  { %v1090_v17 = vpop.f32.mrb[9].mxu0 }
 0x3a0   :  { %v11183_v20 = vadd.f32 %v8648_v13, %v1034_v9  ;;  %v11185_v22 = vadd.f32 %v1090_v17, %v1026_v15  ;;  %v1037_v24 = vadd.f32 %v8067_v8, %v7460_v2  ;;  %v8649_v25 = vpop.f32.mrb[10].mxu0 }
 0x3a1   :  { %v1093_v28 = vpop.f32.mrb[11].mxu0 }
 0x3a2   :  { %v7487_v29 = vmul.f32 -1.442695, %v11183_v20  ;;  %v7485_v30 = vmul.f32 -1.442695, %v11185_v22  ;;  %v1102_v31 = vadd.f32 %v8649_v25, %v1037_v24  ;;  %v11189_v26 = vadd.f32 %v1093_v28, %v1029_v27  ;;  %v8068_v32 = vpop.f32.mrb[8].mxu1 }
 0x3a3   :  { %v8069_v35 = vpop.f32.mrb[9].mxu1 }
 0x3a4   :  { %9611 = vpow2.f32 %v7487_v29  ;;  %v7488_v38 = vmul.f32 -1.442695, %v1102_v31  ;;  %v7486_v40 = vmul.f32 -1.442695, %v11189_v26  ;;  %v8070_v41 = vadd.f32 %v8069_v35, %v8068_v32  ;;  %v8071_v42 = vpop.f32.mrb[10].mxu1 }
 0x3a5   :  { %9613 = vpow2.f32 %v7485_v30  ;;  %v8072_v43 = vpop.f32.mrb[11].mxu1 }
 0x3a6   :  { %9615 = vpow2.f32 %v7488_v38  ;;  %v8073_v46 = vadd.f32 %v8072_v43, %v8071_v42  ;;  %v1042_v39 = vadd.f32 %v8070_v41, %v7460_v2 }
 0x3a7   :  { %9617 = vpow2.f32 %v7486_v40 }
 0x3a8   :  { %v1045_v62 = vadd.f32 %v8073_v46, %v7460_v2 }
 0x3aa   :  { %v8074_v47 = vpop.f32.mrb[12].mxu1  ;;  %v8652_v49 = vpop.f32.mrb[12].mxu0 }
 0x3ab   :  { %v8075_v54 = vpop.f32.mrb[13].mxu1  ;;  %v1106_v55 = vpop.f32.mrb[13].mxu0 }
 0x3ac   :  { %v8076_v58 = vadd.f32 %v8075_v54, %v8074_v47  ;;  %v11192_v59 = vadd.f32 %v1106_v55, %v1042_v39  ;;  %v8077_v60 = vpop.f32.mrb[14].mxu1  ;;  %v8653_v48 = vpop.f32.mrb[14].mxu0 }
 0x3ad   :  { %v8078_v63 = vpop.f32.mrb[15].mxu1  ;;  %v1109_v3 = vpop.f32.mrb[15].mxu0 }
 0x3ae   :  { %v9612_v4 = vpop.eup %9611  ;;  %v1050_v7 = vadd.f32 %v8076_v58, %v7460_v2  ;;  %v7489_v8 = vmul.f32 -1.442695, %v11192_v59  ;;  %v8079_v9 = vadd.f32 %v8078_v63, %v8077_v60  ;;  %v11195_v13 = vadd.f32 %v1109_v3, %v1045_v62 }
 0x3af   :  { %v9614_v15 = vpop.eup %9613  ;;  %v1147_v17 = vadd.f32 1.0, %v9612_v4 }
 0x3b0   :  { %v9616_v24 = vpop.eup %9615  ;;  %v1145_v25 = vadd.f32 1.0, %v9614_v15  ;;  %v11197_v27 = vadd.f32 %v8652_v49, %v1050_v7  ;;  %9619 = vpow2.f32 %v7489_v8  ;;  %v1053_v28 = vadd.f32 %v8079_v9, %v7460_v2 }
 0x3b1   :  { %v9618_v29 = vpop.eup %9617  ;;  %9621 = vrcp.f32 %v1147_v17  ;;  %v1148_v30 = vadd.f32 1.0, %v9616_v24  ;;  %v7490_v40 = vmul.f32 -1.442695, %v11195_v13 }
 0x3b2   :  { %9623 = vrcp.f32 %v1145_v25  ;;  %v1146_v32 = vadd.f32 1.0, %v9618_v29  ;;  %v7491_v35 = vmul.f32 -1.442695, %v11197_v27  ;;  %v11200_v38 = vadd.f32 %v8653_v48, %v1053_v28 }
 0x3b3   :  { %9625 = vrcp.f32 %v1148_v30 }
 0x3b4   :  { %9627 = vrcp.f32 %v1146_v32  ;;  %v7492_v41 = vmul.f32 -1.442695, %v11200_v38 }
 0x3b5   :  { %9629 = vpow2.f32 %v7491_v35 }
 0x3b6   :  { %9631 = vpow2.f32 %v7492_v41 }
 0x3b7   :  { %9633 = vpow2.f32 %v7490_v40 }
 0x3ba   :  { %v9620_v42 = vpop.eup %9619 }
 0x3bb   :  { %v9622_v2 = vpop.eup %9621  ;;  %v1149_v43 = vadd.f32 1.0, %v9620_v42 }
 0x3bc   :  { %v9624_v46 = vpop.eup %9623  ;;  %v11205_v47 = vmul.f32 %v9622_v2, %v11183_v20 }
 0x3bd   :  { %v9626_v49 = vpop.eup %9625  ;;  %v11208_v39 = vmul.f32 %v9624_v46, %v11185_v22  ;;  %9635 = vrcp.f32 %v1149_v43 }
 0x3be   :  { %v9628_v54 = vpop.eup %9627  ;;  %v1179_v55 = vrot.slane %v11205_v47, 7  ;;  %v11211_v58 = vmul.f32 %v9626_v49, %v1102_v31  ;;  %v1203_v48 = vrot.slane %v11205_v47, 1 }
 0x3bf   :  { %v9630_v60 = vpop.eup %9629  ;;  %v1177_v62 = vrot.slane %v11208_v39, 7  ;;  %v1201_v63 = vrot.slane %v11208_v39, 1  ;;  %v1170_v20 = vmul.f32 %v9628_v54, %v11189_v26 }
 0x3c0   :  { %v9632_v3 = vpop.eup %9631  ;;  %v1180_v4 = vrot.slane %v11211_v58, 7  ;;  %v1204_v22 = vrot.slane %v11211_v58, 1  ;;  %v1151_v7 = vadd.f32 1.0, %v9630_v60  ;;  %v1229_v8 = vpack.c.bf16 %v11211_v58, %v11205_v47  ;;  %v9269_v47 = vld [vmem:[#allocation11 + $0x10] sm:$0xff]   ;;  %v9270_v58 = vld [vmem:[#allocation11 + $0x18] sm:$0xff]  }
 0x3c1   :  { %v9634_v31 = vpop.eup %9633  ;;  %v1178_v9 = vrot.slane %v1170_v20, 7  ;;  %v1202_v15 = vrot.slane %v1170_v20, 1  ;;  %v1152_v17 = vadd.f32 1.0, %v9632_v3  ;;  %v1226_v24 = vpack.c.bf16 %v1170_v20, %v11208_v39 }
 0x3c2   :  { %v1213_v25 = vsel %vm719_vm1, %v1203_v48, %v1204_v22  ;;  %9637 = vrcp.f32 %v1151_v7  ;;  %v1150_v26 = vadd.f32 1.0, %v9634_v31  ;;  %v1189_v28 = vsel %vm646_vm0, %v1179_v55, %v1180_v4 }
 0x3c3   :  { %v1191_v29 = vsel %vm646_vm0, %v1177_v62, %v1178_v9  ;;  %9639 = vrcp.f32 %v1152_v17  ;;  %1468 = vmatprep.mubr.bf16.mxu1 %v1226_v24  ;;  %v1214_v30 = vsel %vm719_vm1, %v1202_v15, %v1203_v48  ;;  %v1215_v32 = vsel %vm719_vm1, %v1201_v63, %v1202_v15 }
 0x3c4   :  { %9641 = vrcp.f32 %v1150_v26  ;;  %v1218_v35 = vmul.f32 %v1214_v30, %v11103_v50  ;;  %v1217_v40 = vmul.f32 %v1215_v32, %v11105_v52  ;;  %v1190_v41 = vsel %vm646_vm0, %v1178_v9, %v1179_v55 }
 0x3c5   :  { %v1196_v42 = vmul.f32 %v1189_v28, %v11087_v36  ;;  %v1195_v2 = vmul.f32 %v1190_v41, %v11081_v33  ;;  %v1219_v7 = vmul.f32 %v1213_v25, %v11113_v57  ;;  %v1194_v17 = vmul.f32 %v1191_v29, %v11089_v37 }
 0x3c6   :  { %v1227_v46 = vpack.c.bf16 %v1218_v35, %v1217_v40 }
 0x3c7   :  { %v9636_v43 = vpop.eup %9635  ;;  %v1228_v39 = vpack.c.bf16 %v1196_v42, %v1195_v2 }
 0x3c8   :  { %v1173_v49 = vmul.f32 %v9636_v43, %v11192_v59  ;;  %8670 = vmatprep.mubr.bf16.mxu0 %v1227_v46 }
 0x3ca   :  { %v1181_v54 = vrot.slane %v1173_v49, 7  ;;  %v1205_v60 = vrot.slane %v1173_v49, 1 }
 0x3cc   :  { %v9638_v48 = vpop.eup %9637  ;;  %v1212_v20 = vsel %vm719_vm1, %v1204_v22, %v1205_v60  ;;  %v1188_v3 = vsel %vm646_vm0, %v1180_v4, %v1181_v54 }
 0x3cd   :  { %v9640_v55 = vpop.eup %9639  ;;  %v1175_v31 = vmul.f32 %v9638_v48, %v11197_v27  ;;  %v1220_v9 = vmul.f32 %v1212_v20, %v11111_v56  ;;  %v1197_v27 = vmul.f32 %v1188_v3, %v11098_v45 }
 0x3ce   :  { %v9642_v15 = vpop.eup %9641  ;;  %v1176_v59 = vmul.f32 %v9640_v55, %v11200_v38 }
 0x3cf   :  { %v1207_v24 = vrot.slane %v1175_v31, 1  ;;  %v1174_v26 = vmul.f32 %v9642_v15, %v11195_v13  ;;  %v1230_v28 = vpack.c.bf16 %v1220_v9, %v1219_v7  ;;  %v1183_v22 = vrot.slane %v1175_v31, 7 }
 0x3d0   :  { %v1184_v30 = vrot.slane %v1176_v59, 7  ;;  %v1208_v32 = vrot.slane %v1176_v59, 1  ;;  %v1235_v4 = vpack.c.bf16 %v1176_v59, %v1175_v31  ;;  %v9267_v59 = vld [vmem:[#allocation11] sm:$0xff]  }
 0x3d1   :  { %v1182_v35 = vrot.slane %v1174_v26, 7  ;;  %v1206_v40 = vrot.slane %v1174_v26, 1  ;;  %8671 = vmatmul.mubr.bf16.vlgmr.msra.gmra.mrb[16].mxu0 %v1230_v28  ;;  %v1232_v25 = vpack.c.bf16 %v1174_v26, %v1173_v49  ;;  %v9273_v26 = vld [vmem:[#allocation11 + $0x30] sm:$0xff]   ;;  %v9274_v28 = vld [vmem:[#allocation11 + $0x38] sm:$0xff]  }
 0x3d2   :  { %v1192_v41 = vsel %vm646_vm0, %v1184_v30, %v1177_v62  ;;  %v1209_v38 = vsel %vm719_vm1, %v1207_v24, %v1208_v32  ;;  %v1216_v13 = vsel %vm719_vm1, %v1208_v32, %v1201_v63  ;;  %v1185_v29 = vsel %vm646_vm0, %v1183_v22, %v1184_v30  ;;  %v9276_v30 = vld [vmem:[#allocation14 + $0x8] sm:$0xff]   ;;  %v9277_v32 = vld [vmem:[#allocation14 + $0x10] sm:$0xff]  }
 0x3d3   :  { %v1210_v42 = vsel %vm719_vm1, %v1206_v40, %v1207_v24  ;;  %v1211_v2 = vsel %vm719_vm1, %v1205_v60, %v1206_v40  ;;  %v1193_v43 = vmul.f32 %v1192_v41, %v11083_v34  ;;  %v1223_v46 = vmul.f32 %v1209_v38, %v11137_v6  ;;  %v9268_v24 = vld [vmem:[#allocation11 + $0x8] sm:$0xff]  }
 0x3d4   :  { %v1221_v62 = vmul.f32 %v1211_v2, %v11129_v53  ;;  %v1222_v49 = vmul.f32 %v1210_v42, %v11127_v1  ;;  %v1224_v48 = vmul.f32 %v1216_v13, %v11135_v5  ;;  %v1187_v63 = vsel %vm646_vm0, %v1181_v54, %v1182_v35  ;;  %v9280_v40 = vld [vmem:[#allocation14 + $0x28] sm:$0xff]  }
 0x3d5   :  { %v1225_v20 = vpack.c.bf16 %v1194_v17, %v1193_v43  ;;  %v1198_v3 = vmul.f32 %v1187_v63, %v11096_v44  ;;  %v1186_v55 = vsel %vm646_vm0, %v1182_v35, %v1183_v22  ;;  %v1200_v60 = vmul.f32 %v1185_v29, %v11119_v61  ;;  %v9275_v22 = vld [vmem:[#allocation14] sm:$0xff]   ;;  %v7493_v29 = vld [vmem:[#allocation7] ss:$0 sm:$0xff] }
 0x3d6   :  { %v1233_v7 = vpack.c.bf16 %v1222_v49, %v1221_v62  ;;  %v1236_v31 = vpack.c.bf16 %v1224_v48, %v1223_v46  ;;  %v1199_v9 = vmul.f32 %v1186_v55, %v11121_v51  ;;  %v10588_v17 = vmov 0.0   ;;  %v9279_v35 = vld [vmem:[#allocation14 + $0x20] sm:$0xff]  }
 0x3d7   :  { %1469 = vmatmul.mubr.bf16.vlgmr.msra.gmra.mrb[16].mxu1 %v1225_v20  ;;  %v1231_v15 = vpack.c.bf16 %v1198_v3, %v1197_v27  ;;  %8678 = vmatprep.subr.bf16.mxu1 %v10588_v17 }
 0x3d8   :  { %8674 = vmatprep.mubr.bf16.mxu0 %v1233_v7  ;;  %1476 = vmatprep.mubr.bf16.mxu1 %v1229_v8  ;;  %v1234_v54 = vpack.c.bf16 %v1200_v60, %v1199_v9  ;;  %v9271_v8 = vld [vmem:[#allocation11 + $0x20] sm:$0xff]  }
 0x3d9   :  { %8675 = vmatmul.mubr.bf16.gmra.mrb[20].mxu0 %v1236_v31  ;;  %8698 = vmatprep.subr.bf16.mxu0 %v10588_v17 }
 0x3da   :  { %8679 = vmatpush3.bf16.msra.mxu1 %v9267_v59  ;;  %8714 = vmatprep.mubr.msk.bf16.mxu0 %vm10589_vm2, %v10588_v17 }
 0x3db   :  { %8680 = vmatprep.subr.bf16.mxu1 %v10588_v17  ;;  %8699 = vmatpush3.bf16.msra.mxu0 %v9275_v22 }
 0x3dc   :  { %8700 = vmatprep.subr.bf16.mxu0 %v10588_v17 }
 0x3de   :  { %8681 = vmatpush3.bf16.msra.mxu1 %v9268_v24 }
 0x3df   :  { %1477 = vmatmul.mubr.bf16.gmra.mrb[20].mxu1 %v1228_v39  ;;  %8682 = vmatprep.subr.bf16.mxu1 %v10588_v17  ;;  %v9272_v39 = vld [vmem:[#allocation11 + $0x28] sm:$0xff]  }
 0x3e0   :  { %1484 = vmatprep.mubr.bf16.mxu1 %v1232_v25  ;;  %8701 = vmatpush3.bf16.msra.mxu0 %v9276_v30 }
 0x3e1   :  { %8702 = vmatprep.subr.bf16.mxu0 %v10588_v17 }
 0x3e2   :  { %8683 = vmatpush3.bf16.msra.mxu1 %v9269_v47 }
 0x3e3   :  { %8684 = vmatprep.subr.bf16.mxu1 %v10588_v17 }
 0x3e4   :  { %8703 = vmatpush3.bf16.msra.mxu0 %v9277_v32 }
 0x3e5   :  { %8704 = vmatprep.subr.bf16.mxu0 %v10588_v17 }
 0x3e6   :  { %8685 = vmatpush3.bf16.msra.mxu1 %v9270_v58 }
 0x3e7   :  { %1485 = vmatmul.mubr.bf16.gmra.mrb[24].mxu1 %v1231_v15  ;;  %8686 = vmatprep.subr.bf16.mxu1 %v10588_v17 }
 0x3e8   :  { %1492 = vmatprep.mubr.bf16.mxu1 %v1235_v4  ;;  %v9278_v4 = vld [vmem:[#allocation14 + $0x18] sm:$0xff]  }
 0x3e9   :  { %8705 = vmatpush3.bf16.msra.mxu0 %v9278_v4 }
 0x3ea   :  { %8687 = vmatpush3.bf16.msra.mxu1 %v9271_v8  ;;  %8706 = vmatprep.subr.bf16.mxu0 %v10588_v17 }
 0x3eb   :  { %8688 = vmatprep.subr.bf16.mxu1 %v10588_v17 }
 0x3ed   :  { %8707 = vmatpush3.bf16.msra.mxu0 %v9279_v35 }
 0x3ee   :  { %8689 = vmatpush3.bf16.msra.mxu1 %v9272_v39  ;;  %8708 = vmatprep.subr.bf16.mxu0 %v10588_v17 }
 0x3ef   :  { %1493 = vmatmul.mubr.bf16.gmra.mrb[28].mxu1 %v1234_v54  ;;  %8690 = vmatprep.subr.bf16.mxu1 %v10588_v17 }
 0x3f0   :  { %8694 = vmatprep.mubr.msk.bf16.mxu1 %vm10589_vm2, %v10588_v17 }
 0x3f1   :  { %8709 = vmatpush3.bf16.msra.mxu0 %v9280_v40 }
 0x3f2   :  { %8691 = vmatpush3.bf16.msra.mxu1 %v9273_v26  ;;  %8710 = vmatprep.subr.bf16.mxu0 %v10588_v17 }
 0x3f3   :  { %8692 = vmatprep.subr.bf16.mxu1 %v10588_v17 }
 0x3f6   :  { %8693 = vmatpush3.bf16.msra.mxu1 %v9274_v28 }
 0x4a4   :  { %v8672_v25 = vpop.f32.mrb[16].mxu0 }
 0x4a5   :  { %v1535_v27 = vpop.f32.mrb[17].mxu0 }
 0x4a6   :  { %v8673_v41 = vpop.f32.mrb[18].mxu0 }
 0x4a7   :  { %v1538_v38 = vpop.f32.mrb[19].mxu0 }
 0x4aa   :  { %v8108_v13 = vpop.f32.mrb[16].mxu1 }
 0x4ab   :  { %v8109_v42 = vpop.f32.mrb[17].mxu1 }
 0x4ac   :  { %v8110_v2 = vadd.f32 %v8109_v42, %v8108_v13  ;;  %v8111_v43 = vpop.f32.mrb[18].mxu1  ;;  %v8676_v46 = vpop.f32.mrb[20].mxu0 }
 0x4ad   :  { %v8112_v62 = vpop.f32.mrb[19].mxu1  ;;  %v1551_v49 = vpop.f32.mrb[21].mxu0 }
 0x4ae   :  { %v1471_v48 = vadd.f32 %v8110_v2, %v7493_v29  ;;  %v8113_v63 = vadd.f32 %v8112_v62, %v8111_v43  ;;  %v8677_v20 = vpop.f32.mrb[22].mxu0 }
 0x4af   :  { %v1554_v3 = vpop.f32.mrb[23].mxu0 }
 0x4b0   :  { %v11296_v55 = vadd.f32 %v1535_v27, %v1471_v48  ;;  %v1474_v60 = vadd.f32 %v8113_v63, %v7493_v29 }
 0x4b2   :  { %v11298_v7 = vadd.f32 %v1538_v38, %v1474_v60  ;;  %v8114_v31 = vpop.f32.mrb[20].mxu1 }
 0x4b3   :  { %v8115_v9 = vpop.f32.mrb[21].mxu1 }
 0x4b4   :  { %v8116_v15 = vadd.f32 %v8115_v9, %v8114_v31  ;;  %v8117_v54 = vpop.f32.mrb[22].mxu1  ;;  %v1566_v58 = vadd.f32 %v11298_v7, %v11296_v55 }
 0x4b5   :  { %v8118_v59 = vpop.f32.mrb[23].mxu1 }
 0x4b6   :  { %v1479_v24 = vadd.f32 %v8116_v15, %v7493_v29  ;;  %v8119_v47 = vadd.f32 %v8118_v59, %v8117_v54 }
 0x4b8   :  { %v11302_v8 = vadd.f32 %v8672_v25, %v1479_v24  ;;  %v1482_v39 = vadd.f32 %v8119_v47, %v7493_v29 }
 0x4ba   :  { %v1567_v26 = vadd.f32 %v1566_v58, %v11302_v8  ;;  %v11305_v28 = vadd.f32 %v8673_v41, %v1482_v39  ;;  %v8120_v22 = vpop.f32.mrb[24].mxu1 }
 0x4bb   :  { %v8121_v30 = vpop.f32.mrb[25].mxu1 }
 0x4bc   :  { %v1568_v32 = vadd.f32 %v1567_v26, %v11305_v28  ;;  %v8122_v4 = vadd.f32 %v8121_v30, %v8120_v22  ;;  %v8123_v35 = vpop.f32.mrb[26].mxu1 }
 0x4bd   :  { %v8124_v40 = vpop.f32.mrb[27].mxu1 }
 0x4be   :  { %v1569_v27 = vrot.slane %v1568_v32, 4  ;;  %v1487_v38 = vadd.f32 %v8122_v4, %v7493_v29  ;;  %v8125_v13 = vadd.f32 %v8124_v40, %v8123_v35 }
 0x4c0   :  { %v11308_v42 = vadd.f32 %v1551_v49, %v1487_v38  ;;  %v1490_v2 = vadd.f32 %v8125_v13, %v7493_v29  ;;  %v1570_v25 = vadd.f32 %v1569_v27, %v1568_v32 }
 0x4c2   :  { %v11310_v43 = vadd.f32 %v1554_v3, %v1490_v2  ;;  %v8126_v62 = vpop.f32.mrb[28].mxu1  ;;  %v1571_v31 = vrot.slane %v1570_v25, 2 }
 0x4c3   :  { %v8127_v48 = vpop.f32.mrb[29].mxu1 }
 0x4c4   :  { %v8128_v41 = vadd.f32 %v8127_v48, %v8126_v62  ;;  %v8129_v63 = vpop.f32.mrb[30].mxu1  ;;  %v1575_v54 = vadd.f32 %v11310_v43, %v11308_v42  ;;  %v1572_v49 = vadd.f32 %v1571_v31, %v1570_v25  ;;  %v9281_v62 = vld [vmem:[#allocation14 + $0x30] sm:$0xff]   ;;  %v9282_v48 = vld [vmem:[#allocation14 + $0x38] sm:$0xff]  }
 0x4c5   :  { %v8130_v60 = vpop.f32.mrb[31].mxu1  ;;  %8711 = vmatpush3.bf16.msra.mxu0 %v9281_v62  ;;  %v9303_v62 = vld [vmem:[%s12683_s0 + $0x70] sm:$0xff]  }
 0x4c6   :  { %v1495_v9 = vadd.f32 %v8128_v41, %v7493_v29  ;;  %v8131_v15 = vadd.f32 %v8130_v60, %v8129_v63  ;;  %v1573_v39 = vrot.slane %v1572_v49, 1  ;;  %8712 = vmatprep.subr.bf16.mxu0 %v10588_v17  ;;  %v7518_v41 = vld [vmem:[#allocation13] ss:$0 sm:$0xff] }
 0x4c8   :  { %v11314_v59 = vadd.f32 %v8676_v46, %v1495_v9  ;;  %v1498_v24 = vadd.f32 %v8131_v15, %v7493_v29  ;;  %v1574_v30 = vadd.f32 %v1573_v39, %v1572_v49  ;;  %v9283_v49 = vld [vmem:[#allocation20] sm:$0xff]   ;;  %v9287_v39 = vld [vmem:[%s12683_s0] sm:$0xff]  }
 0x4c9   :  { %8713 = vmatpush3.bf16.msra.mxu0 %v9282_v48  ;;  %8718 = vmatprep.subr.bf16.mxu1 %v9283_v49  ;;  %v9301_v48 = vld [vmem:[#allocation20 + $0x38] sm:$0xff]  }
 0x4ca   :  { %v1576_v47 = vadd.f32 %v1575_v54, %v11314_v59  ;;  %v11317_v58 = vadd.f32 %v8677_v20, %v1498_v24  ;;  %v1585_v35 = vmul.f32 0.03125, %v1574_v30  ;;  %v9286_v30 = vld [vmem:[#allocation20 + $0x10] sm:$0xff]  }
 0x4cc   :  { %v1577_v3 = vadd.f32 %v1576_v47, %v11317_v58  ;;  %v1587_v38 = vpack.c.bf16 %v1585_v35, %v1585_v35  ;;  %v9284_v47 = vld [vmem:[#allocation20 + $0x8] sm:$0xff]   ;;  %v9289_v35 = vld [vmem:[#allocation20 + $0x18] sm:$0xff]  }
 0x4ce   :  { %v1578_v26 = vrot.slane %v1577_v3, 4  ;;  %v1614_v29 = vunpack.c.l.b16 %v1587_v38  ;;  %v9292_v38 = vld [vmem:[#allocation20 + $0x20] sm:$0xff]  }
 0x4d0   :  { %v1579_v22 = vadd.f32 %v1578_v26, %v1577_v3  ;;  %v9285_v3 = vld [vmem:[%s12683_s0 + $0x40] sm:$0xff]   ;;  %v9288_v26 = vld [vmem:[%s12683_s0 + $0x48] sm:$0xff]  }
 0x4d1   :  { %8174 = vmatprep.subr.bf16.mxu0 %v9285_v3 }
 0x4d2   :  { %v1580_v32 = vrot.slane %v1579_v22, 2 }
 0x4d4   :  { %v1581_v4 = vadd.f32 %v1580_v32, %v1579_v22  ;;  %v9290_v22 = vld [vmem:[%s12683_s0 + $0x8] sm:$0xff]   ;;  %v9291_v32 = vld [vmem:[%s12683_s0 + $0x50] sm:$0xff]  }
 0x4d6   :  { %v1582_v40 = vrot.slane %v1581_v4, 1 }
 0x4d8   :  { %v1583_v27 = vadd.f32 %v1582_v40, %v1581_v4  ;;  %v9293_v4 = vld [vmem:[%s12683_s0 + $0x10] sm:$0xff]   ;;  %v9294_v40 = vld [vmem:[%s12683_s0 + $0x58] sm:$0xff]  }
 0x4da   :  { %v1586_v46 = vmul.f32 0.03125, %v1583_v27  ;;  %v9296_v27 = vld [vmem:[%s12683_s0 + $0x18] sm:$0xff]  }
 0x4dc   :  { %v1588_v13 = vpack.c.bf16 %v1586_v46, %v1586_v46  ;;  %v9297_v46 = vld [vmem:[%s12683_s0 + $0x60] sm:$0xff]  }
 0x4de   :  { %v1615_v2 = vunpack.c.l.b16 %v1588_v13  ;;  %v9299_v13 = vld [vmem:[%s12683_s0 + $0x20] sm:$0xff]  }
 0x4e0   :  { %v1617_v20 = vsel %vm1616_vm3, %v1615_v2, %v1614_v29  ;;  %v9295_v29 = vld [vmem:[#allocation20 + $0x28] sm:$0xff]   ;;  %v9300_v2 = vld [vmem:[%s12683_s0 + $0x68] sm:$0xff]  }
 0x4e1   :  { %v1618_v25 = vpack.c.b16 %v1617_v20, %v1617_v20  ;;  %v9302_v20 = vld [vmem:[%s12683_s0 + $0x28] sm:$0xff]  }
 0x4e3   :  { %8695 = vmatmul.mubr.bf16.vlgmr.msra.gmra.mrb[32].mxu1 %v1618_v25  ;;  %v9298_v25 = vld [vmem:[#allocation20 + $0x30] sm:$0xff]  }
 0x4e4   :  { %8719 = vmatpush3.bf16.msra.mxu1 %v9283_v49 }
 0x4e5   :  { %8720 = vmatprep.subr.bf16.mxu1 %v9284_v47 }
 0x4e8   :  { %8721 = vmatpush3.bf16.msra.mxu1 %v9284_v47 }
 0x4e9   :  { %8722 = vmatprep.subr.bf16.mxu1 %v9286_v30 }
 0x4ec   :  { %8723 = vmatpush3.bf16.msra.mxu1 %v9286_v30 }
 0x4ed   :  { %8724 = vmatprep.subr.bf16.mxu1 %v9289_v35 }
 0x4f0   :  { %8725 = vmatpush3.bf16.msra.mxu1 %v9289_v35 }
 0x4f1   :  { %8726 = vmatprep.subr.bf16.mxu1 %v9292_v38 }
 0x4f4   :  { %8727 = vmatpush3.bf16.msra.mxu1 %v9292_v38  ;;  %v7451_v38 = vld [vmem:[#allocation10] ss:$0 sm:$0xff] }
 0x4f5   :  { %8728 = vmatprep.subr.bf16.mxu1 %v9295_v29 }
 0x4f8   :  { %8729 = vmatpush3.bf16.msra.mxu1 %v9295_v29 }
 0x4f9   :  { %8730 = vmatprep.subr.bf16.mxu1 %v9298_v25 }
 0x4fc   :  { %8731 = vmatpush3.bf16.msra.mxu1 %v9298_v25  ;;  %v606_v25 = vadd.f32 %v7451_v38, %v11145_v11 }
 0x4fd   :  { %8732 = vmatprep.subr.bf16.mxu1 %v9301_v48 }
 0x500   :  { %8733 = vmatpush3.bf16.msra.mxu1 %v9301_v48  ;;  %v609_v48 = vadd.f32 %v7451_v38, %v11150_v14 }
 0x5b6   :  { %v1702_v63 = vpop.f32.mrb[32].mxu1 }
 0x5b7   :  { %v1703_v60 = vadd.f32 %v7518_v41, %v1702_v63  ;;  %v8696_v31 = vpop.f32.mrb[33].mxu1  ;;  %v9304_v41 = vld [vmem:[%s12683_s0 + $0x30] sm:$0xff]   ;;  %v11337_v63 = vld [vmem:[%s12683_s0 + $0x80] sm:$0xff]  }
 0x5b8   :  { %v1705_v9 = vpop.f32.mrb[34].mxu1  ;;  %8742 = vmatprep.subr.bf16.mxu1 %v11337_v63  ;;  %v9307_v31 = vld [vmem:[%s12683_s0 + $0x38] sm:$0xff]  }
 0x5b9   :  { %v1708_v15 = vmax.f32 %v1703_v60, 0.0  ;;  %v8697_v54 = vpop.f32.mrb[35].mxu1  ;;  %v9306_v60 = vld [vmem:[%s12683_s0 + $0x78] sm:$0xff]   ;;  %v7527_v9 = vld [vmem:[#allocation16] ss:$0 sm:$0xff] }
 0x5bb   :  { %v1709_v24 = vpack.c.bf16 %v1708_v15, %v1708_v15 }
 0x5bd   :  { %8715 = vmatmul.mubr.bf16.vlgmr.msra.gmra.mrb[24].mxu0 %v1709_v24 }
 0x5be   :  { %8175 = vmatpush3.bf16.msra.mxu0 %v9287_v39 }
 0x5bf   :  { %8176 = vmatprep.subr.bf16.mxu0 %v9288_v26 }
 0x5c2   :  { %8177 = vmatpush3.bf16.msra.mxu0 %v9290_v22  ;;  %v10590_v22 = vmov 1966171168  }
 0x5c3   :  { %8178 = vmatprep.subr.bf16.mxu0 %v9291_v32  ;;  %v1829_v30 = vunpack.c.l.s4 %v10590_v22 }
 0x5c5   :  { %v1830_v32 = vunpack.c.0.s8 %v1829_v30 }
 0x5c6   :  { %8179 = vmatpush3.bf16.msra.mxu0 %v9293_v4 }
 0x5c7   :  { %8180 = vmatprep.subr.bf16.mxu0 %v9294_v40  ;;  %v11343_v4 = vsub.s32 %v1830_v32, %v10979_v19 }
 0x5ca   :  { %8181 = vmatpush3.bf16.msra.mxu0 %v9296_v27  ;;  %v11347_v27 = vsub.s32 0, %v10979_v19 }
 0x5cb   :  { %8182 = vmatprep.subr.bf16.mxu0 %v9297_v46 }
 0x5ce   :  { %8183 = vmatpush3.bf16.msra.mxu0 %v9299_v13 }
 0x5cf   :  { %8184 = vmatprep.subr.bf16.mxu0 %v9300_v2 }
 0x5d2   :  { %8185 = vmatpush3.bf16.msra.mxu0 %v9302_v20  ;;  %v614_v20 = vadd.f32 %v11143_v10, %v7451_v38  ;;  %v625_v10 = vadd.f32 %v7451_v38, %v11162_v23 }
 0x5d3   :  { %8186 = vmatprep.subr.bf16.mxu0 %v9303_v62  ;;  %v617_v62 = vadd.f32 %v11147_v12, %v7451_v38 }
 0x5d6   :  { %8187 = vmatpush3.bf16.msra.mxu0 %v9304_v41 }
 0x5d7   :  { %8188 = vmatprep.subr.bf16.mxu0 %v9306_v60 }
 0x5da   :  { %8189 = vmatpush3.bf16.msra.mxu0 %v9307_v31 }
 0x690   :  { %v1815_v15 = vpop.f32.mrb[24].mxu0 }
 0x691   :  { %v1816_v54 = vadd.f32 %v7527_v9, %v1815_v15  ;;  %v8716_v24 = vpop.f32.mrb[25].mxu0  ;;  %v622_v15 = vadd.f32 %v7451_v38, %v11156_v18  ;;  %v630_v18 = vadd.f32 %v11153_v16, %v7451_v38 }
 0x692   :  { %v1818_v49 = vpop.f32.mrb[26].mxu0 }
 0x693   :  { %v7536_v47 = vmul.f32 -1.442695, %v1816_v54  ;;  %v8717_v3 = vpop.f32.mrb[27].mxu0  ;;  %v633_v54 = vadd.f32 %v11159_v21, %v7451_v38 }
 0x695   :  { %9643 = vpow2.f32 %v7536_v47 }
 0x69f   :  { %v9644_v39 = vpop.eup %9643 }
 0x6a0   :  { %v1824_v26 = vadd.f32 1.0, %v9644_v39 }
 0x6a2   :  { %9645 = vrcp.f32 %v1824_v26 }
 0x6ac   :  { %v9646_v35 = vpop.eup %9645 }
 0x6ad   :  { %v1834_v40 = vrot.slane %v9646_v35, %v11343_v4 }
 0x6af   :  { %v1835_v46 = vcombine.high %v1834_v40, %v1834_v40  ;;  %v1842_v13 = vrot.slane %v1834_v40, %v11343_v4 }
 0x6b1   :  { %v1849_v29 = vrot.slane %v1835_v46, %v11343_v4  ;;  %v1853_v2 = vrot.slane %v1842_v13, %v11347_v27 }
 0x6b3   :  { %v1860_v41 = vmul.f32 %v1853_v2, %v11296_v55  ;;  %v1861_v60 = vmul.f32 %v1853_v2, %v11298_v7  ;;  %v1862_v31 = vmul.f32 %v1853_v2, %v11302_v8  ;;  %v1863_v9 = vmul.f32 %v1853_v2, %v11305_v28 }
 0x6b4   :  { %v1857_v11 = vrot.slane %v1849_v29, %v11347_v27 }
 0x6b5   :  { %v1868_v24 = vadd.f32 %v1860_v41, %v606_v25  ;;  %v1869_v12 = vadd.f32 %v1861_v60, %v609_v48  ;;  %v1870_v49 = vadd.f32 %v1862_v31, %v614_v20  ;;  %v1871_v14 = vadd.f32 %v1863_v9, %v617_v62 }
 0x6b6   :  { %v1864_v55 = vmul.f32 %v1857_v11, %v11308_v42  ;;  %v1865_v7 = vmul.f32 %v1857_v11, %v11310_v43  ;;  %v1867_v8 = vmul.f32 %v1857_v11, %v11317_v58  ;;  %v1866_v28 = vmul.f32 %v1857_v11, %v11314_v59 }
 0x6b7   :  { %v7537_v47 = vmul.f32 -1.442695, %v1868_v24  ;;  %v7538_v21 = vmul.f32 -1.442695, %v1869_v12  ;;  %v7539_v3 = vmul.f32 -1.442695, %v1870_v49 }
 0x6b8   :  { %v7540_v23 = vmul.f32 -1.442695, %v1871_v14  ;;  %v1872_v39 = vadd.f32 %v1864_v55, %v622_v15  ;;  %v1873_v26 = vadd.f32 %v1865_v7, %v625_v10  ;;  %v11369_v22 = vadd.f32 %v1867_v8, %v633_v54 }
 0x6b9   :  { %9647 = vpow2.f32 %v7537_v47  ;;  %v11371_v30 = vadd.f32 %v1866_v28, %v630_v18 }
 0x6ba   :  { %9649 = vpow2.f32 %v7538_v21  ;;  %v7541_v42 = vmul.f32 -1.442695, %v1872_v39  ;;  %v7542_v43 = vmul.f32 -1.442695, %v1873_v26  ;;  %v7544_v58 = vmul.f32 -1.442695, %v11369_v22 }
 0x6bb   :  { %9651 = vpow2.f32 %v7539_v3  ;;  %v7543_v16 = vmul.f32 -1.442695, %v11371_v30 }
 0x6bc   :  { %9653 = vpow2.f32 %v7540_v23 }
 0x6bd   :  { %9655 = vpow2.f32 %v7541_v42 }
 0x6be   :  { %9657 = vpow2.f32 %v7542_v43 }
 0x6bf   :  { %9659 = vpow2.f32 %v7544_v58 }
 0x6c0   :  { %9661 = vpow2.f32 %v7543_v16 }
 0x6c3   :  { %v9648_v59 = vpop.eup %9647 }
 0x6c4   :  { %v9650_v32 = vpop.eup %9649  ;;  %v1900_v35 = vadd.f32 1.0, %v9648_v59 }
 0x6c5   :  { %v9652_v40 = vpop.eup %9651  ;;  %v1901_v38 = vadd.f32 1.0, %v9650_v32  ;;  %v9308_v32 = vld [vmem:[%s12683_s0 + $0x88] sm:$0xff]  }
 0x6c6   :  { %v9654_v46 = vpop.eup %9653  ;;  %9663 = vrcp.f32 %v1900_v35  ;;  %v1902_v13 = vadd.f32 1.0, %v9652_v40 }
 0x6c7   :  { %v9656_v29 = vpop.eup %9655  ;;  %9665 = vrcp.f32 %v1901_v38  ;;  %v1903_v2 = vadd.f32 1.0, %v9654_v46 }
 0x6c8   :  { %v9658_v20 = vpop.eup %9657  ;;  %9667 = vrcp.f32 %v1902_v13  ;;  %v1904_v25 = vadd.f32 1.0, %v9656_v29 }
 0x6c9   :  { %v9660_v62 = vpop.eup %9659  ;;  %9669 = vrcp.f32 %v1903_v2  ;;  %v1905_v48 = vadd.f32 1.0, %v9658_v20 }
 0x6ca   :  { %v9662_v41 = vpop.eup %9661  ;;  %9671 = vrcp.f32 %v1904_v25  ;;  %v1907_v60 = vadd.f32 1.0, %v9660_v62 }
 0x6cb   :  { %9673 = vrcp.f32 %v1905_v48  ;;  %v1906_v31 = vadd.f32 1.0, %v9662_v41 }
 0x6cc   :  { %9675 = vrcp.f32 %v1907_v60 }
 0x6cd   :  { %9677 = vrcp.f32 %v1906_v31 }
 0x6d0   :  { %v9664_v9 = vpop.eup %9663 }
 0x6d1   :  { %v9666_v15 = vpop.eup %9665  ;;  %v11375_v54 = vmul.f32 %v9664_v9, %v1868_v24 }
 0x6d2   :  { %v9668_v10 = vpop.eup %9667  ;;  %v1925_v11 = vmul.f32 %v9666_v15, %v1869_v12 }
 0x6d3   :  { %v9670_v55 = vpop.eup %9669  ;;  %v2072_v7 = vrot.slane %v11375_v54, 7  ;;  %v11378_v8 = vmul.f32 %v9668_v10, %v1870_v49  ;;  %v2096_v28 = vrot.slane %v11375_v54, 1 }
 0x6d4   :  { %v9672_v18 = vpop.eup %9671  ;;  %v1932_v47 = vpack.c.bf16 %v1925_v11, %v11375_v54  ;;  %v2073_v21 = vrot.slane %v1925_v11, 7  ;;  %v1927_v3 = vmul.f32 %v9670_v55, %v1871_v14  ;;  %v2097_v23 = vrot.slane %v1925_v11, 1  ;;  %v9313_v54 = vld [vmem:[%s12683_s0 + $0xb0] sm:$0xff]  }
 0x6d5   :  { %v9674_v42 = vpop.eup %9673  ;;  %v11382_v43 = vmul.f32 %v9672_v18, %v1872_v39  ;;  %v2098_v24 = vrot.slane %v11378_v8, 1  ;;  %v2074_v12 = vrot.slane %v11378_v8, 7 }
 0x6d6   :  { %v9676_v58 = vpop.eup %9675  ;;  %8734 = vmatprep.mubr.bf16.mxu1 %v1932_v47  ;;  %2359 = vmatprep.mubr.bf16.mxu0 %v1932_v47  ;;  %v1933_v49 = vpack.c.bf16 %v1927_v3, %v11378_v8  ;;  %v2099_v16 = vrot.slane %v1927_v3, 1  ;;  %v11387_v59 = vmul.f32 %v9674_v42, %v1873_v26  ;;  %v2086_v14 = vsel %vm646_vm0, %v2072_v7, %v2073_v21  ;;  %v9310_v42 = vld [vmem:[%s12683_s0 + $0x98] sm:$0xff]  }
 0x6d7   :  { %v9678_v35 = vpop.eup %9677  ;;  %v2100_v39 = vrot.slane %v11382_v43, 1  ;;  %v11394_v40 = vmul.f32 %v9676_v58, %v11369_v22  ;;  %v2089_v38 = vmul.f32 %v2086_v14, %v11089_v37  ;;  %v2109_v46 = vsel %vm719_vm1, %v2097_v23, %v2098_v24 }
 0x6d8   :  { %8735 = vmatmul.mubr.bf16.vlgmr.msra.gmra.mrb[36].mxu1 %v1933_v49  ;;  %v11401_v26 = vpack.c.bf16 %v11387_v59, %v11382_v43  ;;  %v1930_v13 = vmul.f32 %v9678_v35, %v11371_v30  ;;  %v2110_v29 = vsel %vm719_vm1, %v2096_v28, %v2097_v23  ;;  %v2113_v22 = vmul.f32 %v2109_v46, %v11103_v50  ;;  %v9309_v30 = vld [vmem:[%s12683_s0 + $0x90] sm:$0xff]  }
 0x6d9   :  { %8743 = vmatpush3.bf16.msra.mxu1 %v11337_v63  ;;  %v2079_v2 = vrot.slane %v11394_v40, 7  ;;  %v2112_v20 = vmul.f32 %v2110_v29, %v11105_v52  ;;  %v2075_v25 = vrot.slane %v1927_v3, 7  ;;  %v2085_v62 = vsel %vm646_vm0, %v2073_v21, %v2074_v12 }
 0x6da   :  { %8738 = vmatprep.mubr.bf16.mxu1 %v11401_v26  ;;  %8744 = vmatprep.subr.bf16.mxu1 %v9308_v32  ;;  %v1935_v48 = vpack.c.bf16 %v11394_v40, %v1930_v13  ;;  %v2090_v41 = vmul.f32 %v2085_v62, %v11081_v33  ;;  %v2076_v60 = vrot.slane %v11382_v43, 7  ;;  %v2077_v63 = vrot.slane %v11387_v59, 7 }
 0x6db   :  { %v2087_v31 = vsel %vm646_vm0, %v2079_v2, %v2072_v7  ;;  %v2121_v9 = vpack.c.bf16 %v2113_v22, %v2112_v20  ;;  %v2084_v15 = vsel %vm646_vm0, %v2074_v12, %v2075_v25  ;;  %v2078_v10 = vrot.slane %v1930_v13, 7 }
 0x6dc   :  { %v2088_v11 = vmul.f32 %v2087_v31, %v11083_v34  ;;  %v2091_v55 = vmul.f32 %v2084_v15, %v11087_v36  ;;  %v2082_v8 = vsel %vm646_vm0, %v2076_v60, %v2077_v63  ;;  %v2083_v18 = vsel %vm646_vm0, %v2075_v25, %v2076_v60  ;;  %v9312_v60 = vld [vmem:[%s12683_s0 + $0xa8] sm:$0xff]   ;;  %v9316_v31 = vld [vmem:[%s12684_s25 + $0x40] sm:$0xff]  }
 0x6dd   :  { %8745 = vmatpush3.bf16.msra.mxu1 %v9308_v32  ;;  %v2092_v47 = vmul.f32 %v2083_v18, %v11098_v45  ;;  %v2093_v7 = vmul.f32 %v2082_v8, %v11096_v44  ;;  %v2080_v21 = vsel %vm646_vm0, %v2078_v10, %v2079_v2  ;;  %v2081_v3 = vsel %vm646_vm0, %v2077_v63, %v2078_v10  ;;  %v9319_v15 = vld [vmem:[%s12684_s25 + $0x48] sm:$0xff]   ;;  %v9323_v8 = vld [vmem:[%s12684_s25 + $0x10] sm:$0xff]   ;;  %v9324_v18 = vld [vmem:[%s12684_s25 + $0x98] sm:$0xff]  }
 0x6de   :  { %v2120_v23 = vpack.c.bf16 %v2089_v38, %v2088_v11  ;;  %8746 = vmatprep.subr.bf16.mxu1 %v9309_v30  ;;  %v2122_v43 = vpack.c.bf16 %v2091_v55, %v2090_v41  ;;  %v2094_v12 = vmul.f32 %v2081_v3, %v11121_v51  ;;  %v2095_v58 = vmul.f32 %v2080_v21, %v11119_v61  ;;  %v9320_v10 = vld [vmem:[%s12684_s25 + $0x8] sm:$0xff]   ;;  %v9321_v11 = vld [vmem:[%s12684_s25 + $0x90] sm:$0xff]   ;;  %v9327_v21 = vld [vmem:[%s12684_s25 + $0xa0] sm:$0xff]  }
 0x6df   :  { %v2124_v14 = vpack.c.bf16 %v2093_v7, %v2092_v47  ;;  %v2107_v32 = vsel %vm719_vm1, %v2099_v16, %v2100_v39  ;;  %v2108_v35 = vsel %vm719_vm1, %v2098_v24, %v2099_v16  ;;  %v2101_v46 = vrot.slane %v11387_v59, 1  ;;  %v9311_v24 = vld [vmem:[%s12683_s0 + $0xa0] sm:$0xff]   ;;  %8226 = vmatprep.subr.bf16.mxu0 %v9316_v31  ;;  %v9322_v55 = vld [vmem:[%s12684_s25 + $0x50] sm:$0xff]   ;;  %v9325_v47 = vld [vmem:[%s12684_s25 + $0x58] sm:$0xff]  }
 0x6e0   :  { %2360 = vmatmul.mubr.bf16.vlgmr.msra.gmra.mrb[28].mxu0 %v2120_v23  ;;  %8739 = vmatmul.mubr.bf16.gmra.mrb[40].mxu1 %v1935_v48  ;;  %v2126_v38 = vpack.c.bf16 %v2095_v58, %v2094_v12  ;;  %v2114_v29 = vmul.f32 %v2108_v35, %v11113_v57  ;;  %v2115_v22 = vmul.f32 %v2107_v32, %v11111_v56  ;;  %v2102_v2 = vrot.slane %v1930_v13, 1  ;;  %v9326_v7 = vld [vmem:[%s12684_s25 + $0x18] sm:$0xff]   ;;  %v9328_v3 = vld [vmem:[%s12684_s25 + $0x60] sm:$0xff]   ;;  %v9332_v12 = vld [vmem:[%s12684_s25 + $0x28] sm:$0xff]  }
 0x6e1   :  { %2367 = vmatprep.mubr.bf16.mxu0 %v1933_v49  ;;  %8747 = vmatpush3.bf16.msra.mxu1 %v9309_v30  ;;  %v2106_v20 = vsel %vm719_vm1, %v2100_v39, %v2101_v46  ;;  %v2103_v25 = vrot.slane %v11394_v40, 1  ;;  %v9329_v23 = vld [vmem:[%s12684_s25 + $0x20] sm:$0xff]   ;;  %v9333_v58 = vld [vmem:[%s12684_s25 + $0xb0] sm:$0xff]   ;;  %v9336_v35 = vld [vmem:[%s12684_s25 + $0xb8] sm:$0xff]  }
 0x6e2   :  { %8758 = vmatprep.mubr.bf16.mxu1 %v2121_v9  ;;  %8748 = vmatprep.subr.bf16.mxu1 %v9310_v42  ;;  %v2123_v16 = vpack.c.bf16 %v2115_v22, %v2114_v29  ;;  %v2105_v59 = vsel %vm719_vm1, %v2101_v46, %v2102_v2  ;;  %v2116_v62 = vmul.f32 %v2106_v20, %v11129_v53  ;;  %v9317_v9 = vld [vmem:[%s12684_s25] sm:$0xff]   ;;  %v9335_v32 = vld [vmem:[%s12684_s25 + $0x30] sm:$0xff]   ;;  %v9337_v46 = vld [vmem:[%s12684_s25 + $0x78] sm:$0xff]  }
 0x6e3   :  { %v2117_v13 = vmul.f32 %v2105_v59, %v11127_v1  ;;  %v2104_v49 = vsel %vm719_vm1, %v2102_v2, %v2103_v25  ;;  %v2111_v39 = vsel %vm719_vm1, %v2103_v25, %v2096_v28  ;;  %v9314_v28 = vld [vmem:[%s12683_s0 + $0xb8] sm:$0xff]   ;;  %8227 = vmatpush3.bf16.msra.mxu0 %v9317_v9 }
 0x6e4   :  { %v2118_v40 = vmul.f32 %v2104_v49, %v11137_v6  ;;  %v2119_v30 = vmul.f32 %v2111_v39, %v11135_v5  ;;  %8228 = vmatprep.subr.bf16.mxu0 %v9319_v15 }
 0x6e5   :  { %8749 = vmatpush3.bf16.msra.mxu1 %v9310_v42  ;;  %v2125_v41 = vpack.c.bf16 %v2117_v13, %v2116_v62  ;;  %v9330_v42 = vld [vmem:[%s12684_s25 + $0xa8] sm:$0xff]  }
 0x6e6   :  { %8750 = vmatprep.subr.bf16.mxu1 %v9311_v24  ;;  %v2127_v63 = vpack.c.bf16 %v2119_v30, %v2118_v40 }
 0x6e7   :  { %8229 = vmatpush3.bf16.msra.mxu0 %v9320_v10 }
 0x6e8   :  { %2368 = vmatmul.mubr.bf16.gmra.mrb[32].mxu0 %v2122_v43  ;;  %8230 = vmatprep.subr.bf16.mxu0 %v9322_v55  ;;  %v9331_v43 = vld [vmem:[%s12684_s25 + $0x68] sm:$0xff]  }
 0x6e9   :  { %2375 = vmatprep.mubr.bf16.mxu0 %v11401_v26  ;;  %8751 = vmatpush3.bf16.msra.mxu1 %v9311_v24  ;;  %v9315_v26 = vld [vmem:[%s12684_s25 + $0x80] sm:$0xff]   ;;  %v7554_v55 = vld [vmem:[#allocation17] ss:$0 sm:$0xff] }
 0x6ea   :  { %8752 = vmatprep.subr.bf16.mxu1 %v9312_v60 }
 0x6eb   :  { %8231 = vmatpush3.bf16.msra.mxu0 %v9323_v8 }
 0x6ec   :  { %8232 = vmatprep.subr.bf16.mxu0 %v9325_v47 }
 0x6ed   :  { %8753 = vmatpush3.bf16.msra.mxu1 %v9312_v60 }
 0x6ee   :  { %8754 = vmatprep.subr.bf16.mxu1 %v9313_v54 }
 0x6ef   :  { %8233 = vmatpush3.bf16.msra.mxu0 %v9326_v7 }
 0x6f0   :  { %2376 = vmatmul.mubr.bf16.gmra.mrb[36].mxu0 %v2124_v14  ;;  %8234 = vmatprep.subr.bf16.mxu0 %v9328_v3  ;;  %v9334_v14 = vld [vmem:[%s12684_s25 + $0x70] sm:$0xff]  }
 0x6f1   :  { %2383 = vmatprep.mubr.bf16.mxu0 %v1935_v48  ;;  %8755 = vmatpush3.bf16.msra.mxu1 %v9313_v54  ;;  %v9318_v48 = vld [vmem:[%s12684_s25 + $0x88] sm:$0xff]  }
 0x6f2   :  { %8756 = vmatprep.subr.bf16.mxu1 %v9314_v28 }
 0x6f3   :  { %8235 = vmatpush3.bf16.msra.mxu0 %v9329_v23 }
 0x6f4   :  { %8236 = vmatprep.subr.bf16.mxu0 %v9331_v43 }
 0x6f5   :  { %8757 = vmatpush3.bf16.msra.mxu1 %v9314_v28 }
 0x6f6   :  { %8766 = vmatprep.subr.bf16.mxu1 %v9315_v26 }
 0x6f7   :  { %8237 = vmatpush3.bf16.msra.mxu0 %v9332_v12 }
 0x6f8   :  { %2384 = vmatmul.mubr.bf16.gmra.mrb[40].mxu0 %v2126_v38  ;;  %8759 = vmatmul.mubr.bf16.vlgmr.msra.gmra.mrb[44].mxu1 %v2123_v16  ;;  %v9338_v38 = vld [vmem:[%s12684_s25 + $0x38] sm:$0xff]  }
 0x6f9   :  { %8762 = vmatprep.mubr.bf16.mxu1 %v2125_v41  ;;  %8767 = vmatpush3.bf16.msra.mxu1 %v9315_v26 }
 0x6fa   :  { %8768 = vmatprep.subr.bf16.mxu1 %v9318_v48  ;;  %8238 = vmatprep.subr.bf16.mxu0 %v9334_v14 }
 0x6fb   :  { %8239 = vmatpush3.bf16.msra.mxu0 %v9335_v32 }
 0x6fc   :  { %8240 = vmatprep.subr.bf16.mxu0 %v9337_v46 }
 0x6fd   :  { %8769 = vmatpush3.bf16.msra.mxu1 %v9318_v48 }
 0x6fe   :  { %8770 = vmatprep.subr.bf16.mxu1 %v9321_v11 }
 0x6ff   :  { %8241 = vmatpush3.bf16.msra.mxu0 %v9338_v38 }
 0x700   :  { %8763 = vmatmul.mubr.bf16.gmra.mrb[48].mxu1 %v2127_v63  ;;  %8790 = vmatprep.subr.bf16.mxu0 %v10588_v17 }
 0x701   :  { %8771 = vmatpush3.bf16.msra.mxu1 %v9321_v11 }
 0x702   :  { %8772 = vmatprep.subr.bf16.mxu1 %v9324_v18 }
 0x705   :  { %8773 = vmatpush3.bf16.msra.mxu1 %v9324_v18 }
 0x706   :  { %8774 = vmatprep.subr.bf16.mxu1 %v9327_v21 }
 0x709   :  { %8775 = vmatpush3.bf16.msra.mxu1 %v9327_v21 }
 0x70a   :  { %8776 = vmatprep.subr.bf16.mxu1 %v9330_v42 }
 0x70d   :  { %8777 = vmatpush3.bf16.msra.mxu1 %v9330_v42 }
 0x70e   :  { %8778 = vmatprep.subr.bf16.mxu1 %v9333_v58 }
 0x711   :  { %8779 = vmatpush3.bf16.msra.mxu1 %v9333_v58 }
 0x712   :  { %8780 = vmatprep.subr.bf16.mxu1 %v9336_v35 }
 0x715   :  { %8781 = vmatpush3.bf16.msra.mxu1 %v9336_v35 }
 0x716   :  { %8810 = vmatprep.subr.bf16.mxu1 %v10588_v17 }
 0x7ab   :  { %v11492_v29 = vpop.f32.mrb[36].mxu1 }
 0x7ac   :  { %v11494_v22 = vpop.f32.mrb[37].mxu1 }
 0x7ad   :  { %v11496_v2 = vpop.f32.mrb[38].mxu1 }
 0x7ae   :  { %v11498_v20 = vpop.f32.mrb[39].mxu1 }
 0x7b3   :  { %v8190_v25 = vpop.f32.mrb[28].mxu0  ;;  %v11500_v24 = vpop.f32.mrb[40].mxu1 }
 0x7b4   :  { %v8191_v16 = vpop.f32.mrb[29].mxu0  ;;  %v11502_v59 = vpop.f32.mrb[41].mxu1 }
 0x7b5   :  { %v8192_v62 = vadd.f32 %v8191_v16, %v8190_v25  ;;  %v8193_v13 = vpop.f32.mrb[30].mxu0  ;;  %v11504_v49 = vpop.f32.mrb[42].mxu1 }
 0x7b6   :  { %v8194_v39 = vpop.f32.mrb[31].mxu0  ;;  %v11506_v40 = vpop.f32.mrb[43].mxu1 }
 0x7b7   :  { %v8195_v30 = vadd.f32 %v8194_v39, %v8193_v13  ;;  %v2362_v7 = vadd.f32 %v8192_v62, %v7554_v55 }
 0x7b9   :  { %v2365_v32 = vadd.f32 %v8195_v30, %v7554_v55 }
 0x7bb   :  { %v8196_v41 = vpop.f32.mrb[32].mxu0 }
 0x7bc   :  { %v8197_v60 = vpop.f32.mrb[33].mxu0 }
 0x7bd   :  { %v8198_v63 = vadd.f32 %v8197_v60, %v8196_v41  ;;  %v8199_v54 = vpop.f32.mrb[34].mxu0 }
 0x7be   :  { %v8200_v28 = vpop.f32.mrb[35].mxu0 }
 0x7bf   :  { %v8201_v26 = vadd.f32 %v8200_v28, %v8199_v54  ;;  %v2370_v8 = vadd.f32 %v8198_v63, %v7554_v55 }
 0x7c1   :  { %v2373_v42 = vadd.f32 %v8201_v26, %v7554_v55 }
 0x7c3   :  { %v8202_v31 = vpop.f32.mrb[36].mxu0 }
 0x7c4   :  { %v8203_v9 = vpop.f32.mrb[37].mxu0 }
 0x7c5   :  { %v8204_v48 = vadd.f32 %v8203_v9, %v8202_v31  ;;  %v8205_v15 = vpop.f32.mrb[38].mxu0 }
 0x7c6   :  { %v8206_v10 = vpop.f32.mrb[39].mxu0 }
 0x7c7   :  { %v8207_v11 = vadd.f32 %v8206_v10, %v8205_v15  ;;  %v2378_v54 = vadd.f32 %v8204_v48, %v7554_v55 }
 0x7c9   :  { %v2381_v15 = vadd.f32 %v8207_v11, %v7554_v55 }
 0x7cb   :  { %v8208_v18 = vpop.f32.mrb[40].mxu0  ;;  %v8760_v47 = vpop.f32.mrb[44].mxu1 }
 0x7cc   :  { %v8209_v21 = vpop.f32.mrb[41].mxu0  ;;  %v11508_v3 = vadd.f32 %v8760_v47, %v2370_v8  ;;  %v2426_v23 = vpop.f32.mrb[45].mxu1 }
 0x7cd   :  { %v8210_v43 = vadd.f32 %v8209_v21, %v8208_v18  ;;  %v8211_v12 = vpop.f32.mrb[42].mxu0  ;;  %v11510_v58 = vadd.f32 %v2426_v23, %v2362_v7  ;;  %v8761_v14 = vpop.f32.mrb[46].mxu1 }
 0x7ce   :  { %v7581_v35 = vmul.f32 -1.442695, %v11508_v3  ;;  %v8212_v46 = vpop.f32.mrb[43].mxu0  ;;  %v2438_v38 = vadd.f32 %v8761_v14, %v2373_v42  ;;  %v2429_v25 = vpop.f32.mrb[47].mxu1 }
 0x7cf   :  { %v7579_v16 = vmul.f32 -1.442695, %v11510_v58  ;;  %v8213_v13 = vadd.f32 %v8212_v46, %v8211_v12  ;;  %v2430_v62 = vadd.f32 %v2429_v25, %v2365_v32  ;;  %v2386_v60 = vadd.f32 %v8210_v43, %v7554_v55 }
 0x7d0   :  { %9679 = vpow2.f32 %v7581_v35  ;;  %v7582_v39 = vmul.f32 -1.442695, %v2438_v38 }
 0x7d1   :  { %9681 = vpow2.f32 %v7579_v16  ;;  %v7580_v41 = vmul.f32 -1.442695, %v2430_v62  ;;  %v2389_v26 = vadd.f32 %v8213_v13, %v7554_v55 }
 0x7d2   :  { %9683 = vpow2.f32 %v7582_v39 }
 0x7d3   :  { %9685 = vpow2.f32 %v7580_v41  ;;  %v8764_v63 = vpop.f32.mrb[48].mxu1 }
 0x7d4   :  { %v11514_v28 = vadd.f32 %v8764_v63, %v2386_v60  ;;  %v2442_v30 = vpop.f32.mrb[49].mxu1 }
 0x7d5   :  { %v11516_v31 = vadd.f32 %v2442_v30, %v2378_v54  ;;  %v8765_v9 = vpop.f32.mrb[50].mxu1 }
 0x7d6   :  { %v7585_v10 = vmul.f32 -1.442695, %v11514_v28  ;;  %v11519_v8 = vadd.f32 %v8765_v9, %v2389_v26  ;;  %v2445_v18 = vpop.f32.mrb[51].mxu1 }
 0x7d7   :  { %v7583_v47 = vmul.f32 -1.442695, %v11516_v31  ;;  %v11522_v7 = vadd.f32 %v2445_v18, %v2381_v15 }
 0x7d8   :  { %9687 = vpow2.f32 %v7585_v10  ;;  %v7586_v48 = vmul.f32 -1.442695, %v11519_v8 }
 0x7d9   :  { %9689 = vpow2.f32 %v7583_v47  ;;  %v7584_v21 = vmul.f32 -1.442695, %v11522_v7 }
 0x7da   :  { %v9680_v23 = vpop.eup %9679  ;;  %9691 = vpow2.f32 %v7586_v48 }
 0x7db   :  { %v9682_v42 = vpop.eup %9681  ;;  %v2483_v43 = vadd.f32 1.0, %v9680_v23  ;;  %9693 = vpow2.f32 %v7584_v21 }
 0x7dc   :  { %v9684_v11 = vpop.eup %9683  ;;  %v2481_v55 = vadd.f32 1.0, %v9682_v42 }
 0x7dd   :  { %v9686_v12 = vpop.eup %9685  ;;  %9695 = vrcp.f32 %v2483_v43  ;;  %v2484_v14 = vadd.f32 1.0, %v9684_v11 }
 0x7de   :  { %9697 = vrcp.f32 %v2481_v55  ;;  %v2482_v32 = vadd.f32 1.0, %v9686_v12 }
 0x7df   :  { %9699 = vrcp.f32 %v2484_v14 }
 0x7e0   :  { %9701 = vrcp.f32 %v2482_v32 }
 0x7e2   :  { %v9688_v35 = vpop.eup %9687 }
 0x7e3   :  { %v9690_v46 = vpop.eup %9689  ;;  %v2487_v25 = vadd.f32 1.0, %v9688_v35 }
 0x7e4   :  { %v9692_v16 = vpop.eup %9691  ;;  %v2485_v13 = vadd.f32 1.0, %v9690_v46 }
 0x7e5   :  { %v9694_v39 = vpop.eup %9693  ;;  %9703 = vrcp.f32 %v2487_v25  ;;  %v2488_v41 = vadd.f32 1.0, %v9692_v16 }
 0x7e6   :  { %9705 = vrcp.f32 %v2485_v13  ;;  %v2486_v60 = vadd.f32 1.0, %v9694_v39 }
 0x7e7   :  { %v9696_v63 = vpop.eup %9695  ;;  %9707 = vrcp.f32 %v2488_v41 }
 0x7e8   :  { %v9698_v54 = vpop.eup %9697  ;;  %v11527_v30 = vmul.f32 %v9696_v63, %v11508_v3  ;;  %9709 = vrcp.f32 %v2486_v60 }
 0x7e9   :  { %v9700_v26 = vpop.eup %9699  ;;  %v2505_v9 = vmul.f32 %v9698_v54, %v11510_v58 }
 0x7ea   :  { %v9702_v15 = vpop.eup %9701  ;;  %v11530_v10 = vmul.f32 %v9700_v26, %v2438_v38  ;;  %v2515_v18 = vrot.slane %v11527_v30, 7  ;;  %v2539_v47 = vrot.slane %v11527_v30, 1 }
 0x7eb   :  { %v2506_v48 = vmul.f32 %v9702_v15, %v2430_v62  ;;  %v2513_v21 = vrot.slane %v2505_v9, 7  ;;  %v2537_v43 = vrot.slane %v2505_v9, 1 }
 0x7ec   :  { %v2516_v23 = vrot.slane %v11530_v10, 7  ;;  %v2540_v42 = vrot.slane %v11530_v10, 1  ;;  %v2565_v3 = vpack.c.bf16 %v11530_v10, %v11527_v30  ;;  %v9342_v30 = vld [vmem:[#allocation23 + $0x18] sm:$0xff]   ;;  %v9343_v10 = vld [vmem:[#allocation23 + $0x20] sm:$0xff]  }
 0x7ed   :  { %v2514_v11 = vrot.slane %v2506_v48, 7  ;;  %v2538_v55 = vrot.slane %v2506_v48, 1  ;;  %v2562_v58 = vpack.c.bf16 %v2506_v48, %v2505_v9 }
 0x7ee   :  { %v2549_v38 = vsel %vm719_vm1, %v2539_v47, %v2540_v42  ;;  %v2525_v12 = vsel %vm646_vm0, %v2515_v18, %v2516_v23 }
 0x7ef   :  { %v9704_v14 = vpop.eup %9703  ;;  %v2527_v62 = vsel %vm646_vm0, %v2513_v21, %v2514_v11  ;;  %2804 = vmatprep.mubr.bf16.mxu0 %v2562_v58  ;;  %v2550_v32 = vsel %vm719_vm1, %v2538_v55, %v2539_v47  ;;  %v2551_v35 = vsel %vm719_vm1, %v2537_v43, %v2538_v55  ;;  %v2555_v41 = vmul.f32 %v2549_v38, %v11113_v57 }
 0x7f0   :  { %v9706_v46 = vpop.eup %9705  ;;  %v2511_v25 = vmul.f32 %v9704_v14, %v11514_v28  ;;  %v2553_v16 = vmul.f32 %v2551_v35, %v11105_v52  ;;  %v2554_v13 = vmul.f32 %v2550_v32, %v11103_v50  ;;  %v2526_v63 = vsel %vm646_vm0, %v2514_v11, %v2515_v18 }
 0x7f1   :  { %v9708_v39 = vpop.eup %9707  ;;  %v2509_v60 = vmul.f32 %v9706_v46, %v11516_v31  ;;  %v2532_v54 = vmul.f32 %v2525_v12, %v11087_v36  ;;  %v2530_v9 = vmul.f32 %v2527_v62, %v11089_v37  ;;  %v2531_v57 = vmul.f32 %v2526_v63, %v11081_v33  ;;  %v9345_v63 = vld [vmem:[#allocation23 + $0x30] sm:$0xff]  }
 0x7f2   :  { %v9710_v26 = vpop.eup %9709  ;;  %v2519_v15 = vrot.slane %v2511_v25, 7  ;;  %v2512_v28 = vmul.f32 %v9708_v39, %v11519_v8  ;;  %v2563_v47 = vpack.c.bf16 %v2554_v13, %v2553_v16  ;;  %v2543_v52 = vrot.slane %v2511_v25, 1 }
 0x7f3   :  { %v2541_v48 = vrot.slane %v2509_v60, 1  ;;  %v2510_v50 = vmul.f32 %v9710_v26, %v11522_v7  ;;  %v2517_v55 = vrot.slane %v2509_v60, 7  ;;  %v2564_v38 = vpack.c.bf16 %v2532_v54, %v2531_v57  ;;  %v9347_v54 = vld [vmem:[#allocation26] sm:$0xff]   ;;  %v9346_v26 = vld [vmem:[#allocation23 + $0x38] sm:$0xff]  }
 0x7f4   :  { %v2520_v31 = vrot.slane %v2512_v28, 7  ;;  %v2544_v58 = vrot.slane %v2512_v28, 1  ;;  %8782 = vmatprep.mubr.bf16.mxu1 %v2563_v47  ;;  %v2571_v18 = vpack.c.bf16 %v2512_v28, %v2511_v25  ;;  %v9350_v28 = vld [vmem:[#allocation26 + $0x18] sm:$0xff]   ;;  %v9351_v47 = vld [vmem:[#allocation26 + $0x20] sm:$0xff]  }
 0x7f5   :  { %v2548_v36 = vsel %vm719_vm1, %v2540_v42, %v2541_v48  ;;  %v2518_v11 = vrot.slane %v2510_v50, 7  ;;  %v2542_v37 = vrot.slane %v2510_v50, 1  ;;  %v2568_v16 = vpack.c.bf16 %v2510_v50, %v2509_v60 }
 0x7f6   :  { %v2556_v8 = vmul.f32 %v2548_v36, %v11111_v56  ;;  %v2528_v12 = vsel %vm646_vm0, %v2520_v31, %v2513_v21  ;;  %v2545_v7 = vsel %vm719_vm1, %v2543_v52, %v2544_v58  ;;  %v2552_v33 = vsel %vm719_vm1, %v2544_v58, %v2537_v43 }
 0x7f7   :  { %v2529_v14 = vmul.f32 %v2528_v12, %v11083_v34  ;;  %v2546_v62 = vsel %vm719_vm1, %v2542_v37, %v2543_v52  ;;  %v2547_v42 = vsel %vm719_vm1, %v2541_v48, %v2542_v37  ;;  %v2559_v32 = vmul.f32 %v2545_v7, %v11137_v6  ;;  %v9352_v52 = vld [vmem:[#allocation26 + $0x28] sm:$0xff]  }
 0x7f8   :  { %v2566_v56 = vpack.c.bf16 %v2556_v8, %v2555_v41  ;;  %v2557_v35 = vmul.f32 %v2547_v42, %v11129_v53  ;;  %v2558_v21 = vmul.f32 %v2546_v62, %v11127_v1  ;;  %v2560_v46 = vmul.f32 %v2552_v33, %v11135_v5 }
 0x7f9   :  { %v2561_v25 = vpack.c.bf16 %v2530_v9, %v2529_v14  ;;  %v2523_v34 = vsel %vm646_vm0, %v2517_v55, %v2518_v11  ;;  %v2524_v43 = vsel %vm646_vm0, %v2516_v23, %v2517_v55  ;;  %v2521_v1 = vsel %vm646_vm0, %v2519_v15, %v2520_v31  ;;  %v9348_v9 = vld [vmem:[#allocation26 + $0x8] sm:$0xff]   ;;  %v7587_v55 = vld [vmem:[#allocation19] ss:$0 sm:$0xff] }
 0x7fa   :  { %8783 = vmatmul.mubr.bf16.vlgmr.msra.gmra.mrb[52].mxu1 %v2566_v56  ;;  %v2569_v13 = vpack.c.bf16 %v2558_v21, %v2557_v35  ;;  %v2572_v39 = vpack.c.bf16 %v2560_v46, %v2559_v32  ;;  %v2533_v6 = vmul.f32 %v2524_v43, %v11098_v45  ;;  %v2534_v41 = vmul.f32 %v2523_v34, %v11096_v44  ;;  %v9339_v44 = vld [vmem:[#allocation23] sm:$0xff]  }
 0x7fb   :  { %2805 = vmatmul.mubr.bf16.vlgmr.msra.gmra.mrb[44].mxu0 %v2561_v25  ;;  %v2522_v53 = vsel %vm646_vm0, %v2518_v11, %v2519_v15  ;;  %v2536_v60 = vmul.f32 %v2521_v1, %v11119_v61  ;;  %v9341_v61 = vld [vmem:[#allocation23 + $0x10] sm:$0xff]   ;;  %8811 = vmatpush3.bf16.msra.mxu1 %v9347_v54 }
 0x7fc   :  { %2812 = vmatprep.mubr.bf16.mxu0 %v2565_v3  ;;  %8786 = vmatprep.mubr.bf16.mxu1 %v2569_v13  ;;  %v2567_v5 = vpack.c.bf16 %v2534_v41, %v2533_v6  ;;  %v2535_v23 = vmul.f32 %v2522_v53, %v11121_v51  ;;  %v9340_v51 = vld [vmem:[#allocation23 + $0x8] sm:$0xff]   ;;  %v9349_v15 = vld [vmem:[#allocation26 + $0x10] sm:$0xff]  }
 0x7fd   :  { %8791 = vmatpush3.bf16.msra.mxu0 %v9339_v44  ;;  %v9344_v3 = vld [vmem:[#allocation23 + $0x28] sm:$0xff]   ;;  %8812 = vmatprep.subr.bf16.mxu1 %v10588_v17 }
 0x7fe   :  { %v2570_v45 = vpack.c.bf16 %v2536_v60, %v2535_v23  ;;  %8792 = vmatprep.subr.bf16.mxu0 %v10588_v17 }
 0x7ff   :  { %8813 = vmatpush3.bf16.msra.mxu1 %v9348_v9 }
 0x800   :  { %8814 = vmatprep.subr.bf16.mxu1 %v10588_v17 }
 0x801   :  { %8793 = vmatpush3.bf16.msra.mxu0 %v9340_v51 }
 0x802   :  { %8787 = vmatmul.mubr.bf16.gmra.mrb[56].mxu1 %v2572_v39  ;;  %8794 = vmatprep.subr.bf16.mxu0 %v10588_v17 }
 0x803   :  { %2813 = vmatmul.mubr.bf16.gmra.mrb[48].mxu0 %v2564_v38  ;;  %8826 = vmatprep.mubr.msk.bf16.mxu1 %vm10589_vm2, %v10588_v17 }
 0x804   :  { %2820 = vmatprep.mubr.bf16.mxu0 %v2568_v16  ;;  %8815 = vmatpush3.bf16.msra.mxu1 %v9349_v15 }
 0x805   :  { %8795 = vmatpush3.bf16.msra.mxu0 %v9341_v61  ;;  %8816 = vmatprep.subr.bf16.mxu1 %v10588_v17 }
 0x806   :  { %8796 = vmatprep.subr.bf16.mxu0 %v10588_v17 }
 0x808   :  { %8817 = vmatpush3.bf16.msra.mxu1 %v9350_v28 }
 0x809   :  { %8797 = vmatpush3.bf16.msra.mxu0 %v9342_v30  ;;  %8818 = vmatprep.subr.bf16.mxu1 %v10588_v17 }
 0x80a   :  { %8798 = vmatprep.subr.bf16.mxu0 %v10588_v17 }
 0x80b   :  { %2821 = vmatmul.mubr.bf16.gmra.mrb[52].mxu0 %v2567_v5 }
 0x80c   :  { %2828 = vmatprep.mubr.bf16.mxu0 %v2571_v18  ;;  %8819 = vmatpush3.bf16.msra.mxu1 %v9351_v47 }
 0x80d   :  { %8799 = vmatpush3.bf16.msra.mxu0 %v9343_v10  ;;  %8820 = vmatprep.subr.bf16.mxu1 %v10588_v17 }
 0x80e   :  { %8800 = vmatprep.subr.bf16.mxu0 %v10588_v17 }
 0x810   :  { %8821 = vmatpush3.bf16.msra.mxu1 %v9352_v52 }
 0x811   :  { %8801 = vmatpush3.bf16.msra.mxu0 %v9344_v3  ;;  %8822 = vmatprep.subr.bf16.mxu1 %v10588_v17 }
 0x812   :  { %8802 = vmatprep.subr.bf16.mxu0 %v10588_v17 }
 0x813   :  { %2829 = vmatmul.mubr.bf16.gmra.mrb[56].mxu0 %v2570_v45 }
 0x814   :  { %8806 = vmatprep.mubr.msk.bf16.mxu0 %vm10589_vm2, %v10588_v17 }
 0x815   :  { %8803 = vmatpush3.bf16.msra.mxu0 %v9345_v63 }
 0x816   :  { %8804 = vmatprep.subr.bf16.mxu0 %v10588_v17 }
 0x819   :  { %8805 = vmatpush3.bf16.msra.mxu0 %v9346_v26 }
 0x8cd   :  { %v8784_v48 = vpop.f32.mrb[52].mxu1 }
 0x8ce   :  { %v8242_v50 = vpop.f32.mrb[44].mxu0  ;;  %v2871_v57 = vpop.f32.mrb[53].mxu1 }
 0x8cf   :  { %v8243_v31 = vpop.f32.mrb[45].mxu0  ;;  %v8785_v58 = vpop.f32.mrb[54].mxu1 }
 0x8d0   :  { %v8244_v18 = vadd.f32 %v8243_v31, %v8242_v50  ;;  %v8245_v36 = vpop.f32.mrb[46].mxu0  ;;  %v2874_v11 = vpop.f32.mrb[55].mxu1 }
 0x8d1   :  { %v8246_v37 = vpop.f32.mrb[47].mxu0 }
 0x8d2   :  { %v2807_v38 = vadd.f32 %v8244_v18, %v7587_v55  ;;  %v8247_v8 = vadd.f32 %v8246_v37, %v8245_v36 }
 0x8d4   :  { %v11610_v12 = vadd.f32 %v2871_v57, %v2807_v38  ;;  %v2810_v7 = vadd.f32 %v8247_v8, %v7587_v55 }
 0x8d5   :  { %v8788_v33 = vpop.f32.mrb[56].mxu1 }
 0x8d6   :  { %v11612_v14 = vadd.f32 %v2874_v11, %v2810_v7  ;;  %v8248_v62 = vpop.f32.mrb[48].mxu0  ;;  %v2887_v42 = vpop.f32.mrb[57].mxu1 }
 0x8d7   :  { %v8249_v32 = vpop.f32.mrb[49].mxu0  ;;  %v8789_v56 = vpop.f32.mrb[58].mxu1 }
 0x8d8   :  { %v8250_v35 = vadd.f32 %v8249_v32, %v8248_v62  ;;  %v8251_v21 = vpop.f32.mrb[50].mxu0  ;;  %v2890_v46 = vpop.f32.mrb[59].mxu1  ;;  %v2902_v43 = vadd.f32 %v11612_v14, %v11610_v12 }
 0x8d9   :  { %v8252_v25 = vpop.f32.mrb[51].mxu0 }
 0x8da   :  { %v2815_v16 = vadd.f32 %v8250_v35, %v7587_v55  ;;  %v8253_v34 = vadd.f32 %v8252_v25, %v8251_v21 }
 0x8dc   :  { %v11616_v13 = vadd.f32 %v8784_v48, %v2815_v16  ;;  %v2818_v39 = vadd.f32 %v8253_v34, %v7587_v55 }
 0x8de   :  { %v2903_v6 = vadd.f32 %v2902_v43, %v11616_v13  ;;  %v11619_v41 = vadd.f32 %v8785_v58, %v2818_v39  ;;  %v8254_v1 = vpop.f32.mrb[52].mxu0  ;;  %v9353_v43 = vld [vmem:[#allocation26 + $0x30] sm:$0xff]   ;;  %v9354_v39 = vld [vmem:[#allocation26 + $0x38] sm:$0xff]  }
 0x8df   :  { %v8255_v53 = vpop.f32.mrb[53].mxu0  ;;  %8823 = vmatpush3.bf16.msra.mxu1 %v9353_v43 }
 0x8e0   :  { %v2904_v5 = vadd.f32 %v2903_v6, %v11619_v41  ;;  %v8256_v23 = vadd.f32 %v8255_v53, %v8254_v1  ;;  %v8257_v60 = vpop.f32.mrb[54].mxu0  ;;  %8824 = vmatprep.subr.bf16.mxu1 %v10588_v17  ;;  %v7612_v6 = vld [vmem:[#allocation25] ss:$0 sm:$0xff] }
 0x8e1   :  { %v8258_v45 = vpop.f32.mrb[55].mxu0 }
 0x8e2   :  { %v2905_v44 = vrot.slane %v2904_v5, 4  ;;  %v2823_v51 = vadd.f32 %v8256_v23, %v7587_v55  ;;  %v8259_v61 = vadd.f32 %v8258_v45, %v8257_v60 }
 0x8e3   :  { %8825 = vmatpush3.bf16.msra.mxu1 %v9354_v39 }
 0x8e4   :  { %v11622_v30 = vadd.f32 %v2887_v42, %v2823_v51  ;;  %v2826_v10 = vadd.f32 %v8259_v61, %v7587_v55  ;;  %v2906_v3 = vadd.f32 %v2905_v44, %v2904_v5  ;;  %v3266_v51 = vld [vmem:[%s12685_s10] sm:$0xff]  ;;  %v9358_v61 = vld [vmem:[%s12686_s9 + $0x8] ss:$16 sps:$4 sm:$0xff]  }
 0x8e6   :  { %v11624_v63 = vadd.f32 %v2890_v46, %v2826_v10  ;;  %v8260_v54 = vpop.f32.mrb[56].mxu0  ;;  %v2907_v47 = vrot.slane %v2906_v3, 2  ;;  %v9360_v10 = vld [vmem:[%s12686_s9 + $0xc] ss:$16 sps:$4 sm:$0xff]  }
 0x8e7   :  { %v8261_v26 = vpop.f32.mrb[57].mxu0  ;;  %3746 = vmatprep.subr.bf16.mxu1 %v9360_v10 }
 0x8e8   :  { %v8262_v9 = vadd.f32 %v8261_v26, %v8260_v54  ;;  %v8263_v15 = vpop.f32.mrb[58].mxu0  ;;  %v2911_v50 = vadd.f32 %v11624_v63, %v11622_v30  ;;  %v2908_v58 = vadd.f32 %v2907_v47, %v2906_v3  ;;  %v9366_v3 = vld [vmem:[%s12686_s9 + $0x2c] ss:$16 sps:$4 sm:$0xff]   ;;  %v9364_v54 = vld [vmem:[%s12686_s9 + $0x28] ss:$16 sps:$4 sm:$0xff]  }
 0x8e9   :  { %v8264_v28 = vpop.f32.mrb[59].mxu0  ;;  %v9372_v26 = vld [vmem:[%s12686_s9 + $0x4c] ss:$16 sps:$4 sm:$0xff]  }
 0x8ea   :  { %v2831_v52 = vadd.f32 %v8262_v9, %v7587_v55  ;;  %v8265_v48 = vadd.f32 %v8264_v28, %v8263_v15  ;;  %v2909_v37 = vrot.slane %v2908_v58, 1  ;;  %v9370_v9 = vld [vmem:[%s12686_s9 + $0x48] ss:$16 sps:$4 sm:$0xff]   ;;  %v9378_v15 = vld [vmem:[%s12686_s9 + $0x6c] ss:$16 sps:$4 sm:$0xff]  }
 0x8eb   :  { %v9376_v28 = vld [vmem:[%s12686_s9 + $0x68] ss:$16 sps:$4 sm:$0xff]   ;;  %v9384_v47 = vld [vmem:[%s12686_s9 + $0x8c] ss:$16 sps:$4 sm:$0xff]  }
 0x8ec   :  { %v11628_v57 = vadd.f32 %v8788_v33, %v2831_v52  ;;  %v2834_v31 = vadd.f32 %v8265_v48, %v7587_v55  ;;  %v2910_v7 = vadd.f32 %v2909_v37, %v2908_v58  ;;  %v9382_v52 = vld [vmem:[%s12686_s9 + $0x88] ss:$16 sps:$4 sm:$0xff]   ;;  %v9390_v48 = vld [vmem:[%s12686_s9 + $0xac] ss:$16 sps:$4 sm:$0xff]  }
 0x8ed   :  { %v9394_v58 = vld [vmem:[%s12686_s9 + $0xc8] ss:$16 sps:$4 sm:$0xff]  }
 0x8ee   :  { %v2912_v18 = vadd.f32 %v2911_v50, %v11628_v57  ;;  %v11631_v36 = vadd.f32 %v8789_v56, %v2834_v31  ;;  %v2920_v32 = vmul.f32 0.03125, %v2910_v7  ;;  %v9388_v50 = vld [vmem:[%s12686_s9 + $0xa8] ss:$16 sps:$4 sm:$0xff]   ;;  %v9396_v31 = vld [vmem:[%s12686_s9 + $0xcc] ss:$16 sps:$4 sm:$0xff]  }
 0x8f0   :  { %v2913_v11 = vadd.f32 %v2912_v18, %v11631_v36  ;;  %v2922_v46 = vpack.c.bf16 %v2920_v32, %v2920_v32  ;;  %v7621_v18 = vld [vmem:[#allocation28] ss:$0 sm:$0xff] }
 0x8f2   :  { %v2914_v38 = vrot.slane %v2913_v11, 4  ;;  %v2949_v55 = vunpack.c.l.b16 %v2922_v46  ;;  %v7545_v46 = vld [vmem:[#allocation22] ss:$0 sm:$0xff] }
 0x8f3   :  { %v2053_v43 = vadd.f32 %v11496_v2, %v7545_v46  ;;  %v2045_v39 = vadd.f32 %v7545_v46, %v11498_v20 }
 0x8f4   :  { %v2915_v8 = vadd.f32 %v2914_v38, %v2913_v11 }
 0x8f6   :  { %v2916_v62 = vrot.slane %v2915_v8, 2 }
 0x8f8   :  { %v2917_v42 = vadd.f32 %v2916_v62, %v2915_v8 }
 0x8fa   :  { %v2918_v35 = vrot.slane %v2917_v42, 1 }
 0x8fc   :  { %v2919_v21 = vadd.f32 %v2918_v35, %v2917_v42 }
 0x8fe   :  { %v2921_v33 = vmul.f32 0.03125, %v2919_v21 }
 0x900   :  { %v2923_v25 = vpack.c.bf16 %v2921_v33, %v2921_v33 }
 0x902   :  { %v2950_v16 = vunpack.c.l.b16 %v2923_v25 }
 0x904   :  { %v2951_v34 = vsel %vm1616_vm3, %v2950_v16, %v2949_v55 }
 0x905   :  { %v2952_v56 = vpack.c.b16 %v2951_v34, %v2951_v34  ;;  %v2050_v34 = vadd.f32 %v11492_v29, %v7545_v46  ;;  %v2061_v29 = vadd.f32 %v7545_v46, %v11506_v40 }
 0x907   :  { %8807 = vmatmul.mubr.bf16.vlgmr.msra.gmra.mrb[60].mxu0 %v2952_v56  ;;  %v2042_v56 = vadd.f32 %v7545_v46, %v11494_v22 }
 0x908   :  { %8838 = vmatprep.mubr.msk.f32.mxu0 %vm3270_vm4, %v3266_v51 }
 0x9da   :  { %v3036_v1 = vpop.f32.mrb[60].mxu0 }
 0x9db   :  { %v3037_v53 = vadd.f32 %v7612_v6, %v3036_v1  ;;  %v8808_v5 = vpop.f32.mrb[61].mxu0 }
 0x9dc   :  { %v3039_v23 = vpop.f32.mrb[62].mxu0 }
 0x9dd   :  { %v3042_v60 = vmax.f32 %v3037_v53, 0.0  ;;  %v8809_v45 = vpop.f32.mrb[63].mxu0  ;;  %v2058_v23 = vadd.f32 %v7545_v46, %v11502_v59 }
 0x9df   :  { %v3043_v44 = vpack.c.bf16 %v3042_v60, %v3042_v60 }
 0x9e1   :  { %8827 = vmatmul.mubr.bf16.vlgmr.msra.gmra.mrb[60].mxu1 %v3043_v44 }
 0x9e2   :  { %3778 = vmatprep.mubr.bf16.mxu1 %v10587_v0  ;;  %3747 = vmatpush1.bf16.msra.mxu1 %v9358_v61 }
 0x9e3   :  { %3748 = vmatprep.subr.bf16.mxu1 %v9366_v3 }
 0x9e6   :  { %3749 = vmatpush1.bf16.msra.mxu1 %v9364_v54 }
 0x9e7   :  { %3750 = vmatprep.subr.bf16.mxu1 %v9372_v26 }
 0x9ea   :  { %3751 = vmatpush1.bf16.msra.mxu1 %v9370_v9 }
 0x9eb   :  { %3752 = vmatprep.subr.bf16.mxu1 %v9378_v15 }
 0x9ee   :  { %3753 = vmatpush1.bf16.msra.mxu1 %v9376_v28 }
 0x9ef   :  { %3754 = vmatprep.subr.bf16.mxu1 %v9384_v47 }
 0x9f2   :  { %3755 = vmatpush1.bf16.msra.mxu1 %v9382_v52 }
 0x9f3   :  { %3756 = vmatprep.subr.bf16.mxu1 %v9390_v48 }
 0x9f6   :  { %3757 = vmatpush1.bf16.msra.mxu1 %v9388_v50 }
 0x9f7   :  { %3758 = vmatprep.subr.bf16.mxu1 %v9396_v31 }
 0x9fa   :  { %3759 = vmatpush1.bf16.msra.mxu1 %v9394_v58 }
 0xab4   :  { %v3149_v11 = vpop.f32.mrb[60].mxu1 }
 0xab5   :  { %v3150_v37 = vadd.f32 %v7621_v18, %v3149_v11  ;;  %v8828_v38 = vpop.f32.mrb[61].mxu1 }
 0xab6   :  { %v3152_v8 = vpop.f32.mrb[62].mxu1 }
 0xab7   :  { %v7630_v7 = vmul.f32 -1.442695, %v3150_v37  ;;  %v8829_v62 = vpop.f32.mrb[63].mxu1 }
 0xab9   :  { %9711 = vpow2.f32 %v7630_v7 }
 0xac3   :  { %v9712_v42 = vpop.eup %9711 }
 0xac4   :  { %v3158_v32 = vadd.f32 1.0, %v9712_v42 }
 0xac6   :  { %9713 = vrcp.f32 %v3158_v32 }
 0xad0   :  { %v9714_v35 = vpop.eup %9713 }
 0xad1   :  { %v3168_v21 = vrot.slane %v9714_v35, %v11343_v4 }
 0xad3   :  { %v3169_v33 = vcombine.high %v3168_v21, %v3168_v21  ;;  %v3176_v25 = vrot.slane %v3168_v21, %v11343_v4 }
 0xad5   :  { %v3183_v55 = vrot.slane %v3169_v33, %v11343_v4  ;;  %v3187_v16 = vrot.slane %v3176_v25, %v11347_v27  ;;  %v2066_v4 = vadd.f32 %v11500_v24, %v7545_v46  ;;  %v2069_v24 = vadd.f32 %v11504_v49, %v7545_v46 }
 0xad7   :  { %v3194_v6 = vmul.f32 %v3187_v16, %v11610_v12  ;;  %v3195_v1 = vmul.f32 %v3187_v16, %v11612_v14  ;;  %v3196_v53 = vmul.f32 %v3187_v16, %v11616_v13  ;;  %v3197_v5 = vmul.f32 %v3187_v16, %v11619_v41 }
 0xad8   :  { %v3191_v22 = vrot.slane %v3183_v55, %v11347_v27 }
 0xad9   :  { %v3202_v60 = vadd.f32 %v3194_v6, %v2042_v56  ;;  %v3203_v2 = vadd.f32 %v3195_v1, %v2045_v39  ;;  %v3204_v45 = vadd.f32 %v3196_v53, %v2050_v34  ;;  %v3205_v20 = vadd.f32 %v3197_v5, %v2053_v43 }
 0xada   :  { %v3198_v12 = vmul.f32 %v3191_v22, %v11622_v30  ;;  %v3199_v14 = vmul.f32 %v3191_v22, %v11624_v63  ;;  %v3200_v13 = vmul.f32 %v3191_v22, %v11628_v57  ;;  %v3201_v41 = vmul.f32 %v3191_v22, %v11631_v36  ;;  %v9357_v22 = vld [vmem:[%s12686_s9 + $0x4] ss:$16 sps:$4 sm:$0xff]  }
 0xadb   :  { %v7631_v44 = vmul.f32 -1.442695, %v3202_v60  ;;  %v7632_v59 = vmul.f32 -1.442695, %v3203_v2  ;;  %v7633_v51 = vmul.f32 -1.442695, %v3204_v45 }
 0xadc   :  { %v7634_v40 = vmul.f32 -1.442695, %v3205_v20  ;;  %v3206_v61 = vadd.f32 %v3198_v12, %v2058_v23  ;;  %v3207_v10 = vadd.f32 %v3199_v14, %v2061_v29  ;;  %v3208_v3 = vadd.f32 %v3200_v13, %v2066_v4  ;;  %v3267_v23 = vld [vmem:[%s12685_s10 + $0x8] sm:$0xff]  ;;  %v3268_v29 = vld [vmem:[%s12685_s10 + $0x10] sm:$0xff] }
 0xadd   :  { %9715 = vpow2.f32 %v7631_v44  ;;  %v3209_v54 = vadd.f32 %v3201_v41, %v2069_v24  ;;  %v9369_v12 = vld [vmem:[%s12686_s9 + $0x44] ss:$16 sps:$4 sm:$0xff]   ;;  %v9367_v14 = vld [vmem:[%s12686_s9 + $0x40] ss:$16 sps:$4 sm:$0xff]  }
 0xade   :  { %9717 = vpow2.f32 %v7632_v59  ;;  %v7635_v26 = vmul.f32 -1.442695, %v3206_v61  ;;  %v7636_v30 = vmul.f32 -1.442695, %v3207_v10  ;;  %v7637_v63 = vmul.f32 -1.442695, %v3208_v3 }
 0xadf   :  { %9719 = vpow2.f32 %v7633_v51  ;;  %v7638_v57 = vmul.f32 -1.442695, %v3209_v54  ;;  %v9375_v13 = vld [vmem:[%s12686_s9 + $0x64] ss:$16 sps:$4 sm:$0xff]   ;;  %v9373_v41 = vld [vmem:[%s12686_s9 + $0x60] ss:$16 sps:$4 sm:$0xff]  }
 0xae0   :  { %9721 = vpow2.f32 %v7634_v40  ;;  %v9381_v24 = vld [vmem:[%s12686_s9 + $0x84] ss:$16 sps:$4 sm:$0xff]   ;;  %v9379_v44 = vld [vmem:[%s12686_s9 + $0x80] ss:$16 sps:$4 sm:$0xff]  }
 0xae1   :  { %9723 = vpow2.f32 %v7635_v26  ;;  %v9387_v59 = vld [vmem:[%s12686_s9 + $0xa4] ss:$16 sps:$4 sm:$0xff]   ;;  %v9385_v51 = vld [vmem:[%s12686_s9 + $0xa0] ss:$16 sps:$4 sm:$0xff]   ;;  %v9402_v26 = vld [vmem:[%s12686_s9 + $0xec] ss:$16 sps:$4 sm:$0xff]  }
 0xae2   :  { %9725 = vpow2.f32 %v7636_v30  ;;  %v9393_v40 = vld [vmem:[%s12686_s9 + $0xc4] ss:$16 sps:$4 sm:$0xff]   ;;  %3760 = vmatprep.subr.bf16.mxu1 %v9402_v26 }
 0xae3   :  { %9727 = vpow2.f32 %v7637_v63 }
 0xae4   :  { %9729 = vpow2.f32 %v7638_v57 }
 0xae7   :  { %v9716_v49 = vpop.eup %9715 }
 0xae8   :  { %v9718_v36 = vpop.eup %9717  ;;  %v3234_v9 = vadd.f32 1.0, %v9716_v49 }
 0xae9   :  { %v9720_v15 = vpop.eup %9719  ;;  %v3235_v28 = vadd.f32 1.0, %v9718_v36 }
 0xaea   :  { %v9722_v47 = vpop.eup %9721  ;;  %9731 = vrcp.f32 %v3234_v9  ;;  %v3236_v52 = vadd.f32 1.0, %v9720_v15 }
 0xaeb   :  { %v9724_v48 = vpop.eup %9723  ;;  %9733 = vrcp.f32 %v3235_v28  ;;  %v3237_v50 = vadd.f32 1.0, %v9722_v47 }
 0xaec   :  { %v9726_v31 = vpop.eup %9725  ;;  %9735 = vrcp.f32 %v3236_v52  ;;  %v3238_v58 = vadd.f32 1.0, %v9724_v48 }
 0xaed   :  { %v9728_v18 = vpop.eup %9727  ;;  %9737 = vrcp.f32 %v3237_v50  ;;  %v3239_v11 = vadd.f32 1.0, %v9726_v31 }
 0xaee   :  { %v9730_v37 = vpop.eup %9729  ;;  %9739 = vrcp.f32 %v3238_v58  ;;  %v3240_v38 = vadd.f32 1.0, %v9728_v18 }
 0xaef   :  { %9741 = vrcp.f32 %v3239_v11  ;;  %v3241_v8 = vadd.f32 1.0, %v9730_v37 }
 0xaf0   :  { %9743 = vrcp.f32 %v3240_v38 }
 0xaf1   :  { %9745 = vrcp.f32 %v3241_v8 }
 0xaf4   :  { %v9732_v7 = vpop.eup %9731 }
 0xaf5   :  { %v9734_v62 = vpop.eup %9733  ;;  %v3258_v42 = vmul.f32 %v9732_v7, %v3202_v60  ;;  %v3269_v60 = vld [vmem:[%s12685_s10 + $0x18] sm:$0xff] }
 0xaf6   :  { %v9736_v32 = vpop.eup %9735  ;;  %v3259_v35 = vmul.f32 %v9734_v62, %v3203_v2  ;;  %v9355_v2 = vld [vmem:[%s12686_s9] ss:$16 sps:$4 sm:$0xff]  }
 0xaf7   :  { %v9738_v21 = vpop.eup %9737  ;;  %v3260_v46 = vmul.f32 %v9736_v32, %v3204_v45  ;;  %v9363_v45 = vld [vmem:[%s12686_s9 + $0x24] ss:$16 sps:$4 sm:$0xff]  }
 0xaf8   :  { %v9740_v33 = vpop.eup %9739  ;;  %v9116_v25 = vpack.c.bf16 %v3259_v35, %v3258_v42  ;;  %v3261_v55 = vmul.f32 %v9738_v21, %v3205_v20  ;;  %v9361_v20 = vld [vmem:[%s12686_s9 + $0x20] ss:$16 sps:$4 sm:$0xff]  }
 0xaf9   :  { %v9742_v16 = vpop.eup %9741  ;;  %v3262_v34 = vmul.f32 %v9740_v33, %v3206_v61  ;;  %v9391_v61 = vld [vmem:[%s12686_s9 + $0xc0] ss:$16 sps:$4 sm:$0xff]  }
 0xafa   :  { %v9744_v56 = vpop.eup %9743  ;;  %9117 = vmatprep.subr.bf16.mxu0 %v9116_v25  ;;  %v9120_v43 = vpack.c.bf16 %v3261_v55, %v3260_v46  ;;  %v3263_v39 = vmul.f32 %v9742_v16, %v3207_v10  ;;  %v9397_v10 = vld [vmem:[%s12686_s9 + $0xe0] ss:$16 sps:$4 sm:$0xff]  }
 0xafb   :  { %v9746_v6 = vpop.eup %9745  ;;  %9119 = vmatpush3.bf16.msra.mxu0 %v9116_v25  ;;  %v3264_v1 = vmul.f32 %v9744_v56, %v3208_v3  ;;  %v9399_v3 = vld [vmem:[%s12686_s9 + $0xe4] ss:$16 sps:$4 sm:$0xff]   ;;  %v3511_v56 = vld [vmem:[%s12687_s11] sm:$0xf] }
 0xafc   :  { %9121 = vmatprep.subr.bf16.mxu0 %v9120_v43  ;;  %v9124_v53 = vpack.c.bf16 %v3263_v39, %v3262_v34  ;;  %v3265_v5 = vmul.f32 %v9746_v6, %v3209_v54  ;;  %v9400_v54 = vld [vmem:[%s12686_s9 + $0xe8] ss:$16 sps:$4 sm:$0xff]   ;;  %v3523_v34 = vsub.s32 2, %v10979_v19  ;;  %v3527_v39 = vsub.s32 3, %v10979_v19 }
 0xafd   :  { %3761 = vmatpush1.bf16.msra.mxu1 %v9400_v54 }
 0xafe   :  { %v9128_v4 = vpack.c.bf16 %v3265_v5, %v3264_v1  ;;  %v3524_v6 = vrot.slane %v3511_v56, %v3523_v34  ;;  %v3516_v5 = vrot.slane %v3511_v56, %v11347_v27 }
 0xaff   :  { %9123 = vmatpush3.bf16.msra.mxu0 %v9120_v43  ;;  %v11766_v43 = vsub.s32 1, %v10979_v19 }
 0xb00   :  { %9125 = vmatprep.subr.bf16.mxu0 %v9124_v53 }
 0xb01   :  { %v3520_v1 = vrot.slane %v3511_v56, %v11766_v43 }
 0xb02   :  { %8839 = vmatmul.mubr.msk.f32.vlgmr.msra.gmra.mrb[64].mxu0 %vm3270_vm4, %v3267_v23 }
 0xb03   :  { %9127 = vmatpush3.bf16.msra.mxu0 %v9124_v53  ;;  %8849 = vmatprep.mubr.msk.f32.mxu0 %vm3270_vm4, %v3268_v29  ;;  %v3528_v53 = vrot.slane %v3511_v56, %v3527_v39 }
 0xb04   :  { %9129 = vmatprep.subr.bf16.mxu0 %v9128_v4 }
 0xb07   :  { %9131 = vmatpush3.bf16.msra.mxu0 %v9128_v4 }
 0xb08   :  { %3693 = vmatprep.subr.bf16.mxu0 %v9357_v22 }
 0xb0a   :  { %8850 = vmatmul.mubr.msk.f32.vlgmr.msra.gmra.mrb[66].mxu0 %vm3270_vm4, %v3269_v60 }
 0xb0b   :  { %3694 = vmatpush1.bf16.msra.mxu0 %v9355_v2  ;;  %3725 = vmatprep.mubr.bf16.mxu0 %v10587_v0 }
 0xb0c   :  { %3695 = vmatprep.subr.bf16.mxu0 %v9363_v45 }
 0xb0f   :  { %3696 = vmatpush1.bf16.msra.mxu0 %v9361_v20 }
 0xb10   :  { %3697 = vmatprep.subr.bf16.mxu0 %v9369_v12 }
 0xb13   :  { %3698 = vmatpush1.bf16.msra.mxu0 %v9367_v14 }
 0xb14   :  { %3699 = vmatprep.subr.bf16.mxu0 %v9375_v13 }
 0xb17   :  { %3700 = vmatpush1.bf16.msra.mxu0 %v9373_v41 }
 0xb18   :  { %3701 = vmatprep.subr.bf16.mxu0 %v9381_v24 }
 0xb1b   :  { %3702 = vmatpush1.bf16.msra.mxu0 %v9379_v44 }
 0xb1c   :  { %3703 = vmatprep.subr.bf16.mxu0 %v9387_v59 }
 0xb1f   :  { %3704 = vmatpush1.bf16.msra.mxu0 %v9385_v51 }
 0xb20   :  { %3705 = vmatprep.subr.bf16.mxu0 %v9393_v40 }
 0xb23   :  { %3706 = vmatpush1.bf16.msra.mxu0 %v9391_v61 }
 0xb24   :  { %3707 = vmatprep.subr.bf16.mxu0 %v9399_v3 }
 0xb27   :  { %3708 = vmatpush1.bf16.msra.mxu0 %v9397_v10 }
 0xbd5   :  { %v11699_v30 = vpop.f32.mrb[64].mxu0 }
 0xbd6   :  { %v11701_v63 = vpop.f32.mrb[65].mxu0 }
 0xbd7   :  { %v11705_v57 = vpack.c.bf16 %v11699_v30, %v11701_v63  ;;  %3439 = vxpose.xlu0.b32.start [1/4] (short) %v11701_v63, 128 }
 0xbd9   :  { %3726 = vmatmul.mubr.bf16.vlgmr.msra.gmra.mrb[68].mxu0 %v11705_v57  ;;  %3779 = vmatmul.mubr.bf16.vlgmr.msra.gmra.mrb[64].mxu1 %v11705_v57 }
 0xbda   :  { %8872 = vmatprep.subr.bf16.mxu1 %v11705_v57  ;;  %3735 = vmatprep.mubr.bf16.mxu0 %v10587_v0 }
 0xbdb   :  { %8873 = vmatpush3.bf16.msra.mxu1 %v11705_v57  ;;  %3440 = vxpose.xlu0.b32.cont [2/4] (short) %v11699_v30, 128 }
 0xbdc   :  { %3788 = vmatprep.mubr.bf16.mxu1 %v10587_v0 }
 0xbdd   :  { %v11715_v49 = vpop.f32.mrb[66].mxu0 }
 0xbde   :  { %v11717_v36 = vpop.f32.mrb[67].mxu0 }
 0xbdf   :  { %v11721_v9 = vpack.c.bf16 %v11715_v49, %v11717_v36  ;;  %3441 = vxpose.xlu0.b32.cont [3/4] (short) %v11717_v36, 128 }
 0xbe1   :  { %3736 = vmatmul.mubr.bf16.gmra.mrb[72].mxu0 %v11721_v9  ;;  %3789 = vmatmul.mubr.bf16.gmra.mrb[68].mxu1 %v11721_v9 }
 0xbe2   :  { %8874 = vmatprep.subr.bf16.mxu1 %v11721_v9 }
 0xbe3   :  { %8875 = vmatpush3.bf16.msra.mxu1 %v11721_v9  ;;  %3442 = vxpose.xlu0.b32.end [4/4] (short) %v11715_v49, 128 }
 0xc57   :  { %v3455_v15 = vpop.trf.xlu0 }
 0xc5b   :  { %v3456_v28 = vpop.trf.xlu0 }
 0xc5c   :  { %v11729_v47 = vpack.c.bf16 %v3456_v28, %v3455_v15 }
 0xc5e   :  { %8852 = vmatprep.subr.bf16.mxu0 %v11729_v47  ;;  %8880 = vmatprep.subr.bf16.mxu1 %v11729_v47 }
 0xc5f   :  { %v3457_v52 = vpop.trf.xlu0  ;;  %8853 = vmatpush3.bf16.msra.mxu0 %v11729_v47 }
 0xc63   :  { %v3458_v48 = vpop.trf.xlu0 }
 0xc64   :  { %v11734_v50 = vpack.c.bf16 %v3458_v48, %v3457_v52 }
 0xc66   :  { %8854 = vmatprep.subr.bf16.mxu0 %v11734_v50 }
 0xc67   :  { %v3459_v31 = vpop.trf.xlu0  ;;  %8855 = vmatpush3.bf16.msra.mxu0 %v11734_v50 }
 0xc6b   :  { %v3460_v58 = vpop.trf.xlu0 }
 0xc6c   :  { %v11738_v18 = vpack.c.bf16 %v3460_v58, %v3459_v31 }
 0xc6e   :  { %8856 = vmatprep.subr.bf16.mxu0 %v11738_v18 }
 0xc6f   :  { %v3461_v11 = vpop.trf.xlu0  ;;  %8857 = vmatpush3.bf16.msra.mxu0 %v11738_v18 }
 0xc73   :  { %v3462_v37 = vpop.trf.xlu0 }
 0xc74   :  { %v11742_v38 = vpack.c.bf16 %v3462_v37, %v3461_v11 }
 0xc76   :  { %8858 = vmatprep.subr.bf16.mxu0 %v11742_v38 }
 0xc77   :  { %v3463_v8 = vpop.trf.xlu0  ;;  %8859 = vmatpush3.bf16.msra.mxu0 %v11742_v38 }
 0xc7b   :  { %v3464_v7 = vpop.trf.xlu0 }
 0xc7c   :  { %v11746_v62 = vpack.c.bf16 %v3464_v7, %v3463_v8 }
 0xc7e   :  { %8860 = vmatprep.subr.bf16.mxu0 %v11746_v62 }
 0xc7f   :  { %v3465_v42 = vpop.trf.xlu0  ;;  %8861 = vmatpush3.bf16.msra.mxu0 %v11746_v62 }
 0xc83   :  { %v3466_v32 = vpop.trf.xlu0 }
 0xc84   :  { %v11750_v35 = vpack.c.bf16 %v3466_v32, %v3465_v42 }
 0xc86   :  { %8862 = vmatprep.subr.bf16.mxu0 %v11750_v35 }
 0xc87   :  { %v3467_v21 = vpop.trf.xlu0  ;;  %8863 = vmatpush3.bf16.msra.mxu0 %v11750_v35 }
 0xc8b   :  { %v3468_v46 = vpop.trf.xlu0 }
 0xc8c   :  { %v11754_v33 = vpack.c.bf16 %v3468_v46, %v3467_v21 }
 0xc8e   :  { %8864 = vmatprep.subr.bf16.mxu0 %v11754_v33 }
 0xc8f   :  { %v3469_v25 = vpop.trf.xlu0  ;;  %8865 = vmatpush3.bf16.msra.mxu0 %v11754_v33 }
 0xc93   :  { %v3470_v55 = vpop.trf.xlu0 }
 0xc94   :  { %v11758_v16 = vpack.c.bf16 %v3470_v55, %v3469_v25 }
 0xc96   :  { %8866 = vmatprep.subr.bf16.mxu0 %v11758_v16 }
 0xc97   :  { %8867 = vmatpush3.bf16.msra.mxu0 %v11758_v16 }
 0xc98   :  { %8900 = vmatprep.subr.bf16.mxu0 %v11705_v57 }
 0xcac   :  { %v3727_v4 = vpop.f32.mrb[68].mxu0  ;;  %v3780_v23 = vpop.f32.mrb[64].mxu1 }
 0xcad   :  { %v11775_v29 = vadd.f32 %v3780_v23, %v3524_v6  ;;  %v3729_v22 = vpop.f32.mrb[69].mxu0  ;;  %v3782_v60 = vpop.f32.mrb[65].mxu1  ;;  %v3728_v14 = vadd.f32 %v3727_v4, %v3516_v5  ;;  %v11822_v23 = vld [vmem:[%s12688_s15 + $0x8] sm:$0xff] }
 0xcae   :  { %v11777_v2 = vadd.f32 %v3729_v22, %v3520_v1  ;;  %v11779_v45 = vadd.f32 %v3782_v60, %v3528_v53  ;;  %v3731_v20 = vpop.f32.mrb[70].mxu0  ;;  %v3784_v12 = vpop.f32.mrb[66].mxu1 }
 0xcaf   :  { %v3732_v13 = vadd.f32 %v3731_v20, %v3516_v5  ;;  %v11781_v41 = vadd.f32 %v3784_v12, %v3524_v6  ;;  %v3733_v24 = vpop.f32.mrb[71].mxu0  ;;  %v3786_v44 = vpop.f32.mrb[67].mxu1 }
 0xcb0   :  { %v11783_v59 = vadd.f32 %v3733_v24, %v3520_v1  ;;  %v11785_v51 = vadd.f32 %v3786_v44, %v3528_v53  ;;  %v11829_v24 = vld [vmem:[%s12688_s15 + $0x10] sm:$0xff] }
 0xcb1   :  { %v3799_v40 = vpack.c.bf16 %v3732_v13, %v3728_v14  ;;  %v4103_v61 = vpack.c.bf16 %v11781_v41, %v11775_v29 }
 0xcb2   :  { %v3951_v10 = vpack.c.bf16 %v11783_v59, %v11777_v2  ;;  %v4255_v3 = vpack.c.bf16 %v11785_v51, %v11779_v45 }
 0xcb3   :  { %8868 = vmatprep.mubr.bf16.mxu0 %v3799_v40 }
 0xcb4   :  { %v3737_v54 = vpop.f32.mrb[72].mxu0  ;;  %v3790_v26 = vpop.f32.mrb[68].mxu1 }
 0xcb5   :  { %v11793_v15 = vadd.f32 %v3790_v26, %v3524_v6  ;;  %v3739_v28 = vpop.f32.mrb[73].mxu0  ;;  %v3792_v52 = vpop.f32.mrb[69].mxu1  ;;  %v3738_v37 = vadd.f32 %v3737_v54, %v3516_v5 }
 0xcb6   :  { %v11795_v48 = vadd.f32 %v3739_v28, %v3520_v1  ;;  %v11797_v31 = vadd.f32 %v3792_v52, %v3528_v53  ;;  %v3741_v58 = vpop.f32.mrb[74].mxu0  ;;  %v3794_v11 = vpop.f32.mrb[70].mxu1 }
 0xcb7   :  { %v3742_v8 = vadd.f32 %v3741_v58, %v3516_v5  ;;  %v11799_v7 = vadd.f32 %v3794_v11, %v3524_v6  ;;  %v3743_v42 = vpop.f32.mrb[75].mxu0  ;;  %v3796_v32 = vpop.f32.mrb[71].mxu1  ;;  %v11816_v6 = vld [vmem:[%s12688_s15] sm:$0xff] }
 0xcb8   :  { %v11801_v21 = vadd.f32 %v3743_v42, %v3520_v1  ;;  %v11803_v46 = vadd.f32 %v3796_v32, %v3528_v53  ;;  %v11819_v53 = vld [vmem:[%s12688_s15 + $0x18] sm:$0xff] }
 0xcb9   :  { %v3800_v25 = vpack.c.bf16 %v3742_v8, %v3738_v37  ;;  %v4104_v55 = vpack.c.bf16 %v11799_v7, %v11793_v15 }
 0xcba   :  { %v3952_v56 = vpack.c.bf16 %v11801_v21, %v11795_v48  ;;  %v4256_v5 = vpack.c.bf16 %v11803_v46, %v11797_v31 }
 0xcbb   :  { %8869 = vmatmul.mubr.bf16.vlgmr.msra.gmra.mrb[76].mxu0 %v3800_v25 }
 0xcbc   :  { %8901 = vmatpush3.bf16.msra.mxu0 %v11705_v57 }
 0xcbd   :  { %8902 = vmatprep.subr.bf16.mxu0 %v11721_v9 }
 0xcc0   :  { %8903 = vmatpush3.bf16.msra.mxu0 %v11721_v9 }
 0xcc1   :  { %8908 = vmatprep.subr.bf16.mxu0 %v11729_v47 }
 0xd8e   :  { %v8870_v1 = vpop.f32.mrb[76].mxu0 }
 0xd8f   :  { %v3835_v4 = vpop.f32.mrb[77].mxu0  ;;  %v3844_v40 = vadd.f32 %v8870_v1, %v11829_v24 }
 0xd90   :  { %v3836_v22 = vadd.f32 %v3835_v4, %v11816_v6  ;;  %v8871_v60 = vpop.f32.mrb[78].mxu0 }
 0xd91   :  { %v3847_v20 = vadd.f32 %v8871_v60, %v11819_v53  ;;  %v3838_v12 = vpop.f32.mrb[79].mxu0  ;;  %v3856_v26 = vsel %vm3270_vm4, %v3844_v40, -inf }
 0xd92   :  { %v3839_v14 = vadd.f32 %v3838_v12, %v11822_v23  ;;  %v3850_v13 = vsel %vm3270_vm4, %v3836_v22, -inf }
 0xd93   :  { %3851 = vmax.xlane.f32.xlu1 %v3850_v13  ;;  %v3859_v44 = vsel %vm3270_vm4, %v3847_v20, -inf }
 0xd94   :  { %3860 = vmax.xlane.f32.xlu0 %v3859_v44  ;;  %v3853_v54 = vsel %vm3270_vm4, %v3839_v14, -inf }
 0xd97   :  { %3854 = vmax.xlane.f32.xlu1 %v3853_v54 }
 0xd9b   :  { %3857 = vmax.xlane.f32.xlu1 %v3856_v26 }
 0xe20   :  { %v3852_v28 = vpop.xlane.xlu1 %3851 }
 0xe21   :  { %v3862_v58 = vsub.f32 %v3836_v22, %v3852_v28  ;;  %v3861_v25 = vpop.xlane.xlu0 %3860 }
 0xe22   :  { %v3865_v4 = vsub.f32 %v3847_v20, %v3861_v25 }
 0xe23   :  { %v3866_v8 = vmul.f32 1.442695, %v3862_v58 }
 0xe24   :  { %v3855_v52 = vpop.xlane.xlu1 %3854  ;;  %v3872_v1 = vmul.f32 1.442695, %v3865_v4 }
 0xe25   :  { %v3863_v42 = vsub.f32 %v3839_v14, %v3855_v52 }
 0xe27   :  { %v3868_v60 = vmul.f32 1.442695, %v3863_v42 }
 0xe28   :  { %v3858_v11 = vpop.xlane.xlu1 %3857 }
 0xe29   :  { %v3864_v37 = vsub.f32 %v3844_v40, %v3858_v11 }
 0xe2b   :  { %v3870_v32 = vmul.f32 1.442695, %v3864_v37 }
 0xe2d   :  { %9747 = vpow2.f32 %v3870_v32 }
 0xe2e   :  { %9749 = vpow2.f32 %v3866_v8 }
 0xe2f   :  { %9751 = vpow2.f32 %v3868_v60 }
 0xe30   :  { %9753 = vpow2.f32 %v3872_v1 }
 0xe37   :  { %v9748_v12 = vpop.eup %9747 }
 0xe38   :  { %v3880_v13 = vsel %vm3270_vm4, %v9748_v12, 0.0  ;;  %v9750_v44 = vpop.eup %9749 }
 0xe39   :  { %3881 = vadd.xlane.f32.xlu1 %v3880_v13  ;;  %v3874_v22 = vsel %vm3270_vm4, %v9750_v44, 0.0  ;;  %v9752_v54 = vpop.eup %9751 }
 0xe3a   :  { %v3877_v14 = vsel %vm3270_vm4, %v9752_v54, 0.0  ;;  %v9754_v40 = vpop.eup %9753 }
 0xe3b   :  { %v3883_v26 = vsel %vm3270_vm4, %v9754_v40, 0.0 }
 0xe3d   :  { %3875 = vadd.xlane.f32.xlu1 %v3874_v22 }
 0xe41   :  { %3878 = vadd.xlane.f32.xlu1 %v3877_v14 }
 0xe45   :  { %3884 = vadd.xlane.f32.xlu1 %v3883_v26 }
 0xec6   :  { %v3882_v20 = vpop.xlane.xlu1 %3881 }
 0xeca   :  { %v3876_v28 = vpop.xlane.xlu1 %3875 }
 0xecb   :  { %9755 = vrcp.f32 %v3876_v28 }
 0xece   :  { %v3879_v52 = vpop.xlane.xlu1 %3878 }
 0xecf   :  { %9757 = vrcp.f32 %v3879_v52 }
 0xed0   :  { %9759 = vrcp.f32 %v3882_v20 }
 0xed2   :  { %v3885_v58 = vpop.xlane.xlu1 %3884 }
 0xed3   :  { %9761 = vrcp.f32 %v3885_v58 }
 0xed5   :  { %v9756_v11 = vpop.eup %9755 }
 0xed6   :  { %v3887_v8 = vmul.f32 %v9756_v11, %v9750_v44 }
 0xed9   :  { %v9758_v37 = vpop.eup %9757 }
 0xeda   :  { %v3889_v42 = vmul.f32 %v9758_v37, %v9752_v54  ;;  %v9760_v32 = vpop.eup %9759 }
 0xedb   :  { %v3891_v60 = vmul.f32 %v9760_v32, %v9748_v12 }
 0xedc   :  { %v3894_v25 = vpack.c.bf16 %v3889_v42, %v3887_v8 }
 0xedd   :  { %v9762_v4 = vpop.eup %9761 }
 0xede   :  { %v3893_v1 = vmul.f32 %v9762_v4, %v9754_v40  ;;  %8876 = vmatprep.mubr.msk.bf16.mxu1 %vm3270_vm4, %v3894_v25 }
 0xee0   :  { %v3895_v13 = vpack.c.bf16 %v3893_v1, %v3891_v60 }
 0xee2   :  { %8877 = vmatmul.mubr.msk.bf16.vlgmr.msra.gmra.mrb[72].mxu1 %vm3270_vm4, %v3895_v13 }
 0xee3   :  { %8881 = vmatpush3.bf16.msra.mxu1 %v11729_v47  ;;  %8896 = vmatprep.mubr.bf16.mxu1 %v3951_v10 }
 0xee4   :  { %8882 = vmatprep.subr.bf16.mxu1 %v11734_v50 }
 0xee7   :  { %8883 = vmatpush3.bf16.msra.mxu1 %v11734_v50 }
 0xee8   :  { %8884 = vmatprep.subr.bf16.mxu1 %v11738_v18 }
 0xeeb   :  { %8885 = vmatpush3.bf16.msra.mxu1 %v11738_v18 }
 0xeec   :  { %8886 = vmatprep.subr.bf16.mxu1 %v11742_v38 }
 0xeef   :  { %8887 = vmatpush3.bf16.msra.mxu1 %v11742_v38 }
 0xef0   :  { %8888 = vmatprep.subr.bf16.mxu1 %v11746_v62 }
 0xef3   :  { %8889 = vmatpush3.bf16.msra.mxu1 %v11746_v62 }
 0xef4   :  { %8890 = vmatprep.subr.bf16.mxu1 %v11750_v35 }
 0xef7   :  { %8891 = vmatpush3.bf16.msra.mxu1 %v11750_v35 }
 0xef8   :  { %8892 = vmatprep.subr.bf16.mxu1 %v11754_v33 }
 0xefb   :  { %8893 = vmatpush3.bf16.msra.mxu1 %v11754_v33 }
 0xefc   :  { %8894 = vmatprep.subr.bf16.mxu1 %v11758_v16 }
 0xeff   :  { %8895 = vmatpush3.bf16.msra.mxu1 %v11758_v16 }
 0xf00   :  { %8928 = vmatprep.subr.bf16.mxu1 %v11705_v57 }
 0xf02   :  { %8897 = vmatmul.mubr.bf16.vlgmr.msra.gmra.mrb[76].mxu1 %v3952_v56 }
 0xf03   :  { %8929 = vmatpush3.bf16.msra.mxu1 %v11705_v57 }
 0xf04   :  { %8930 = vmatprep.subr.bf16.mxu1 %v11721_v9 }
 0xf07   :  { %8931 = vmatpush3.bf16.msra.mxu1 %v11721_v9 }
 0xf08   :  { %8936 = vmatprep.subr.bf16.mxu1 %v11729_v47 }
 0xfb5   :  { %v11867_v2 = vpop.f32.mrb[72].mxu1 }
 0xfb6   :  { %v11869_v59 = vpop.f32.mrb[73].mxu1 }
 0xfb7   :  { %v11871_v10 = vpop.f32.mrb[74].mxu1 }
 0xfb8   :  { %v4411_v12 = vpack.c.bf16 %v11871_v10, %v11867_v2  ;;  %v11875_v44 = vpop.f32.mrb[75].mxu1 }
 0xfb9   :  { %v4407_v48 = vpack.c.bf16 %v11875_v44, %v11869_v59 }
 0xfd5   :  { %v8898_v21 = vpop.f32.mrb[76].mxu1 }
 0xfd6   :  { %v3996_v56 = vadd.f32 %v8898_v21, %v11829_v24  ;;  %v3987_v22 = vpop.f32.mrb[77].mxu1 }
 0xfd7   :  { %v8899_v54 = vpop.f32.mrb[78].mxu1  ;;  %v3988_v14 = vadd.f32 %v3987_v22, %v11816_v6 }
 0xfd8   :  { %v3990_v40 = vpop.f32.mrb[79].mxu1  ;;  %v4008_v26 = vsel %vm3270_vm4, %v3996_v56, -inf  ;;  %v3999_v52 = vadd.f32 %v8899_v54, %v11819_v53 }
 0xfd9   :  { %4009 = vmax.xlane.f32.xlu1 %v4008_v26  ;;  %v3991_v20 = vadd.f32 %v3990_v40, %v11822_v23  ;;  %v4002_v28 = vsel %vm3270_vm4, %v3988_v14, -inf }
 0xfda   :  { %v4011_v11 = vsel %vm3270_vm4, %v3999_v52, -inf }
 0xfdb   :  { %v4005_v58 = vsel %vm3270_vm4, %v3991_v20, -inf }
 0xfdd   :  { %4003 = vmax.xlane.f32.xlu1 %v4002_v28 }
 0xfe1   :  { %4006 = vmax.xlane.f32.xlu1 %v4005_v58 }
 0xfe5   :  { %4012 = vmax.xlane.f32.xlu1 %v4011_v11 }
0x1066   :  { %v4010_v37 = vpop.xlane.xlu1 %4009 }
0x1067   :  { %v4016_v8 = vsub.f32 %v3996_v56, %v4010_v37 }
0x1069   :  { %v4022_v42 = vmul.f32 1.442695, %v4016_v8 }
0x106a   :  { %v4004_v32 = vpop.xlane.xlu1 %4003 }
0x106b   :  { %9763 = vpow2.f32 %v4022_v42  ;;  %v4014_v25 = vsub.f32 %v3988_v14, %v4004_v32 }
0x106d   :  { %v4018_v4 = vmul.f32 1.442695, %v4014_v25 }
0x106e   :  { %v4007_v60 = vpop.xlane.xlu1 %4006 }
0x106f   :  { %9765 = vpow2.f32 %v4018_v4  ;;  %v4015_v1 = vsub.f32 %v3991_v20, %v4007_v60 }
0x1071   :  { %v4020_v13 = vmul.f32 1.442695, %v4015_v1 }
0x1072   :  { %v4013_v21 = vpop.xlane.xlu1 %4012 }
0x1073   :  { %9767 = vpow2.f32 %v4020_v13  ;;  %v4017_v22 = vsub.f32 %v3999_v52, %v4013_v21 }
0x1075   :  { %v9764_v54 = vpop.eup %9763  ;;  %v4024_v40 = vmul.f32 1.442695, %v4017_v22 }
0x1076   :  { %v4032_v26 = vsel %vm3270_vm4, %v9764_v54, 0.0 }
0x1077   :  { %9769 = vpow2.f32 %v4024_v40  ;;  %4033 = vadd.xlane.f32.xlu1 %v4032_v26 }
0x1079   :  { %v9766_v28 = vpop.eup %9765 }
0x107a   :  { %v4026_v56 = vsel %vm3270_vm4, %v9766_v28, 0.0 }
0x107b   :  { %4027 = vadd.xlane.f32.xlu1 %v4026_v56 }
0x107d   :  { %v9768_v58 = vpop.eup %9767 }
0x107e   :  { %v4029_v14 = vsel %vm3270_vm4, %v9768_v58, 0.0 }
0x107f   :  { %4030 = vadd.xlane.f32.xlu1 %v4029_v14 }
0x1081   :  { %v9770_v11 = vpop.eup %9769 }
0x1082   :  { %v4035_v20 = vsel %vm3270_vm4, %v9770_v11, 0.0 }
0x1083   :  { %4036 = vadd.xlane.f32.xlu1 %v4035_v20 }
0x1104   :  { %v4034_v37 = vpop.xlane.xlu1 %4033 }
0x1108   :  { %v4028_v52 = vpop.xlane.xlu1 %4027 }
0x1109   :  { %9771 = vrcp.f32 %v4028_v52 }
0x110c   :  { %v4031_v8 = vpop.xlane.xlu1 %4030 }
0x110d   :  { %9773 = vrcp.f32 %v4031_v8 }
0x110e   :  { %9775 = vrcp.f32 %v4034_v37 }
0x1110   :  { %v4037_v42 = vpop.xlane.xlu1 %4036 }
0x1111   :  { %9777 = vrcp.f32 %v4037_v42 }
0x1113   :  { %v9772_v32 = vpop.eup %9771 }
0x1114   :  { %v4039_v4 = vmul.f32 %v9772_v32, %v9766_v28 }
0x1117   :  { %v9774_v25 = vpop.eup %9773 }
0x1118   :  { %v4041_v60 = vmul.f32 %v9774_v25, %v9768_v58  ;;  %v9776_v1 = vpop.eup %9775 }
0x1119   :  { %v4043_v22 = vmul.f32 %v9776_v1, %v9764_v54 }
0x111a   :  { %v4046_v13 = vpack.c.bf16 %v4041_v60, %v4039_v4 }
0x111b   :  { %v9778_v21 = vpop.eup %9777 }
0x111c   :  { %v4045_v40 = vmul.f32 %v9778_v21, %v9770_v11  ;;  %8904 = vmatprep.mubr.msk.bf16.mxu0 %vm3270_vm4, %v4046_v13 }
0x111e   :  { %v4047_v26 = vpack.c.bf16 %v4045_v40, %v4043_v22 }
0x1120   :  { %8905 = vmatmul.mubr.msk.bf16.vlgmr.msra.gmra.mrb[80].mxu0 %vm3270_vm4, %v4047_v26 }
0x1121   :  { %8909 = vmatpush3.bf16.msra.mxu0 %v11729_v47  ;;  %8924 = vmatprep.mubr.bf16.mxu0 %v4103_v61 }
0x1122   :  { %8910 = vmatprep.subr.bf16.mxu0 %v11734_v50 }
0x1125   :  { %8911 = vmatpush3.bf16.msra.mxu0 %v11734_v50 }
0x1126   :  { %8912 = vmatprep.subr.bf16.mxu0 %v11738_v18 }
0x1129   :  { %8913 = vmatpush3.bf16.msra.mxu0 %v11738_v18 }
0x112a   :  { %8914 = vmatprep.subr.bf16.mxu0 %v11742_v38 }
0x112d   :  { %8915 = vmatpush3.bf16.msra.mxu0 %v11742_v38 }
0x112e   :  { %8916 = vmatprep.subr.bf16.mxu0 %v11746_v62 }
0x1131   :  { %8917 = vmatpush3.bf16.msra.mxu0 %v11746_v62 }
0x1132   :  { %8918 = vmatprep.subr.bf16.mxu0 %v11750_v35 }
0x1135   :  { %8919 = vmatpush3.bf16.msra.mxu0 %v11750_v35 }
0x1136   :  { %8920 = vmatprep.subr.bf16.mxu0 %v11754_v33 }
0x1139   :  { %8921 = vmatpush3.bf16.msra.mxu0 %v11754_v33 }
0x113a   :  { %8922 = vmatprep.subr.bf16.mxu0 %v11758_v16 }
0x113d   :  { %8923 = vmatpush3.bf16.msra.mxu0 %v11758_v16 }
0x113e   :  { %8956 = vmatprep.subr.bf16.mxu0 %v11705_v57 }
0x1140   :  { %8925 = vmatmul.mubr.bf16.vlgmr.msra.gmra.mrb[84].mxu0 %v4104_v55 }
0x1141   :  { %8957 = vmatpush3.bf16.msra.mxu0 %v11705_v57 }
0x1142   :  { %8958 = vmatprep.subr.bf16.mxu0 %v11721_v9 }
0x1145   :  { %8959 = vmatpush3.bf16.msra.mxu0 %v11721_v9 }
0x11f3   :  { %v11918_v29 = vpop.f32.mrb[80].mxu0 }
0x11f4   :  { %v11920_v41 = vpop.f32.mrb[81].mxu0 }
0x11f5   :  { %v11922_v61 = vpop.f32.mrb[82].mxu0 }
0x11f6   :  { %v4412_v54 = vpack.c.bf16 %v11922_v61, %v11918_v29  ;;  %v11926_v28 = vpop.f32.mrb[83].mxu0 }
0x11f7   :  { %v4408_v15 = vpack.c.bf16 %v11926_v28, %v11920_v41  ;;  %v9412_v41 = vld [vmem:[%s12689_s16 + $0x20] sm:$0xff]   ;;  %v9413_v28 = vld [vmem:[%s12689_s16 + $0x68] sm:$0xff]  }
0x1213   :  { %v8926_v7 = vpop.f32.mrb[84].mxu0 }
0x1214   :  { %v4148_v57 = vadd.f32 %v8926_v7, %v11829_v24  ;;  %v4139_v55 = vpop.f32.mrb[85].mxu0 }
0x1215   :  { %v8927_v56 = vpop.f32.mrb[86].mxu0  ;;  %v4140_v9 = vadd.f32 %v4139_v55, %v11816_v6 }
0x1216   :  { %v4142_v58 = vpop.f32.mrb[87].mxu0  ;;  %v4160_v14 = vsel %vm3270_vm4, %v4148_v57, -inf  ;;  %v4151_v37 = vadd.f32 %v8927_v56, %v11819_v53 }
0x1217   :  { %4161 = vmax.xlane.f32.xlu1 %v4160_v14  ;;  %v4143_v11 = vadd.f32 %v4142_v58, %v11822_v23  ;;  %v4154_v20 = vsel %vm3270_vm4, %v4140_v9, -inf }
0x1218   :  { %v4163_v8 = vsel %vm3270_vm4, %v4151_v37, -inf }
0x1219   :  { %v4157_v52 = vsel %vm3270_vm4, %v4143_v11, -inf }
0x121b   :  { %4155 = vmax.xlane.f32.xlu1 %v4154_v20 }
0x121f   :  { %4158 = vmax.xlane.f32.xlu1 %v4157_v52 }
0x1223   :  { %4164 = vmax.xlane.f32.xlu1 %v4163_v8 }
0x12a4   :  { %v4162_v42 = vpop.xlane.xlu1 %4161 }
0x12a5   :  { %v4168_v32 = vsub.f32 %v4148_v57, %v4162_v42 }
0x12a7   :  { %v4174_v25 = vmul.f32 1.442695, %v4168_v32 }
0x12a8   :  { %v4156_v4 = vpop.xlane.xlu1 %4155 }
0x12a9   :  { %9779 = vpow2.f32 %v4174_v25  ;;  %v4166_v60 = vsub.f32 %v4140_v9, %v4156_v4 }
0x12ab   :  { %v4170_v1 = vmul.f32 1.442695, %v4166_v60 }
0x12ac   :  { %v4159_v13 = vpop.xlane.xlu1 %4158 }
0x12ad   :  { %9781 = vpow2.f32 %v4170_v1  ;;  %v4167_v21 = vsub.f32 %v4143_v11, %v4159_v13 }
0x12af   :  { %v4172_v22 = vmul.f32 1.442695, %v4167_v21 }
0x12b0   :  { %v4165_v40 = vpop.xlane.xlu1 %4164 }
0x12b1   :  { %9783 = vpow2.f32 %v4172_v22  ;;  %v4169_v26 = vsub.f32 %v4151_v37, %v4165_v40 }
0x12b3   :  { %v9780_v7 = vpop.eup %9779  ;;  %v4176_v55 = vmul.f32 1.442695, %v4169_v26 }
0x12b4   :  { %v4184_v56 = vsel %vm3270_vm4, %v9780_v7, 0.0 }
0x12b5   :  { %9785 = vpow2.f32 %v4176_v55  ;;  %4185 = vadd.xlane.f32.xlu1 %v4184_v56 }
0x12b7   :  { %v9782_v58 = vpop.eup %9781 }
0x12b8   :  { %v4178_v57 = vsel %vm3270_vm4, %v9782_v58, 0.0 }
0x12b9   :  { %4179 = vadd.xlane.f32.xlu1 %v4178_v57 }
0x12bb   :  { %v9784_v14 = vpop.eup %9783 }
0x12bc   :  { %v4181_v9 = vsel %vm3270_vm4, %v9784_v14, 0.0 }
0x12bd   :  { %4182 = vadd.xlane.f32.xlu1 %v4181_v9 }
0x12bf   :  { %v9786_v20 = vpop.eup %9785 }
0x12c0   :  { %v4187_v11 = vsel %vm3270_vm4, %v9786_v20, 0.0 }
0x12c1   :  { %4188 = vadd.xlane.f32.xlu1 %v4187_v11 }
0x1342   :  { %v4186_v52 = vpop.xlane.xlu1 %4185 }
0x1346   :  { %v4180_v37 = vpop.xlane.xlu1 %4179 }
0x1347   :  { %9787 = vrcp.f32 %v4180_v37 }
0x134a   :  { %v4183_v8 = vpop.xlane.xlu1 %4182 }
0x134b   :  { %9789 = vrcp.f32 %v4183_v8 }
0x134c   :  { %9791 = vrcp.f32 %v4186_v52 }
0x134e   :  { %v4189_v42 = vpop.xlane.xlu1 %4188 }
0x134f   :  { %9793 = vrcp.f32 %v4189_v42 }
0x1351   :  { %v9788_v32 = vpop.eup %9787 }
0x1352   :  { %v4191_v4 = vmul.f32 %v9788_v32, %v9782_v58 }
0x1355   :  { %v9790_v25 = vpop.eup %9789 }
0x1356   :  { %v4193_v60 = vmul.f32 %v9790_v25, %v9784_v14  ;;  %v9792_v1 = vpop.eup %9791 }
0x1357   :  { %v4195_v22 = vmul.f32 %v9792_v1, %v9780_v7 }
0x1358   :  { %v4198_v13 = vpack.c.bf16 %v4193_v60, %v4191_v4 }
0x1359   :  { %v9794_v21 = vpop.eup %9793 }
0x135a   :  { %v4197_v40 = vmul.f32 %v9794_v21, %v9786_v20  ;;  %8932 = vmatprep.mubr.msk.bf16.mxu1 %vm3270_vm4, %v4198_v13 }
0x135c   :  { %v4199_v26 = vpack.c.bf16 %v4197_v40, %v4195_v22  ;;  %v9403_v22 = vld [vmem:[%s12689_s16 + $0x40] sm:$0xff]  }
0x135d   :  { %8364 = vmatprep.subr.bf16.mxu0 %v9403_v22  ;;  %v9419_v40 = vld [vmem:[%s12689_s16 + $0xc0] sm:$0xff]  }
0x135e   :  { %8933 = vmatmul.mubr.msk.bf16.vlgmr.msra.gmra.mrb[80].mxu1 %vm3270_vm4, %v4199_v26  ;;  %v9420_v26 = vld [vmem:[%s12689_s16 + $0x80] sm:$0xff]  }
0x135f   :  { %8937 = vmatpush3.bf16.msra.mxu1 %v11729_v47  ;;  %8952 = vmatprep.mubr.bf16.mxu1 %v4255_v3  ;;  %v9411_v22 = vld [vmem:[%s12689_s16 + $0x60] sm:$0xff]  }
0x1360   :  { %8938 = vmatprep.subr.bf16.mxu1 %v11734_v50 }
0x1363   :  { %8939 = vmatpush3.bf16.msra.mxu1 %v11734_v50 }
0x1364   :  { %8940 = vmatprep.subr.bf16.mxu1 %v11738_v18 }
0x1367   :  { %8941 = vmatpush3.bf16.msra.mxu1 %v11738_v18 }
0x1368   :  { %8942 = vmatprep.subr.bf16.mxu1 %v11742_v38 }
0x136b   :  { %8943 = vmatpush3.bf16.msra.mxu1 %v11742_v38 }
0x136c   :  { %8944 = vmatprep.subr.bf16.mxu1 %v11746_v62 }
0x136f   :  { %8945 = vmatpush3.bf16.msra.mxu1 %v11746_v62 }
0x1370   :  { %8946 = vmatprep.subr.bf16.mxu1 %v11750_v35 }
0x1373   :  { %8947 = vmatpush3.bf16.msra.mxu1 %v11750_v35 }
0x1374   :  { %8948 = vmatprep.subr.bf16.mxu1 %v11754_v33 }
0x1377   :  { %8949 = vmatpush3.bf16.msra.mxu1 %v11754_v33 }
0x1378   :  { %8950 = vmatprep.subr.bf16.mxu1 %v11758_v16 }
0x137b   :  { %8951 = vmatpush3.bf16.msra.mxu1 %v11758_v16 }
0x137c   :  { %8392 = vmatprep.subr.bf16.mxu1 %v9419_v40  ;;  %v9415_v40 = vld [vmem:[%s12689_s16 + $0x70] sm:$0xff]  }
0x137e   :  { %8953 = vmatmul.mubr.bf16.vlgmr.msra.gmra.mrb[84].mxu1 %v4256_v5 }
0x137f   :  { %8393 = vmatpush3.bf16.msra.mxu1 %v9420_v26  ;;  %v9416_v26 = vld [vmem:[%s12689_s16 + $0x30] sm:$0xff]  }
0x1431   :  { %v11965_v47 = vpop.f32.mrb[80].mxu1 }
0x1432   :  { %v11967_v50 = vpop.f32.mrb[81].mxu1 }
0x1433   :  { %v11969_v18 = vpop.f32.mrb[82].mxu1 }
0x1434   :  { %v4413_v38 = vpack.c.bf16 %v11969_v18, %v11965_v47  ;;  %v11973_v62 = vpop.f32.mrb[83].mxu1 }
0x1435   :  { %v4409_v35 = vpack.c.bf16 %v11973_v62, %v11967_v50  ;;  %v7683_v50 = vld [vmem:[%s12690_s20] ss:$0 sm:$0xff] }
0x1451   :  { %v8954_v33 = vpop.f32.mrb[84].mxu1 }
0x1452   :  { %v4291_v16 = vpop.f32.mrb[85].mxu1  ;;  %v4300_v55 = vadd.f32 %v8954_v33, %v11829_v24  ;;  %v9421_v33 = vld [vmem:[%s12689_s16 + $0xc8] sm:$0xff]  }
0x1453   :  { %v4292_v45 = vadd.f32 %v4291_v16, %v11816_v6  ;;  %v8955_v51 = vpop.f32.mrb[86].mxu1  ;;  %v9422_v16 = vld [vmem:[%s12689_s16 + $0x88] sm:$0xff]   ;;  %8394 = vmatprep.subr.bf16.mxu1 %v9421_v33  ;;  %v9417_v33 = vld [vmem:[%s12689_s16 + $0x78] sm:$0xff]  }
0x1454   :  { %v4303_v3 = vadd.f32 %v8955_v51, %v11819_v53  ;;  %v4294_v31 = vpop.f32.mrb[87].mxu1  ;;  %v4312_v58 = vsel %vm3270_vm4, %v4300_v55, -inf  ;;  %8395 = vmatpush3.bf16.msra.mxu1 %v9422_v16  ;;  %v9424_v51 = vld [vmem:[%s12689_s16 + $0x90] sm:$0xff]   ;;  %v9418_v16 = vld [vmem:[%s12689_s16 + $0x38] sm:$0xff]  }
0x1455   :  { %v4295_v46 = vadd.f32 %v4294_v31, %v11822_v23  ;;  %v4306_v5 = vsel %vm3270_vm4, %v4292_v45, -inf  ;;  %v9426_v31 = vld [vmem:[%s12689_s16 + $0x98] sm:$0xff]  }
0x1456   :  { %4307 = vmax.xlane.f32.xlu1 %v4306_v5  ;;  %v4315_v7 = vsel %vm3270_vm4, %v4303_v3, -inf  ;;  %v9428_v5 = vld [vmem:[%s12689_s16 + $0xa0] sm:$0xff]  }
0x1457   :  { %4316 = vmax.xlane.f32.xlu0 %v4315_v7  ;;  %v4309_v56 = vsel %vm3270_vm4, %v4295_v46, -inf  ;;  %v9429_v7 = vld [vmem:[%s12689_s16 + $0xe8] sm:$0xff]  }
0x145a   :  { %4310 = vmax.xlane.f32.xlu1 %v4309_v56  ;;  %v9431_v56 = vld [vmem:[%s12689_s16 + $0xf0] sm:$0xff]  }
0x145e   :  { %4313 = vmax.xlane.f32.xlu1 %v4312_v58 }
0x14e3   :  { %v4308_v6 = vpop.xlane.xlu1 %4307 }
0x14e4   :  { %v4318_v57 = vsub.f32 %v4292_v45, %v4308_v6  ;;  %v4317_v53 = vpop.xlane.xlu0 %4316  ;;  %v9423_v45 = vld [vmem:[%s12689_s16 + $0xd0] sm:$0xff]  }
0x14e5   :  { %v4321_v9 = vsub.f32 %v4303_v3, %v4317_v53  ;;  %8396 = vmatprep.subr.bf16.mxu1 %v9423_v45  ;;  %v9425_v3 = vld [vmem:[%s12689_s16 + $0xd8] sm:$0xff]   ;;  %v9432_v45 = vld [vmem:[%s12689_s16 + $0xb0] sm:$0xff]  }
0x14e6   :  { %v4322_v14 = vmul.f32 1.442695, %v4318_v57  ;;  %8397 = vmatpush3.bf16.msra.mxu1 %v9424_v51  ;;  %v9433_v51 = vld [vmem:[%s12689_s16 + $0xf8] sm:$0xff]  }
0x14e7   :  { %v4311_v23 = vpop.xlane.xlu1 %4310  ;;  %v4328_v11 = vmul.f32 1.442695, %v4321_v9  ;;  %8398 = vmatprep.subr.bf16.mxu1 %v9425_v3  ;;  %v9434_v3 = vld [vmem:[%s12689_s16 + $0xb8] sm:$0xff]  }
0x14e8   :  { %9795 = vpow2.f32 %v4322_v14  ;;  %v4319_v20 = vsub.f32 %v4295_v46, %v4311_v23  ;;  %v9427_v46 = vld [vmem:[%s12689_s16 + $0xe0] sm:$0xff]  }
0x14ea   :  { %v4324_v52 = vmul.f32 1.442695, %v4319_v20  ;;  %8399 = vmatpush3.bf16.msra.mxu1 %v9426_v31 }
0x14eb   :  { %v4314_v37 = vpop.xlane.xlu1 %4313  ;;  %8400 = vmatprep.subr.bf16.mxu1 %v9427_v46 }
0x14ec   :  { %9797 = vpow2.f32 %v4324_v52  ;;  %v4320_v8 = vsub.f32 %v4300_v55, %v4314_v37  ;;  %v9430_v55 = vld [vmem:[%s12689_s16 + $0xa8] sm:$0xff]  }
0x14ed   :  { %9799 = vpow2.f32 %v4328_v11 }
0x14ee   :  { %v4326_v24 = vmul.f32 1.442695, %v4320_v8  ;;  %8401 = vmatpush3.bf16.msra.mxu1 %v9428_v5 }
0x14ef   :  { %8402 = vmatprep.subr.bf16.mxu1 %v9429_v7 }
0x14f0   :  { %9801 = vpow2.f32 %v4326_v24 }
0x14f2   :  { %v9796_v42 = vpop.eup %9795  ;;  %8403 = vmatpush3.bf16.msra.mxu1 %v9430_v55 }
0x14f3   :  { %v4330_v32 = vsel %vm3270_vm4, %v9796_v42, 0.0  ;;  %8404 = vmatprep.subr.bf16.mxu1 %v9431_v56 }
0x14f4   :  { %4331 = vadd.xlane.f32.xlu1 %v4330_v32  ;;  %v9404_v32 = vld [vmem:[%s12689_s16] sm:$0xff]  }
0x14f6   :  { %v9798_v25 = vpop.eup %9797  ;;  %8405 = vmatpush3.bf16.msra.mxu1 %v9432_v45 }
0x14f7   :  { %v4333_v4 = vsel %vm3270_vm4, %v9798_v25, 0.0  ;;  %v9800_v60 = vpop.eup %9799  ;;  %8406 = vmatprep.subr.bf16.mxu1 %v9433_v51 }
0x14f8   :  { %4334 = vadd.xlane.f32.xlu0 %v4333_v4  ;;  %v4339_v13 = vsel %vm3270_vm4, %v9800_v60, 0.0 }
0x14fa   :  { %v9802_v1 = vpop.eup %9801  ;;  %8407 = vmatpush3.bf16.msra.mxu1 %v9434_v3 }
0x14fb   :  { %v4336_v21 = vsel %vm3270_vm4, %v9802_v1, 0.0 }
0x14fc   :  { %4340 = vadd.xlane.f32.xlu0 %v4339_v13  ;;  %4337 = vadd.xlane.f32.xlu1 %v4336_v21  ;;  %v9405_v13 = vld [vmem:[%s12689_s16 + $0x48] sm:$0xff]   ;;  %v9410_v21 = vld [vmem:[%s12689_s16 + $0x18] sm:$0xff]  }
0x1581   :  { %v4332_v58 = vpop.xlane.xlu1 %4331 }
0x1582   :  { %9803 = vrcp.f32 %v4332_v58 }
0x1585   :  { %v4335_v6 = vpop.xlane.xlu0 %4334 }
0x1586   :  { %9805 = vrcp.f32 %v4335_v6 }
0x1589   :  { %v4341_v57 = vpop.xlane.xlu0 %4340  ;;  %v4338_v53 = vpop.xlane.xlu1 %4337 }
0x158a   :  { %9807 = vrcp.f32 %v4341_v57 }
0x158b   :  { %9809 = vrcp.f32 %v4338_v53 }
0x158c   :  { %v9804_v14 = vpop.eup %9803 }
0x158d   :  { %v4343_v23 = vmul.f32 %v9804_v14, %v9796_v42  ;;  %v9406_v42 = vld [vmem:[%s12689_s16 + $0x8] sm:$0xff]  }
0x1590   :  { %v9806_v9 = vpop.eup %9805 }
0x1591   :  { %v4345_v20 = vmul.f32 %v9806_v9, %v9798_v25  ;;  %v9407_v25 = vld [vmem:[%s12689_s16 + $0x50] sm:$0xff]  }
0x1593   :  { %v4350_v11 = vpack.c.bf16 %v4345_v20, %v4343_v23 }
0x1594   :  { %v9808_v52 = vpop.eup %9807 }
0x1595   :  { %v9810_v37 = vpop.eup %9809  ;;  %v4349_v8 = vmul.f32 %v9808_v52, %v9800_v60  ;;  %8960 = vmatprep.mubr.msk.bf16.mxu0 %vm3270_vm4, %v4350_v11  ;;  %v9408_v60 = vld [vmem:[%s12689_s16 + $0x10] sm:$0xff]  }
0x1596   :  { %v4347_v24 = vmul.f32 %v9810_v37, %v9802_v1  ;;  %v9409_v1 = vld [vmem:[%s12689_s16 + $0x58] sm:$0xff]  }
0x1598   :  { %v4351_v4 = vpack.c.bf16 %v4349_v8, %v4347_v24 }
0x159a   :  { %8961 = vmatmul.mubr.msk.bf16.vlgmr.msra.gmra.mrb[88].mxu0 %vm3270_vm4, %v4351_v4 }
0x159b   :  { %8365 = vmatpush3.bf16.msra.mxu0 %v9404_v32  ;;  %4710 = vmatprep.mubr.bf16.mxu0 %v4408_v15  ;;  %v9414_v15 = vld [vmem:[%s12689_s16 + $0x28] sm:$0xff]  }
0x159c   :  { %8366 = vmatprep.subr.bf16.mxu0 %v9405_v13 }
0x159f   :  { %8367 = vmatpush3.bf16.msra.mxu0 %v9406_v42 }
0x15a0   :  { %8368 = vmatprep.subr.bf16.mxu0 %v9407_v25 }
0x15a3   :  { %8369 = vmatpush3.bf16.msra.mxu0 %v9408_v60 }
0x15a4   :  { %8370 = vmatprep.subr.bf16.mxu0 %v9409_v1 }
0x15a7   :  { %8371 = vmatpush3.bf16.msra.mxu0 %v9410_v21 }
0x15a8   :  { %8372 = vmatprep.subr.bf16.mxu0 %v9411_v22  ;;  %v9437_v22 = vld [vmem:[%s12691_s14 + $0x4] ss:$8 sps:$4 sm:$0xff]  }
0x15ab   :  { %8373 = vmatpush3.bf16.msra.mxu0 %v9412_v41  ;;  %v9440_v41 = vld [vmem:[%s12691_s14 + $0x14] ss:$8 sps:$4 sm:$0xff]  }
0x15ac   :  { %8374 = vmatprep.subr.bf16.mxu0 %v9413_v28  ;;  %v9438_v28 = vld [vmem:[%s12691_s14 + $0x10] ss:$8 sps:$4 sm:$0xff]  }
0x15af   :  { %8375 = vmatpush3.bf16.msra.mxu0 %v9414_v15 }
0x15b0   :  { %8376 = vmatprep.subr.bf16.mxu0 %v9415_v40 }
0x15b3   :  { %8377 = vmatpush3.bf16.msra.mxu0 %v9416_v26 }
0x15b4   :  { %8378 = vmatprep.subr.bf16.mxu0 %v9417_v33 }
0x15b7   :  { %8379 = vmatpush3.bf16.msra.mxu0 %v9418_v16 }
0x15b8   :  { %4957 = vmatprep.subr.bf16.mxu0 %v9437_v22 }
0x15ba   :  { %4711 = vmatmul.mubr.bf16.vlgmr.msra.gmra.mrb[92].mxu0 %v4407_v48 }
0x15bb   :  { %4718 = vmatprep.mubr.bf16.mxu0 %v4412_v54 }
0x15c2   :  { %4719 = vmatmul.mubr.bf16.gmra.mrb[96].mxu0 %v4411_v12 }
0x15c3   :  { %4989 = vmatprep.mubr.bf16.mxu0 %v10587_v0 }
0x166d   :  { %v8962_v31 = vpop.f32.mrb[88].mxu0 }
0x166e   :  { %v4392_v46 = vpop.f32.mrb[89].mxu0 }
0x166f   :  { %v8963_v59 = vpop.f32.mrb[90].mxu0 }
0x1670   :  { %v4414_v44 = vpack.c.bf16 %v8963_v59, %v8962_v31  ;;  %v4395_v48 = vpop.f32.mrb[91].mxu0 }
0x1671   :  { %v4410_v5 = vpack.c.bf16 %v4395_v48, %v4392_v46 }
0x1673   :  { %4759 = vmatprep.mubr.bf16.mxu1 %v4410_v5 }
0x1674   :  { %4760 = vmatmul.mubr.bf16.vlgmr.msra.gmra.mrb[88].mxu1 %v4409_v35 }
0x1675   :  { %4767 = vmatprep.mubr.bf16.mxu1 %v4414_v44 }
0x167c   :  { %4768 = vmatmul.mubr.bf16.gmra.mrb[92].mxu1 %v4413_v38 }
0x168d   :  { %v8380_v2 = vpop.f32.mrb[92].mxu0 }
0x168e   :  { %v8381_v10 = vpop.f32.mrb[93].mxu0 }
0x168f   :  { %v8382_v12 = vadd.f32 %v8381_v10, %v8380_v2  ;;  %v8383_v29 = vpop.f32.mrb[94].mxu0  ;;  %v9443_v2 = vld [vmem:[%s12691_s14 + $0x24] ss:$8 sps:$4 sm:$0xff]   ;;  %v9441_v10 = vld [vmem:[%s12691_s14 + $0x20] ss:$8 sps:$4 sm:$0xff]  }
0x1690   :  { %v8384_v61 = vpop.f32.mrb[95].mxu0 }
0x1691   :  { %v8385_v54 = vadd.f32 %v8384_v61, %v8383_v29  ;;  %v4713_v53 = vadd.f32 %v8382_v12, %v7683_v50  ;;  %v9446_v12 = vld [vmem:[%s12691_s14 + $0x34] ss:$8 sps:$4 sm:$0xff]   ;;  %v9444_v29 = vld [vmem:[%s12691_s14 + $0x30] ss:$8 sps:$4 sm:$0xff]   ;;  %v9449_v61 = vld [vmem:[%s12691_s14 + $0x44] ss:$8 sps:$4 sm:$0xff]  }
0x1693   :  { %v4716_v18 = vadd.f32 %v8385_v54, %v7683_v50  ;;  %v9447_v54 = vld [vmem:[%s12691_s14 + $0x40] ss:$8 sps:$4 sm:$0xff]  }
0x1695   :  { %v8386_v7 = vpop.f32.mrb[96].mxu0 }
0x1696   :  { %v8387_v55 = vpop.f32.mrb[97].mxu0 }
0x1697   :  { %v8388_v56 = vadd.f32 %v8387_v55, %v8386_v7  ;;  %v8389_v58 = vpop.f32.mrb[98].mxu0  ;;  %v9452_v7 = vld [vmem:[%s12691_s14 + $0x54] ss:$8 sps:$4 sm:$0xff]   ;;  %v9450_v55 = vld [vmem:[%s12691_s14 + $0x50] ss:$8 sps:$4 sm:$0xff]  }
0x1698   :  { %v8390_v6 = vpop.f32.mrb[99].mxu0 }
0x1699   :  { %v8391_v57 = vadd.f32 %v8390_v6, %v8389_v58  ;;  %v4721_v24 = vadd.f32 %v8388_v56, %v7683_v50  ;;  %v9453_v56 = vld [vmem:[%s12691_s14 + $0x60] ss:$8 sps:$4 sm:$0xff]   ;;  %v9455_v58 = vld [vmem:[%s12691_s14 + $0x64] ss:$8 sps:$4 sm:$0xff]   ;;  %v9458_v6 = vld [vmem:[%s12691_s14 + $0x74] ss:$8 sps:$4 sm:$0xff]  }
0x169b   :  { %v4724_v42 = vadd.f32 %v8391_v57, %v7683_v50  ;;  %v9456_v57 = vld [vmem:[%s12691_s14 + $0x70] ss:$8 sps:$4 sm:$0xff]   ;;  %v9459_v50 = vld [vmem:[%s12692_s27 + $0x40] sm:$0xff]  }
0x169c   :  { %8420 = vmatprep.subr.bf16.mxu1 %v9459_v50 }
0x1747   :  { %v8408_v62 = vpop.f32.mrb[88].mxu1 }
0x1748   :  { %v8409_v35 = vpop.f32.mrb[89].mxu1 }
0x1749   :  { %v8410_v14 = vadd.f32 %v8409_v35, %v8408_v62  ;;  %v8411_v9 = vpop.f32.mrb[90].mxu1  ;;  %v9460_v62 = vld [vmem:[%s12692_s27] sm:$0xff]   ;;  %v9461_v35 = vld [vmem:[%s12692_s27 + $0x48] sm:$0xff]  }
0x174a   :  { %v8412_v47 = vpop.f32.mrb[91].mxu1  ;;  %8421 = vmatpush3.bf16.msra.mxu1 %v9460_v62 }
0x174b   :  { %v4762_v38 = vadd.f32 %v8410_v14, %v4713_v53  ;;  %v8413_v23 = vadd.f32 %v8412_v47, %v8411_v9  ;;  %v9462_v53 = vld [vmem:[%s12692_s27 + $0x8] sm:$0xff]   ;;  %8422 = vmatprep.subr.bf16.mxu1 %v9461_v35  ;;  %v9463_v14 = vld [vmem:[%s12692_s27 + $0x50] sm:$0xff]   ;;  %v9465_v47 = vld [vmem:[%s12692_s27 + $0x58] sm:$0xff]  }
0x174c   :  { %v9464_v9 = vld [vmem:[%s12692_s27 + $0x10] sm:$0xff]  }
0x174d   :  { %v4765_v20 = vadd.f32 %v8413_v23, %v4716_v18  ;;  %v4776_v11 = vadd.f32 %v4762_v38, %v11701_v63  ;;  %v9466_v18 = vld [vmem:[%s12692_s27 + $0x18] sm:$0xff]   ;;  %v9467_v38 = vld [vmem:[%s12692_s27 + $0x60] sm:$0xff]  }
0x174e   :  { %8423 = vmatpush3.bf16.msra.mxu1 %v9462_v53  ;;  %v9468_v23 = vld [vmem:[%s12692_s27 + $0x20] sm:$0xff]  }
0x174f   :  { %v8414_v52 = vpop.f32.mrb[92].mxu1  ;;  %4782 = vadd.xlane.f32.xlu1 %v4776_v11  ;;  %v4777_v37 = vadd.f32 %v11699_v30, %v4765_v20  ;;  %v9435_v30 = vld [vmem:[%s12691_s14] ss:$8 sps:$4 sm:$0xff]   ;;  %8424 = vmatprep.subr.bf16.mxu1 %v9463_v14 }
0x1750   :  { %v8415_v8 = vpop.f32.mrb[93].mxu1  ;;  %4958 = vmatpush1.bf16.msra.mxu0 %v9435_v30  ;;  %v9469_v20 = vld [vmem:[%s12692_s27 + $0x68] sm:$0xff]  }
0x1751   :  { %v8416_v32 = vadd.f32 %v8415_v8, %v8414_v52  ;;  %v8417_v4 = vpop.f32.mrb[94].mxu1  ;;  %4784 = vadd.xlane.f32.xlu0 %v4777_v37  ;;  %4959 = vmatprep.subr.bf16.mxu0 %v9440_v41 }
0x1752   :  { %v8418_v13 = vpop.f32.mrb[95].mxu1  ;;  %8425 = vmatpush3.bf16.msra.mxu1 %v9464_v9 }
0x1753   :  { %v4770_v25 = vadd.f32 %v8416_v32, %v4721_v24  ;;  %v8419_v60 = vadd.f32 %v8418_v13, %v8417_v4  ;;  %8426 = vmatprep.subr.bf16.mxu1 %v9465_v47 }
0x1754   :  { %4960 = vmatpush1.bf16.msra.mxu0 %v9438_v28 }
0x1755   :  { %v4773_v1 = vadd.f32 %v8419_v60, %v4724_v42  ;;  %v4778_v63 = vadd.f32 %v4770_v25, %v11717_v36  ;;  %4961 = vmatprep.subr.bf16.mxu0 %v9443_v2  ;;  %v9471_v2 = vld [vmem:[%s12692_s27 + $0x70] sm:$0xff]  }
0x1756   :  { %8427 = vmatpush3.bf16.msra.mxu1 %v9466_v18 }
0x1757   :  { %4786 = vadd.xlane.f32.xlu1 %v4778_v63  ;;  %v4779_v21 = vadd.f32 %v11715_v49, %v4773_v1  ;;  %8428 = vmatprep.subr.bf16.mxu1 %v9467_v38 }
0x1758   :  { %4962 = vmatpush1.bf16.msra.mxu0 %v9441_v10  ;;  %v9472_v10 = vld [vmem:[%s12692_s27 + $0x30] sm:$0xff]  }
0x1759   :  { %4788 = vadd.xlane.f32.xlu0 %v4779_v21  ;;  %4963 = vmatprep.subr.bf16.mxu0 %v9446_v12  ;;  %v9474_v12 = vld [vmem:[%s12692_s27 + $0x38] sm:$0xff]  }
0x175a   :  { %8429 = vmatpush3.bf16.msra.mxu1 %v9468_v23 }
0x175b   :  { %8430 = vmatprep.subr.bf16.mxu1 %v9469_v20 }
0x175c   :  { %4964 = vmatpush1.bf16.msra.mxu0 %v9444_v29  ;;  %v4865_v29 = vld [vmem:[#allocation32] sm:$0x3] }
0x175d   :  { %4965 = vmatprep.subr.bf16.mxu0 %v9449_v61  ;;  %v4870_v61 = vrot.slane %v4865_v29, %v11347_v27 }
0x1760   :  { %4966 = vmatpush1.bf16.msra.mxu0 %v9447_v54  ;;  %v4874_v54 = vrot.slane %v4865_v29, %v11766_v43  ;;  %v9480_v29 = vld [vmem:[%s12686_s9 + $0x10c] ss:$16 sps:$4 sm:$0xff]  }
0x1761   :  { %4967 = vmatprep.subr.bf16.mxu0 %v9452_v7 }
0x1764   :  { %4968 = vmatpush1.bf16.msra.mxu0 %v9450_v55 }
0x1765   :  { %4969 = vmatprep.subr.bf16.mxu0 %v9455_v58 }
0x1768   :  { %4970 = vmatpush1.bf16.msra.mxu0 %v9453_v56 }
0x1769   :  { %4971 = vmatprep.subr.bf16.mxu0 %v9458_v6 }
0x176c   :  { %4972 = vmatpush1.bf16.msra.mxu0 %v9456_v57 }
0x17dc   :  { %v4783_v15 = vpop.xlane.xlu1 %4782 }
0x17dd   :  { %v4791_v40 = vmul.f32 0.0078125, %v4783_v15  ;;  %v7717_v15 = vld [vmem:[#allocation31] ss:$0 sm:$0xff] }
0x17de   :  { %v4785_v26 = vpop.xlane.xlu0 %4784 }
0x17df   :  { %v12051_v33 = vsub.f32 %v4776_v11, %v4791_v40  ;;  %v4792_v16 = vmul.f32 0.0078125, %v4785_v26 }
0x17e1   :  { %v4799_v36 = vmul.f32 %v12051_v33, %v12051_v33  ;;  %v12055_v49 = vsub.f32 %v4777_v37, %v4792_v16 }
0x17e3   :  { %4803 = vadd.xlane.f32.xlu1 %v4799_v36  ;;  %v4800_v45 = vmul.f32 %v12055_v49, %v12055_v49 }
0x17e4   :  { %v4787_v51 = vpop.xlane.xlu1 %4786 }
0x17e5   :  { %v4793_v3 = vmul.f32 0.0078125, %v4787_v51  ;;  %4805 = vadd.xlane.f32.xlu0 %v4800_v45 }
0x17e6   :  { %v4789_v31 = vpop.xlane.xlu0 %4788 }
0x17e7   :  { %v12059_v46 = vsub.f32 %v4778_v63, %v4793_v3  ;;  %v4794_v59 = vmul.f32 0.0078125, %v4789_v31 }
0x17e9   :  { %v12061_v44 = vsub.f32 %v4779_v21, %v4794_v59  ;;  %v4801_v48 = vmul.f32 %v12059_v46, %v12059_v46  ;;  %v7716_v21 = vld [vmem:[#allocation29] ss:$0 sm:$0xff] }
0x17eb   :  { %4807 = vadd.xlane.f32.xlu1 %v4801_v48  ;;  %v4802_v5 = vmul.f32 %v12061_v44, %v12061_v44 }
0x17ed   :  { %4809 = vadd.xlane.f32.xlu0 %v4802_v5 }
0x1870   :  { %v4804_v11 = vpop.xlane.xlu1 %4803 }
0x1871   :  { %v4811_v52 = vmul.f32 0.0078125, %v4804_v11 }
0x1872   :  { %v4806_v37 = vpop.xlane.xlu0 %4805 }
0x1873   :  { %v4815_v8 = vadd.f32 1e-05, %v4811_v52  ;;  %v4812_v24 = vmul.f32 0.0078125, %v4806_v37 }
0x1875   :  { %9811 = vrsqrt.f32 %v4815_v8  ;;  %v4816_v32 = vadd.f32 1e-05, %v4812_v24 }
0x1877   :  { %9813 = vrsqrt.f32 %v4816_v32 }
0x1878   :  { %v4808_v4 = vpop.xlane.xlu1 %4807 }
0x1879   :  { %v4813_v13 = vmul.f32 0.0078125, %v4808_v4 }
0x187a   :  { %v4810_v42 = vpop.xlane.xlu0 %4809 }
0x187b   :  { %v4817_v25 = vadd.f32 1e-05, %v4813_v13  ;;  %v4814_v60 = vmul.f32 0.0078125, %v4810_v42 }
0x187d   :  { %9815 = vrsqrt.f32 %v4817_v25  ;;  %v4818_v1 = vadd.f32 1e-05, %v4814_v60 }
0x187f   :  { %v9812_v63 = vpop.eup %9811  ;;  %9817 = vrsqrt.f32 %v4818_v1 }
0x1880   :  { %v4823_v30 = vmul.f32 %v9812_v63, %v12051_v33  ;;  %v7734_v63 = vld [vmem:[#allocation34] ss:$0 sm:$0xff] }
0x1881   :  { %v9814_v22 = vpop.eup %9813 }
0x1882   :  { %v4833_v41 = vmul.f32 %v7716_v21, %v4823_v30  ;;  %v4824_v28 = vmul.f32 %v9814_v22, %v12055_v49 }
0x1884   :  { %v4834_v40 = vmul.f32 %v7716_v21, %v4824_v28  ;;  %v12092_v26 = vadd.f32 %v7717_v15, %v4833_v41 }
0x1886   :  { %v12094_v16 = vadd.f32 %v7717_v15, %v4834_v40 }
0x1887   :  { %v9816_v36 = vpop.eup %9815 }
0x1888   :  { %v4847_v45 = vpack.c.bf16 %v12094_v16, %v12092_v26  ;;  %v4825_v51 = vmul.f32 %v9816_v36, %v12059_v46  ;;  %v9470_v46 = vld [vmem:[%s12692_s27 + $0x28] sm:$0xff]  }
0x1889   :  { %v9818_v33 = vpop.eup %9817  ;;  %8431 = vmatpush3.bf16.msra.mxu1 %v9470_v46 }
0x188a   :  { %4990 = vmatmul.mubr.bf16.vlgmr.msra.gmra.mrb[100].mxu0 %v4847_v45  ;;  %v4826_v49 = vmul.f32 %v9818_v33, %v12061_v44  ;;  %v4835_v3 = vmul.f32 %v7716_v21, %v4825_v51  ;;  %8432 = vmatprep.subr.bf16.mxu1 %v9471_v2  ;;  %v9473_v44 = vld [vmem:[%s12692_s27 + $0x78] sm:$0xff]  }
0x188b   :  { %4999 = vmatprep.mubr.bf16.mxu0 %v10587_v0 }
0x188c   :  { %v4836_v31 = vmul.f32 %v7716_v21, %v4826_v49  ;;  %v12101_v59 = vadd.f32 %v7717_v15, %v4835_v3 }
0x188d   :  { %8433 = vmatpush3.bf16.msra.mxu1 %v9472_v10 }
0x188e   :  { %v12103_v48 = vadd.f32 %v7717_v15, %v4836_v31  ;;  %8434 = vmatprep.subr.bf16.mxu1 %v9473_v44  ;;  %v9477_v44 = vld [vmem:[%s12686_s9 + $0x104] ss:$16 sps:$4 sm:$0xff]  }
0x188f   :  { %5534 = vmatprep.subr.bf16.mxu0 %v9477_v44 }
0x1890   :  { %v4848_v5 = vpack.c.bf16 %v12103_v48, %v12101_v59 }
0x1891   :  { %8435 = vmatpush3.bf16.msra.mxu1 %v9474_v12  ;;  %v9478_v12 = vld [vmem:[%s12686_s9 + $0x108] ss:$16 sps:$4 sm:$0xff]  }
0x1892   :  { %5000 = vmatmul.mubr.bf16.gmra.mrb[104].mxu0 %v4848_v5  ;;  %5587 = vmatprep.subr.bf16.mxu1 %v9480_v29 }
0x1893   :  { %5566 = vmatprep.mubr.bf16.mxu0 %v10587_v0 }
0x195d   :  { %v4991_v7 = vpop.f32.mrb[100].mxu0 }
0x195e   :  { %v4992_v55 = vadd.f32 %v4991_v7, %v4870_v61  ;;  %v4993_v56 = vpop.f32.mrb[101].mxu0  ;;  %v9481_v7 = vld [vmem:[%s12686_s9 + $0x120] ss:$16 sps:$4 sm:$0xff]  }
0x195f   :  { %v4994_v58 = vadd.f32 %v4993_v56, %v4874_v54  ;;  %v4995_v6 = vpop.f32.mrb[102].mxu0 }
0x1960   :  { %v4996_v57 = vadd.f32 %v4995_v6, %v4870_v61  ;;  %v4997_v50 = vpop.f32.mrb[103].mxu0  ;;  %v5010_v35 = vmax.f32 %v4992_v55, 0.0  ;;  %v9484_v55 = vld [vmem:[%s12686_s9 + $0x128] ss:$16 sps:$4 sm:$0xff]  }
0x1961   :  { %v4998_v62 = vadd.f32 %v4997_v50, %v4874_v54  ;;  %v5011_v14 = vmax.f32 %v4994_v58, 0.0 }
0x1962   :  { %v5012_v53 = vmax.f32 %v4996_v57, 0.0 }
0x1963   :  { %v5013_v9 = vmax.f32 %v4998_v62, 0.0 }
0x1964   :  { %v5018_v47 = vpack.c.bf16 %v5012_v53, %v5010_v35 }
0x1965   :  { %v5019_v18 = vpack.c.bf16 %v5013_v9, %v5011_v14  ;;  %v5001_v38 = vpop.f32.mrb[104].mxu0 }
0x1966   :  { %v5002_v23 = vadd.f32 %v5001_v38, %v4870_v61  ;;  %v5003_v20 = vpop.f32.mrb[105].mxu0 }
0x1967   :  { %v5004_v11 = vadd.f32 %v5003_v20, %v4874_v54  ;;  %v5005_v52 = vpop.f32.mrb[106].mxu0  ;;  %5189 = vmatprep.mubr.bf16.mxu1 %v5019_v18  ;;  %v9489_v20 = vld [vmem:[%s12686_s9 + $0x144] ss:$16 sps:$4 sm:$0xff]  }
0x1968   :  { %v5006_v37 = vadd.f32 %v5005_v52, %v4870_v61  ;;  %v5007_v8 = vpop.f32.mrb[107].mxu0  ;;  %5190 = vmatmul.mubr.bf16.vlgmr.msra.gmra.mrb[96].mxu1 %v5018_v47  ;;  %v5014_v32 = vmax.f32 %v5002_v23, 0.0  ;;  %v9483_v61 = vld [vmem:[%s12686_s9 + $0x124] ss:$16 sps:$4 sm:$0xff]   ;;  %v9487_v52 = vld [vmem:[%s12686_s9 + $0x140] ss:$16 sps:$4 sm:$0xff]  }
0x1969   :  { %v5008_v24 = vadd.f32 %v5007_v8, %v4874_v54  ;;  %v5015_v13 = vmax.f32 %v5004_v11, 0.0  ;;  %v9486_v54 = vld [vmem:[%s12686_s9 + $0x12c] ss:$16 sps:$4 sm:$0xff]   ;;  %5588 = vmatpush1.bf16.msra.mxu1 %v9478_v12  ;;  %v9493_v8 = vld [vmem:[%s12686_s9 + $0x160] ss:$16 sps:$4 sm:$0xff]  }
0x196a   :  { %v5016_v4 = vmax.f32 %v5006_v37, 0.0  ;;  %5589 = vmatprep.subr.bf16.mxu1 %v9486_v54  ;;  %v9492_v11 = vld [vmem:[%s12686_s9 + $0x14c] ss:$16 sps:$4 sm:$0xff]   ;;  %v9490_v37 = vld [vmem:[%s12686_s9 + $0x148] ss:$16 sps:$4 sm:$0xff]  }
0x196b   :  { %v5017_v42 = vmax.f32 %v5008_v24, 0.0  ;;  %v9495_v24 = vld [vmem:[%s12686_s9 + $0x164] ss:$16 sps:$4 sm:$0xff]  }
0x196c   :  { %v5020_v25 = vpack.c.bf16 %v5016_v4, %v5014_v32  ;;  %v9496_v32 = vld [vmem:[%s12686_s9 + $0x168] ss:$16 sps:$4 sm:$0xff]   ;;  %v9498_v4 = vld [vmem:[%s12686_s9 + $0x16c] ss:$16 sps:$4 sm:$0xff]  }
0x196d   :  { %v5021_v60 = vpack.c.bf16 %v5017_v42, %v5015_v13  ;;  %5590 = vmatpush1.bf16.msra.mxu1 %v9484_v55  ;;  %v9501_v13 = vld [vmem:[%s12686_s9 + $0x184] ss:$16 sps:$4 sm:$0xff]   ;;  %v9504_v42 = vld [vmem:[%s12686_s9 + $0x18c] ss:$16 sps:$4 sm:$0xff]   ;;  %v7752_v55 = vld [vmem:[#allocation37] ss:$0 sm:$0xff] }
0x196e   :  { %5591 = vmatprep.subr.bf16.mxu1 %v9492_v11 }
0x196f   :  { %5197 = vmatprep.mubr.bf16.mxu1 %v5021_v60  ;;  %v9502_v60 = vld [vmem:[%s12686_s9 + $0x188] ss:$16 sps:$4 sm:$0xff]  }
0x1970   :  { %5198 = vmatmul.mubr.bf16.gmra.mrb[100].mxu1 %v5020_v25  ;;  %v9499_v25 = vld [vmem:[%s12686_s9 + $0x180] ss:$16 sps:$4 sm:$0xff]  }
0x1971   :  { %5619 = vmatprep.mubr.bf16.mxu1 %v10587_v0  ;;  %5592 = vmatpush1.bf16.msra.mxu1 %v9490_v37 }
0x1972   :  { %5593 = vmatprep.subr.bf16.mxu1 %v9498_v4 }
0x1975   :  { %5594 = vmatpush1.bf16.msra.mxu1 %v9496_v32 }
0x1976   :  { %5595 = vmatprep.subr.bf16.mxu1 %v9504_v42 }
0x1979   :  { %5596 = vmatpush1.bf16.msra.mxu1 %v9502_v60 }
0x1a3b   :  { %v8436_v1 = vpop.f32.mrb[96].mxu1 }
0x1a3c   :  { %v8437_v21 = vpop.f32.mrb[97].mxu1 }
0x1a3d   :  { %v8438_v30 = vadd.f32 %v8437_v21, %v8436_v1  ;;  %v8439_v22 = vpop.f32.mrb[98].mxu1  ;;  %v9505_v1 = vld [vmem:[%s12686_s9 + $0x1a0] ss:$16 sps:$4 sm:$0xff]   ;;  %v9508_v21 = vld [vmem:[%s12686_s9 + $0x1a8] ss:$16 sps:$4 sm:$0xff]  }
0x1a3e   :  { %v8440_v41 = vpop.f32.mrb[99].mxu1 }
0x1a3f   :  { %v5192_v28 = vadd.f32 %v8438_v30, %v7734_v63  ;;  %v8441_v15 = vadd.f32 %v8440_v41, %v8439_v22  ;;  %v9510_v30 = vld [vmem:[%s12686_s9 + $0x1ac] ss:$16 sps:$4 sm:$0xff]   ;;  %v9513_v22 = vld [vmem:[%s12686_s9 + $0x1c4] ss:$16 sps:$4 sm:$0xff]  }
0x1a40   :  { %v9516_v41 = vld [vmem:[%s12686_s9 + $0x1cc] ss:$16 sps:$4 sm:$0xff]   ;;  %5597 = vmatprep.subr.bf16.mxu1 %v9510_v30 }
0x1a41   :  { %v5195_v40 = vadd.f32 %v8441_v15, %v7734_v63  ;;  %v5206_v36 = vadd.f32 %v5192_v28, %v12092_v26  ;;  %5598 = vmatpush1.bf16.msra.mxu1 %v9508_v21  ;;  %v9511_v28 = vld [vmem:[%s12686_s9 + $0x1c0] ss:$16 sps:$4 sm:$0xff]   ;;  %v9514_v15 = vld [vmem:[%s12686_s9 + $0x1c8] ss:$16 sps:$4 sm:$0xff]  }
0x1a42   :  { %5599 = vmatprep.subr.bf16.mxu1 %v9516_v41 }
0x1a43   :  { %5212 = vadd.xlane.f32.xlu1 %v5206_v36  ;;  %v8442_v45 = vpop.f32.mrb[100].mxu1  ;;  %v5207_v51 = vadd.f32 %v5195_v40, %v12094_v16  ;;  %v9475_v16 = vld [vmem:[%s12686_s9 + $0x100] ss:$16 sps:$4 sm:$0xff]   ;;  %v9519_v40 = vld [vmem:[%s12686_s9 + $0x1e4] ss:$16 sps:$4 sm:$0xff]  }
0x1a44   :  { %v8443_v33 = vpop.f32.mrb[101].mxu1  ;;  %5535 = vmatpush1.bf16.msra.mxu0 %v9475_v16 }
0x1a45   :  { %v8444_v49 = vadd.f32 %v8443_v33, %v8442_v45  ;;  %5214 = vadd.xlane.f32.xlu0 %v5207_v51  ;;  %v8445_v3 = vpop.f32.mrb[102].mxu1  ;;  %5536 = vmatprep.subr.bf16.mxu0 %v9483_v61  ;;  %v9517_v45 = vld [vmem:[%s12686_s9 + $0x1e0] ss:$16 sps:$4 sm:$0xff]   ;;  %v7751_v61 = vld [vmem:[#allocation35] ss:$0 sm:$0xff] }
0x1a46   :  { %v8446_v31 = vpop.f32.mrb[103].mxu1  ;;  %5600 = vmatpush1.bf16.msra.mxu1 %v9514_v15 }
0x1a47   :  { %v5200_v5 = vadd.f32 %v8444_v49, %v7734_v63  ;;  %v8447_v46 = vadd.f32 %v8446_v31, %v8445_v3 }
0x1a48   :  { %5537 = vmatpush1.bf16.msra.mxu0 %v9481_v7 }
0x1a49   :  { %v5203_v2 = vadd.f32 %v8447_v46, %v7734_v63  ;;  %v5208_v26 = vadd.f32 %v5200_v5, %v12101_v59  ;;  %5538 = vmatprep.subr.bf16.mxu0 %v9489_v20  ;;  %v9507_v63 = vld [vmem:[%s12686_s9 + $0x1a4] ss:$16 sps:$4 sm:$0xff]  }
0x1a4b   :  { %5216 = vadd.xlane.f32.xlu1 %v5208_v26  ;;  %v5209_v10 = vadd.f32 %v5203_v2, %v12103_v48 }
0x1a4c   :  { %5539 = vmatpush1.bf16.msra.mxu0 %v9487_v52 }
0x1a4d   :  { %5218 = vadd.xlane.f32.xlu0 %v5209_v10  ;;  %5540 = vmatprep.subr.bf16.mxu0 %v9495_v24 }
0x1a50   :  { %5541 = vmatpush1.bf16.msra.mxu0 %v9493_v8 }
0x1a51   :  { %5542 = vmatprep.subr.bf16.mxu0 %v9501_v13 }
0x1a54   :  { %5543 = vmatpush1.bf16.msra.mxu0 %v9499_v25 }
0x1a55   :  { %5544 = vmatprep.subr.bf16.mxu0 %v9507_v63 }
0x1a58   :  { %5545 = vmatpush1.bf16.msra.mxu0 %v9505_v1 }
0x1a59   :  { %5546 = vmatprep.subr.bf16.mxu0 %v9513_v22 }
0x1a5c   :  { %5547 = vmatpush1.bf16.msra.mxu0 %v9511_v28 }
0x1a5d   :  { %5548 = vmatprep.subr.bf16.mxu0 %v9519_v40 }
0x1a60   :  { %5549 = vmatpush1.bf16.msra.mxu0 %v9517_v45 }
0x1ad0   :  { %v5213_v59 = vpop.xlane.xlu1 %5212 }
0x1ad1   :  { %v5220_v56 = vmul.f32 0.0078125, %v5213_v59 }
0x1ad2   :  { %v5215_v48 = vpop.xlane.xlu0 %5214 }
0x1ad3   :  { %v12128_v58 = vsub.f32 %v5206_v36, %v5220_v56  ;;  %v5221_v6 = vmul.f32 0.0078125, %v5215_v48  ;;  %v9522_v36 = vld [vmem:[%s12686_s9 + $0x1ec] ss:$16 sps:$4 sm:$0xff]  }
0x1ad4   :  { %5601 = vmatprep.subr.bf16.mxu1 %v9522_v36 }
0x1ad5   :  { %v12130_v57 = vsub.f32 %v5207_v51, %v5221_v6  ;;  %v5228_v50 = vmul.f32 %v12128_v58, %v12128_v58  ;;  %v9520_v51 = vld [vmem:[%s12686_s9 + $0x1e8] ss:$16 sps:$4 sm:$0xff]  }
0x1ad6   :  { %5602 = vmatpush1.bf16.msra.mxu1 %v9520_v51  ;;  %v7785_v51 = vld [vmem:[%s12687_s11 + $0x4] sm:$0xf] }
0x1ad7   :  { %5232 = vadd.xlane.f32.xlu1 %v5228_v50  ;;  %v5229_v62 = vmul.f32 %v12130_v57, %v12130_v57 }
0x1ad8   :  { %v5217_v35 = vpop.xlane.xlu1 %5216 }
0x1ad9   :  { %v5222_v53 = vmul.f32 0.0078125, %v5217_v35  ;;  %5234 = vadd.xlane.f32.xlu0 %v5229_v62 }
0x1ada   :  { %v5219_v14 = vpop.xlane.xlu0 %5218 }
0x1adb   :  { %v12136_v9 = vsub.f32 %v5208_v26, %v5222_v53  ;;  %v5223_v47 = vmul.f32 0.0078125, %v5219_v14 }
0x1add   :  { %v12138_v18 = vsub.f32 %v5209_v10, %v5223_v47  ;;  %v5230_v38 = vmul.f32 %v12136_v9, %v12136_v9 }
0x1adf   :  { %5236 = vadd.xlane.f32.xlu1 %v5230_v38  ;;  %v5231_v23 = vmul.f32 %v12138_v18, %v12138_v18 }
0x1ae1   :  { %5238 = vadd.xlane.f32.xlu0 %v5231_v23 }
0x1b64   :  { %v5233_v33 = vpop.xlane.xlu1 %5232 }
0x1b65   :  { %v5240_v49 = vmul.f32 0.0078125, %v5233_v33  ;;  %v5365_v33 = vrot.slane %v7785_v51, %v3523_v34 }
0x1b66   :  { %v5235_v3 = vpop.xlane.xlu0 %5234 }
0x1b67   :  { %v5244_v31 = vadd.f32 1e-05, %v5240_v49  ;;  %v5241_v5 = vmul.f32 0.0078125, %v5235_v3  ;;  %v5361_v49 = vrot.slane %v7785_v51, %v11766_v43  ;;  %v5357_v3 = vrot.slane %v7785_v51, %v11347_v27 }
0x1b69   :  { %9819 = vrsqrt.f32 %v5244_v31  ;;  %v5245_v46 = vadd.f32 1e-05, %v5241_v5  ;;  %v5369_v31 = vrot.slane %v7785_v51, %v3527_v39  ;;  %v12284_v51 = vld [vmem:[%s12688_s15 + $0x10] sm:$0xff] }
0x1b6b   :  { %9821 = vrsqrt.f32 %v5245_v46 }
0x1b6c   :  { %v5237_v2 = vpop.xlane.xlu1 %5236 }
0x1b6d   :  { %v5242_v26 = vmul.f32 0.0078125, %v5237_v2 }
0x1b6e   :  { %v5239_v10 = vpop.xlane.xlu0 %5238 }
0x1b6f   :  { %v5246_v16 = vadd.f32 1e-05, %v5242_v26  ;;  %v5243_v44 = vmul.f32 0.0078125, %v5239_v10 }
0x1b71   :  { %9823 = vrsqrt.f32 %v5246_v16  ;;  %v5247_v12 = vadd.f32 1e-05, %v5243_v44 }
0x1b73   :  { %v9820_v29 = vpop.eup %9819  ;;  %9825 = vrsqrt.f32 %v5247_v12 }
0x1b74   :  { %v5252_v54 = vmul.f32 %v9820_v29, %v12128_v58 }
0x1b75   :  { %v9822_v7 = vpop.eup %9821 }
0x1b76   :  { %v5262_v59 = vmul.f32 %v7751_v61, %v5252_v54  ;;  %v5253_v56 = vmul.f32 %v9822_v7, %v12130_v57 }
0x1b78   :  { %v12170_v48 = vadd.f32 %v7752_v55, %v5262_v59  ;;  %v5263_v6 = vmul.f32 %v7751_v61, %v5253_v56 }
0x1b7a   :  { %5278 = vxpose.xlu1.b32.start [1/4] (short) %v12170_v48, 128  ;;  %v12173_v50 = vadd.f32 %v7752_v55, %v5263_v6 }
0x1b7b   :  { %v9824_v62 = vpop.eup %9823 }
0x1b7c   :  { %v12177_v35 = vpack.c.bf16 %v12173_v50, %v12170_v48  ;;  %v5254_v53 = vmul.f32 %v9824_v62, %v12136_v9 }
0x1b7d   :  { %v9826_v58 = vpop.eup %9825 }
0x1b7e   :  { %5279 = vxpose.xlu1.b32.cont [2/4] (short) %v12173_v50, 128  ;;  %5567 = vmatmul.mubr.bf16.vlgmr.msra.gmra.mrb[108].mxu0 %v12177_v35  ;;  %v5264_v57 = vmul.f32 %v7751_v61, %v5254_v53  ;;  %v5255_v14 = vmul.f32 %v9826_v58, %v12138_v18 }
0x1b7f   :  { %5620 = vmatmul.mubr.bf16.vlgmr.msra.gmra.mrb[104].mxu1 %v12177_v35  ;;  %8984 = vmatprep.subr.bf16.mxu1 %v12177_v35 }
0x1b80   :  { %8985 = vmatpush3.bf16.msra.mxu1 %v12177_v35  ;;  %v12186_v47 = vadd.f32 %v7752_v55, %v5264_v57  ;;  %5576 = vmatprep.mubr.bf16.mxu0 %v10587_v0  ;;  %v5265_v38 = vmul.f32 %v7751_v61, %v5255_v14 }
0x1b81   :  { %5629 = vmatprep.mubr.bf16.mxu1 %v10587_v0 }
0x1b82   :  { %5280 = vxpose.xlu1.b32.cont [3/4] (short) %v12186_v47, 128  ;;  %v12191_v9 = vadd.f32 %v7752_v55, %v5265_v38 }
0x1b84   :  { %v12195_v18 = vpack.c.bf16 %v12191_v9, %v12186_v47 }
0x1b86   :  { %5281 = vxpose.xlu1.b32.end [4/4] (short) %v12191_v9, 128  ;;  %5577 = vmatmul.mubr.bf16.gmra.mrb[112].mxu0 %v12195_v18 }
0x1b87   :  { %5630 = vmatmul.mubr.bf16.gmra.mrb[108].mxu1 %v12195_v18  ;;  %8986 = vmatprep.subr.bf16.mxu1 %v12195_v18 }
0x1b88   :  { %8987 = vmatpush3.bf16.msra.mxu1 %v12195_v18 }
0x1bfa   :  { %v5294_v23 = vpop.trf.xlu1 }
0x1bfe   :  { %v5295_v20 = vpop.trf.xlu1 }
0x1bff   :  { %v12202_v11 = vpack.c.bf16 %v5295_v20, %v5294_v23 }
0x1c01   :  { %8964 = vmatprep.subr.bf16.mxu0 %v12202_v11  ;;  %8992 = vmatprep.subr.bf16.mxu1 %v12202_v11 }
0x1c02   :  { %v5296_v52 = vpop.trf.xlu1  ;;  %8965 = vmatpush3.bf16.msra.mxu0 %v12202_v11 }
0x1c06   :  { %v5297_v37 = vpop.trf.xlu1 }
0x1c07   :  { %v12207_v8 = vpack.c.bf16 %v5297_v37, %v5296_v52 }
0x1c09   :  { %8966 = vmatprep.subr.bf16.mxu0 %v12207_v8 }
0x1c0a   :  { %v5298_v24 = vpop.trf.xlu1  ;;  %8967 = vmatpush3.bf16.msra.mxu0 %v12207_v8 }
0x1c0e   :  { %v5299_v32 = vpop.trf.xlu1 }
0x1c0f   :  { %v12211_v4 = vpack.c.bf16 %v5299_v32, %v5298_v24 }
0x1c11   :  { %8968 = vmatprep.subr.bf16.mxu0 %v12211_v4 }
0x1c12   :  { %v5300_v13 = vpop.trf.xlu1  ;;  %8969 = vmatpush3.bf16.msra.mxu0 %v12211_v4 }
0x1c16   :  { %v5301_v42 = vpop.trf.xlu1 }
0x1c17   :  { %v12215_v25 = vpack.c.bf16 %v5301_v42, %v5300_v13 }
0x1c19   :  { %8970 = vmatprep.subr.bf16.mxu0 %v12215_v25 }
0x1c1a   :  { %v5302_v60 = vpop.trf.xlu1  ;;  %8971 = vmatpush3.bf16.msra.mxu0 %v12215_v25 }
0x1c1e   :  { %v5303_v1 = vpop.trf.xlu1 }
0x1c1f   :  { %v12219_v63 = vpack.c.bf16 %v5303_v1, %v5302_v60 }
0x1c21   :  { %8972 = vmatprep.subr.bf16.mxu0 %v12219_v63 }
0x1c22   :  { %v5304_v21 = vpop.trf.xlu1  ;;  %8973 = vmatpush3.bf16.msra.mxu0 %v12219_v63 }
0x1c26   :  { %v5305_v30 = vpop.trf.xlu1 }
0x1c27   :  { %v12223_v22 = vpack.c.bf16 %v5305_v30, %v5304_v21 }
0x1c29   :  { %8974 = vmatprep.subr.bf16.mxu0 %v12223_v22 }
0x1c2a   :  { %v5306_v41 = vpop.trf.xlu1  ;;  %8975 = vmatpush3.bf16.msra.mxu0 %v12223_v22 }
0x1c2e   :  { %v5307_v28 = vpop.trf.xlu1 }
0x1c2f   :  { %v12227_v15 = vpack.c.bf16 %v5307_v28, %v5306_v41 }
0x1c31   :  { %8976 = vmatprep.subr.bf16.mxu0 %v12227_v15 }
0x1c32   :  { %v5308_v40 = vpop.trf.xlu1  ;;  %8977 = vmatpush3.bf16.msra.mxu0 %v12227_v15 }
0x1c36   :  { %v5309_v36 = vpop.trf.xlu1 }
0x1c37   :  { %v12231_v45 = vpack.c.bf16 %v5309_v36, %v5308_v40 }
0x1c39   :  { %8978 = vmatprep.subr.bf16.mxu0 %v12231_v45 }
0x1c3a   :  { %8979 = vmatpush3.bf16.msra.mxu0 %v12231_v45 }
0x1c3b   :  { %9012 = vmatprep.subr.bf16.mxu0 %v12177_v35 }
0x1c51   :  { %v5568_v5 = vpop.f32.mrb[108].mxu0 }
0x1c52   :  { %v5621_v46 = vpop.f32.mrb[104].mxu1  ;;  %v5570_v2 = vpop.f32.mrb[109].mxu0  ;;  %v5569_v12 = vadd.f32 %v5568_v5, %v5357_v3 }
0x1c53   :  { %v12243_v26 = vadd.f32 %v5621_v46, %v5365_v33  ;;  %v12245_v10 = vadd.f32 %v5570_v2, %v5361_v49  ;;  %v5623_v16 = vpop.f32.mrb[105].mxu1  ;;  %v5572_v44 = vpop.f32.mrb[110].mxu0 }
0x1c54   :  { %v12247_v29 = vadd.f32 %v5623_v16, %v5369_v31  ;;  %v5573_v34 = vadd.f32 %v5572_v44, %v5357_v3  ;;  %v5625_v61 = vpop.f32.mrb[106].mxu1  ;;  %v5574_v54 = vpop.f32.mrb[111].mxu0  ;;  %v12293_v16 = vld [vmem:[%s12688_s15 + $0x8] sm:$0xff] }
0x1c55   :  { %v12249_v7 = vadd.f32 %v5625_v61, %v5365_v33  ;;  %v12251_v55 = vadd.f32 %v5574_v54, %v5361_v49  ;;  %v5627_v19 = vpop.f32.mrb[107].mxu1 }
0x1c56   :  { %v5640_v39 = vpack.c.bf16 %v5573_v34, %v5569_v12  ;;  %v12253_v59 = vadd.f32 %v5627_v19, %v5369_v31  ;;  %v12298_v34 = vld [vmem:[%s12688_s15 + $0x18] sm:$0xff] }
0x1c57   :  { %v5944_v56 = vpack.c.bf16 %v12249_v7, %v12243_v26  ;;  %v5792_v6 = vpack.c.bf16 %v12251_v55, %v12245_v10 }
0x1c58   :  { %v6096_v62 = vpack.c.bf16 %v12253_v59, %v12247_v29  ;;  %8980 = vmatprep.mubr.bf16.mxu0 %v5640_v39 }
0x1c59   :  { %v5578_v53 = vpop.f32.mrb[112].mxu0 }
0x1c5a   :  { %v5631_v58 = vpop.f32.mrb[108].mxu1  ;;  %v5580_v57 = vpop.f32.mrb[113].mxu0  ;;  %v5579_v52 = vadd.f32 %v5578_v53, %v5357_v3 }
0x1c5b   :  { %v12261_v14 = vadd.f32 %v5631_v58, %v5365_v33  ;;  %v12263_v38 = vadd.f32 %v5580_v57, %v5361_v49  ;;  %v5633_v23 = vpop.f32.mrb[109].mxu1  ;;  %v5582_v20 = vpop.f32.mrb[114].mxu0 }
0x1c5c   :  { %v12265_v37 = vadd.f32 %v5633_v23, %v5369_v31  ;;  %v5583_v24 = vadd.f32 %v5582_v20, %v5357_v3  ;;  %v5635_v32 = vpop.f32.mrb[110].mxu1  ;;  %v5584_v13 = vpop.f32.mrb[115].mxu0 }
0x1c5d   :  { %v12267_v42 = vadd.f32 %v5635_v32, %v5365_v33  ;;  %v12269_v60 = vadd.f32 %v5584_v13, %v5361_v49  ;;  %v5637_v1 = vpop.f32.mrb[111].mxu1 }
0x1c5e   :  { %v5641_v21 = vpack.c.bf16 %v5583_v24, %v5579_v52  ;;  %v12271_v30 = vadd.f32 %v5637_v1, %v5369_v31  ;;  %v12288_v31 = vld [vmem:[%s12688_s15] sm:$0xff] }
0x1c5f   :  { %v5945_v41 = vpack.c.bf16 %v12267_v42, %v12261_v14  ;;  %v5793_v28 = vpack.c.bf16 %v12269_v60, %v12263_v38 }
0x1c60   :  { %v6097_v40 = vpack.c.bf16 %v12271_v30, %v12265_v37  ;;  %8981 = vmatmul.mubr.bf16.vlgmr.msra.gmra.mrb[116].mxu0 %v5641_v21 }
0x1c61   :  { %9013 = vmatpush3.bf16.msra.mxu0 %v12177_v35 }
0x1c62   :  { %9014 = vmatprep.subr.bf16.mxu0 %v12195_v18 }
0x1c65   :  { %9015 = vmatpush3.bf16.msra.mxu0 %v12195_v18 }
0x1c66   :  { %9020 = vmatprep.subr.bf16.mxu0 %v12202_v11 }
0x1d33   :  { %v8982_v36 = vpop.f32.mrb[116].mxu0 }
0x1d34   :  { %v5685_v33 = vadd.f32 %v12284_v51, %v8982_v36  ;;  %v5676_v49 = vpop.f32.mrb[117].mxu0 }
0x1d35   :  { %v8983_v3 = vpop.f32.mrb[118].mxu0  ;;  %v5677_v5 = vadd.f32 %v12288_v31, %v5676_v49 }
0x1d36   :  { %v5679_v46 = vpop.f32.mrb[119].mxu0  ;;  %v5697_v2 = vsel %vm3270_vm4, %v5685_v33, -inf  ;;  %v5688_v61 = vadd.f32 %v12298_v34, %v8983_v3 }
0x1d37   :  { %5698 = vmax.xlane.f32.xlu0 %v5697_v2  ;;  %v5680_v44 = vadd.f32 %v12293_v16, %v5679_v46  ;;  %v5691_v12 = vsel %vm3270_vm4, %v5677_v5, -inf }
0x1d38   :  { %v5700_v19 = vsel %vm3270_vm4, %v5688_v61, -inf }
0x1d39   :  { %v5694_v54 = vsel %vm3270_vm4, %v5680_v44, -inf }
0x1d3b   :  { %5692 = vmax.xlane.f32.xlu0 %v5691_v12 }
0x1d3f   :  { %5695 = vmax.xlane.f32.xlu0 %v5694_v54 }
0x1d43   :  { %5701 = vmax.xlane.f32.xlu0 %v5700_v19 }
0x1dc4   :  { %v5699_v39 = vpop.xlane.xlu0 %5698 }
0x1dc5   :  { %v5705_v53 = vsub.f32 %v5685_v33, %v5699_v39 }
0x1dc7   :  { %v5711_v58 = vmul.f32 1.442695, %v5705_v53 }
0x1dc8   :  { %v5693_v57 = vpop.xlane.xlu0 %5692 }
0x1dc9   :  { %9827 = vpow2.f32 %v5711_v58  ;;  %v5703_v23 = vsub.f32 %v5677_v5, %v5693_v57 }
0x1dcb   :  { %v5707_v20 = vmul.f32 1.442695, %v5703_v23 }
0x1dcc   :  { %v5696_v52 = vpop.xlane.xlu0 %5695 }
0x1dcd   :  { %9829 = vpow2.f32 %v5707_v20  ;;  %v5704_v24 = vsub.f32 %v5680_v44, %v5696_v52 }
0x1dcf   :  { %v5709_v32 = vmul.f32 1.442695, %v5704_v24 }
0x1dd0   :  { %v5702_v13 = vpop.xlane.xlu0 %5701 }
0x1dd1   :  { %9831 = vpow2.f32 %v5709_v32  ;;  %v5706_v1 = vsub.f32 %v5688_v61, %v5702_v13 }
0x1dd3   :  { %v9828_v21 = vpop.eup %9827  ;;  %v5713_v36 = vmul.f32 1.442695, %v5706_v1 }
0x1dd4   :  { %v5721_v49 = vsel %vm3270_vm4, %v9828_v21, 0.0 }
0x1dd5   :  { %9833 = vpow2.f32 %v5713_v36  ;;  %5722 = vadd.xlane.f32.xlu0 %v5721_v49 }
0x1dd7   :  { %v9830_v3 = vpop.eup %9829 }
0x1dd8   :  { %v5715_v33 = vsel %vm3270_vm4, %v9830_v3, 0.0 }
0x1dd9   :  { %5716 = vadd.xlane.f32.xlu0 %v5715_v33 }
0x1ddb   :  { %v9832_v46 = vpop.eup %9831 }
0x1ddc   :  { %v5718_v5 = vsel %vm3270_vm4, %v9832_v46, 0.0 }
0x1ddd   :  { %5719 = vadd.xlane.f32.xlu0 %v5718_v5 }
0x1ddf   :  { %v9834_v2 = vpop.eup %9833 }
0x1de0   :  { %v5724_v44 = vsel %vm3270_vm4, %v9834_v2, 0.0 }
0x1de1   :  { %5725 = vadd.xlane.f32.xlu0 %v5724_v44 }
0x1e62   :  { %v5723_v12 = vpop.xlane.xlu0 %5722 }
0x1e66   :  { %v5717_v61 = vpop.xlane.xlu0 %5716 }
0x1e67   :  { %9835 = vrcp.f32 %v5717_v61 }
0x1e6a   :  { %v5720_v54 = vpop.xlane.xlu0 %5719 }
0x1e6b   :  { %9837 = vrcp.f32 %v5720_v54 }
0x1e6c   :  { %9839 = vrcp.f32 %v5723_v12 }
0x1e6e   :  { %v5726_v19 = vpop.xlane.xlu0 %5725 }
0x1e6f   :  { %9841 = vrcp.f32 %v5726_v19 }
0x1e71   :  { %v9836_v39 = vpop.eup %9835 }
0x1e72   :  { %v5728_v58 = vmul.f32 %v9836_v39, %v9830_v3 }
0x1e75   :  { %v9838_v53 = vpop.eup %9837 }
0x1e76   :  { %v5730_v57 = vmul.f32 %v9838_v53, %v9832_v46  ;;  %v9840_v23 = vpop.eup %9839 }
0x1e77   :  { %v5732_v24 = vmul.f32 %v9840_v23, %v9828_v21 }
0x1e78   :  { %v5735_v20 = vpack.c.bf16 %v5730_v57, %v5728_v58 }
0x1e79   :  { %v9842_v52 = vpop.eup %9841 }
0x1e7a   :  { %v5734_v32 = vmul.f32 %v9842_v52, %v9834_v2  ;;  %8988 = vmatprep.mubr.msk.bf16.mxu1 %vm3270_vm4, %v5735_v20 }
0x1e7c   :  { %v5736_v13 = vpack.c.bf16 %v5734_v32, %v5732_v24 }
0x1e7e   :  { %8989 = vmatmul.mubr.msk.bf16.vlgmr.msra.gmra.mrb[112].mxu1 %vm3270_vm4, %v5736_v13 }
0x1e7f   :  { %8993 = vmatpush3.bf16.msra.mxu1 %v12202_v11  ;;  %9008 = vmatprep.mubr.bf16.mxu1 %v5792_v6 }
0x1e80   :  { %8994 = vmatprep.subr.bf16.mxu1 %v12207_v8 }
0x1e83   :  { %8995 = vmatpush3.bf16.msra.mxu1 %v12207_v8 }
0x1e84   :  { %8996 = vmatprep.subr.bf16.mxu1 %v12211_v4 }
0x1e87   :  { %8997 = vmatpush3.bf16.msra.mxu1 %v12211_v4 }
0x1e88   :  { %8998 = vmatprep.subr.bf16.mxu1 %v12215_v25 }
0x1e8b   :  { %8999 = vmatpush3.bf16.msra.mxu1 %v12215_v25 }
0x1e8c   :  { %9000 = vmatprep.subr.bf16.mxu1 %v12219_v63 }
0x1e8f   :  { %9001 = vmatpush3.bf16.msra.mxu1 %v12219_v63 }
0x1e90   :  { %9002 = vmatprep.subr.bf16.mxu1 %v12223_v22 }
0x1e93   :  { %9003 = vmatpush3.bf16.msra.mxu1 %v12223_v22 }
0x1e94   :  { %9004 = vmatprep.subr.bf16.mxu1 %v12227_v15 }
0x1e97   :  { %9005 = vmatpush3.bf16.msra.mxu1 %v12227_v15 }
0x1e98   :  { %9006 = vmatprep.subr.bf16.mxu1 %v12231_v45 }
0x1e9b   :  { %9007 = vmatpush3.bf16.msra.mxu1 %v12231_v45 }
0x1e9c   :  { %9040 = vmatprep.subr.bf16.mxu1 %v12177_v35 }
0x1e9e   :  { %9009 = vmatmul.mubr.bf16.vlgmr.msra.gmra.mrb[116].mxu1 %v5793_v28 }
0x1e9f   :  { %9041 = vmatpush3.bf16.msra.mxu1 %v12177_v35 }
0x1ea0   :  { %9042 = vmatprep.subr.bf16.mxu1 %v12195_v18 }
0x1ea3   :  { %9043 = vmatpush3.bf16.msra.mxu1 %v12195_v18 }
0x1ea4   :  { %9048 = vmatprep.subr.bf16.mxu1 %v12202_v11 }
0x1f51   :  { %v12335_v10 = vpop.f32.mrb[112].mxu1 }
0x1f52   :  { %v12337_v55 = vpop.f32.mrb[113].mxu1 }
0x1f53   :  { %v12339_v6 = vpop.f32.mrb[114].mxu1 }
0x1f54   :  { %v6252_v1 = vpack.c.bf16 %v12339_v6, %v12335_v10  ;;  %v12343_v21 = vpop.f32.mrb[115].mxu1 }
0x1f55   :  { %v6248_v38 = vpack.c.bf16 %v12343_v21, %v12337_v55 }
0x1f71   :  { %v9010_v60 = vpop.f32.mrb[116].mxu1 }
0x1f72   :  { %v5837_v28 = vadd.f32 %v12284_v51, %v9010_v60  ;;  %v5828_v36 = vpop.f32.mrb[117].mxu1 }
0x1f73   :  { %v9011_v49 = vpop.f32.mrb[118].mxu1  ;;  %v5829_v3 = vadd.f32 %v12288_v31, %v5828_v36 }
0x1f74   :  { %v5831_v33 = vpop.f32.mrb[119].mxu1  ;;  %v5849_v46 = vsel %vm3270_vm4, %v5837_v28, -inf  ;;  %v5840_v44 = vadd.f32 %v12298_v34, %v9011_v49 }
0x1f75   :  { %5850 = vmax.xlane.f32.xlu0 %v5849_v46  ;;  %v5832_v5 = vadd.f32 %v12293_v16, %v5831_v33  ;;  %v5843_v2 = vsel %vm3270_vm4, %v5829_v3, -inf }
0x1f76   :  { %v5852_v61 = vsel %vm3270_vm4, %v5840_v44, -inf }
0x1f77   :  { %v5846_v12 = vsel %vm3270_vm4, %v5832_v5, -inf }
0x1f79   :  { %5844 = vmax.xlane.f32.xlu0 %v5843_v2 }
0x1f7d   :  { %5847 = vmax.xlane.f32.xlu0 %v5846_v12 }
0x1f81   :  { %5853 = vmax.xlane.f32.xlu0 %v5852_v61 }
0x2002   :  { %v5851_v54 = vpop.xlane.xlu0 %5850 }
0x2003   :  { %v5857_v19 = vsub.f32 %v5837_v28, %v5851_v54 }
0x2005   :  { %v5863_v39 = vmul.f32 1.442695, %v5857_v19 }
0x2006   :  { %v5845_v53 = vpop.xlane.xlu0 %5844 }
0x2007   :  { %9843 = vpow2.f32 %v5863_v39  ;;  %v5855_v58 = vsub.f32 %v5829_v3, %v5845_v53 }
0x2009   :  { %v5859_v57 = vmul.f32 1.442695, %v5855_v58 }
0x200a   :  { %v5848_v23 = vpop.xlane.xlu0 %5847 }
0x200b   :  { %9845 = vpow2.f32 %v5859_v57  ;;  %v5856_v20 = vsub.f32 %v5832_v5, %v5848_v23 }
0x200d   :  { %v5861_v52 = vmul.f32 1.442695, %v5856_v20 }
0x200e   :  { %v5854_v24 = vpop.xlane.xlu0 %5853 }
0x200f   :  { %9847 = vpow2.f32 %v5861_v52  ;;  %v5858_v32 = vsub.f32 %v5840_v44, %v5854_v24 }
0x2011   :  { %v9844_v13 = vpop.eup %9843  ;;  %v5865_v60 = vmul.f32 1.442695, %v5858_v32 }
0x2012   :  { %v5873_v36 = vsel %vm3270_vm4, %v9844_v13, 0.0 }
0x2013   :  { %9849 = vpow2.f32 %v5865_v60  ;;  %5874 = vadd.xlane.f32.xlu0 %v5873_v36 }
0x2015   :  { %v9846_v49 = vpop.eup %9845 }
0x2016   :  { %v5867_v28 = vsel %vm3270_vm4, %v9846_v49, 0.0 }
0x2017   :  { %5868 = vadd.xlane.f32.xlu0 %v5867_v28 }
0x2019   :  { %v9848_v33 = vpop.eup %9847 }
0x201a   :  { %v5870_v3 = vsel %vm3270_vm4, %v9848_v33, 0.0 }
0x201b   :  { %5871 = vadd.xlane.f32.xlu0 %v5870_v3 }
0x201d   :  { %v9850_v46 = vpop.eup %9849 }
0x201e   :  { %v5876_v5 = vsel %vm3270_vm4, %v9850_v46, 0.0 }
0x201f   :  { %5877 = vadd.xlane.f32.xlu0 %v5876_v5 }
0x20a0   :  { %v5875_v2 = vpop.xlane.xlu0 %5874 }
0x20a4   :  { %v5869_v44 = vpop.xlane.xlu0 %5868 }
0x20a5   :  { %9851 = vrcp.f32 %v5869_v44 }
0x20a8   :  { %v5872_v12 = vpop.xlane.xlu0 %5871 }
0x20a9   :  { %9853 = vrcp.f32 %v5872_v12 }
0x20aa   :  { %9855 = vrcp.f32 %v5875_v2 }
0x20ac   :  { %v5878_v61 = vpop.xlane.xlu0 %5877 }
0x20ad   :  { %9857 = vrcp.f32 %v5878_v61 }
0x20af   :  { %v9852_v54 = vpop.eup %9851 }
0x20b0   :  { %v5880_v39 = vmul.f32 %v9852_v54, %v9846_v49 }
0x20b3   :  { %v9854_v19 = vpop.eup %9853 }
0x20b4   :  { %v5882_v53 = vmul.f32 %v9854_v19, %v9848_v33  ;;  %v9856_v58 = vpop.eup %9855 }
0x20b5   :  { %v5884_v20 = vmul.f32 %v9856_v58, %v9844_v13 }
0x20b6   :  { %v5887_v57 = vpack.c.bf16 %v5882_v53, %v5880_v39 }
0x20b7   :  { %v9858_v23 = vpop.eup %9857 }
0x20b8   :  { %v5886_v52 = vmul.f32 %v9858_v23, %v9850_v46  ;;  %9016 = vmatprep.mubr.msk.bf16.mxu0 %vm3270_vm4, %v5887_v57 }
0x20ba   :  { %v5888_v24 = vpack.c.bf16 %v5886_v52, %v5884_v20 }
0x20bc   :  { %9017 = vmatmul.mubr.msk.bf16.vlgmr.msra.gmra.mrb[120].mxu0 %vm3270_vm4, %v5888_v24 }
0x20bd   :  { %9021 = vmatpush3.bf16.msra.mxu0 %v12202_v11  ;;  %9036 = vmatprep.mubr.bf16.mxu0 %v5944_v56 }
0x20be   :  { %9022 = vmatprep.subr.bf16.mxu0 %v12207_v8 }
0x20c1   :  { %9023 = vmatpush3.bf16.msra.mxu0 %v12207_v8 }
0x20c2   :  { %9024 = vmatprep.subr.bf16.mxu0 %v12211_v4 }
0x20c5   :  { %9025 = vmatpush3.bf16.msra.mxu0 %v12211_v4 }
0x20c6   :  { %9026 = vmatprep.subr.bf16.mxu0 %v12215_v25 }
0x20c9   :  { %9027 = vmatpush3.bf16.msra.mxu0 %v12215_v25 }
0x20ca   :  { %9028 = vmatprep.subr.bf16.mxu0 %v12219_v63 }
0x20cd   :  { %9029 = vmatpush3.bf16.msra.mxu0 %v12219_v63 }
0x20ce   :  { %9030 = vmatprep.subr.bf16.mxu0 %v12223_v22 }
0x20d1   :  { %9031 = vmatpush3.bf16.msra.mxu0 %v12223_v22 }
0x20d2   :  { %9032 = vmatprep.subr.bf16.mxu0 %v12227_v15 }
0x20d5   :  { %9033 = vmatpush3.bf16.msra.mxu0 %v12227_v15 }
0x20d6   :  { %9034 = vmatprep.subr.bf16.mxu0 %v12231_v45 }
0x20d9   :  { %9035 = vmatpush3.bf16.msra.mxu0 %v12231_v45 }
0x20da   :  { %9068 = vmatprep.subr.bf16.mxu0 %v12177_v35 }
0x20dc   :  { %9037 = vmatmul.mubr.bf16.vlgmr.msra.gmra.mrb[124].mxu0 %v5945_v41 }
0x20dd   :  { %9069 = vmatpush3.bf16.msra.mxu0 %v12177_v35 }
0x20de   :  { %9070 = vmatprep.subr.bf16.mxu0 %v12195_v18 }
0x20e1   :  { %9071 = vmatpush3.bf16.msra.mxu0 %v12195_v18 }
0x218f   :  { %v12386_v26 = vpop.f32.mrb[120].mxu0 }
0x2190   :  { %v12388_v7 = vpop.f32.mrb[121].mxu0 }
0x2191   :  { %v12390_v56 = vpop.f32.mrb[122].mxu0 }
0x2192   :  { %v6253_v32 = vpack.c.bf16 %v12390_v56, %v12386_v26  ;;  %v12394_v13 = vpop.f32.mrb[123].mxu0 }
0x2193   :  { %v6249_v14 = vpack.c.bf16 %v12394_v13, %v12388_v7  ;;  %v9532_v7 = vld [vmem:[%s12689_s16 + $0x120] sm:$0xff]   ;;  %v9533_v13 = vld [vmem:[%s12689_s16 + $0x168] sm:$0xff]  }
0x21af   :  { %v9038_v42 = vpop.f32.mrb[124].mxu0 }
0x21b0   :  { %v5989_v35 = vadd.f32 %v12284_v51, %v9038_v42  ;;  %v5980_v41 = vpop.f32.mrb[125].mxu0 }
0x21b1   :  { %v5981_v18 = vadd.f32 %v12288_v31, %v5980_v41  ;;  %v9039_v60 = vpop.f32.mrb[126].mxu0 }
0x21b2   :  { %v5983_v36 = vpop.f32.mrb[127].mxu0  ;;  %v6001_v49 = vsel %vm3270_vm4, %v5989_v35, -inf  ;;  %v5992_v46 = vadd.f32 %v12298_v34, %v9039_v60 }
0x21b3   :  { %v5984_v28 = vadd.f32 %v12293_v16, %v5983_v36  ;;  %6002 = vmax.xlane.f32.xlu0 %v6001_v49  ;;  %v5995_v33 = vsel %vm3270_vm4, %v5981_v18, -inf }
0x21b4   :  { %5996 = vmax.xlane.f32.xlu1 %v5995_v33  ;;  %v6004_v5 = vsel %vm3270_vm4, %v5992_v46, -inf }
0x21b5   :  { %v5998_v3 = vsel %vm3270_vm4, %v5984_v28, -inf }
0x21b7   :  { %5999 = vmax.xlane.f32.xlu0 %v5998_v3 }
0x21bb   :  { %6005 = vmax.xlane.f32.xlu0 %v6004_v5 }
0x2240   :  { %v6003_v2 = vpop.xlane.xlu0 %6002 }
0x2241   :  { %v6009_v44 = vsub.f32 %v5989_v35, %v6003_v2  ;;  %v5997_v12 = vpop.xlane.xlu1 %5996 }
0x2242   :  { %v6007_v61 = vsub.f32 %v5981_v18, %v5997_v12 }
0x2243   :  { %v6015_v54 = vmul.f32 1.442695, %v6009_v44 }
0x2244   :  { %v6011_v19 = vmul.f32 1.442695, %v6007_v61  ;;  %v6000_v39 = vpop.xlane.xlu0 %5999 }
0x2245   :  { %9859 = vpow2.f32 %v6015_v54  ;;  %v6008_v53 = vsub.f32 %v5984_v28, %v6000_v39 }
0x2246   :  { %9861 = vpow2.f32 %v6011_v19 }
0x2247   :  { %v6013_v58 = vmul.f32 1.442695, %v6008_v53 }
0x2248   :  { %v6006_v57 = vpop.xlane.xlu0 %6005 }
0x2249   :  { %v6010_v23 = vsub.f32 %v5992_v46, %v6006_v57  ;;  %9863 = vpow2.f32 %v6013_v58 }
0x224b   :  { %v6017_v20 = vmul.f32 1.442695, %v6010_v23 }
0x224d   :  { %9865 = vpow2.f32 %v6017_v20 }
0x224f   :  { %v9860_v52 = vpop.eup %9859 }
0x2250   :  { %v6025_v24 = vsel %vm3270_vm4, %v9860_v52, 0.0  ;;  %v9862_v42 = vpop.eup %9861 }
0x2251   :  { %6026 = vadd.xlane.f32.xlu0 %v6025_v24  ;;  %v6019_v35 = vsel %vm3270_vm4, %v9862_v42, 0.0 }
0x2253   :  { %v9864_v41 = vpop.eup %9863 }
0x2254   :  { %v6022_v18 = vsel %vm3270_vm4, %v9864_v41, 0.0 }
0x2255   :  { %6020 = vadd.xlane.f32.xlu0 %v6019_v35 }
0x2257   :  { %v9866_v60 = vpop.eup %9865 }
0x2258   :  { %v6028_v36 = vsel %vm3270_vm4, %v9866_v60, 0.0 }
0x2259   :  { %6023 = vadd.xlane.f32.xlu0 %v6022_v18 }
0x225d   :  { %6029 = vadd.xlane.f32.xlu0 %v6028_v36 }
0x22de   :  { %v6027_v49 = vpop.xlane.xlu0 %6026 }
0x22e2   :  { %v6021_v28 = vpop.xlane.xlu0 %6020 }
0x22e3   :  { %9867 = vrcp.f32 %v6021_v28 }
0x22e6   :  { %v6024_v33 = vpop.xlane.xlu0 %6023 }
0x22e7   :  { %9869 = vrcp.f32 %v6024_v33 }
0x22e8   :  { %9871 = vrcp.f32 %v6027_v49 }
0x22ea   :  { %v6030_v3 = vpop.xlane.xlu0 %6029 }
0x22eb   :  { %9873 = vrcp.f32 %v6030_v3 }
0x22ed   :  { %v9868_v46 = vpop.eup %9867 }
0x22ee   :  { %v6032_v2 = vmul.f32 %v9868_v46, %v9862_v42 }
0x22f1   :  { %v9870_v5 = vpop.eup %9869 }
0x22f2   :  { %v6034_v44 = vmul.f32 %v9870_v5, %v9864_v41  ;;  %v9872_v12 = vpop.eup %9871 }
0x22f3   :  { %v6036_v19 = vmul.f32 %v9872_v12, %v9860_v52  ;;  %v9523_v12 = vld [vmem:[%s12689_s16 + $0x140] sm:$0xff]  }
0x22f4   :  { %v6039_v61 = vpack.c.bf16 %v6034_v44, %v6032_v2  ;;  %8504 = vmatprep.subr.bf16.mxu0 %v9523_v12  ;;  %v9537_v12 = vld [vmem:[%s12689_s16 + $0x178] sm:$0xff]  }
0x22f5   :  { %v9874_v54 = vpop.eup %9873 }
0x22f6   :  { %v6038_v39 = vmul.f32 %v9874_v54, %v9866_v60  ;;  %9044 = vmatprep.mubr.msk.bf16.mxu1 %vm3270_vm4, %v6039_v61  ;;  %v9539_v61 = vld [vmem:[%s12689_s16 + $0x1c0] sm:$0xff]  }
0x22f7   :  { %v9540_v54 = vld [vmem:[%s12689_s16 + $0x180] sm:$0xff]  }
0x22f8   :  { %v6040_v53 = vpack.c.bf16 %v6038_v39, %v6036_v19  ;;  %v9541_v19 = vld [vmem:[%s12689_s16 + $0x1c8] sm:$0xff]  }
0x22f9   :  { %v9542_v39 = vld [vmem:[%s12689_s16 + $0x188] sm:$0xff]  }
0x22fa   :  { %9045 = vmatmul.mubr.msk.bf16.vlgmr.msra.gmra.mrb[120].mxu1 %vm3270_vm4, %v6040_v53  ;;  %v9543_v53 = vld [vmem:[%s12689_s16 + $0x1d0] sm:$0xff]  }
0x22fb   :  { %9049 = vmatpush3.bf16.msra.mxu1 %v12202_v11  ;;  %9064 = vmatprep.mubr.bf16.mxu1 %v6096_v62 }
0x22fc   :  { %9050 = vmatprep.subr.bf16.mxu1 %v12207_v8 }
0x22ff   :  { %9051 = vmatpush3.bf16.msra.mxu1 %v12207_v8 }
0x2300   :  { %9052 = vmatprep.subr.bf16.mxu1 %v12211_v4 }
0x2303   :  { %9053 = vmatpush3.bf16.msra.mxu1 %v12211_v4 }
0x2304   :  { %9054 = vmatprep.subr.bf16.mxu1 %v12215_v25 }
0x2307   :  { %9055 = vmatpush3.bf16.msra.mxu1 %v12215_v25 }
0x2308   :  { %9056 = vmatprep.subr.bf16.mxu1 %v12219_v63 }
0x230b   :  { %9057 = vmatpush3.bf16.msra.mxu1 %v12219_v63 }
0x230c   :  { %9058 = vmatprep.subr.bf16.mxu1 %v12223_v22 }
0x230f   :  { %9059 = vmatpush3.bf16.msra.mxu1 %v12223_v22 }
0x2310   :  { %9060 = vmatprep.subr.bf16.mxu1 %v12227_v15 }
0x2313   :  { %9061 = vmatpush3.bf16.msra.mxu1 %v12227_v15 }
0x2314   :  { %9062 = vmatprep.subr.bf16.mxu1 %v12231_v45 }
0x2317   :  { %9063 = vmatpush3.bf16.msra.mxu1 %v12231_v45 }
0x2318   :  { %8532 = vmatprep.subr.bf16.mxu1 %v9539_v61  ;;  %v9538_v61 = vld [vmem:[%s12689_s16 + $0x138] sm:$0xff]  }
0x231a   :  { %9065 = vmatmul.mubr.bf16.vlgmr.msra.gmra.mrb[124].mxu1 %v6097_v40 }
0x231b   :  { %8533 = vmatpush3.bf16.msra.mxu1 %v9540_v54  ;;  %v9552_v54 = vld [vmem:[%s12689_s16 + $0x1b0] sm:$0xff]  }
0x231c   :  { %8534 = vmatprep.subr.bf16.mxu1 %v9541_v19  ;;  %v9553_v19 = vld [vmem:[%s12689_s16 + $0x1f8] sm:$0xff]  }
0x231f   :  { %8535 = vmatpush3.bf16.msra.mxu1 %v9542_v39  ;;  %v9554_v39 = vld [vmem:[%s12689_s16 + $0x1b8] sm:$0xff]  }
0x2320   :  { %8536 = vmatprep.subr.bf16.mxu1 %v9543_v53 }
0x23cd   :  { %v12433_v11 = vpop.f32.mrb[120].mxu1 }
0x23ce   :  { %v12435_v8 = vpop.f32.mrb[121].mxu1 }
0x23cf   :  { %v12437_v4 = vpop.f32.mrb[122].mxu1 }
0x23d0   :  { %v6254_v25 = vpack.c.bf16 %v12437_v4, %v12433_v11  ;;  %v12441_v63 = vpop.f32.mrb[123].mxu1 }
0x23d1   :  { %v6250_v22 = vpack.c.bf16 %v12441_v63, %v12435_v8  ;;  %v7891_v8 = vld [vmem:[%s12690_s20 + $0x1] ss:$0 sm:$0xff] }
0x23ed   :  { %v9066_v15 = vpop.f32.mrb[124].mxu1 }
0x23ee   :  { %v6141_v45 = vadd.f32 %v12284_v51, %v9066_v15  ;;  %v6132_v29 = vpop.f32.mrb[125].mxu1  ;;  %v9544_v15 = vld [vmem:[%s12689_s16 + $0x190] sm:$0xff]  }
0x23ef   :  { %v9067_v59 = vpop.f32.mrb[126].mxu1  ;;  %v6133_v62 = vadd.f32 %v12288_v31, %v6132_v29  ;;  %8537 = vmatpush3.bf16.msra.mxu1 %v9544_v15  ;;  %v9546_v29 = vld [vmem:[%s12689_s16 + $0x198] sm:$0xff]  }
0x23f0   :  { %v6135_v37 = vpop.f32.mrb[127].mxu1  ;;  %v6153_v30 = vsel %vm3270_vm4, %v6141_v45, -inf  ;;  %v6144_v57 = vadd.f32 %v12298_v34, %v9067_v59  ;;  %v9547_v59 = vld [vmem:[%s12689_s16 + $0x1e0] sm:$0xff]  }
0x23f1   :  { %6154 = vmax.xlane.f32.xlu0 %v6153_v30  ;;  %v6136_v40 = vadd.f32 %v12293_v16, %v6135_v37  ;;  %v6147_v58 = vsel %vm3270_vm4, %v6133_v62, -inf  ;;  %v9549_v37 = vld [vmem:[%s12689_s16 + $0x1e8] sm:$0xff]  }
0x23f2   :  { %v6156_v51 = vsel %vm3270_vm4, %v6144_v57, -inf  ;;  %v9550_v30 = vld [vmem:[%s12689_s16 + $0x1a8] sm:$0xff]  }
0x23f3   :  { %v6150_v23 = vsel %vm3270_vm4, %v6136_v40, -inf }
0x23f5   :  { %6148 = vmax.xlane.f32.xlu0 %v6147_v58 }
0x23f9   :  { %6151 = vmax.xlane.f32.xlu0 %v6150_v23 }
0x23fd   :  { %6157 = vmax.xlane.f32.xlu0 %v6156_v51 }
0x247e   :  { %v6155_v20 = vpop.xlane.xlu0 %6154 }
0x247f   :  { %v6161_v52 = vsub.f32 %v6141_v45, %v6155_v20  ;;  %v9545_v45 = vld [vmem:[%s12689_s16 + $0x1d8] sm:$0xff]  }
0x2480   :  { %8538 = vmatprep.subr.bf16.mxu1 %v9545_v45 }
0x2481   :  { %v6167_v31 = vmul.f32 1.442695, %v6161_v52  ;;  %8539 = vmatpush3.bf16.msra.mxu1 %v9546_v29 }
0x2482   :  { %v6149_v24 = vpop.xlane.xlu0 %6148  ;;  %8540 = vmatprep.subr.bf16.mxu1 %v9547_v59 }
0x2483   :  { %9875 = vpow2.f32 %v6167_v31  ;;  %v6159_v42 = vsub.f32 %v6133_v62, %v6149_v24  ;;  %v9548_v62 = vld [vmem:[%s12689_s16 + $0x1a0] sm:$0xff]  }
0x2485   :  { %v6163_v35 = vmul.f32 1.442695, %v6159_v42  ;;  %8541 = vmatpush3.bf16.msra.mxu1 %v9548_v62 }
0x2486   :  { %v6152_v41 = vpop.xlane.xlu0 %6151  ;;  %8542 = vmatprep.subr.bf16.mxu1 %v9549_v37 }
0x2487   :  { %9877 = vpow2.f32 %v6163_v35  ;;  %v6160_v16 = vsub.f32 %v6136_v40, %v6152_v41  ;;  %v9551_v40 = vld [vmem:[%s12689_s16 + $0x1f0] sm:$0xff]  }
0x2489   :  { %v6165_v18 = vmul.f32 1.442695, %v6160_v16  ;;  %8543 = vmatpush3.bf16.msra.mxu1 %v9550_v30 }
0x248a   :  { %v6158_v60 = vpop.xlane.xlu0 %6157  ;;  %8544 = vmatprep.subr.bf16.mxu1 %v9551_v40 }
0x248b   :  { %9879 = vpow2.f32 %v6165_v18  ;;  %v6162_v34 = vsub.f32 %v6144_v57, %v6158_v60  ;;  %v9524_v60 = vld [vmem:[%s12689_s16 + $0x100] sm:$0xff]  }
0x248d   :  { %v9876_v36 = vpop.eup %9875  ;;  %v6169_v49 = vmul.f32 1.442695, %v6162_v34  ;;  %8545 = vmatpush3.bf16.msra.mxu1 %v9552_v54 }
0x248e   :  { %v6177_v28 = vsel %vm3270_vm4, %v9876_v36, 0.0  ;;  %8546 = vmatprep.subr.bf16.mxu1 %v9553_v19 }
0x248f   :  { %9881 = vpow2.f32 %v6169_v49  ;;  %6178 = vadd.xlane.f32.xlu0 %v6177_v28  ;;  %v9525_v49 = vld [vmem:[%s12689_s16 + $0x148] sm:$0xff]  }
0x2490   :  { %v9526_v28 = vld [vmem:[%s12689_s16 + $0x108] sm:$0xff]  }
0x2491   :  { %v9878_v33 = vpop.eup %9877  ;;  %8547 = vmatpush3.bf16.msra.mxu1 %v9554_v39 }
0x2492   :  { %v6171_v3 = vsel %vm3270_vm4, %v9878_v33, 0.0 }
0x2493   :  { %6172 = vadd.xlane.f32.xlu0 %v6171_v3  ;;  %v9529_v3 = vld [vmem:[%s12689_s16 + $0x158] sm:$0xff]  }
0x2495   :  { %v9880_v46 = vpop.eup %9879 }
0x2496   :  { %v6174_v5 = vsel %vm3270_vm4, %v9880_v46, 0.0 }
0x2497   :  { %6175 = vadd.xlane.f32.xlu0 %v6174_v5  ;;  %v9531_v5 = vld [vmem:[%s12689_s16 + $0x160] sm:$0xff]  }
0x2499   :  { %v9882_v2 = vpop.eup %9881 }
0x249a   :  { %v6180_v44 = vsel %vm3270_vm4, %v9882_v2, 0.0 }
0x249b   :  { %6181 = vadd.xlane.f32.xlu0 %v6180_v44  ;;  %v9536_v44 = vld [vmem:[%s12689_s16 + $0x130] sm:$0xff]  }
0x251c   :  { %v6179_v58 = vpop.xlane.xlu0 %6178 }
0x2520   :  { %v6173_v57 = vpop.xlane.xlu0 %6172 }
0x2521   :  { %9883 = vrcp.f32 %v6173_v57 }
0x2524   :  { %v6176_v23 = vpop.xlane.xlu0 %6175 }
0x2525   :  { %9885 = vrcp.f32 %v6176_v23 }
0x2526   :  { %9887 = vrcp.f32 %v6179_v58 }
0x2528   :  { %v6182_v51 = vpop.xlane.xlu0 %6181 }
0x2529   :  { %9889 = vrcp.f32 %v6182_v51 }
0x252b   :  { %v9884_v20 = vpop.eup %9883 }
0x252c   :  { %v6184_v31 = vmul.f32 %v9884_v20, %v9878_v33  ;;  %v9528_v33 = vld [vmem:[%s12689_s16 + $0x110] sm:$0xff]  }
0x252f   :  { %v9886_v52 = vpop.eup %9885 }
0x2530   :  { %v6186_v24 = vmul.f32 %v9886_v52, %v9880_v46  ;;  %v9888_v42 = vpop.eup %9887  ;;  %v9530_v46 = vld [vmem:[%s12689_s16 + $0x118] sm:$0xff]  }
0x2531   :  { %v6188_v16 = vmul.f32 %v9888_v42, %v9876_v36  ;;  %v9527_v36 = vld [vmem:[%s12689_s16 + $0x150] sm:$0xff]  }
0x2532   :  { %v6191_v35 = vpack.c.bf16 %v6186_v24, %v6184_v31 }
0x2533   :  { %v9890_v41 = vpop.eup %9889 }
0x2534   :  { %v6190_v18 = vmul.f32 %v9890_v41, %v9882_v2  ;;  %9072 = vmatprep.mubr.msk.bf16.mxu0 %vm3270_vm4, %v6191_v35  ;;  %v9535_v2 = vld [vmem:[%s12689_s16 + $0x170] sm:$0xff]  }
0x2536   :  { %v6192_v34 = vpack.c.bf16 %v6190_v18, %v6188_v16 }
0x2538   :  { %9073 = vmatmul.mubr.msk.bf16.vlgmr.msra.gmra.mrb[128].mxu0 %vm3270_vm4, %v6192_v34 }
0x2539   :  { %8505 = vmatpush3.bf16.msra.mxu0 %v9524_v60  ;;  %6553 = vmatprep.mubr.bf16.mxu0 %v6249_v14  ;;  %v9534_v14 = vld [vmem:[%s12689_s16 + $0x128] sm:$0xff]  }
0x253a   :  { %8506 = vmatprep.subr.bf16.mxu0 %v9525_v49 }
0x253d   :  { %8507 = vmatpush3.bf16.msra.mxu0 %v9526_v28 }
0x253e   :  { %8508 = vmatprep.subr.bf16.mxu0 %v9527_v36 }
0x2541   :  { %8509 = vmatpush3.bf16.msra.mxu0 %v9528_v33  ;;  %v9555_v33 = vld [vmem:[%s12691_s14 + $0x80] ss:$8 sps:$4 sm:$0xff]  }
0x2542   :  { %8510 = vmatprep.subr.bf16.mxu0 %v9529_v3  ;;  %v9557_v3 = vld [vmem:[%s12691_s14 + $0x84] ss:$8 sps:$4 sm:$0xff]  }
0x2545   :  { %8511 = vmatpush3.bf16.msra.mxu0 %v9530_v46  ;;  %v9560_v46 = vld [vmem:[%s12691_s14 + $0x94] ss:$8 sps:$4 sm:$0xff]  }
0x2546   :  { %8512 = vmatprep.subr.bf16.mxu0 %v9531_v5  ;;  %v9558_v5 = vld [vmem:[%s12691_s14 + $0x90] ss:$8 sps:$4 sm:$0xff]  }
0x2549   :  { %8513 = vmatpush3.bf16.msra.mxu0 %v9532_v7 }
0x254a   :  { %8514 = vmatprep.subr.bf16.mxu0 %v9533_v13 }
0x254d   :  { %8515 = vmatpush3.bf16.msra.mxu0 %v9534_v14 }
0x254e   :  { %8516 = vmatprep.subr.bf16.mxu0 %v9535_v2 }
0x2551   :  { %8517 = vmatpush3.bf16.msra.mxu0 %v9536_v44 }
0x2552   :  { %8518 = vmatprep.subr.bf16.mxu0 %v9537_v12 }
0x2555   :  { %8519 = vmatpush3.bf16.msra.mxu0 %v9538_v61 }
0x2556   :  { %6803 = vmatprep.subr.bf16.mxu0 %v9557_v3  ;;  %v7925_v3 = vld [vmem:[#allocation31 + $0x1] ss:$0 sm:$0xff] }
0x2558   :  { %6554 = vmatmul.mubr.bf16.vlgmr.msra.gmra.mrb[132].mxu0 %v6248_v38 }
0x2559   :  { %6561 = vmatprep.mubr.bf16.mxu0 %v6253_v32  ;;  %6804 = vmatpush1.bf16.msra.mxu0 %v9555_v33 }
0x255a   :  { %6805 = vmatprep.subr.bf16.mxu0 %v9560_v46 }
0x255d   :  { %6806 = vmatpush1.bf16.msra.mxu0 %v9558_v5 }
0x2560   :  { %6562 = vmatmul.mubr.bf16.gmra.mrb[136].mxu0 %v6252_v1 }
0x2561   :  { %6835 = vmatprep.mubr.bf16.mxu0 %v10587_v0 }
0x260b   :  { %v9074_v53 = vpop.f32.mrb[128].mxu0 }
0x260c   :  { %v6233_v15 = vpop.f32.mrb[129].mxu0 }
0x260d   :  { %v9075_v55 = vpop.f32.mrb[130].mxu0 }
0x260e   :  { %v6255_v21 = vpack.c.bf16 %v9075_v55, %v9074_v53  ;;  %v6236_v38 = vpop.f32.mrb[131].mxu0 }
0x260f   :  { %v6251_v45 = vpack.c.bf16 %v6236_v38, %v6233_v15  ;;  %v9561_v38 = vld [vmem:[%s12691_s14 + $0xa0] ss:$8 sps:$4 sm:$0xff]  }
0x2611   :  { %6602 = vmatprep.mubr.bf16.mxu1 %v6251_v45  ;;  %v9566_v45 = vld [vmem:[%s12691_s14 + $0xb4] ss:$8 sps:$4 sm:$0xff]  }
0x2612   :  { %6603 = vmatmul.mubr.bf16.vlgmr.msra.gmra.mrb[128].mxu1 %v6250_v22 }
0x2613   :  { %6610 = vmatprep.mubr.bf16.mxu1 %v6255_v21  ;;  %v9563_v21 = vld [vmem:[%s12691_s14 + $0xa4] ss:$8 sps:$4 sm:$0xff]  }
0x2614   :  { %6807 = vmatprep.subr.bf16.mxu0 %v9563_v21 }
0x2615   :  { %6808 = vmatpush1.bf16.msra.mxu0 %v9561_v38 }
0x2616   :  { %6809 = vmatprep.subr.bf16.mxu0 %v9566_v45 }
0x261a   :  { %6611 = vmatmul.mubr.bf16.gmra.mrb[132].mxu1 %v6254_v25 }
0x262b   :  { %v8520_v10 = vpop.f32.mrb[132].mxu0 }
0x262c   :  { %v8521_v6 = vpop.f32.mrb[133].mxu0 }
0x262d   :  { %v8522_v1 = vadd.f32 %v8521_v6, %v8520_v10  ;;  %v8523_v26 = vpop.f32.mrb[134].mxu0  ;;  %v9564_v10 = vld [vmem:[%s12691_s14 + $0xb0] ss:$8 sps:$4 sm:$0xff]   ;;  %v9569_v6 = vld [vmem:[%s12691_s14 + $0xc4] ss:$8 sps:$4 sm:$0xff]  }
0x262e   :  { %v8524_v56 = vpop.f32.mrb[135].mxu0  ;;  %6810 = vmatpush1.bf16.msra.mxu0 %v9564_v10 }
0x262f   :  { %v8525_v32 = vadd.f32 %v8524_v56, %v8523_v26  ;;  %v6556_v58 = vadd.f32 %v8522_v1, %v7891_v8  ;;  %v9567_v1 = vld [vmem:[%s12691_s14 + $0xc0] ss:$8 sps:$4 sm:$0xff]   ;;  %6811 = vmatprep.subr.bf16.mxu0 %v9569_v6  ;;  %v9572_v26 = vld [vmem:[%s12691_s14 + $0xd4] ss:$8 sps:$4 sm:$0xff]   ;;  %v9570_v56 = vld [vmem:[%s12691_s14 + $0xd0] ss:$8 sps:$4 sm:$0xff]  }
0x2631   :  { %v6559_v4 = vadd.f32 %v8525_v32, %v7891_v8  ;;  %v9575_v32 = vld [vmem:[%s12691_s14 + $0xe4] ss:$8 sps:$4 sm:$0xff]  }
0x2632   :  { %6812 = vmatpush1.bf16.msra.mxu0 %v9567_v1 }
0x2633   :  { %v8526_v29 = vpop.f32.mrb[136].mxu0  ;;  %6813 = vmatprep.subr.bf16.mxu0 %v9572_v26 }
0x2634   :  { %v8527_v59 = vpop.f32.mrb[137].mxu0 }
0x2635   :  { %v8528_v62 = vadd.f32 %v8527_v59, %v8526_v29  ;;  %v8529_v37 = vpop.f32.mrb[138].mxu0  ;;  %v9573_v29 = vld [vmem:[%s12691_s14 + $0xe0] ss:$8 sps:$4 sm:$0xff]   ;;  %v9576_v59 = vld [vmem:[%s12691_s14 + $0xf0] ss:$8 sps:$4 sm:$0xff]  }
0x2636   :  { %v8530_v30 = vpop.f32.mrb[139].mxu0  ;;  %6814 = vmatpush1.bf16.msra.mxu0 %v9570_v56 }
0x2637   :  { %v8531_v40 = vadd.f32 %v8530_v30, %v8529_v37  ;;  %v6564_v42 = vadd.f32 %v8528_v62, %v7891_v8  ;;  %6815 = vmatprep.subr.bf16.mxu0 %v9575_v32  ;;  %v9578_v62 = vld [vmem:[%s12691_s14 + $0xf4] ss:$8 sps:$4 sm:$0xff]   ;;  %v9579_v37 = vld [vmem:[%s12692_s27 + $0xc0] sm:$0xff]  }
0x2638   :  { %v9580_v30 = vld [vmem:[%s12692_s27 + $0x80] sm:$0xff]   ;;  %8560 = vmatprep.subr.bf16.mxu1 %v9579_v37 }
0x2639   :  { %v6567_v60 = vadd.f32 %v8531_v40, %v7891_v8  ;;  %v9581_v40 = vld [vmem:[%s12692_s27 + $0xc8] sm:$0xff]   ;;  %8561 = vmatpush3.bf16.msra.mxu1 %v9580_v30 }
0x263a   :  { %6816 = vmatpush1.bf16.msra.mxu0 %v9573_v29  ;;  %v9582_v8 = vld [vmem:[%s12692_s27 + $0x88] sm:$0xff]   ;;  %8562 = vmatprep.subr.bf16.mxu1 %v9581_v40 }
0x263b   :  { %6817 = vmatprep.subr.bf16.mxu0 %v9578_v62 }
0x263d   :  { %8563 = vmatpush3.bf16.msra.mxu1 %v9582_v8 }
0x263e   :  { %6818 = vmatpush1.bf16.msra.mxu0 %v9576_v59 }
0x263f   :  { %9076 = vmatprep.subr.bf16.mxu0 %v10588_v17 }
0x26e5   :  { %v8548_v63 = vpop.f32.mrb[128].mxu1 }
0x26e6   :  { %v8549_v22 = vpop.f32.mrb[129].mxu1 }
0x26e7   :  { %v8550_v57 = vadd.f32 %v8549_v22, %v8548_v63  ;;  %v8551_v23 = vpop.f32.mrb[130].mxu1  ;;  %v9583_v63 = vld [vmem:[%s12692_s27 + $0xd0] sm:$0xff]  }
0x26e8   :  { %v8552_v11 = vpop.f32.mrb[131].mxu1  ;;  %v9584_v22 = vld [vmem:[%s12692_s27 + $0x90] sm:$0xff]   ;;  %8564 = vmatprep.subr.bf16.mxu1 %v9583_v63 }
0x26e9   :  { %v6605_v25 = vadd.f32 %v8550_v57, %v6556_v58  ;;  %v8553_v51 = vadd.f32 %v8552_v11, %v8551_v23  ;;  %v9585_v58 = vld [vmem:[%s12692_s27 + $0xd8] sm:$0xff]   ;;  %8565 = vmatpush3.bf16.msra.mxu1 %v9584_v22  ;;  %v9587_v23 = vld [vmem:[%s12692_s27 + $0xe0] sm:$0xff]  }
0x26ea   :  { %v9586_v57 = vld [vmem:[%s12692_s27 + $0x98] sm:$0xff]   ;;  %8566 = vmatprep.subr.bf16.mxu1 %v9585_v58  ;;  %v9588_v11 = vld [vmem:[%s12692_s27 + $0xa0] sm:$0xff]  }
0x26eb   :  { %v6608_v20 = vadd.f32 %v8553_v51, %v6559_v4  ;;  %v6619_v52 = vadd.f32 %v6605_v25, %v12170_v48  ;;  %v9589_v4 = vld [vmem:[%s12692_s27 + $0xe8] sm:$0xff]  }
0x26ed   :  { %v8554_v31 = vpop.f32.mrb[132].mxu1  ;;  %6627 = vadd.xlane.f32.xlu0 %v6619_v52  ;;  %v6620_v16 = vadd.f32 %v6608_v20, %v12173_v50  ;;  %8567 = vmatpush3.bf16.msra.mxu1 %v9586_v57 }
0x26ee   :  { %v8555_v24 = vpop.f32.mrb[133].mxu1  ;;  %8568 = vmatprep.subr.bf16.mxu1 %v9587_v23 }
0x26ef   :  { %v8556_v35 = vadd.f32 %v8555_v24, %v8554_v31  ;;  %v8557_v41 = vpop.f32.mrb[134].mxu1 }
0x26f0   :  { %v8558_v18 = vpop.f32.mrb[135].mxu1 }
0x26f1   :  { %v6613_v34 = vadd.f32 %v8556_v35, %v6564_v42  ;;  %v8559_v49 = vadd.f32 %v8558_v18, %v8557_v41  ;;  %6629 = vadd.xlane.f32.xlu0 %v6620_v16  ;;  %8569 = vmatpush3.bf16.msra.mxu1 %v9588_v11 }
0x26f2   :  { %8570 = vmatprep.subr.bf16.mxu1 %v9589_v4 }
0x26f3   :  { %v6616_v28 = vadd.f32 %v8559_v49, %v6567_v60  ;;  %v6621_v48 = vadd.f32 %v6613_v34, %v12186_v47 }
0x26f5   :  { %6631 = vadd.xlane.f32.xlu0 %v6621_v48  ;;  %v6622_v36 = vadd.f32 %v6616_v28, %v12191_v9  ;;  %v7924_v28 = vld [vmem:[#allocation29 + $0x1] ss:$0 sm:$0xff] }
0x26f9   :  { %6633 = vadd.xlane.f32.xlu0 %v6622_v36 }
0x277a   :  { %v6628_v50 = vpop.xlane.xlu0 %6627 }
0x277b   :  { %v6635_v7 = vmul.f32 0.0078125, %v6628_v50 }
0x277d   :  { %v12519_v13 = vsub.f32 %v6619_v52, %v6635_v7 }
0x277e   :  { %v6630_v14 = vpop.xlane.xlu0 %6629 }
0x277f   :  { %v6636_v2 = vmul.f32 0.0078125, %v6630_v14  ;;  %v6643_v47 = vmul.f32 %v12519_v13, %v12519_v13 }
0x2781   :  { %v12523_v9 = vsub.f32 %v6620_v16, %v6636_v2  ;;  %6647 = vadd.xlane.f32.xlu0 %v6643_v47 }
0x2782   :  { %v6632_v44 = vpop.xlane.xlu0 %6631 }
0x2783   :  { %v6637_v12 = vmul.f32 0.0078125, %v6632_v44  ;;  %v6644_v61 = vmul.f32 %v12523_v9, %v12523_v9 }
0x2785   :  { %v12527_v54 = vsub.f32 %v6621_v48, %v6637_v12  ;;  %6649 = vadd.xlane.f32.xlu0 %v6644_v61 }
0x2786   :  { %v6634_v19 = vpop.xlane.xlu0 %6633 }
0x2787   :  { %v6638_v39 = vmul.f32 0.0078125, %v6634_v19  ;;  %v6645_v53 = vmul.f32 %v12527_v54, %v12527_v54  ;;  %v9590_v19 = vld [vmem:[%s12692_s27 + $0xa8] sm:$0xff]  }
0x2788   :  { %8571 = vmatpush3.bf16.msra.mxu1 %v9590_v19 }
0x2789   :  { %v12531_v15 = vsub.f32 %v6622_v36, %v6638_v39  ;;  %6651 = vadd.xlane.f32.xlu1 %v6645_v53  ;;  %v9591_v39 = vld [vmem:[%s12692_s27 + $0xf0] sm:$0xff]  }
0x278a   :  { %v9592_v53 = vld [vmem:[%s12692_s27 + $0xb0] sm:$0xff]   ;;  %8572 = vmatprep.subr.bf16.mxu1 %v9591_v39 }
0x278b   :  { %v6646_v55 = vmul.f32 %v12531_v15, %v12531_v15 }
0x278c   :  { %8573 = vmatpush3.bf16.msra.mxu1 %v9592_v53 }
0x278d   :  { %6653 = vadd.xlane.f32.xlu0 %v6646_v55  ;;  %v6711_v55 = vld [vmem:[#allocation32 + $0x2] sm:$0x3] }
0x278e   :  { %v6716_v21 = vrot.slane %v6711_v55, %v11347_v27  ;;  %v6720_v38 = vrot.slane %v6711_v55, %v11766_v43 }
0x280e   :  { %v6648_v25 = vpop.xlane.xlu0 %6647 }
0x280f   :  { %v6655_v51 = vmul.f32 0.0078125, %v6648_v25 }
0x2811   :  { %v6659_v20 = vadd.f32 1e-05, %v6655_v51 }
0x2812   :  { %v6650_v52 = vpop.xlane.xlu0 %6649 }
0x2813   :  { %9891 = vrsqrt.f32 %v6659_v20  ;;  %v6656_v31 = vmul.f32 0.0078125, %v6650_v52 }
0x2815   :  { %v6660_v24 = vadd.f32 1e-05, %v6656_v31 }
0x2816   :  { %v6652_v42 = vpop.xlane.xlu1 %6651 }
0x2817   :  { %9893 = vrsqrt.f32 %v6660_v24  ;;  %v6657_v35 = vmul.f32 0.0078125, %v6652_v42  ;;  %v7990_v42 = vld [vmem:[#allocation34 + $0x1] ss:$0 sm:$0xff] }
0x2819   :  { %v6661_v41 = vadd.f32 1e-05, %v6657_v35 }
0x281a   :  { %v6654_v16 = vpop.xlane.xlu0 %6653 }
0x281b   :  { %9895 = vrsqrt.f32 %v6661_v41  ;;  %v6658_v18 = vmul.f32 0.0078125, %v6654_v16 }
0x281d   :  { %v9892_v60 = vpop.eup %9891  ;;  %v6662_v34 = vadd.f32 1e-05, %v6658_v18 }
0x281e   :  { %v6667_v49 = vmul.f32 %v9892_v60, %v12519_v13 }
0x281f   :  { %9897 = vrsqrt.f32 %v6662_v34 }
0x2820   :  { %v6677_v36 = vmul.f32 %v7924_v28, %v6667_v49 }
0x2821   :  { %v9894_v48 = vpop.eup %9893 }
0x2822   :  { %v6668_v33 = vmul.f32 %v9894_v48, %v12523_v9  ;;  %v12561_v50 = vadd.f32 %v7925_v3, %v6677_v36 }
0x2824   :  { %v6678_v46 = vmul.f32 %v7924_v28, %v6668_v33 }
0x2825   :  { %v9896_v5 = vpop.eup %9895 }
0x2826   :  { %v12563_v7 = vadd.f32 %v7925_v3, %v6678_v46  ;;  %v6669_v14 = vmul.f32 %v9896_v5, %v12527_v54 }
0x2828   :  { %v6691_v13 = vpack.c.bf16 %v12563_v7, %v12561_v50  ;;  %v6679_v9 = vmul.f32 %v7924_v28, %v6669_v14 }
0x2829   :  { %v9898_v2 = vpop.eup %9897 }
0x282a   :  { %6836 = vmatmul.mubr.bf16.vlgmr.msra.gmra.mrb[140].mxu0 %v6691_v13  ;;  %v6670_v47 = vmul.f32 %v9898_v2, %v12531_v15  ;;  %v12570_v12 = vadd.f32 %v7925_v3, %v6679_v9  ;;  %v9593_v15 = vld [vmem:[%s12692_s27 + $0xf8] sm:$0xff]  }
0x282b   :  { %6845 = vmatprep.mubr.bf16.mxu0 %v10587_v0  ;;  %v9594_v0 = vld [vmem:[%s12692_s27 + $0xb8] sm:$0xff]   ;;  %8574 = vmatprep.subr.bf16.mxu1 %v9593_v15 }
0x282c   :  { %v6680_v44 = vmul.f32 %v7924_v28, %v6670_v47  ;;  %8575 = vmatpush3.bf16.msra.mxu1 %v9594_v0 }
0x282d   :  { %9096 = vmatprep.subr.bf16.mxu1 %v10588_v17 }
0x282e   :  { %v12572_v61 = vadd.f32 %v7925_v3, %v6680_v44 }
0x2830   :  { %v6692_v54 = vpack.c.bf16 %v12572_v61, %v12570_v12 }
0x2832   :  { %6846 = vmatmul.mubr.bf16.gmra.mrb[144].mxu0 %v6692_v54 }
0x2833   :  { %9092 = vmatprep.mubr.msk.bf16.mxu0 %vm10589_vm2, %v10588_v17 }
0x28fd   :  { %v6837_v45 = vpop.f32.mrb[140].mxu0 }
0x28fe   :  { %v6838_v10 = vadd.f32 %v6837_v45, %v6716_v21  ;;  %v6839_v6 = vpop.f32.mrb[141].mxu0 }
0x28ff   :  { %v6840_v1 = vadd.f32 %v6839_v6, %v6720_v38  ;;  %v6841_v26 = vpop.f32.mrb[142].mxu0  ;;  %v9595_v6 = vld [vmem:[#allocation38] sm:$0xff]  }
0x2900   :  { %v6842_v56 = vadd.f32 %v6841_v26, %v6716_v21  ;;  %v6843_v32 = vpop.f32.mrb[143].mxu0  ;;  %v6856_v59 = vmax.f32 %v6838_v10, 0.0  ;;  %9077 = vmatpush3.bf16.msra.mxu0 %v9595_v6  ;;  %v9597_v26 = vld [vmem:[#allocation38 + $0x10] sm:$0xff]  }
0x2901   :  { %v6844_v29 = vadd.f32 %v6843_v32, %v6720_v38  ;;  %v6857_v37 = vmax.f32 %v6840_v1, 0.0  ;;  %9078 = vmatprep.subr.bf16.mxu0 %v10588_v17  ;;  %v9596_v1 = vld [vmem:[#allocation38 + $0x8] sm:$0xff]   ;;  %v9599_v32 = vld [vmem:[#allocation38 + $0x20] sm:$0xff]   ;;  %v9606_v6 = vld [vmem:[%s10795_s19 + $0x18] sm:$0xff]  }
0x2902   :  { %v6858_v62 = vmax.f32 %v6842_v56, 0.0  ;;  %v9598_v56 = vld [vmem:[#allocation38 + $0x18] sm:$0xff]  }
0x2903   :  { %v6859_v30 = vmax.f32 %v6844_v29, 0.0  ;;  %v9600_v29 = vld [vmem:[#allocation38 + $0x28] sm:$0xff]  }
0x2904   :  { %v6864_v40 = vpack.c.bf16 %v6858_v62, %v6856_v59  ;;  %9079 = vmatpush3.bf16.msra.mxu0 %v9596_v1  ;;  %v9601_v59 = vld [vmem:[#allocation38 + $0x30] sm:$0xff]   ;;  %v9602_v62 = vld [vmem:[#allocation38 + $0x38] sm:$0xff]  }
0x2905   :  { %v6865_v8 = vpack.c.bf16 %v6859_v30, %v6857_v37  ;;  %v6847_v63 = vpop.f32.mrb[144].mxu0  ;;  %9080 = vmatprep.subr.bf16.mxu0 %v10588_v17  ;;  %v9607_v1 = vld [vmem:[%s10795_s19 + $0x20] sm:$0xff]  }
0x2906   :  { %v6848_v22 = vadd.f32 %v6847_v63, %v6716_v21  ;;  %v6849_v58 = vpop.f32.mrb[145].mxu0 }
0x2907   :  { %v6850_v27 = vadd.f32 %v6849_v58, %v6720_v38  ;;  %v6851_v57 = vpop.f32.mrb[146].mxu0  ;;  %7037 = vmatprep.mubr.bf16.mxu1 %v6865_v8 }
0x2908   :  { %v6852_v43 = vadd.f32 %v6851_v57, %v6716_v21  ;;  %v6853_v23 = vpop.f32.mrb[147].mxu0  ;;  %7038 = vmatmul.mubr.bf16.vlgmr.msra.gmra.mrb[136].mxu1 %v6864_v40  ;;  %v6860_v4 = vmax.f32 %v6848_v22, 0.0  ;;  %9081 = vmatpush3.bf16.msra.mxu0 %v9597_v26  ;;  %v9608_v26 = vld [vmem:[%s10795_s19 + $0x28] sm:$0xff]  }
0x2909   :  { %v6854_v11 = vadd.f32 %v6853_v23, %v6720_v38  ;;  %v6861_v51 = vmax.f32 %v6850_v27, 0.0  ;;  %9082 = vmatprep.subr.bf16.mxu0 %v10588_v17 }
0x290a   :  { %v6862_v25 = vmax.f32 %v6852_v43, 0.0 }
0x290b   :  { %v6863_v20 = vmax.f32 %v6854_v11, 0.0 }
0x290c   :  { %v6866_v52 = vpack.c.bf16 %v6862_v25, %v6860_v4  ;;  %9083 = vmatpush3.bf16.msra.mxu0 %v9598_v56  ;;  %v8007_v25 = vld [vmem:[#allocation35 + $0x1] ss:$0 sm:$0xff]  ;;  %v9609_v56 = vld [vmem:[%s10795_s19 + $0x30] sm:$0xff]  }
0x290d   :  { %v6867_v31 = vpack.c.bf16 %v6863_v20, %v6861_v51  ;;  %9084 = vmatprep.subr.bf16.mxu0 %v10588_v17 }
0x290f   :  { %7045 = vmatprep.mubr.bf16.mxu1 %v6867_v31 }
0x2910   :  { %7046 = vmatmul.mubr.bf16.gmra.mrb[140].mxu1 %v6866_v52  ;;  %9085 = vmatpush3.bf16.msra.mxu0 %v9599_v32  ;;  %v9610_v32 = vld [vmem:[%s10795_s19 + $0x38] sm:$0xff]  }
0x2911   :  { %9112 = vmatprep.mubr.msk.bf16.mxu1 %vm10589_vm2, %v10588_v17  ;;  %9086 = vmatprep.subr.bf16.mxu0 %v10588_v17 }
0x2914   :  { %9087 = vmatpush3.bf16.msra.mxu0 %v9600_v29  ;;  %v8009_v29 = vld [vmem:[#allocation40] ss:$0 sm:$0xff] }
0x2915   :  { %9088 = vmatprep.subr.bf16.mxu0 %v10588_v17 }
0x2918   :  { %9089 = vmatpush3.bf16.msra.mxu0 %v9601_v59 }
0x2919   :  { %9090 = vmatprep.subr.bf16.mxu0 %v10588_v17 }
0x291c   :  { %9091 = vmatpush3.bf16.msra.mxu0 %v9602_v62 }
0x29db   :  { %v8576_v24 = vpop.f32.mrb[136].mxu1 }
0x29dc   :  { %v8577_v35 = vpop.f32.mrb[137].mxu1 }
0x29dd   :  { %v8578_v41 = vadd.f32 %v8577_v35, %v8576_v24  ;;  %v8579_v16 = vpop.f32.mrb[138].mxu1  ;;  %v8008_v24 = vld [vmem:[#allocation37 + $0x1] ss:$0 sm:$0xff] }
0x29de   :  { %v8580_v18 = vpop.f32.mrb[139].mxu1 }
0x29df   :  { %v7040_v60 = vadd.f32 %v8578_v41, %v7990_v42  ;;  %v8581_v34 = vadd.f32 %v8580_v18, %v8579_v16 }
0x29e1   :  { %v7043_v49 = vadd.f32 %v8581_v34, %v7990_v42  ;;  %v7054_v28 = vadd.f32 %v7040_v60, %v12561_v50 }
0x29e3   :  { %7062 = vadd.xlane.f32.xlu1 %v7054_v28  ;;  %v8582_v48 = vpop.f32.mrb[140].mxu1  ;;  %v7055_v36 = vadd.f32 %v7043_v49, %v12563_v7 }
0x29e4   :  { %v8583_v33 = vpop.f32.mrb[141].mxu1 }
0x29e5   :  { %v8584_v3 = vadd.f32 %v8583_v33, %v8582_v48  ;;  %7064 = vadd.xlane.f32.xlu0 %v7055_v36  ;;  %v8585_v46 = vpop.f32.mrb[142].mxu1 }
0x29e6   :  { %v8586_v5 = vpop.f32.mrb[143].mxu1 }
0x29e7   :  { %v7048_v14 = vadd.f32 %v8584_v3, %v7990_v42  ;;  %v8587_v13 = vadd.f32 %v8586_v5, %v8585_v46 }
0x29e9   :  { %v7051_v2 = vadd.f32 %v8587_v13, %v7990_v42  ;;  %v7056_v47 = vadd.f32 %v7048_v14, %v12570_v12 }
0x29eb   :  { %7066 = vadd.xlane.f32.xlu1 %v7056_v47  ;;  %v7057_v9 = vadd.f32 %v7051_v2, %v12572_v61 }
0x29ed   :  { %7068 = vadd.xlane.f32.xlu0 %v7057_v9 }
0x2a70   :  { %v7063_v44 = vpop.xlane.xlu1 %7062 }
0x2a71   :  { %v7070_v50 = vmul.f32 0.0078125, %v7063_v44 }
0x2a72   :  { %v7065_v54 = vpop.xlane.xlu0 %7064 }
0x2a73   :  { %v7074_v19 = vsub.f32 %v7054_v28, %v7070_v50  ;;  %v7071_v39 = vmul.f32 0.0078125, %v7065_v54 }
0x2a75   :  { %v7075_v7 = vsub.f32 %v7055_v36, %v7071_v39  ;;  %v7078_v53 = vmul.f32 %v7074_v19, %v7074_v19 }
0x2a77   :  { %7082 = vadd.xlane.f32.xlu1 %v7078_v53  ;;  %v7079_v15 = vmul.f32 %v7075_v7, %v7075_v7 }
0x2a78   :  { %v7067_v0 = vpop.xlane.xlu1 %7066 }
0x2a79   :  { %v7072_v55 = vmul.f32 0.0078125, %v7067_v0  ;;  %7084 = vadd.xlane.f32.xlu0 %v7079_v15 }
0x2a7a   :  { %v7069_v21 = vpop.xlane.xlu0 %7068 }
0x2a7b   :  { %v7076_v38 = vsub.f32 %v7056_v47, %v7072_v55  ;;  %v7073_v45 = vmul.f32 0.0078125, %v7069_v21 }
0x2a7d   :  { %v7077_v12 = vsub.f32 %v7057_v9, %v7073_v45  ;;  %v7080_v10 = vmul.f32 %v7076_v38, %v7076_v38 }
0x2a7f   :  { %7086 = vadd.xlane.f32.xlu1 %v7080_v10  ;;  %v7081_v61 = vmul.f32 %v7077_v12, %v7077_v12  ;;  %v9604_v10 = vld [vmem:[%s10795_s19 + $0x8] sm:$0xff]  }
0x2a81   :  { %7088 = vadd.xlane.f32.xlu0 %v7081_v61  ;;  %v9605_v61 = vld [vmem:[%s10795_s19 + $0x10] sm:$0xff]  }
0x2b04   :  { %v7083_v37 = vpop.xlane.xlu1 %7082 }
0x2b05   :  { %v7090_v30 = vmul.f32 0.0078125, %v7083_v37 }
0x2b06   :  { %v7085_v40 = vpop.xlane.xlu0 %7084 }
0x2b07   :  { %v7094_v8 = vadd.f32 1e-05, %v7090_v30  ;;  %v7091_v63 = vmul.f32 0.0078125, %v7085_v40 }
0x2b09   :  { %9899 = vrsqrt.f32 %v7094_v8  ;;  %v7095_v22 = vadd.f32 1e-05, %v7091_v63 }
0x2b0b   :  { %9901 = vrsqrt.f32 %v7095_v22 }
0x2b0c   :  { %v7087_v58 = vpop.xlane.xlu1 %7086 }
0x2b0d   :  { %v7092_v27 = vmul.f32 0.0078125, %v7087_v58 }
0x2b0e   :  { %v7089_v57 = vpop.xlane.xlu0 %7088 }
0x2b0f   :  { %v7096_v43 = vadd.f32 1e-05, %v7092_v27  ;;  %v7093_v23 = vmul.f32 0.0078125, %v7089_v57 }
0x2b11   :  { %9903 = vrsqrt.f32 %v7096_v43  ;;  %v7097_v11 = vadd.f32 1e-05, %v7093_v23  ;;  %v8019_v43 = vld [vmem:[%s10800_s30] ss:$0 sm:$0xff] }
0x2b13   :  { %v9900_v4 = vpop.eup %9899  ;;  %9905 = vrsqrt.f32 %v7097_v11 }
0x2b14   :  { %v7102_v51 = vmul.f32 %v9900_v4, %v7074_v19 }
0x2b15   :  { %v9902_v20 = vpop.eup %9901 }
0x2b16   :  { %v7112_v52 = vmul.f32 %v8007_v25, %v7102_v51  ;;  %v7103_v31 = vmul.f32 %v9902_v20, %v7075_v7 }
0x2b18   :  { %v7113_v42 = vmul.f32 %v8007_v25, %v7103_v31  ;;  %v7122_v35 = vadd.f32 %v8008_v24, %v7112_v52 }
0x2b1a   :  { %v7123_v41 = vadd.f32 %v8008_v24, %v7113_v42 }
0x2b1b   :  { %v9904_v16 = vpop.eup %9903 }
0x2b1c   :  { %v7126_v18 = vadd.f32 %v7123_v41, %v7122_v35  ;;  %v7104_v60 = vmul.f32 %v9904_v16, %v7076_v38 }
0x2b1d   :  { %v9906_v34 = vpop.eup %9905 }
0x2b1e   :  { %v7127_v49 = vrot.slane %v7126_v18, 4  ;;  %v7114_v28 = vmul.f32 %v8007_v25, %v7104_v60  ;;  %v7105_v48 = vmul.f32 %v9906_v34, %v7077_v12  ;;  %v9603_v12 = vld [vmem:[%s10795_s19] sm:$0xff]   ;;  %s7389_s19 = sshll.u32 %s10591_s5, 4  ;;  %s7390_s19 = int_to_ptr.vmem [resolvable:$true] %s7389_s19 }
0x2b1f   :  { %9097 = vmatpush3.bf16.msra.mxu1 %v9603_v12  ;;  %s10465_s24 = scalar_lea.vmem %s7390_s19, 32  ;;  %p10470_p5 = scmp.lt.s32.totalorder %s7390_s19, %s7390_s19 }
0x2b20   :  { %v7128_v36 = vadd.f32 %v7127_v49, %v7126_v18  ;;  %v7115_v33 = vmul.f32 %v8007_v25, %v7105_v48  ;;  %v7124_v3 = vadd.f32 %v8008_v24, %v7114_v28  ;;  %9098 = vmatprep.subr.bf16.mxu1 %v10588_v17  ;;  %p10466_p4 = scmp.ne.s32.totalorder %s7390_s19, %s10465_s24  ;;  %p10471_p6 = scmp.lt.s32.totalorder %s10465_s24, %s10465_s24 }
0x2b22   :  { %v7125_v46 = vadd.f32 %v8008_v24, %v7115_v33  ;;  %v7129_v5 = vrot.slane %v7128_v36, 2  ;;  %p10472_p7 = por %p10471_p6, %p10470_p5 }
0x2b23   :  { %9099 = vmatpush3.bf16.msra.mxu1 %v9604_v10 }
0x2b24   :  { %v7133_v14 = vadd.f32 %v7125_v46, %v7124_v3  ;;  %v7130_v13 = vadd.f32 %v7129_v5, %v7128_v36  ;;  %9100 = vmatprep.subr.bf16.mxu1 %v10588_v17  ;;  %p10473_p8 = pnand %p10472_p7, %p10466_p4 }
0x2b26   :  { %v7134_v2 = vrot.slane %v7133_v14, 4  ;;  %v7131_v47 = vrot.slane %v7130_v13, 1 }
0x2b27   :  { %9101 = vmatpush3.bf16.msra.mxu1 %v9605_v61 }
0x2b28   :  { %v7135_v9 = vadd.f32 %v7134_v2, %v7133_v14  ;;  %v7132_v50 = vadd.f32 %v7131_v47, %v7130_v13  ;;  %9102 = vmatprep.subr.bf16.mxu1 %v10588_v17 }
0x2b2a   :  { %v7136_v44 = vrot.slane %v7135_v9, 2  ;;  %v7141_v39 = vmul.f32 0.0625, %v7132_v50 }
0x2b2b   :  { %9103 = vmatpush3.bf16.msra.mxu1 %v9606_v6 }
0x2b2c   :  { %v7137_v54 = vadd.f32 %v7136_v44, %v7135_v9  ;;  %v7143_v15 = vpack.c.bf16 %v7141_v39, %v7141_v39  ;;  %9104 = vmatprep.subr.bf16.mxu1 %v10588_v17 }
0x2b2e   :  { %v7138_v19 = vrot.slane %v7137_v54, 1  ;;  %v7170_v55 = vunpack.c.l.b16 %v7143_v15 }
0x2b2f   :  { %9105 = vmatpush3.bf16.msra.mxu1 %v9607_v1 }
0x2b30   :  { %v7139_v7 = vadd.f32 %v7138_v19, %v7137_v54  ;;  %9106 = vmatprep.subr.bf16.mxu1 %v10588_v17 }
0x2b32   :  { %v7142_v53 = vmul.f32 0.0625, %v7139_v7 }
0x2b33   :  { %9107 = vmatpush3.bf16.msra.mxu1 %v9608_v26 }
0x2b34   :  { %v7144_v0 = vpack.c.bf16 %v7142_v53, %v7142_v53  ;;  %9108 = vmatprep.subr.bf16.mxu1 %v10588_v17 }
0x2b36   :  { %v7171_v21 = vunpack.c.l.b16 %v7144_v0 }
0x2b37   :  { %9109 = vmatpush3.bf16.msra.mxu1 %v9609_v56 }
0x2b38   :  { %v7172_v38 = vsel %vm1616_vm3, %v7171_v21, %v7170_v55  ;;  %9110 = vmatprep.subr.bf16.mxu1 %v10588_v17 }
0x2b39   :  { %v7173_v45 = vpack.c.b16 %v7172_v38, %v7172_v38 }
0x2b3b   :  { %9093 = vmatmul.mubr.bf16.vlgmr.msra.gmra.mrb[148].mxu0 %v7173_v45  ;;  %9111 = vmatpush3.bf16.msra.mxu1 %v9610_v32 }
0x2c0e   :  { %v7257_v59 = vpop.f32.mrb[148].mxu0 }
0x2c0f   :  { %v7258_v62 = vadd.f32 %v8009_v29, %v7257_v59  ;;  %v9094_v37 = vpop.f32.mrb[149].mxu0 }
0x2c10   :  { %v7260_v30 = vpop.f32.mrb[150].mxu0 }
0x2c11   :  { %v8018_v40 = vmul.f32 -1.442695, %v7258_v62  ;;  %v9095_v8 = vpop.f32.mrb[151].mxu0 }
0x2c13   :  { %9907 = vpow2.f32 %v8018_v40 }
0x2c1d   :  { %v9908_v63 = vpop.eup %9907 }
0x2c1e   :  { %v7266_v22 = vadd.f32 1.0, %v9908_v63 }
0x2c20   :  { %9909 = vrcp.f32 %v7266_v22 }
0x2c2a   :  { %v9910_v58 = vpop.eup %9909 }
0x2c2b   :  { %v7269_v27 = vmul.f32 %v9910_v58, %v7258_v62 }
0x2c2d   :  { %v7270_v57 = vpack.c.bf16 %v7269_v27, %v7269_v27 }
0x2c2f   :  { %9113 = vmatmul.mubr.bf16.vlgmr.msra.gmra.mrb[144].mxu1 %v7270_v57 }
0x2d02   :  { %v7376_v17 = vpop.f32.mrb[144].mxu1 }
0x2d03   :  { %v7377_v23 = vadd.f32 %v8019_v43, %v7376_v17  ;;  %v9114_v11 = vpop.f32.mrb[145].mxu1 }
0x2d04   :  { %v7379_v4 = vpop.f32.mrb[146].mxu1 }
0x2d05   :  { %7382 = vst [vmem:[#allocation41] sm:$0x3] %v7377_v23  ;;  %v9115_v25 = vpop.f32.mrb[147].mxu1 }
0x2d06   :  { %10476 = shalt.err (!%p10473_p8)
}
0x2d07   :  { %s10477_s30 = scalar_lea.hbm %s10805_s8, 32 }
0x2d08   :  { %p10478_p9 = scmp.ne.s32.totalorder %s10805_s8, %s10477_s30  ;;  %p10481_p10 = scmp.lt.u32.totalorder %s10477_s30, %s10805_s8 }
0x2d0a   :  { %p10483_p11 = pnand %p10481_p10, %p10478_p9 }
0x2d0c   :  { %10486 = shalt.err (!%p10483_p11)
}
0x2d0d   :  { %7392 = dma.vmem_to_hbm [thread:$0]  %s7390_s19, 32, %s10805_s8, [#allocation4]  }
0x2d0e   :  { %10513 = dma.done.wait [#allocation4], 32  }
0x2d0f   :  { %10514 = vsyncadd [#allocation4], 4294967264 }
0x2d10   :  { %7396 = vsyncpa [#allocation3], 1 }
0x2d11   :  { %7397 = vsyncpa [#allocation6], 1 }
0x2d12   :  { %7398 = vsyncpa [#allocation9], 1 }
0x2d13   :  { %7399 = vsyncpa [#allocation12], 1 }
0x2d14   :  { %7400 = vsyncpa [#allocation15], 1 }
0x2d15   :  { %7401 = vsyncpa [#allocation18], 1 }
0x2d16   :  { %7402 = vsyncpa [#allocation21], 1 }
0x2d17   :  { %7403 = vsyncpa [#allocation24], 1 }
0x2d18   :  { %7404 = vsyncpa [#allocation27], 1 }
0x2d19   :  { %7405 = vsyncpa [#allocation30], 1 }
0x2d1a   :  { %7406 = vsyncpa [#allocation33], 1 }
0x2d1b   :  { %7407 = vsyncpa [#allocation36], 1 }
0x2d1c   :  { %7408 = vsyncpa [#allocation39], 1 }
0x2d1d   :  { %7409 = vsyncpa [#allocation4], 1 }

</bundles_post_ra>
